<compile_context>
chip_gen: v5e
topology: v5e:2x2
jax: 0.10.0
libtpu: 0.0.40
codegen_flags: <defaults>
</compile_context>

<pallas_src>
import functools

import jax
import jax.numpy as jnp
from jax.experimental import pallas as pl
from jax.experimental.pallas import tpu as pltpu

BN_EPS = 1e-5
MAX_TILE_M = 1024          # lane tile over the flattened voxel axis (multiple of 256)

_COMPILER_PARAMS = pltpu.CompilerParams(
    dimension_semantics=("parallel",),       # voxel tiles can split across TensorCores
    vmem_limit_bytes=32 * 1024 * 1024,       # small footprint; safe on v5e/v6e/v7x
)


def _round_up(x, m):
    return (x + m - 1) // m * m


def _cdiv(a, b):
    return (a + b - 1) // b


def _pick_tile(m_full, halo_pad, max_tile=MAX_TILE_M):
    """Lane tile: multiple of 256 and of halo_pad, >= halo_pad, ~max_tile."""
    base = min(max_tile, _round_up(max(m_full, 256), 256))
    return max(_round_up(base, halo_pad), halo_pad)


def _valid_mask(spatial, valid_dims, width):
    """{0,1} bf16 mask (1, width) over the flattened full grid: 1 where the conv
    window fits (the PyTorch 'valid' output positions), 0 on borders/padding."""
    n, d, h, w = spatial
    dv, hv, wv = valid_dims
    m = ((jnp.arange(d) < dv)[:, None, None]
         & (jnp.arange(h) < hv)[None, :, None]
         & (jnp.arange(w) < wv)[None, None, :])
    m = jnp.tile(m.reshape(1, d * h * w), (1, n)).astype(jnp.bfloat16)
    return jnp.pad(m, ((0, 0), (0, width - n * d * h * w)))


# ----------------------------- Pallas kernels ------------------------------ #

def _conv_kernel(x_ref, xh_ref, m_ref, w_ref, b_ref, *rest,
                 offs, tile_m, halo_pad, apply_act):
    """One voxel tile of a valid Conv3d evaluated on the flattened parent grid.

    x_ref  : (Cin, tile_m)    bf16  main input block (flattened voxels)
    xh_ref : (Cin, halo_pad)  bf16  next columns (tap overhang / halo)
    m_ref  : (1, tile_m)      bf16  {0,1} validity mask for the BN statistics
    w_ref  : (k^3, Cout, Cin) bf16  one (Cout, Cin) weight slab per tap
    b_ref  : (Cout, 1)        f32
    [scale_ref, shift_ref : (Cin, 1) f32 -- previous layer's BN+ReLU, fused]
    y_ref  : (Cout, tile_m)   bf16  conv + bias output
    st_ref : (1, Cout, 2)     f32   bias-centred [sum, sum^2] over valid voxels
    buf    : (Cin, tile_m+halo_pad) bf16 VMEM scratch holding the halo'd block
    """
    if apply_act:
        scale_ref, shift_ref, y_ref, st_ref, buf_ref = rest
    else:
        y_ref, st_ref, buf_ref = rest

    if apply_act:
        sc = scale_ref[...]
        sh = shift_ref[...]
        buf_ref[:, :tile_m] = jnp.maximum(
            x_ref[...].astype(jnp.float32) * sc + sh, 0.0).astype(jnp.bfloat16)
        buf_ref[:, tile_m:tile_m + halo_pad] = jnp.maximum(
            xh_ref[...].astype(jnp.float32) * sc + sh, 0.0).astype(jnp.bfloat16)
    else:
        buf_ref[:, :tile_m] = x_ref[...]
        buf_ref[:, tile_m:tile_m + halo_pad] = xh_ref[...]

    # Accumulate the k^3 taps from shifted slices of the halo'd block.
    acc = jnp.zeros((y_ref.shape[0], tile_m), jnp.float32)
    for ti, off in enumerate(offs):
        acc = acc + jnp.dot(w_ref[ti], buf_ref[:, off:off + tile_m],
                            preferred_element_type=jnp.float32)

    y_ref[...] = (acc + b_ref[...]).astype(y_ref.dtype)

    # Bias-centred, masked partial sums for the global BatchNorm batch stats.
    am = acc * m_ref[...].astype(jnp.float32)          # mask is {0,1}
    s1 = jnp.sum(am, axis=1, keepdims=True)            # (Cout, 1)
    s2 = jnp.sum(am * am, axis=1, keepdims=True)
    st_ref[...] = jnp.concatenate([s1, s2], axis=1)[None]


def _bn_relu_upconv_kernel(y_ref, scale_ref, shift_ref, w_ref, b_ref, o_ref):
    """relu(y*scale + shift) fused with the non-overlapping ConvTranspose3d
    (kernel == stride): one (k^3*Cout, Cin) matmul per voxel column."""
    a = jnp.maximum(
        y_ref[...].astype(jnp.float32) * scale_ref[...] + shift_ref[...], 0.0)
    up = jnp.dot(w_ref[...], a.astype(jnp.bfloat16),
                 preferred_element_type=jnp.float32)
    o_ref[...] = (up + b_ref[...]).astype(o_ref.dtype)


def _bn_relu_kernel(y_ref, scale_ref, shift_ref, o_ref):
    o_ref[...] = jnp.maximum(
        y_ref[...].astype(jnp.float32) * scale_ref[...] + shift_ref[...],
        0.0).astype(o_ref.dtype)


# ------------------------------ layer pieces ------------------------------- #

def conv3d_bn_stats(x_flat, w, b, *, k, spatial, valid_dims, tile_m, halo_pad,
                    act=None, extra_out_cols=0):
    """Valid Conv3d + bias on a channel-major flattened full grid, with fused
    (bias-centred) BatchNorm batch-statistic partials.

    x_flat : (Cin, >= N*D*H*W) bf16/f32, channel-major flattening of (N,D,H,W).
    w, b   : PyTorch Conv3d weight (Cout, Cin, k, k, k) and bias (Cout,).
    act    : None, or (scale, shift) of shape (Cin,) -- the previous layer's
             BN+ReLU applied to the input block right after the load.
    extra_out_cols: extra (garbage) output columns so the *next* conv can read
             its halo blocks straight out of this output, without re-padding.
    Returns (y, mean, var); y is (Cout, num_tiles*tile_m) bf16 on the same grid.
    """
    n, d, h, wd = spatial
    dv, hv, wv = valid_dims
    cout, cin = w.shape[0], w.shape[1]
    m_full = n * d * h * wd
    offs = tuple(kd * h * wd + kh * wd + kw
                 for kd in range(k) for kh in range(k) for kw in range(k))
    assert offs[-1] <= halo_pad and tile_m % halo_pad == 0

    num_tiles = _cdiv(m_full, tile_m) + _cdiv(extra_out_cols, tile_m)
    wx_need = num_tiles * tile_m + halo_pad
    x_flat = x_flat.astype(jnp.bfloat16)
    if x_flat.shape[1] < wx_need:
        x_flat = jnp.pad(x_flat, ((0, 0), (0, wx_need - x_flat.shape[1])))

    mask = _valid_mask(spatial, valid_dims, num_tiles * tile_m)
    # (Cout, Cin, kd, kh, kw) -> (kd, kh, kw, Cout, Cin) -> (k^3, Cout, Cin)
    w_taps = jnp.transpose(w, (2, 3, 4, 0, 1)).reshape(
        k ** 3, cout, cin).astype(jnp.bfloat16)
    b_col = b.reshape(cout, 1).astype(jnp.float32)

    hstep = tile_m // halo_pad
    in_specs = [
        pl.BlockSpec((cin, tile_m), lambda i: (0, i)),
        pl.BlockSpec((cin, halo_pad), lambda i: (0, (i + 1) * hstep)),
        pl.BlockSpec((1, tile_m), lambda i: (0, i)),
        pl.BlockSpec((k ** 3, cout, cin), lambda i: (0, 0, 0)),
        pl.BlockSpec((cout, 1), lambda i: (0, 0)),
    ]
    args = [x_flat, x_flat, mask, w_taps, b_col]
    if act is not None:
        scale, shift = act
        in_specs += [pl.BlockSpec((cin, 1), lambda i: (0, 0)),
                     pl.BlockSpec((cin, 1), lambda i: (0, 0))]
        args += [scale.reshape(cin, 1).astype(jnp.float32),
                 shift.reshape(cin, 1).astype(jnp.float32)]

    kernel = functools.partial(_conv_kernel, offs=offs, tile_m=tile_m,
                               halo_pad=halo_pad, apply_act=act is not None)
    cost = pl.CostEstimate(
        flops=int(2 * num_tiles * tile_m * (k ** 3) * cin * cout),
        transcendentals=0,
        bytes_accessed=int(num_tiles * (tile_m + halo_pad) * cin * 2
                           + num_tiles * tile_m * (cout * 2 + 2)))

    y, stats = pl.pallas_call(
        kernel,
        grid=(num_tiles,),
        in_specs=in_specs,
        out_specs=[pl.BlockSpec((cout, tile_m), lambda i: (0, i)),
                   pl.BlockSpec((1, cout, 2), lambda i: (i, 0, 0))],
        out_shape=[jax.ShapeDtypeStruct((cout, num_tiles * tile_m), jnp.bfloat16),
                   jax.ShapeDtypeStruct((num_tiles, cout, 2), jnp.float32)],
        scratch_shapes=[pltpu.VMEM((cin, tile_m + halo_pad), jnp.bfloat16)],
        compiler_params=_COMPILER_PARAMS,
        cost_estimate=cost,
    )(*args)

    # Combine per-tile, bias-centred partials into exact global batch stats.
    m_valid = n * dv * hv * wv
    s = jnp.sum(stats, axis=0)                       # (Cout, 2)
    mean_c = s[:, 0] / m_valid                       # E[y - b]
    var = jnp.maximum(s[:, 1] / m_valid - mean_c * mean_c, 0.0)
    mean = mean_c + b.astype(jnp.float32)
    return y, mean, var


def _bn_scale_shift(mean, var, gamma, beta):
    inv = jax.lax.rsqrt(var + BN_EPS)
    scale = gamma.astype(jnp.float32) * inv
    shift = beta.astype(jnp.float32) - mean * scale
    return scale, shift


def bn_relu_upconv(y, scale, shift, w_up, b_up, *, k, tile_m):
    """BN-apply + ReLU fused with the non-overlapping ConvTranspose3d.

    y: (C, Wy) bf16 conv2+bias output (full grid).  w_up: (Cin, Cout, k, k, k).
    Returns (k^3*Cout, Wy) f32 with rows ordered (kd, kh, kw, cout).
    """
    c, wy = y.shape
    cout = w_up.shape[1]
    kup = (k ** 3) * cout
    wup2d = jnp.transpose(w_up, (2, 3, 4, 1, 0)).reshape(kup, c).astype(jnp.bfloat16)
    bup = jnp.tile(b_up.reshape(1, cout), (k ** 3, 1)).reshape(kup, 1).astype(jnp.float32)
    num_tiles = wy // tile_m
    cost = pl.CostEstimate(
        flops=int(2 * wy * c * kup + 3 * c * wy), transcendentals=0,
        bytes_accessed=int(c * wy * 2 + kup * wy * 4))
    return pl.pallas_call(
        _bn_relu_upconv_kernel,
        grid=(num_tiles,),
        in_specs=[pl.BlockSpec((c, tile_m), lambda i: (0, i)),
                  pl.BlockSpec((c, 1), lambda i: (0, 0)),
                  pl.BlockSpec((c, 1), lambda i: (0, 0)),
                  pl.BlockSpec((kup, c), lambda i: (0, 0)),
                  pl.BlockSpec((kup, 1), lambda i: (0, 0))],
        out_specs=pl.BlockSpec((kup, tile_m), lambda i: (0, i)),
        out_shape=jax.ShapeDtypeStruct((kup, wy), jnp.float32),
        compiler_params=_COMPILER_PARAMS,
        cost_estimate=cost,
    )(y, scale.reshape(c, 1), shift.reshape(c, 1), wup2d, bup)


def bn_relu_apply(y, scale, shift, *, tile_m, out_dtype=jnp.float32):
    """relu(y*scale + shift) on a (C, Wy) channel-major slab (last=True path).
    The contiguous slab is viewed as (C*8, Wy/8) when the tiling allows it so a
    tiny channel count still fills all 8 vreg sublanes."""
    c, wy = y.shape
    num_tiles = wy // tile_m
    pack = 8 if (num_tiles == 1 or (tile_m // 8) % 128 == 0) else 1
    lane_tile = (wy // pack) if num_tiles == 1 else (tile_m // pack)
    yv = y.reshape(c * pack, wy // pack)
    sc = jnp.repeat(scale.reshape(c, 1).astype(jnp.float32), pack, axis=0)
    sh = jnp.repeat(shift.reshape(c, 1).astype(jnp.float32), pack, axis=0)
    out = pl.pallas_call(
        _bn_relu_kernel,
        grid=(num_tiles,),
        in_specs=[pl.BlockSpec((c * pack, lane_tile), lambda i: (0, i)),
                  pl.BlockSpec((c * pack, 1), lambda i: (0, 0)),
                  pl.BlockSpec((c * pack, 1), lambda i: (0, 0))],
        out_specs=pl.BlockSpec((c * pack, lane_tile), lambda i: (0, i)),
        out_shape=jax.ShapeDtypeStruct((c * pack, wy // pack), out_dtype),
        compiler_params=_COMPILER_PARAMS,
    )(yv, sc, sh)
    return out.reshape(c, wy)


# ------------------------------ SynthesisLayer ----------------------------- #

def init_synthesis_layer_params(key, n_features, conv_size=3, upconv_size=2,
                                last=False):
    features_out = n_features // 3
    k1, k2, k3, k4, k5, k6 = jax.random.split(key, 6)
    cs = conv_size
    params = {
        "w1": 0.1 * jax.random.normal(k1, (features_out, n_features, cs, cs, cs),
                                      jnp.float32),
        "b1": 0.1 * jax.random.normal(k2, (features_out,), jnp.float32),
        "g1": jnp.ones((features_out,), jnp.float32),
        "beta1": jnp.zeros((features_out,), jnp.float32),
        "w2": 0.1 * jax.random.normal(k3, (features_out, features_out, cs, cs, cs),
                                      jnp.float32),
        "b2": 0.1 * jax.random.normal(k4, (features_out,), jnp.float32),
        "g2": jnp.ones((features_out,), jnp.float32),
        "beta2": jnp.zeros((features_out,), jnp.float32),
    }
    if not last:
        us = upconv_size
        params["w_up"] = 0.1 * jax.random.normal(
            k5, (features_out, features_out, us, us, us), jnp.float32)
        params["b_up"] = 0.1 * jax.random.normal(k6, (features_out,), jnp.float32)
    return params


def synthesis_layer_forward(x_ncdhw, params, conv_size=3, upconv_size=2,
                            last=False):
    """Forward pass.  x_ncdhw: (N, C_in, D, H, W), PyTorch NCDHW layout.
    Matches Conv3d -> BN -> ReLU -> Conv3d -> BN -> ReLU -> (ConvTranspose3d)
    with train-mode batch statistics."""
    k = conv_size
    n, cin, d, h, w = x_ncdhw.shape
    m_full = n * d * h * w
    spatial = (n, d, h, w)

    # Flat tap offsets live on the full (D, H, W) grid, shared by both convs.
    max_off = (k - 1) * (h * w + w + 1)
    halo_pad = max(256, _round_up(max_off, 256))
    tile_m = _pick_tile(m_full, halo_pad)

    # Channel-major flattening: the single layout transpose of the whole layer.
    x_cm = jnp.transpose(x_ncdhw.astype(jnp.bfloat16),
                         (1, 0, 2, 3, 4)).reshape(cin, m_full)

    # conv1 (+ fused BN1 partial stats); extra columns so conv2's halo blocks
    # read straight out of y1.
    dv1, hv1, wv1 = d - (k - 1), h - (k - 1), w - (k - 1)
    y1, m1, v1 = conv3d_bn_stats(
        x_cm, params["w1"], params["b1"], k=k, spatial=spatial,
        valid_dims=(dv1, hv1, wv1), tile_m=tile_m, halo_pad=halo_pad,
        act=None, extra_out_cols=halo_pad)
    scale1, shift1 = _bn_scale_shift(m1, v1, params["g1"], params["beta1"])

    # conv2 with BN1+ReLU folded into its input load (a1 never hits HBM).
    dv2, hv2, wv2 = d - 2 * (k - 1), h - 2 * (k - 1), w - 2 * (k - 1)
    y2, m2, v2 = conv3d_bn_stats(
        y1, params["w2"], params["b2"], k=k, spatial=spatial,
        valid_dims=(dv2, hv2, wv2), tile_m=tile_m, halo_pad=halo_pad,
        act=(scale1, shift1), extra_out_cols=0)
    scale2, shift2 = _bn_scale_shift(m2, v2, params["g2"], params["beta2"])

    c2 = params["w2"].shape[0]
    if last:
        a2 = bn_relu_apply(y2, scale2, shift2, tile_m=tile_m,
                           out_dtype=jnp.float32)
        a2 = a2[:, :m_full].reshape(c2, n, d, h, w)[:, :, :dv2, :hv2, :wv2]
        return jnp.transpose(a2, (1, 0, 2, 3, 4))

    ku = upconv_size
    cout = params["w_up"].shape[1]
    up = bn_relu_upconv(y2, scale2, shift2, params["w_up"], params["b_up"],
                        k=ku, tile_m=tile_m)
    # Pixel-shuffle the (kd, kh, kw, cout) row blocks onto the upsampled grid,
    # keeping only the conv2-valid voxels of the full parent grid.
    up = up[:, :m_full].reshape(ku, ku, ku, cout, n, d, h, w)
    up = up[..., :dv2, :hv2, :wv2]
    up = jnp.transpose(up, (4, 3, 5, 0, 6, 1, 7, 2))
    return up.reshape(n, cout, dv2 * ku, hv2 * ku, wv2 * ku)


# ------------------------------ XLA reference ------------------------------ #

def _reference_forward(x, params, conv_size=3, upconv_size=2, last=False):
    """Pure-JAX (XLA) reference of the PyTorch module, for validation."""
    def conv(xx, w, b):
        y = jax.lax.conv_general_dilated(
            xx, w, window_strides=(1, 1, 1), padding="VALID",
            dimension_numbers=("NCDHW", "OIDHW", "NCDHW"))
        return y + b.reshape(1, -1, 1, 1, 1)

    def bn_relu(y, g, beta):
        mean = jnp.mean(y, axis=(0, 2, 3, 4), keepdims=True)
        var = jnp.mean(y * y, axis=(0, 2, 3, 4), keepdims=True) - mean * mean
        yn = (y - mean) * jax.lax.rsqrt(var + BN_EPS)
        return jnp.maximum(yn * g.reshape(1, -1, 1, 1, 1)
                           + beta.reshape(1, -1, 1, 1, 1), 0.0)

    a1 = bn_relu(conv(x, params["w1"], params["b1"]), params["g1"], params["beta1"])
    a2 = bn_relu(conv(a1, params["w2"], params["b2"]), params["g2"], params["beta2"])
    if last:
        return a2
    ku = upconv_size
    t = jnp.einsum("ncdhw,coxyz->nodxhywz", a2, params["w_up"])
    nn, co, d2, _, h2, _, w2, _ = t.shape
    return (t.reshape(nn, co, d2 * ku, h2 * ku, w2 * ku)
            + params["b_up"].reshape(1, -1, 1, 1, 1))


# ---------------------------------- main ----------------------------------- #

if __name__ == "__main__":
    key = jax.random.PRNGKey(0)
    kx, kp = jax.random.split(key)

    # module config: n_features must be divisible by 3 (features_out = n // 3)
    N, n_features, D, H, W = 2, 6, 8, 8, 8

    x = jax.random.normal(kx, (N, n_features, D, H, W), jnp.float32)   # NCDHW
    params = init_synthesis_layer_params(kp, n_features, conv_size=3,
                                         upconv_size=2, last=False)

    fwd = jax.jit(functools.partial(synthesis_layer_forward, conv_size=3,
                                    upconv_size=2, last=False))
    out = jax.block_until_ready(fwd(x, params))

    # spatial: 8 -> conv(3) 6 -> conv(3) 4 -> upconv(2, stride 2) 8 ; channels 6 -> 2
    expected = (N, n_features // 3, D, H, W)
    assert out.shape == expected, (out.shape, expected)
    assert bool(jnp.all(jnp.isfinite(out)))

    # loose numerical check (bf16 MXU operands) against the pure-XLA reference
    ref = _reference_forward(x, params, conv_size=3, upconv_size=2, last=False)
    err = float(jnp.max(jnp.abs(out - ref.astype(out.dtype))))
    assert err < 0.1, f"max abs err vs reference: {err}"

    print("KERNEL_OK")
</pallas_src>

<mosaic_0001>
module attributes {stable_mosaic.version = 11 : i64} {
  func.func @_conv_kernel(%arg0: i32, %arg1: memref<6x1024xbf16, #tpu.memory_space<vmem>>, %arg2: memref<6x256xbf16, #tpu.memory_space<vmem>>, %arg3: memref<1x1024xbf16, #tpu.memory_space<vmem>>, %arg4: memref<27x2x6xbf16, #tpu.memory_space<vmem>>, %arg5: memref<2x1xf32, #tpu.memory_space<vmem>>, %arg6: memref<2x1024xbf16, #tpu.memory_space<vmem>>, %arg7: memref<1x2x2xf32, #tpu.memory_space<vmem>>, %arg8: memref<6x1280xbf16, #tpu.memory_space<vmem>>) attributes {dimension_semantics = [#tpu.dimension_semantics<parallel>], iteration_bounds = array<i64: 2>, scalar_prefetch = 0 : i64, scratch_operands = 1 : i64, tpu.core_type = #tpu.core_type<tc>, window_params = [{transform_indices = @transform_0, window_bounds = array<i64: 6, 1024>}, {transform_indices = @transform_1, window_bounds = array<i64: 6, 256>}, {transform_indices = @transform_2, window_bounds = array<i64: 1, 1024>}, {pipeline_mode = #tpu.pipeline_mode<synchronous>, transform_indices = @transform_3, window_bounds = array<i64: 27, 2, 6>}, {pipeline_mode = #tpu.pipeline_mode<synchronous>, transform_indices = @transform_4, window_bounds = array<i64: 2, 1>}, {transform_indices = @transform_5, window_bounds = array<i64: 2, 1024>}, {transform_indices = @transform_6, window_bounds = array<i64: 1, 2, 2>}]} {
    %c0 = arith.constant 0 : index
    %c0_0 = arith.constant 0 : index
    %0 = vector.load %arg1[%c0, %c0_0] : memref<6x1024xbf16, #tpu.memory_space<vmem>>, vector<6x1024xbf16>
    %c0_1 = arith.constant 0 : index
    %c0_2 = arith.constant 0 : index
    %1 = vector.load %arg8[%c0_1, %c0_2] : memref<6x1280xbf16, #tpu.memory_space<vmem>>, vector<6x1024xbf16>
    tpu.vector_store %arg8[%c0_1, %c0_2], %0 {strides = array<i32>} : memref<6x1280xbf16, #tpu.memory_space<vmem>>, vector<6x1024xbf16>,
    %c0_3 = arith.constant 0 : index
    %c0_4 = arith.constant 0 : index
    %2 = vector.load %arg2[%c0_3, %c0_4] : memref<6x256xbf16, #tpu.memory_space<vmem>>, vector<6x256xbf16>
    %c0_5 = arith.constant 0 : index
    %c1024 = arith.constant 1024 : index
    %3 = vector.load %arg8[%c0_5, %c1024] : memref<6x1280xbf16, #tpu.memory_space<vmem>>, vector<6x256xbf16>
    tpu.vector_store %arg8[%c0_5, %c1024], %2 {strides = array<i32>} : memref<6x1280xbf16, #tpu.memory_space<vmem>>, vector<6x256xbf16>,
    %cst = arith.constant 0.000000e+00 : f32
    %4 = vector.broadcast %cst : f32 to vector<2x1024xf32>
    %c0_6 = arith.constant 0 : index
    %c0_7 = arith.constant 0 : index
    %c0_8 = arith.constant 0 : index
    %5 = vector.load %arg4[%c0_6, %c0_7, %c0_8] : memref<27x2x6xbf16, #tpu.memory_space<vmem>>, vector<1x2x6xbf16>
    %6 = vector.shape_cast %5 : vector<1x2x6xbf16> to vector<2x6xbf16>
    %c0_9 = arith.constant 0 : index
    %c0_10 = arith.constant 0 : index
    %7 = vector.load %arg8[%c0_9, %c0_10] : memref<6x1280xbf16, #tpu.memory_space<vmem>>, vector<6x1024xbf16>
    %cst_11 = arith.constant dense<0.000000e+00> : vector<2x1024xf32>
    %8 = tpu.matmul %6, %7, %cst_11 {dimension_numbers = #tpu.dot_dimension_numbers<[1], [0], [0], [1], [0, 0, 1, 1], [], []>} : vector<2x6xbf16>, vector<6x1024xbf16>, vector<2x1024xf32> -> vector<2x1024xf32>
    %9 = arith.addf %4, %8 : vector<2x1024xf32>
    %c1 = arith.constant 1 : index
    %c0_12 = arith.constant 0 : index
    %c0_13 = arith.constant 0 : index
    %10 = vector.load %arg4[%c1, %c0_12, %c0_13] : memref<27x2x6xbf16, #tpu.memory_space<vmem>>, vector<1x2x6xbf16>
    %11 = vector.shape_cast %10 : vector<1x2x6xbf16> to vector<2x6xbf16>
    %c0_14 = arith.constant 0 : index
    %c1_15 = arith.constant 1 : index
    %12 = vector.load %arg8[%c0_14, %c1_15] : memref<6x1280xbf16, #tpu.memory_space<vmem>>, vector<6x1024xbf16>
    %cst_16 = arith.constant dense<0.000000e+00> : vector<2x1024xf32>
    %13 = tpu.matmul %11, %12, %cst_16 {dimension_numbers = #tpu.dot_dimension_numbers<[1], [0], [0], [1], [0, 0, 1, 1], [], []>} : vector<2x6xbf16>, vector<6x1024xbf16>, vector<2x1024xf32> -> vector<2x1024xf32>
    %14 = arith.addf %9, %13 : vector<2x1024xf32>
    %c2 = arith.constant 2 : index
    %c0_17 = arith.constant 0 : index
    %c0_18 = arith.constant 0 : index
    %15 = vector.load %arg4[%c2, %c0_17, %c0_18] : memref<27x2x6xbf16, #tpu.memory_space<vmem>>, vector<1x2x6xbf16>
    %16 = vector.shape_cast %15 : vector<1x2x6xbf16> to vector<2x6xbf16>
    %c0_19 = arith.constant 0 : index
    %c2_20 = arith.constant 2 : index
    %17 = vector.load %arg8[%c0_19, %c2_20] : memref<6x1280xbf16, #tpu.memory_space<vmem>>, vector<6x1024xbf16>
    %cst_21 = arith.constant dense<0.000000e+00> : vector<2x1024xf32>
    %18 = tpu.matmul %16, %17, %cst_21 {dimension_numbers = #tpu.dot_dimension_numbers<[1], [0], [0], [1], [0, 0, 1, 1], [], []>} : vector<2x6xbf16>, vector<6x1024xbf16>, vector<2x1024xf32> -> vector<2x1024xf32>
    %19 = arith.addf %14, %18 : vector<2x1024xf32>
    %c3 = arith.constant 3 : index
    %c0_22 = arith.constant 0 : index
    %c0_23 = arith.constant 0 : index
    %20 = vector.load %arg4[%c3, %c0_22, %c0_23] : memref<27x2x6xbf16, #tpu.memory_space<vmem>>, vector<1x2x6xbf16>
    %21 = vector.shape_cast %20 : vector<1x2x6xbf16> to vector<2x6xbf16>
    %c0_24 = arith.constant 0 : index
    %c8 = arith.constant 8 : index
    %22 = vector.load %arg8[%c0_24, %c8] : memref<6x1280xbf16, #tpu.memory_space<vmem>>, vector<6x1024xbf16>
    %cst_25 = arith.constant dense<0.000000e+00> : vector<2x1024xf32>
    %23 = tpu.matmul %21, %22, %cst_25 {dimension_numbers = #tpu.dot_dimension_numbers<[1], [0], [0], [1], [0, 0, 1, 1], [], []>} : vector<2x6xbf16>, vector<6x1024xbf16>, vector<2x1024xf32> -> vector<2x1024xf32>
    %24 = arith.addf %19, %23 : vector<2x1024xf32>
    %c4 = arith.constant 4 : index
    %c0_26 = arith.constant 0 : index
    %c0_27 = arith.constant 0 : index
    %25 = vector.load %arg4[%c4, %c0_26, %c0_27] : memref<27x2x6xbf16, #tpu.memory_space<vmem>>, vector<1x2x6xbf16>
    %26 = vector.shape_cast %25 : vector<1x2x6xbf16> to vector<2x6xbf16>
    %c0_28 = arith.constant 0 : index
    %c9 = arith.constant 9 : index
    %27 = vector.load %arg8[%c0_28, %c9] : memref<6x1280xbf16, #tpu.memory_space<vmem>>, vector<6x1024xbf16>
    %cst_29 = arith.constant dense<0.000000e+00> : vector<2x1024xf32>
    %28 = tpu.matmul %26, %27, %cst_29 {dimension_numbers = #tpu.dot_dimension_numbers<[1], [0], [0], [1], [0, 0, 1, 1], [], []>} : vector<2x6xbf16>, vector<6x1024xbf16>, vector<2x1024xf32> -> vector<2x1024xf32>
    %29 = arith.addf %24, %28 : vector<2x1024xf32>
    %c5 = arith.constant 5 : index
    %c0_30 = arith.constant 0 : index
    %c0_31 = arith.constant 0 : index
    %30 = vector.load %arg4[%c5, %c0_30, %c0_31] : memref<27x2x6xbf16, #tpu.memory_space<vmem>>, vector<1x2x6xbf16>
    %31 = vector.shape_cast %30 : vector<1x2x6xbf16> to vector<2x6xbf16>
    %c0_32 = arith.constant 0 : index
    %c10 = arith.constant 10 : index
    %32 = vector.load %arg8[%c0_32, %c10] : memref<6x1280xbf16, #tpu.memory_space<vmem>>, vector<6x1024xbf16>
    %cst_33 = arith.constant dense<0.000000e+00> : vector<2x1024xf32>
    %33 = tpu.matmul %31, %32, %cst_33 {dimension_numbers = #tpu.dot_dimension_numbers<[1], [0], [0], [1], [0, 0, 1, 1], [], []>} : vector<2x6xbf16>, vector<6x1024xbf16>, vector<2x1024xf32> -> vector<2x1024xf32>
    %34 = arith.addf %29, %33 : vector<2x1024xf32>
    %c6 = arith.constant 6 : index
    %c0_34 = arith.constant 0 : index
    %c0_35 = arith.constant 0 : index
    %35 = vector.load %arg4[%c6, %c0_34, %c0_35] : memref<27x2x6xbf16, #tpu.memory_space<vmem>>, vector<1x2x6xbf16>
    %36 = vector.shape_cast %35 : vector<1x2x6xbf16> to vector<2x6xbf16>
    %c0_36 = arith.constant 0 : index
    %c16 = arith.constant 16 : index
    %37 = vector.load %arg8[%c0_36, %c16] : memref<6x1280xbf16, #tpu.memory_space<vmem>>, vector<6x1024xbf16>
    %cst_37 = arith.constant dense<0.000000e+00> : vector<2x1024xf32>
    %38 = tpu.matmul %36, %37, %cst_37 {dimension_numbers = #tpu.dot_dimension_numbers<[1], [0], [0], [1], [0, 0, 1, 1], [], []>} : vector<2x6xbf16>, vector<6x1024xbf16>, vector<2x1024xf32> -> vector<2x1024xf32>
    %39 = arith.addf %34, %38 : vector<2x1024xf32>
    %c7 = arith.constant 7 : index
    %c0_38 = arith.constant 0 : index
    %c0_39 = arith.constant 0 : index
    %40 = vector.load %arg4[%c7, %c0_38, %c0_39] : memref<27x2x6xbf16, #tpu.memory_space<vmem>>, vector<1x2x6xbf16>
    %41 = vector.shape_cast %40 : vector<1x2x6xbf16> to vector<2x6xbf16>
    %c0_40 = arith.constant 0 : index
    %c17 = arith.constant 17 : index
    %42 = vector.load %arg8[%c0_40, %c17] : memref<6x1280xbf16, #tpu.memory_space<vmem>>, vector<6x1024xbf16>
    %cst_41 = arith.constant dense<0.000000e+00> : vector<2x1024xf32>
    %43 = tpu.matmul %41, %42, %cst_41 {dimension_numbers = #tpu.dot_dimension_numbers<[1], [0], [0], [1], [0, 0, 1, 1], [], []>} : vector<2x6xbf16>, vector<6x1024xbf16>, vector<2x1024xf32> -> vector<2x1024xf32>
    %44 = arith.addf %39, %43 : vector<2x1024xf32>
    %c8_42 = arith.constant 8 : index
    %c0_43 = arith.constant 0 : index
    %c0_44 = arith.constant 0 : index
    %45 = vector.load %arg4[%c8_42, %c0_43, %c0_44] : memref<27x2x6xbf16, #tpu.memory_space<vmem>>, vector<1x2x6xbf16>
    %46 = vector.shape_cast %45 : vector<1x2x6xbf16> to vector<2x6xbf16>
    %c0_45 = arith.constant 0 : index
    %c18 = arith.constant 18 : index
    %47 = vector.load %arg8[%c0_45, %c18] : memref<6x1280xbf16, #tpu.memory_space<vmem>>, vector<6x1024xbf16>
    %cst_46 = arith.constant dense<0.000000e+00> : vector<2x1024xf32>
    %48 = tpu.matmul %46, %47, %cst_46 {dimension_numbers = #tpu.dot_dimension_numbers<[1], [0], [0], [1], [0, 0, 1, 1], [], []>} : vector<2x6xbf16>, vector<6x1024xbf16>, vector<2x1024xf32> -> vector<2x1024xf32>
    %49 = arith.addf %44, %48 : vector<2x1024xf32>
    %c9_47 = arith.constant 9 : index
    %c0_48 = arith.constant 0 : index
    %c0_49 = arith.constant 0 : index
    %50 = vector.load %arg4[%c9_47, %c0_48, %c0_49] : memref<27x2x6xbf16, #tpu.memory_space<vmem>>, vector<1x2x6xbf16>
    %51 = vector.shape_cast %50 : vector<1x2x6xbf16> to vector<2x6xbf16>
    %c0_50 = arith.constant 0 : index
    %c64 = arith.constant 64 : index
    %52 = vector.load %arg8[%c0_50, %c64] : memref<6x1280xbf16, #tpu.memory_space<vmem>>, vector<6x1024xbf16>
    %cst_51 = arith.constant dense<0.000000e+00> : vector<2x1024xf32>
    %53 = tpu.matmul %51, %52, %cst_51 {dimension_numbers = #tpu.dot_dimension_numbers<[1], [0], [0], [1], [0, 0, 1, 1], [], []>} : vector<2x6xbf16>, vector<6x1024xbf16>, vector<2x1024xf32> -> vector<2x1024xf32>
    %54 = arith.addf %49, %53 : vector<2x1024xf32>
    %c10_52 = arith.constant 10 : index
    %c0_53 = arith.constant 0 : index
    %c0_54 = arith.constant 0 : index
    %55 = vector.load %arg4[%c10_52, %c0_53, %c0_54] : memref<27x2x6xbf16, #tpu.memory_space<vmem>>, vector<1x2x6xbf16>
    %56 = vector.shape_cast %55 : vector<1x2x6xbf16> to vector<2x6xbf16>
    %c0_55 = arith.constant 0 : index
    %c65 = arith.constant 65 : index
    %57 = vector.load %arg8[%c0_55, %c65] : memref<6x1280xbf16, #tpu.memory_space<vmem>>, vector<6x1024xbf16>
    %cst_56 = arith.constant dense<0.000000e+00> : vector<2x1024xf32>
    %58 = tpu.matmul %56, %57, %cst_56 {dimension_numbers = #tpu.dot_dimension_numbers<[1], [0], [0], [1], [0, 0, 1, 1], [], []>} : vector<2x6xbf16>, vector<6x1024xbf16>, vector<2x1024xf32> -> vector<2x1024xf32>
    %59 = arith.addf %54, %58 : vector<2x1024xf32>
    %c11 = arith.constant 11 : index
    %c0_57 = arith.constant 0 : index
    %c0_58 = arith.constant 0 : index
    %60 = vector.load %arg4[%c11, %c0_57, %c0_58] : memref<27x2x6xbf16, #tpu.memory_space<vmem>>, vector<1x2x6xbf16>
    %61 = vector.shape_cast %60 : vector<1x2x6xbf16> to vector<2x6xbf16>
    %c0_59 = arith.constant 0 : index
    %c66 = arith.constant 66 : index
    %62 = vector.load %arg8[%c0_59, %c66] : memref<6x1280xbf16, #tpu.memory_space<vmem>>, vector<6x1024xbf16>
    %cst_60 = arith.constant dense<0.000000e+00> : vector<2x1024xf32>
    %63 = tpu.matmul %61, %62, %cst_60 {dimension_numbers = #tpu.dot_dimension_numbers<[1], [0], [0], [1], [0, 0, 1, 1], [], []>} : vector<2x6xbf16>, vector<6x1024xbf16>, vector<2x1024xf32> -> vector<2x1024xf32>
    %64 = arith.addf %59, %63 : vector<2x1024xf32>
    %c12 = arith.constant 12 : index
    %c0_61 = arith.constant 0 : index
    %c0_62 = arith.constant 0 : index
    %65 = vector.load %arg4[%c12, %c0_61, %c0_62] : memref<27x2x6xbf16, #tpu.memory_space<vmem>>, vector<1x2x6xbf16>
    %66 = vector.shape_cast %65 : vector<1x2x6xbf16> to vector<2x6xbf16>
    %c0_63 = arith.constant 0 : index
    %c72 = arith.constant 72 : index
    %67 = vector.load %arg8[%c0_63, %c72] : memref<6x1280xbf16, #tpu.memory_space<vmem>>, vector<6x1024xbf16>
    %cst_64 = arith.constant dense<0.000000e+00> : vector<2x1024xf32>
    %68 = tpu.matmul %66, %67, %cst_64 {dimension_numbers = #tpu.dot_dimension_numbers<[1], [0], [0], [1], [0, 0, 1, 1], [], []>} : vector<2x6xbf16>, vector<6x1024xbf16>, vector<2x1024xf32> -> vector<2x1024xf32>
    %69 = arith.addf %64, %68 : vector<2x1024xf32>
    %c13 = arith.constant 13 : index
    %c0_65 = arith.constant 0 : index
    %c0_66 = arith.constant 0 : index
    %70 = vector.load %arg4[%c13, %c0_65, %c0_66] : memref<27x2x6xbf16, #tpu.memory_space<vmem>>, vector<1x2x6xbf16>
    %71 = vector.shape_cast %70 : vector<1x2x6xbf16> to vector<2x6xbf16>
    %c0_67 = arith.constant 0 : index
    %c73 = arith.constant 73 : index
    %72 = vector.load %arg8[%c0_67, %c73] : memref<6x1280xbf16, #tpu.memory_space<vmem>>, vector<6x1024xbf16>
    %cst_68 = arith.constant dense<0.000000e+00> : vector<2x1024xf32>
    %73 = tpu.matmul %71, %72, %cst_68 {dimension_numbers = #tpu.dot_dimension_numbers<[1], [0], [0], [1], [0, 0, 1, 1], [], []>} : vector<2x6xbf16>, vector<6x1024xbf16>, vector<2x1024xf32> -> vector<2x1024xf32>
    %74 = arith.addf %69, %73 : vector<2x1024xf32>
    %c14 = arith.constant 14 : index
    %c0_69 = arith.constant 0 : index
    %c0_70 = arith.constant 0 : index
    %75 = vector.load %arg4[%c14, %c0_69, %c0_70] : memref<27x2x6xbf16, #tpu.memory_space<vmem>>, vector<1x2x6xbf16>
    %76 = vector.shape_cast %75 : vector<1x2x6xbf16> to vector<2x6xbf16>
    %c0_71 = arith.constant 0 : index
    %c74 = arith.constant 74 : index
    %77 = vector.load %arg8[%c0_71, %c74] : memref<6x1280xbf16, #tpu.memory_space<vmem>>, vector<6x1024xbf16>
    %cst_72 = arith.constant dense<0.000000e+00> : vector<2x1024xf32>
    %78 = tpu.matmul %76, %77, %cst_72 {dimension_numbers = #tpu.dot_dimension_numbers<[1], [0], [0], [1], [0, 0, 1, 1], [], []>} : vector<2x6xbf16>, vector<6x1024xbf16>, vector<2x1024xf32> -> vector<2x1024xf32>
    %79 = arith.addf %74, %78 : vector<2x1024xf32>
    %c15 = arith.constant 15 : index
    %c0_73 = arith.constant 0 : index
    %c0_74 = arith.constant 0 : index
    %80 = vector.load %arg4[%c15, %c0_73, %c0_74] : memref<27x2x6xbf16, #tpu.memory_space<vmem>>, vector<1x2x6xbf16>
    %81 = vector.shape_cast %80 : vector<1x2x6xbf16> to vector<2x6xbf16>
    %c0_75 = arith.constant 0 : index
    %c80 = arith.constant 80 : index
    %82 = vector.load %arg8[%c0_75, %c80] : memref<6x1280xbf16, #tpu.memory_space<vmem>>, vector<6x1024xbf16>
    %cst_76 = arith.constant dense<0.000000e+00> : vector<2x1024xf32>
    %83 = tpu.matmul %81, %82, %cst_76 {dimension_numbers = #tpu.dot_dimension_numbers<[1], [0], [0], [1], [0, 0, 1, 1], [], []>} : vector<2x6xbf16>, vector<6x1024xbf16>, vector<2x1024xf32> -> vector<2x1024xf32>
    %84 = arith.addf %79, %83 : vector<2x1024xf32>
    %c16_77 = arith.constant 16 : index
    %c0_78 = arith.constant 0 : index
    %c0_79 = arith.constant 0 : index
    %85 = vector.load %arg4[%c16_77, %c0_78, %c0_79] : memref<27x2x6xbf16, #tpu.memory_space<vmem>>, vector<1x2x6xbf16>
    %86 = vector.shape_cast %85 : vector<1x2x6xbf16> to vector<2x6xbf16>
    %c0_80 = arith.constant 0 : index
    %c81 = arith.constant 81 : index
    %87 = vector.load %arg8[%c0_80, %c81] : memref<6x1280xbf16, #tpu.memory_space<vmem>>, vector<6x1024xbf16>
    %cst_81 = arith.constant dense<0.000000e+00> : vector<2x1024xf32>
    %88 = tpu.matmul %86, %87, %cst_81 {dimension_numbers = #tpu.dot_dimension_numbers<[1], [0], [0], [1], [0, 0, 1, 1], [], []>} : vector<2x6xbf16>, vector<6x1024xbf16>, vector<2x1024xf32> -> vector<2x1024xf32>
    %89 = arith.addf %84, %88 : vector<2x1024xf32>
    %c17_82 = arith.constant 17 : index
    %c0_83 = arith.constant 0 : index
    %c0_84 = arith.constant 0 : index
    %90 = vector.load %arg4[%c17_82, %c0_83, %c0_84] : memref<27x2x6xbf16, #tpu.memory_space<vmem>>, vector<1x2x6xbf16>
    %91 = vector.shape_cast %90 : vector<1x2x6xbf16> to vector<2x6xbf16>
    %c0_85 = arith.constant 0 : index
    %c82 = arith.constant 82 : index
    %92 = vector.load %arg8[%c0_85, %c82] : memref<6x1280xbf16, #tpu.memory_space<vmem>>, vector<6x1024xbf16>
    %cst_86 = arith.constant dense<0.000000e+00> : vector<2x1024xf32>
    %93 = tpu.matmul %91, %92, %cst_86 {dimension_numbers = #tpu.dot_dimension_numbers<[1], [0], [0], [1], [0, 0, 1, 1], [], []>} : vector<2x6xbf16>, vector<6x1024xbf16>, vector<2x1024xf32> -> vector<2x1024xf32>
    %94 = arith.addf %89, %93 : vector<2x1024xf32>
    %c18_87 = arith.constant 18 : index
    %c0_88 = arith.constant 0 : index
    %c0_89 = arith.constant 0 : index
    %95 = vector.load %arg4[%c18_87, %c0_88, %c0_89] : memref<27x2x6xbf16, #tpu.memory_space<vmem>>, vector<1x2x6xbf16>
    %96 = vector.shape_cast %95 : vector<1x2x6xbf16> to vector<2x6xbf16>
    %c0_90 = arith.constant 0 : index
    %c128 = arith.constant 128 : index
    %97 = vector.load %arg8[%c0_90, %c128] : memref<6x1280xbf16, #tpu.memory_space<vmem>>, vector<6x1024xbf16>
    %cst_91 = arith.constant dense<0.000000e+00> : vector<2x1024xf32>
    %98 = tpu.matmul %96, %97, %cst_91 {dimension_numbers = #tpu.dot_dimension_numbers<[1], [0], [0], [1], [0, 0, 1, 1], [], []>} : vector<2x6xbf16>, vector<6x1024xbf16>, vector<2x1024xf32> -> vector<2x1024xf32>
    %99 = arith.addf %94, %98 : vector<2x1024xf32>
    %c19 = arith.constant 19 : index
    %c0_92 = arith.constant 0 : index
    %c0_93 = arith.constant 0 : index
    %100 = vector.load %arg4[%c19, %c0_92, %c0_93] : memref<27x2x6xbf16, #tpu.memory_space<vmem>>, vector<1x2x6xbf16>
    %101 = vector.shape_cast %100 : vector<1x2x6xbf16> to vector<2x6xbf16>
    %c0_94 = arith.constant 0 : index
    %c129 = arith.constant 129 : index
    %102 = vector.load %arg8[%c0_94, %c129] : memref<6x1280xbf16, #tpu.memory_space<vmem>>, vector<6x1024xbf16>
    %cst_95 = arith.constant dense<0.000000e+00> : vector<2x1024xf32>
    %103 = tpu.matmul %101, %102, %cst_95 {dimension_numbers = #tpu.dot_dimension_numbers<[1], [0], [0], [1], [0, 0, 1, 1], [], []>} : vector<2x6xbf16>, vector<6x1024xbf16>, vector<2x1024xf32> -> vector<2x1024xf32>
    %104 = arith.addf %99, %103 : vector<2x1024xf32>
    %c20 = arith.constant 20 : index
    %c0_96 = arith.constant 0 : index
    %c0_97 = arith.constant 0 : index
    %105 = vector.load %arg4[%c20, %c0_96, %c0_97] : memref<27x2x6xbf16, #tpu.memory_space<vmem>>, vector<1x2x6xbf16>
    %106 = vector.shape_cast %105 : vector<1x2x6xbf16> to vector<2x6xbf16>
    %c0_98 = arith.constant 0 : index
    %c130 = arith.constant 130 : index
    %107 = vector.load %arg8[%c0_98, %c130] : memref<6x1280xbf16, #tpu.memory_space<vmem>>, vector<6x1024xbf16>
    %cst_99 = arith.constant dense<0.000000e+00> : vector<2x1024xf32>
    %108 = tpu.matmul %106, %107, %cst_99 {dimension_numbers = #tpu.dot_dimension_numbers<[1], [0], [0], [1], [0, 0, 1, 1], [], []>} : vector<2x6xbf16>, vector<6x1024xbf16>, vector<2x1024xf32> -> vector<2x1024xf32>
    %109 = arith.addf %104, %108 : vector<2x1024xf32>
    %c21 = arith.constant 21 : index
    %c0_100 = arith.constant 0 : index
    %c0_101 = arith.constant 0 : index
    %110 = vector.load %arg4[%c21, %c0_100, %c0_101] : memref<27x2x6xbf16, #tpu.memory_space<vmem>>, vector<1x2x6xbf16>
    %111 = vector.shape_cast %110 : vector<1x2x6xbf16> to vector<2x6xbf16>
    %c0_102 = arith.constant 0 : index
    %c136 = arith.constant 136 : index
    %112 = vector.load %arg8[%c0_102, %c136] : memref<6x1280xbf16, #tpu.memory_space<vmem>>, vector<6x1024xbf16>
    %cst_103 = arith.constant dense<0.000000e+00> : vector<2x1024xf32>
    %113 = tpu.matmul %111, %112, %cst_103 {dimension_numbers = #tpu.dot_dimension_numbers<[1], [0], [0], [1], [0, 0, 1, 1], [], []>} : vector<2x6xbf16>, vector<6x1024xbf16>, vector<2x1024xf32> -> vector<2x1024xf32>
    %114 = arith.addf %109, %113 : vector<2x1024xf32>
    %c22 = arith.constant 22 : index
    %c0_104 = arith.constant 0 : index
    %c0_105 = arith.constant 0 : index
    %115 = vector.load %arg4[%c22, %c0_104, %c0_105] : memref<27x2x6xbf16, #tpu.memory_space<vmem>>, vector<1x2x6xbf16>
    %116 = vector.shape_cast %115 : vector<1x2x6xbf16> to vector<2x6xbf16>
    %c0_106 = arith.constant 0 : index
    %c137 = arith.constant 137 : index
    %117 = vector.load %arg8[%c0_106, %c137] : memref<6x1280xbf16, #tpu.memory_space<vmem>>, vector<6x1024xbf16>
    %cst_107 = arith.constant dense<0.000000e+00> : vector<2x1024xf32>
    %118 = tpu.matmul %116, %117, %cst_107 {dimension_numbers = #tpu.dot_dimension_numbers<[1], [0], [0], [1], [0, 0, 1, 1], [], []>} : vector<2x6xbf16>, vector<6x1024xbf16>, vector<2x1024xf32> -> vector<2x1024xf32>
    %119 = arith.addf %114, %118 : vector<2x1024xf32>
    %c23 = arith.constant 23 : index
    %c0_108 = arith.constant 0 : index
    %c0_109 = arith.constant 0 : index
    %120 = vector.load %arg4[%c23, %c0_108, %c0_109] : memref<27x2x6xbf16, #tpu.memory_space<vmem>>, vector<1x2x6xbf16>
    %121 = vector.shape_cast %120 : vector<1x2x6xbf16> to vector<2x6xbf16>
    %c0_110 = arith.constant 0 : index
    %c138 = arith.constant 138 : index
    %122 = vector.load %arg8[%c0_110, %c138] : memref<6x1280xbf16, #tpu.memory_space<vmem>>, vector<6x1024xbf16>
    %cst_111 = arith.constant dense<0.000000e+00> : vector<2x1024xf32>
    %123 = tpu.matmul %121, %122, %cst_111 {dimension_numbers = #tpu.dot_dimension_numbers<[1], [0], [0], [1], [0, 0, 1, 1], [], []>} : vector<2x6xbf16>, vector<6x1024xbf16>, vector<2x1024xf32> -> vector<2x1024xf32>
    %124 = arith.addf %119, %123 : vector<2x1024xf32>
    %c24 = arith.constant 24 : index
    %c0_112 = arith.constant 0 : index
    %c0_113 = arith.constant 0 : index
    %125 = vector.load %arg4[%c24, %c0_112, %c0_113] : memref<27x2x6xbf16, #tpu.memory_space<vmem>>, vector<1x2x6xbf16>
    %126 = vector.shape_cast %125 : vector<1x2x6xbf16> to vector<2x6xbf16>
    %c0_114 = arith.constant 0 : index
    %c144 = arith.constant 144 : index
    %127 = vector.load %arg8[%c0_114, %c144] : memref<6x1280xbf16, #tpu.memory_space<vmem>>, vector<6x1024xbf16>
    %cst_115 = arith.constant dense<0.000000e+00> : vector<2x1024xf32>
    %128 = tpu.matmul %126, %127, %cst_115 {dimension_numbers = #tpu.dot_dimension_numbers<[1], [0], [0], [1], [0, 0, 1, 1], [], []>} : vector<2x6xbf16>, vector<6x1024xbf16>, vector<2x1024xf32> -> vector<2x1024xf32>
    %129 = arith.addf %124, %128 : vector<2x1024xf32>
    %c25 = arith.constant 25 : index
    %c0_116 = arith.constant 0 : index
    %c0_117 = arith.constant 0 : index
    %130 = vector.load %arg4[%c25, %c0_116, %c0_117] : memref<27x2x6xbf16, #tpu.memory_space<vmem>>, vector<1x2x6xbf16>
    %131 = vector.shape_cast %130 : vector<1x2x6xbf16> to vector<2x6xbf16>
    %c0_118 = arith.constant 0 : index
    %c145 = arith.constant 145 : index
    %132 = vector.load %arg8[%c0_118, %c145] : memref<6x1280xbf16, #tpu.memory_space<vmem>>, vector<6x1024xbf16>
    %cst_119 = arith.constant dense<0.000000e+00> : vector<2x1024xf32>
    %133 = tpu.matmul %131, %132, %cst_119 {dimension_numbers = #tpu.dot_dimension_numbers<[1], [0], [0], [1], [0, 0, 1, 1], [], []>} : vector<2x6xbf16>, vector<6x1024xbf16>, vector<2x1024xf32> -> vector<2x1024xf32>
    %134 = arith.addf %129, %133 : vector<2x1024xf32>
    %c26 = arith.constant 26 : index
    %c0_120 = arith.constant 0 : index
    %c0_121 = arith.constant 0 : index
    %135 = vector.load %arg4[%c26, %c0_120, %c0_121] : memref<27x2x6xbf16, #tpu.memory_space<vmem>>, vector<1x2x6xbf16>
    %136 = vector.shape_cast %135 : vector<1x2x6xbf16> to vector<2x6xbf16>
    %c0_122 = arith.constant 0 : index
    %c146 = arith.constant 146 : index
    %137 = vector.load %arg8[%c0_122, %c146] : memref<6x1280xbf16, #tpu.memory_space<vmem>>, vector<6x1024xbf16>
    %cst_123 = arith.constant dense<0.000000e+00> : vector<2x1024xf32>
    %138 = tpu.matmul %136, %137, %cst_123 {dimension_numbers = #tpu.dot_dimension_numbers<[1], [0], [0], [1], [0, 0, 1, 1], [], []>} : vector<2x6xbf16>, vector<6x1024xbf16>, vector<2x1024xf32> -> vector<2x1024xf32>
    %139 = arith.addf %134, %138 : vector<2x1024xf32>
    %c0_124 = arith.constant 0 : index
    %c0_125 = arith.constant 0 : index
    %140 = vector.load %arg5[%c0_124, %c0_125] : memref<2x1xf32, #tpu.memory_space<vmem>>, vector<2x1xf32>
    %141 = vector.broadcast %140 : vector<2x1xf32> to vector<2x1024xf32>
    %142 = arith.addf %139, %141 : vector<2x1024xf32>
    %143 = arith.truncf %142 : vector<2x1024xf32> to vector<2x1024xbf16>
    %c0_126 = arith.constant 0 : index
    %c0_127 = arith.constant 0 : index
    %144 = vector.load %arg6[%c0_126, %c0_127] : memref<2x1024xbf16, #tpu.memory_space<vmem>>, vector<2x1024xbf16>
    tpu.vector_store %arg6[%c0_126, %c0_127], %143 {strides = array<i32>} : memref<2x1024xbf16, #tpu.memory_space<vmem>>, vector<2x1024xbf16>,
    %c0_128 = arith.constant 0 : index
    %c0_129 = arith.constant 0 : index
    %145 = vector.load %arg3[%c0_128, %c0_129] : memref<1x1024xbf16, #tpu.memory_space<vmem>>, vector<1x1024xbf16>
    %146 = arith.extf %145 : vector<1x1024xbf16> to vector<1x1024xf32>
    %147 = vector.broadcast %146 : vector<1x1024xf32> to vector<2x1024xf32>
    %148 = arith.mulf %139, %147 : vector<2x1024xf32>
    %cst_130 = arith.constant dense<0.000000e+00> : vector<2xf32>
    %149 = vector.multi_reduction <add>, %148, %cst_130 [1] : vector<2x1024xf32> to vector<2xf32>
    %150 = vector.shape_cast %149 : vector<2xf32> to vector<2x1xf32>
    %151 = arith.mulf %148, %148 : vector<2x1024xf32>
    %cst_131 = arith.constant dense<0.000000e+00> : vector<2xf32>
    %152 = vector.multi_reduction <add>, %151, %cst_131 [1] : vector<2x1024xf32> to vector<2xf32>
    %153 = vector.shape_cast %152 : vector<2xf32> to vector<2x1xf32>
    %154 = tpu.concatenate %150, %153 in 1 : vector<2x1xf32>, vector<2x1xf32> -> vector<2x2xf32>
    %155 = vector.shape_cast %154 : vector<2x2xf32> to vector<1x2x2xf32>
    %c0_132 = arith.constant 0 : index
    %c0_133 = arith.constant 0 : index
    %c0_134 = arith.constant 0 : index
    %156 = vector.load %arg7[%c0_132, %c0_133, %c0_134] : memref<1x2x2xf32, #tpu.memory_space<vmem>>, vector<1x2x2xf32>
    tpu.vector_store %arg7[%c0_132, %c0_133, %c0_134], %155 {strides = array<i32>} : memref<1x2x2xf32, #tpu.memory_space<vmem>>, vector<1x2x2xf32>,
    return
  }
  func.func @transform_0(%arg0: i32) -> (i32, i32) {
    %c0_i32 = arith.constant 0 : i32
    %c0_i32_0 = arith.constant 0 : i32
    return %c0_i32, %arg0 : i32, i32
  }
  func.func @transform_1(%arg0: i32) -> (i32, i32) {
    %c1_i32 = arith.constant 1 : i32
    %0 = arith.addi %arg0, %c1_i32 : i32
    %c4_i32 = arith.constant 4 : i32
    %1 = arith.muli %0, %c4_i32 : i32
    %c0_i32 = arith.constant 0 : i32
    %c0_i32_0 = arith.constant 0 : i32
    return %c0_i32, %1 : i32, i32
  }
  func.func @transform_2(%arg0: i32) -> (i32, i32) {
    %c0_i32 = arith.constant 0 : i32
    %c0_i32_0 = arith.constant 0 : i32
    return %c0_i32, %arg0 : i32, i32
  }
  func.func @transform_3(%arg0: i32) -> (i32, i32, i32) {
    %c0_i32 = arith.constant 0 : i32
    %c0_i32_0 = arith.constant 0 : i32
    %c0_i32_1 = arith.constant 0 : i32
    %c0_i32_2 = arith.constant 0 : i32
    return %c0_i32, %c0_i32_0, %c0_i32_1 : i32, i32, i32
  }
  func.func @transform_4(%arg0: i32) -> (i32, i32) {
    %c0_i32 = arith.constant 0 : i32
    %c0_i32_0 = arith.constant 0 : i32
    %c0_i32_1 = arith.constant 0 : i32
    return %c0_i32, %c0_i32_0 : i32, i32
  }
  func.func @transform_5(%arg0: i32) -> (i32, i32) {
    %c0_i32 = arith.constant 0 : i32
    %c0_i32_0 = arith.constant 0 : i32
    return %c0_i32, %arg0 : i32, i32
  }
  func.func @transform_6(%arg0: i32) -> (i32, i32, i32) {
    %c0_i32 = arith.constant 0 : i32
    %c0_i32_0 = arith.constant 0 : i32
    %c0_i32_1 = arith.constant 0 : i32
    return %arg0, %c0_i32, %c0_i32_0 : i32, i32, i32
  }
}

module attributes {stable_mosaic.version = 11 : i64} {
  func.func @_conv_kernel(%arg0: i32, %arg1: memref<2x1024xbf16, #tpu.memory_space<vmem>>, %arg2: memref<2x256xbf16, #tpu.memory_space<vmem>>, %arg3: memref<1x1024xbf16, #tpu.memory_space<vmem>>, %arg4: memref<27x2x2xbf16, #tpu.memory_space<vmem>>, %arg5: memref<2x1xf32, #tpu.memory_space<vmem>>, %arg6: memref<2x1xf32, #tpu.memory_space<vmem>>, %arg7: memref<2x1xf32, #tpu.memory_space<vmem>>, %arg8: memref<2x1024xbf16, #tpu.memory_space<vmem>>, %arg9: memref<1x2x2xf32, #tpu.memory_space<vmem>>, %arg10: memref<2x1280xbf16, #tpu.memory_space<vmem>>) attributes {dimension_semantics = [#tpu.dimension_semantics<parallel>], iteration_bounds = array<i64: 1>, scalar_prefetch = 0 : i64, scratch_operands = 1 : i64, tpu.core_type = #tpu.core_type<tc>, window_params = [{transform_indices = @transform_0, window_bounds = array<i64: 2, 1024>}, {transform_indices = @transform_1, window_bounds = array<i64: 2, 256>}, {transform_indices = @transform_2, window_bounds = array<i64: 1, 1024>}, {pipeline_mode = #tpu.pipeline_mode<synchronous>, transform_indices = @transform_3, window_bounds = array<i64: 27, 2, 2>}, {pipeline_mode = #tpu.pipeline_mode<synchronous>, transform_indices = @transform_4, window_bounds = array<i64: 2, 1>}, {pipeline_mode = #tpu.pipeline_mode<synchronous>, transform_indices = @transform_5, window_bounds = array<i64: 2, 1>}, {pipeline_mode = #tpu.pipeline_mode<synchronous>, transform_indices = @transform_6, window_bounds = array<i64: 2, 1>}, {transform_indices = @transform_7, window_bounds = array<i64: 2, 1024>}, {transform_indices = @transform_8, window_bounds = array<i64: 1, 2, 2>}]} {
    %c0 = arith.constant 0 : index
    %c0_0 = arith.constant 0 : index
    %0 = vector.load %arg6[%c0, %c0_0] : memref<2x1xf32, #tpu.memory_space<vmem>>, vector<2x1xf32>
    %c0_1 = arith.constant 0 : index
    %c0_2 = arith.constant 0 : index
    %1 = vector.load %arg7[%c0_1, %c0_2] : memref<2x1xf32, #tpu.memory_space<vmem>>, vector<2x1xf32>
    %c0_3 = arith.constant 0 : index
    %c0_4 = arith.constant 0 : index
    %2 = vector.load %arg1[%c0_3, %c0_4] : memref<2x1024xbf16, #tpu.memory_space<vmem>>, vector<2x1024xbf16>
    %3 = arith.extf %2 : vector<2x1024xbf16> to vector<2x1024xf32>
    %4 = vector.broadcast %0 : vector<2x1xf32> to vector<2x1024xf32>
    %5 = arith.mulf %3, %4 : vector<2x1024xf32>
    %6 = vector.broadcast %1 : vector<2x1xf32> to vector<2x1024xf32>
    %7 = arith.addf %5, %6 : vector<2x1024xf32>
    %cst = arith.constant 0.000000e+00 : f32
    %8 = vector.broadcast %cst : f32 to vector<2x1024xf32>
    %9 = arith.maximumf %7, %8 : vector<2x1024xf32>
    %10 = arith.truncf %9 : vector<2x1024xf32> to vector<2x1024xbf16>
    %c0_5 = arith.constant 0 : index
    %c0_6 = arith.constant 0 : index
    %11 = vector.load %arg10[%c0_5, %c0_6] : memref<2x1280xbf16, #tpu.memory_space<vmem>>, vector<2x1024xbf16>
    tpu.vector_store %arg10[%c0_5, %c0_6], %10 {strides = array<i32>} : memref<2x1280xbf16, #tpu.memory_space<vmem>>, vector<2x1024xbf16>,
    %c0_7 = arith.constant 0 : index
    %c0_8 = arith.constant 0 : index
    %12 = vector.load %arg2[%c0_7, %c0_8] : memref<2x256xbf16, #tpu.memory_space<vmem>>, vector<2x256xbf16>
    %13 = arith.extf %12 : vector<2x256xbf16> to vector<2x256xf32>
    %14 = vector.broadcast %0 : vector<2x1xf32> to vector<2x256xf32>
    %15 = arith.mulf %13, %14 : vector<2x256xf32>
    %16 = vector.broadcast %1 : vector<2x1xf32> to vector<2x256xf32>
    %17 = arith.addf %15, %16 : vector<2x256xf32>
    %cst_9 = arith.constant 0.000000e+00 : f32
    %18 = vector.broadcast %cst_9 : f32 to vector<2x256xf32>
    %19 = arith.maximumf %17, %18 : vector<2x256xf32>
    %20 = arith.truncf %19 : vector<2x256xf32> to vector<2x256xbf16>
    %c0_10 = arith.constant 0 : index
    %c1024 = arith.constant 1024 : index
    %21 = vector.load %arg10[%c0_10, %c1024] : memref<2x1280xbf16, #tpu.memory_space<vmem>>, vector<2x256xbf16>
    tpu.vector_store %arg10[%c0_10, %c1024], %20 {strides = array<i32>} : memref<2x1280xbf16, #tpu.memory_space<vmem>>, vector<2x256xbf16>,
    %cst_11 = arith.constant 0.000000e+00 : f32
    %22 = vector.broadcast %cst_11 : f32 to vector<2x1024xf32>
    %c0_12 = arith.constant 0 : index
    %c0_13 = arith.constant 0 : index
    %c0_14 = arith.constant 0 : index
    %23 = vector.load %arg4[%c0_12, %c0_13, %c0_14] : memref<27x2x2xbf16, #tpu.memory_space<vmem>>, vector<1x2x2xbf16>
    %24 = vector.shape_cast %23 : vector<1x2x2xbf16> to vector<2x2xbf16>
    %c0_15 = arith.constant 0 : index
    %c0_16 = arith.constant 0 : index
    %25 = vector.load %arg10[%c0_15, %c0_16] : memref<2x1280xbf16, #tpu.memory_space<vmem>>, vector<2x1024xbf16>
    %cst_17 = arith.constant dense<0.000000e+00> : vector<2x1024xf32>
    %26 = tpu.matmul %24, %25, %cst_17 {dimension_numbers = #tpu.dot_dimension_numbers<[1], [0], [0], [1], [0, 0, 1, 1], [], []>} : vector<2x2xbf16>, vector<2x1024xbf16>, vector<2x1024xf32> -> vector<2x1024xf32>
    %27 = arith.addf %22, %26 : vector<2x1024xf32>
    %c1 = arith.constant 1 : index
    %c0_18 = arith.constant 0 : index
    %c0_19 = arith.constant 0 : index
    %28 = vector.load %arg4[%c1, %c0_18, %c0_19] : memref<27x2x2xbf16, #tpu.memory_space<vmem>>, vector<1x2x2xbf16>
    %29 = vector.shape_cast %28 : vector<1x2x2xbf16> to vector<2x2xbf16>
    %c0_20 = arith.constant 0 : index
    %c1_21 = arith.constant 1 : index
    %30 = vector.load %arg10[%c0_20, %c1_21] : memref<2x1280xbf16, #tpu.memory_space<vmem>>, vector<2x1024xbf16>
    %cst_22 = arith.constant dense<0.000000e+00> : vector<2x1024xf32>
    %31 = tpu.matmul %29, %30, %cst_22 {dimension_numbers = #tpu.dot_dimension_numbers<[1], [0], [0], [1], [0, 0, 1, 1], [], []>} : vector<2x2xbf16>, vector<2x1024xbf16>, vector<2x1024xf32> -> vector<2x1024xf32>
    %32 = arith.addf %27, %31 : vector<2x1024xf32>
    %c2 = arith.constant 2 : index
    %c0_23 = arith.constant 0 : index
    %c0_24 = arith.constant 0 : index
    %33 = vector.load %arg4[%c2, %c0_23, %c0_24] : memref<27x2x2xbf16, #tpu.memory_space<vmem>>, vector<1x2x2xbf16>
    %34 = vector.shape_cast %33 : vector<1x2x2xbf16> to vector<2x2xbf16>
    %c0_25 = arith.constant 0 : index
    %c2_26 = arith.constant 2 : index
    %35 = vector.load %arg10[%c0_25, %c2_26] : memref<2x1280xbf16, #tpu.memory_space<vmem>>, vector<2x1024xbf16>
    %cst_27 = arith.constant dense<0.000000e+00> : vector<2x1024xf32>
    %36 = tpu.matmul %34, %35, %cst_27 {dimension_numbers = #tpu.dot_dimension_numbers<[1], [0], [0], [1], [0, 0, 1, 1], [], []>} : vector<2x2xbf16>, vector<2x1024xbf16>, vector<2x1024xf32> -> vector<2x1024xf32>
    %37 = arith.addf %32, %36 : vector<2x1024xf32>
    %c3 = arith.constant 3 : index
    %c0_28 = arith.constant 0 : index
    %c0_29 = arith.constant 0 : index
    %38 = vector.load %arg4[%c3, %c0_28, %c0_29] : memref<27x2x2xbf16, #tpu.memory_space<vmem>>, vector<1x2x2xbf16>
    %39 = vector.shape_cast %38 : vector<1x2x2xbf16> to vector<2x2xbf16>
    %c0_30 = arith.constant 0 : index
    %c8 = arith.constant 8 : index
    %40 = vector.load %arg10[%c0_30, %c8] : memref<2x1280xbf16, #tpu.memory_space<vmem>>, vector<2x1024xbf16>
    %cst_31 = arith.constant dense<0.000000e+00> : vector<2x1024xf32>
    %41 = tpu.matmul %39, %40, %cst_31 {dimension_numbers = #tpu.dot_dimension_numbers<[1], [0], [0], [1], [0, 0, 1, 1], [], []>} : vector<2x2xbf16>, vector<2x1024xbf16>, vector<2x1024xf32> -> vector<2x1024xf32>
    %42 = arith.addf %37, %41 : vector<2x1024xf32>
    %c4 = arith.constant 4 : index
    %c0_32 = arith.constant 0 : index
    %c0_33 = arith.constant 0 : index
    %43 = vector.load %arg4[%c4, %c0_32, %c0_33] : memref<27x2x2xbf16, #tpu.memory_space<vmem>>, vector<1x2x2xbf16>
    %44 = vector.shape_cast %43 : vector<1x2x2xbf16> to vector<2x2xbf16>
    %c0_34 = arith.constant 0 : index
    %c9 = arith.constant 9 : index
    %45 = vector.load %arg10[%c0_34, %c9] : memref<2x1280xbf16, #tpu.memory_space<vmem>>, vector<2x1024xbf16>
    %cst_35 = arith.constant dense<0.000000e+00> : vector<2x1024xf32>
    %46 = tpu.matmul %44, %45, %cst_35 {dimension_numbers = #tpu.dot_dimension_numbers<[1], [0], [0], [1], [0, 0, 1, 1], [], []>} : vector<2x2xbf16>, vector<2x1024xbf16>, vector<2x1024xf32> -> vector<2x1024xf32>
    %47 = arith.addf %42, %46 : vector<2x1024xf32>
    %c5 = arith.constant 5 : index
    %c0_36 = arith.constant 0 : index
    %c0_37 = arith.constant 0 : index
    %48 = vector.load %arg4[%c5, %c0_36, %c0_37] : memref<27x2x2xbf16, #tpu.memory_space<vmem>>, vector<1x2x2xbf16>
    %49 = vector.shape_cast %48 : vector<1x2x2xbf16> to vector<2x2xbf16>
    %c0_38 = arith.constant 0 : index
    %c10 = arith.constant 10 : index
    %50 = vector.load %arg10[%c0_38, %c10] : memref<2x1280xbf16, #tpu.memory_space<vmem>>, vector<2x1024xbf16>
    %cst_39 = arith.constant dense<0.000000e+00> : vector<2x1024xf32>
    %51 = tpu.matmul %49, %50, %cst_39 {dimension_numbers = #tpu.dot_dimension_numbers<[1], [0], [0], [1], [0, 0, 1, 1], [], []>} : vector<2x2xbf16>, vector<2x1024xbf16>, vector<2x1024xf32> -> vector<2x1024xf32>
    %52 = arith.addf %47, %51 : vector<2x1024xf32>
    %c6 = arith.constant 6 : index
    %c0_40 = arith.constant 0 : index
    %c0_41 = arith.constant 0 : index
    %53 = vector.load %arg4[%c6, %c0_40, %c0_41] : memref<27x2x2xbf16, #tpu.memory_space<vmem>>, vector<1x2x2xbf16>
    %54 = vector.shape_cast %53 : vector<1x2x2xbf16> to vector<2x2xbf16>
    %c0_42 = arith.constant 0 : index
    %c16 = arith.constant 16 : index
    %55 = vector.load %arg10[%c0_42, %c16] : memref<2x1280xbf16, #tpu.memory_space<vmem>>, vector<2x1024xbf16>
    %cst_43 = arith.constant dense<0.000000e+00> : vector<2x1024xf32>
    %56 = tpu.matmul %54, %55, %cst_43 {dimension_numbers = #tpu.dot_dimension_numbers<[1], [0], [0], [1], [0, 0, 1, 1], [], []>} : vector<2x2xbf16>, vector<2x1024xbf16>, vector<2x1024xf32> -> vector<2x1024xf32>
    %57 = arith.addf %52, %56 : vector<2x1024xf32>
    %c7 = arith.constant 7 : index
    %c0_44 = arith.constant 0 : index
    %c0_45 = arith.constant 0 : index
    %58 = vector.load %arg4[%c7, %c0_44, %c0_45] : memref<27x2x2xbf16, #tpu.memory_space<vmem>>, vector<1x2x2xbf16>
    %59 = vector.shape_cast %58 : vector<1x2x2xbf16> to vector<2x2xbf16>
    %c0_46 = arith.constant 0 : index
    %c17 = arith.constant 17 : index
    %60 = vector.load %arg10[%c0_46, %c17] : memref<2x1280xbf16, #tpu.memory_space<vmem>>, vector<2x1024xbf16>
    %cst_47 = arith.constant dense<0.000000e+00> : vector<2x1024xf32>
    %61 = tpu.matmul %59, %60, %cst_47 {dimension_numbers = #tpu.dot_dimension_numbers<[1], [0], [0], [1], [0, 0, 1, 1], [], []>} : vector<2x2xbf16>, vector<2x1024xbf16>, vector<2x1024xf32> -> vector<2x1024xf32>
    %62 = arith.addf %57, %61 : vector<2x1024xf32>
    %c8_48 = arith.constant 8 : index
    %c0_49 = arith.constant 0 : index
    %c0_50 = arith.constant 0 : index
    %63 = vector.load %arg4[%c8_48, %c0_49, %c0_50] : memref<27x2x2xbf16, #tpu.memory_space<vmem>>, vector<1x2x2xbf16>
    %64 = vector.shape_cast %63 : vector<1x2x2xbf16> to vector<2x2xbf16>
    %c0_51 = arith.constant 0 : index
    %c18 = arith.constant 18 : index
    %65 = vector.load %arg10[%c0_51, %c18] : memref<2x1280xbf16, #tpu.memory_space<vmem>>, vector<2x1024xbf16>
    %cst_52 = arith.constant dense<0.000000e+00> : vector<2x1024xf32>
    %66 = tpu.matmul %64, %65, %cst_52 {dimension_numbers = #tpu.dot_dimension_numbers<[1], [0], [0], [1], [0, 0, 1, 1], [], []>} : vector<2x2xbf16>, vector<2x1024xbf16>, vector<2x1024xf32> -> vector<2x1024xf32>
    %67 = arith.addf %62, %66 : vector<2x1024xf32>
    %c9_53 = arith.constant 9 : index
    %c0_54 = arith.constant 0 : index
    %c0_55 = arith.constant 0 : index
    %68 = vector.load %arg4[%c9_53, %c0_54, %c0_55] : memref<27x2x2xbf16, #tpu.memory_space<vmem>>, vector<1x2x2xbf16>
    %69 = vector.shape_cast %68 : vector<1x2x2xbf16> to vector<2x2xbf16>
    %c0_56 = arith.constant 0 : index
    %c64 = arith.constant 64 : index
    %70 = vector.load %arg10[%c0_56, %c64] : memref<2x1280xbf16, #tpu.memory_space<vmem>>, vector<2x1024xbf16>
    %cst_57 = arith.constant dense<0.000000e+00> : vector<2x1024xf32>
    %71 = tpu.matmul %69, %70, %cst_57 {dimension_numbers = #tpu.dot_dimension_numbers<[1], [0], [0], [1], [0, 0, 1, 1], [], []>} : vector<2x2xbf16>, vector<2x1024xbf16>, vector<2x1024xf32> -> vector<2x1024xf32>
    %72 = arith.addf %67, %71 : vector<2x1024xf32>
    %c10_58 = arith.constant 10 : index
    %c0_59 = arith.constant 0 : index
    %c0_60 = arith.constant 0 : index
    %73 = vector.load %arg4[%c10_58, %c0_59, %c0_60] : memref<27x2x2xbf16, #tpu.memory_space<vmem>>, vector<1x2x2xbf16>
    %74 = vector.shape_cast %73 : vector<1x2x2xbf16> to vector<2x2xbf16>
    %c0_61 = arith.constant 0 : index
    %c65 = arith.constant 65 : index
    %75 = vector.load %arg10[%c0_61, %c65] : memref<2x1280xbf16, #tpu.memory_space<vmem>>, vector<2x1024xbf16>
    %cst_62 = arith.constant dense<0.000000e+00> : vector<2x1024xf32>
    %76 = tpu.matmul %74, %75, %cst_62 {dimension_numbers = #tpu.dot_dimension_numbers<[1], [0], [0], [1], [0, 0, 1, 1], [], []>} : vector<2x2xbf16>, vector<2x1024xbf16>, vector<2x1024xf32> -> vector<2x1024xf32>
    %77 = arith.addf %72, %76 : vector<2x1024xf32>
    %c11 = arith.constant 11 : index
    %c0_63 = arith.constant 0 : index
    %c0_64 = arith.constant 0 : index
    %78 = vector.load %arg4[%c11, %c0_63, %c0_64] : memref<27x2x2xbf16, #tpu.memory_space<vmem>>, vector<1x2x2xbf16>
    %79 = vector.shape_cast %78 : vector<1x2x2xbf16> to vector<2x2xbf16>
    %c0_65 = arith.constant 0 : index
    %c66 = arith.constant 66 : index
    %80 = vector.load %arg10[%c0_65, %c66] : memref<2x1280xbf16, #tpu.memory_space<vmem>>, vector<2x1024xbf16>
    %cst_66 = arith.constant dense<0.000000e+00> : vector<2x1024xf32>
    %81 = tpu.matmul %79, %80, %cst_66 {dimension_numbers = #tpu.dot_dimension_numbers<[1], [0], [0], [1], [0, 0, 1, 1], [], []>} : vector<2x2xbf16>, vector<2x1024xbf16>, vector<2x1024xf32> -> vector<2x1024xf32>
    %82 = arith.addf %77, %81 : vector<2x1024xf32>
    %c12 = arith.constant 12 : index
    %c0_67 = arith.constant 0 : index
    %c0_68 = arith.constant 0 : index
    %83 = vector.load %arg4[%c12, %c0_67, %c0_68] : memref<27x2x2xbf16, #tpu.memory_space<vmem>>, vector<1x2x2xbf16>
    %84 = vector.shape_cast %83 : vector<1x2x2xbf16> to vector<2x2xbf16>
    %c0_69 = arith.constant 0 : index
    %c72 = arith.constant 72 : index
    %85 = vector.load %arg10[%c0_69, %c72] : memref<2x1280xbf16, #tpu.memory_space<vmem>>, vector<2x1024xbf16>
    %cst_70 = arith.constant dense<0.000000e+00> : vector<2x1024xf32>
    %86 = tpu.matmul %84, %85, %cst_70 {dimension_numbers = #tpu.dot_dimension_numbers<[1], [0], [0], [1], [0, 0, 1, 1], [], []>} : vector<2x2xbf16>, vector<2x1024xbf16>, vector<2x1024xf32> -> vector<2x1024xf32>
    %87 = arith.addf %82, %86 : vector<2x1024xf32>
    %c13 = arith.constant 13 : index
    %c0_71 = arith.constant 0 : index
    %c0_72 = arith.constant 0 : index
    %88 = vector.load %arg4[%c13, %c0_71, %c0_72] : memref<27x2x2xbf16, #tpu.memory_space<vmem>>, vector<1x2x2xbf16>
    %89 = vector.shape_cast %88 : vector<1x2x2xbf16> to vector<2x2xbf16>
    %c0_73 = arith.constant 0 : index
    %c73 = arith.constant 73 : index
    %90 = vector.load %arg10[%c0_73, %c73] : memref<2x1280xbf16, #tpu.memory_space<vmem>>, vector<2x1024xbf16>
    %cst_74 = arith.constant dense<0.000000e+00> : vector<2x1024xf32>
    %91 = tpu.matmul %89, %90, %cst_74 {dimension_numbers = #tpu.dot_dimension_numbers<[1], [0], [0], [1], [0, 0, 1, 1], [], []>} : vector<2x2xbf16>, vector<2x1024xbf16>, vector<2x1024xf32> -> vector<2x1024xf32>
    %92 = arith.addf %87, %91 : vector<2x1024xf32>
    %c14 = arith.constant 14 : index
    %c0_75 = arith.constant 0 : index
    %c0_76 = arith.constant 0 : index
    %93 = vector.load %arg4[%c14, %c0_75, %c0_76] : memref<27x2x2xbf16, #tpu.memory_space<vmem>>, vector<1x2x2xbf16>
    %94 = vector.shape_cast %93 : vector<1x2x2xbf16> to vector<2x2xbf16>
    %c0_77 = arith.constant 0 : index
    %c74 = arith.constant 74 : index
    %95 = vector.load %arg10[%c0_77, %c74] : memref<2x1280xbf16, #tpu.memory_space<vmem>>, vector<2x1024xbf16>
    %cst_78 = arith.constant dense<0.000000e+00> : vector<2x1024xf32>
    %96 = tpu.matmul %94, %95, %cst_78 {dimension_numbers = #tpu.dot_dimension_numbers<[1], [0], [0], [1], [0, 0, 1, 1], [], []>} : vector<2x2xbf16>, vector<2x1024xbf16>, vector<2x1024xf32> -> vector<2x1024xf32>
    %97 = arith.addf %92, %96 : vector<2x1024xf32>
    %c15 = arith.constant 15 : index
    %c0_79 = arith.constant 0 : index
    %c0_80 = arith.constant 0 : index
    %98 = vector.load %arg4[%c15, %c0_79, %c0_80] : memref<27x2x2xbf16, #tpu.memory_space<vmem>>, vector<1x2x2xbf16>
    %99 = vector.shape_cast %98 : vector<1x2x2xbf16> to vector<2x2xbf16>
    %c0_81 = arith.constant 0 : index
    %c80 = arith.constant 80 : index
    %100 = vector.load %arg10[%c0_81, %c80] : memref<2x1280xbf16, #tpu.memory_space<vmem>>, vector<2x1024xbf16>
    %cst_82 = arith.constant dense<0.000000e+00> : vector<2x1024xf32>
    %101 = tpu.matmul %99, %100, %cst_82 {dimension_numbers = #tpu.dot_dimension_numbers<[1], [0], [0], [1], [0, 0, 1, 1], [], []>} : vector<2x2xbf16>, vector<2x1024xbf16>, vector<2x1024xf32> -> vector<2x1024xf32>
    %102 = arith.addf %97, %101 : vector<2x1024xf32>
    %c16_83 = arith.constant 16 : index
    %c0_84 = arith.constant 0 : index
    %c0_85 = arith.constant 0 : index
    %103 = vector.load %arg4[%c16_83, %c0_84, %c0_85] : memref<27x2x2xbf16, #tpu.memory_space<vmem>>, vector<1x2x2xbf16>
    %104 = vector.shape_cast %103 : vector<1x2x2xbf16> to vector<2x2xbf16>
    %c0_86 = arith.constant 0 : index
    %c81 = arith.constant 81 : index
    %105 = vector.load %arg10[%c0_86, %c81] : memref<2x1280xbf16, #tpu.memory_space<vmem>>, vector<2x1024xbf16>
    %cst_87 = arith.constant dense<0.000000e+00> : vector<2x1024xf32>
    %106 = tpu.matmul %104, %105, %cst_87 {dimension_numbers = #tpu.dot_dimension_numbers<[1], [0], [0], [1], [0, 0, 1, 1], [], []>} : vector<2x2xbf16>, vector<2x1024xbf16>, vector<2x1024xf32> -> vector<2x1024xf32>
    %107 = arith.addf %102, %106 : vector<2x1024xf32>
    %c17_88 = arith.constant 17 : index
    %c0_89 = arith.constant 0 : index
    %c0_90 = arith.constant 0 : index
    %108 = vector.load %arg4[%c17_88, %c0_89, %c0_90] : memref<27x2x2xbf16, #tpu.memory_space<vmem>>, vector<1x2x2xbf16>
    %109 = vector.shape_cast %108 : vector<1x2x2xbf16> to vector<2x2xbf16>
    %c0_91 = arith.constant 0 : index
    %c82 = arith.constant 82 : index
    %110 = vector.load %arg10[%c0_91, %c82] : memref<2x1280xbf16, #tpu.memory_space<vmem>>, vector<2x1024xbf16>
    %cst_92 = arith.constant dense<0.000000e+00> : vector<2x1024xf32>
    %111 = tpu.matmul %109, %110, %cst_92 {dimension_numbers = #tpu.dot_dimension_numbers<[1], [0], [0], [1], [0, 0, 1, 1], [], []>} : vector<2x2xbf16>, vector<2x1024xbf16>, vector<2x1024xf32> -> vector<2x1024xf32>
    %112 = arith.addf %107, %111 : vector<2x1024xf32>
    %c18_93 = arith.constant 18 : index
    %c0_94 = arith.constant 0 : index
    %c0_95 = arith.constant 0 : index
    %113 = vector.load %arg4[%c18_93, %c0_94, %c0_95] : memref<27x2x2xbf16, #tpu.memory_space<vmem>>, vector<1x2x2xbf16>
    %114 = vector.shape_cast %113 : vector<1x2x2xbf16> to vector<2x2xbf16>
    %c0_96 = arith.constant 0 : index
    %c128 = arith.constant 128 : index
    %115 = vector.load %arg10[%c0_96, %c128] : memref<2x1280xbf16, #tpu.memory_space<vmem>>, vector<2x1024xbf16>
    %cst_97 = arith.constant dense<0.000000e+00> : vector<2x1024xf32>
    %116 = tpu.matmul %114, %115, %cst_97 {dimension_numbers = #tpu.dot_dimension_numbers<[1], [0], [0], [1], [0, 0, 1, 1], [], []>} : vector<2x2xbf16>, vector<2x1024xbf16>, vector<2x1024xf32> -> vector<2x1024xf32>
    %117 = arith.addf %112, %116 : vector<2x1024xf32>
    %c19 = arith.constant 19 : index
    %c0_98 = arith.constant 0 : index
    %c0_99 = arith.constant 0 : index
    %118 = vector.load %arg4[%c19, %c0_98, %c0_99] : memref<27x2x2xbf16, #tpu.memory_space<vmem>>, vector<1x2x2xbf16>
    %119 = vector.shape_cast %118 : vector<1x2x2xbf16> to vector<2x2xbf16>
    %c0_100 = arith.constant 0 : index
    %c129 = arith.constant 129 : index
    %120 = vector.load %arg10[%c0_100, %c129] : memref<2x1280xbf16, #tpu.memory_space<vmem>>, vector<2x1024xbf16>
    %cst_101 = arith.constant dense<0.000000e+00> : vector<2x1024xf32>
    %121 = tpu.matmul %119, %120, %cst_101 {dimension_numbers = #tpu.dot_dimension_numbers<[1], [0], [0], [1], [0, 0, 1, 1], [], []>} : vector<2x2xbf16>, vector<2x1024xbf16>, vector<2x1024xf32> -> vector<2x1024xf32>
    %122 = arith.addf %117, %121 : vector<2x1024xf32>
    %c20 = arith.constant 20 : index
    %c0_102 = arith.constant 0 : index
    %c0_103 = arith.constant 0 : index
    %123 = vector.load %arg4[%c20, %c0_102, %c0_103] : memref<27x2x2xbf16, #tpu.memory_space<vmem>>, vector<1x2x2xbf16>
    %124 = vector.shape_cast %123 : vector<1x2x2xbf16> to vector<2x2xbf16>
    %c0_104 = arith.constant 0 : index
    %c130 = arith.constant 130 : index
    %125 = vector.load %arg10[%c0_104, %c130] : memref<2x1280xbf16, #tpu.memory_space<vmem>>, vector<2x1024xbf16>
    %cst_105 = arith.constant dense<0.000000e+00> : vector<2x1024xf32>
    %126 = tpu.matmul %124, %125, %cst_105 {dimension_numbers = #tpu.dot_dimension_numbers<[1], [0], [0], [1], [0, 0, 1, 1], [], []>} : vector<2x2xbf16>, vector<2x1024xbf16>, vector<2x1024xf32> -> vector<2x1024xf32>
    %127 = arith.addf %122, %126 : vector<2x1024xf32>
    %c21 = arith.constant 21 : index
    %c0_106 = arith.constant 0 : index
    %c0_107 = arith.constant 0 : index
    %128 = vector.load %arg4[%c21, %c0_106, %c0_107] : memref<27x2x2xbf16, #tpu.memory_space<vmem>>, vector<1x2x2xbf16>
    %129 = vector.shape_cast %128 : vector<1x2x2xbf16> to vector<2x2xbf16>
    %c0_108 = arith.constant 0 : index
    %c136 = arith.constant 136 : index
    %130 = vector.load %arg10[%c0_108, %c136] : memref<2x1280xbf16, #tpu.memory_space<vmem>>, vector<2x1024xbf16>
    %cst_109 = arith.constant dense<0.000000e+00> : vector<2x1024xf32>
    %131 = tpu.matmul %129, %130, %cst_109 {dimension_numbers = #tpu.dot_dimension_numbers<[1], [0], [0], [1], [0, 0, 1, 1], [], []>} : vector<2x2xbf16>, vector<2x1024xbf16>, vector<2x1024xf32> -> vector<2x1024xf32>
    %132 = arith.addf %127, %131 : vector<2x1024xf32>
    %c22 = arith.constant 22 : index
    %c0_110 = arith.constant 0 : index
    %c0_111 = arith.constant 0 : index
    %133 = vector.load %arg4[%c22, %c0_110, %c0_111] : memref<27x2x2xbf16, #tpu.memory_space<vmem>>, vector<1x2x2xbf16>
    %134 = vector.shape_cast %133 : vector<1x2x2xbf16> to vector<2x2xbf16>
    %c0_112 = arith.constant 0 : index
    %c137 = arith.constant 137 : index
    %135 = vector.load %arg10[%c0_112, %c137] : memref<2x1280xbf16, #tpu.memory_space<vmem>>, vector<2x1024xbf16>
    %cst_113 = arith.constant dense<0.000000e+00> : vector<2x1024xf32>
    %136 = tpu.matmul %134, %135, %cst_113 {dimension_numbers = #tpu.dot_dimension_numbers<[1], [0], [0], [1], [0, 0, 1, 1], [], []>} : vector<2x2xbf16>, vector<2x1024xbf16>, vector<2x1024xf32> -> vector<2x1024xf32>
    %137 = arith.addf %132, %136 : vector<2x1024xf32>
    %c23 = arith.constant 23 : index
    %c0_114 = arith.constant 0 : index
    %c0_115 = arith.constant 0 : index
    %138 = vector.load %arg4[%c23, %c0_114, %c0_115] : memref<27x2x2xbf16, #tpu.memory_space<vmem>>, vector<1x2x2xbf16>
    %139 = vector.shape_cast %138 : vector<1x2x2xbf16> to vector<2x2xbf16>
    %c0_116 = arith.constant 0 : index
    %c138 = arith.constant 138 : index
    %140 = vector.load %arg10[%c0_116, %c138] : memref<2x1280xbf16, #tpu.memory_space<vmem>>, vector<2x1024xbf16>
    %cst_117 = arith.constant dense<0.000000e+00> : vector<2x1024xf32>
    %141 = tpu.matmul %139, %140, %cst_117 {dimension_numbers = #tpu.dot_dimension_numbers<[1], [0], [0], [1], [0, 0, 1, 1], [], []>} : vector<2x2xbf16>, vector<2x1024xbf16>, vector<2x1024xf32> -> vector<2x1024xf32>
    %142 = arith.addf %137, %141 : vector<2x1024xf32>
    %c24 = arith.constant 24 : index
    %c0_118 = arith.constant 0 : index
    %c0_119 = arith.constant 0 : index
    %143 = vector.load %arg4[%c24, %c0_118, %c0_119] : memref<27x2x2xbf16, #tpu.memory_space<vmem>>, vector<1x2x2xbf16>
    %144 = vector.shape_cast %143 : vector<1x2x2xbf16> to vector<2x2xbf16>
    %c0_120 = arith.constant 0 : index
    %c144 = arith.constant 144 : index
    %145 = vector.load %arg10[%c0_120, %c144] : memref<2x1280xbf16, #tpu.memory_space<vmem>>, vector<2x1024xbf16>
    %cst_121 = arith.constant dense<0.000000e+00> : vector<2x1024xf32>
    %146 = tpu.matmul %144, %145, %cst_121 {dimension_numbers = #tpu.dot_dimension_numbers<[1], [0], [0], [1], [0, 0, 1, 1], [], []>} : vector<2x2xbf16>, vector<2x1024xbf16>, vector<2x1024xf32> -> vector<2x1024xf32>
    %147 = arith.addf %142, %146 : vector<2x1024xf32>
    %c25 = arith.constant 25 : index
    %c0_122 = arith.constant 0 : index
    %c0_123 = arith.constant 0 : index
    %148 = vector.load %arg4[%c25, %c0_122, %c0_123] : memref<27x2x2xbf16, #tpu.memory_space<vmem>>, vector<1x2x2xbf16>
    %149 = vector.shape_cast %148 : vector<1x2x2xbf16> to vector<2x2xbf16>
    %c0_124 = arith.constant 0 : index
    %c145 = arith.constant 145 : index
    %150 = vector.load %arg10[%c0_124, %c145] : memref<2x1280xbf16, #tpu.memory_space<vmem>>, vector<2x1024xbf16>
    %cst_125 = arith.constant dense<0.000000e+00> : vector<2x1024xf32>
    %151 = tpu.matmul %149, %150, %cst_125 {dimension_numbers = #tpu.dot_dimension_numbers<[1], [0], [0], [1], [0, 0, 1, 1], [], []>} : vector<2x2xbf16>, vector<2x1024xbf16>, vector<2x1024xf32> -> vector<2x1024xf32>
    %152 = arith.addf %147, %151 : vector<2x1024xf32>
    %c26 = arith.constant 26 : index
    %c0_126 = arith.constant 0 : index
    %c0_127 = arith.constant 0 : index
    %153 = vector.load %arg4[%c26, %c0_126, %c0_127] : memref<27x2x2xbf16, #tpu.memory_space<vmem>>, vector<1x2x2xbf16>
    %154 = vector.shape_cast %153 : vector<1x2x2xbf16> to vector<2x2xbf16>
    %c0_128 = arith.constant 0 : index
    %c146 = arith.constant 146 : index
    %155 = vector.load %arg10[%c0_128, %c146] : memref<2x1280xbf16, #tpu.memory_space<vmem>>, vector<2x1024xbf16>
    %cst_129 = arith.constant dense<0.000000e+00> : vector<2x1024xf32>
    %156 = tpu.matmul %154, %155, %cst_129 {dimension_numbers = #tpu.dot_dimension_numbers<[1], [0], [0], [1], [0, 0, 1, 1], [], []>} : vector<2x2xbf16>, vector<2x1024xbf16>, vector<2x1024xf32> -> vector<2x1024xf32>
    %157 = arith.addf %152, %156 : vector<2x1024xf32>
    %c0_130 = arith.constant 0 : index
    %c0_131 = arith.constant 0 : index
    %158 = vector.load %arg5[%c0_130, %c0_131] : memref<2x1xf32, #tpu.memory_space<vmem>>, vector<2x1xf32>
    %159 = vector.broadcast %158 : vector<2x1xf32> to vector<2x1024xf32>
    %160 = arith.addf %157, %159 : vector<2x1024xf32>
    %161 = arith.truncf %160 : vector<2x1024xf32> to vector<2x1024xbf16>
    %c0_132 = arith.constant 0 : index
    %c0_133 = arith.constant 0 : index
    %162 = vector.load %arg8[%c0_132, %c0_133] : memref<2x1024xbf16, #tpu.memory_space<vmem>>, vector<2x1024xbf16>
    tpu.vector_store %arg8[%c0_132, %c0_133], %161 {strides = array<i32>} : memref<2x1024xbf16, #tpu.memory_space<vmem>>, vector<2x1024xbf16>,
    %c0_134 = arith.constant 0 : index
    %c0_135 = arith.constant 0 : index
    %163 = vector.load %arg3[%c0_134, %c0_135] : memref<1x1024xbf16, #tpu.memory_space<vmem>>, vector<1x1024xbf16>
    %164 = arith.extf %163 : vector<1x1024xbf16> to vector<1x1024xf32>
    %165 = vector.broadcast %164 : vector<1x1024xf32> to vector<2x1024xf32>
    %166 = arith.mulf %157, %165 : vector<2x1024xf32>
    %cst_136 = arith.constant dense<0.000000e+00> : vector<2xf32>
    %167 = vector.multi_reduction <add>, %166, %cst_136 [1] : vector<2x1024xf32> to vector<2xf32>
    %168 = vector.shape_cast %167 : vector<2xf32> to vector<2x1xf32>
    %169 = arith.mulf %166, %166 : vector<2x1024xf32>
    %cst_137 = arith.constant dense<0.000000e+00> : vector<2xf32>
    %170 = vector.multi_reduction <add>, %169, %cst_137 [1] : vector<2x1024xf32> to vector<2xf32>
    %171 = vector.shape_cast %170 : vector<2xf32> to vector<2x1xf32>
    %172 = tpu.concatenate %168, %171 in 1 : vector<2x1xf32>, vector<2x1xf32> -> vector<2x2xf32>
    %173 = vector.shape_cast %172 : vector<2x2xf32> to vector<1x2x2xf32>
    %c0_138 = arith.constant 0 : index
    %c0_139 = arith.constant 0 : index
    %c0_140 = arith.constant 0 : index
    %174 = vector.load %arg9[%c0_138, %c0_139, %c0_140] : memref<1x2x2xf32, #tpu.memory_space<vmem>>, vector<1x2x2xf32>
    tpu.vector_store %arg9[%c0_138, %c0_139, %c0_140], %173 {strides = array<i32>} : memref<1x2x2xf32, #tpu.memory_space<vmem>>, vector<1x2x2xf32>,
    return
  }
  func.func @transform_0(%arg0: i32) -> (i32, i32) {
    %c0_i32 = arith.constant 0 : i32
    %c0_i32_0 = arith.constant 0 : i32
    return %c0_i32, %arg0 : i32, i32
  }
  func.func @transform_1(%arg0: i32) -> (i32, i32) {
    %c1_i32 = arith.constant 1 : i32
    %0 = arith.addi %arg0, %c1_i32 : i32
    %c4_i32 = arith.constant 4 : i32
    %1 = arith.muli %0, %c4_i32 : i32
    %c0_i32 = arith.constant 0 : i32
    %c0_i32_0 = arith.constant 0 : i32
    return %c0_i32, %1 : i32, i32
  }
  func.func @transform_2(%arg0: i32) -> (i32, i32) {
    %c0_i32 = arith.constant 0 : i32
    %c0_i32_0 = arith.constant 0 : i32
    return %c0_i32, %arg0 : i32, i32
  }
  func.func @transform_3(%arg0: i32) -> (i32, i32, i32) {
    %c0_i32 = arith.constant 0 : i32
    %c0_i32_0 = arith.constant 0 : i32
    %c0_i32_1 = arith.constant 0 : i32
    %c0_i32_2 = arith.constant 0 : i32
    return %c0_i32, %c0_i32_0, %c0_i32_1 : i32, i32, i32
  }
  func.func @transform_4(%arg0: i32) -> (i32, i32) {
    %c0_i32 = arith.constant 0 : i32
    %c0_i32_0 = arith.constant 0 : i32
    %c0_i32_1 = arith.constant 0 : i32
    return %c0_i32, %c0_i32_0 : i32, i32
  }
  func.func @transform_5(%arg0: i32) -> (i32, i32) {
    %c0_i32 = arith.constant 0 : i32
    %c0_i32_0 = arith.constant 0 : i32
    %c0_i32_1 = arith.constant 0 : i32
    return %c0_i32, %c0_i32_0 : i32, i32
  }
  func.func @transform_6(%arg0: i32) -> (i32, i32) {
    %c0_i32 = arith.constant 0 : i32
    %c0_i32_0 = arith.constant 0 : i32
    %c0_i32_1 = arith.constant 0 : i32
    return %c0_i32, %c0_i32_0 : i32, i32
  }
  func.func @transform_7(%arg0: i32) -> (i32, i32) {
    %c0_i32 = arith.constant 0 : i32
    %c0_i32_0 = arith.constant 0 : i32
    return %c0_i32, %arg0 : i32, i32
  }
  func.func @transform_8(%arg0: i32) -> (i32, i32, i32) {
    %c0_i32 = arith.constant 0 : i32
    %c0_i32_0 = arith.constant 0 : i32
    %c0_i32_1 = arith.constant 0 : i32
    return %arg0, %c0_i32, %c0_i32_0 : i32, i32, i32
  }
}

module attributes {stable_mosaic.version = 11 : i64} {
  func.func @_bn_relu_upconv_kernel(%arg0: i32, %arg1: memref<2x1024xbf16, #tpu.memory_space<vmem>>, %arg2: memref<2x1xf32, #tpu.memory_space<vmem>>, %arg3: memref<2x1xf32, #tpu.memory_space<vmem>>, %arg4: memref<16x2xbf16, #tpu.memory_space<vmem>>, %arg5: memref<16x1xf32, #tpu.memory_space<vmem>>, %arg6: memref<16x1024xf32, #tpu.memory_space<vmem>>) attributes {dimension_semantics = [#tpu.dimension_semantics<parallel>], iteration_bounds = array<i64: 1>, scalar_prefetch = 0 : i64, scratch_operands = 0 : i64, tpu.core_type = #tpu.core_type<tc>, window_params = [{transform_indices = @transform_0, window_bounds = array<i64: 2, 1024>}, {pipeline_mode = #tpu.pipeline_mode<synchronous>, transform_indices = @transform_1, window_bounds = array<i64: 2, 1>}, {pipeline_mode = #tpu.pipeline_mode<synchronous>, transform_indices = @transform_2, window_bounds = array<i64: 2, 1>}, {pipeline_mode = #tpu.pipeline_mode<synchronous>, transform_indices = @transform_3, window_bounds = array<i64: 16, 2>}, {pipeline_mode = #tpu.pipeline_mode<synchronous>, transform_indices = @transform_4, window_bounds = array<i64: 16, 1>}, {transform_indices = @transform_5, window_bounds = array<i64: 16, 1024>}]} {
    %c0 = arith.constant 0 : index
    %c0_0 = arith.constant 0 : index
    %0 = vector.load %arg1[%c0, %c0_0] : memref<2x1024xbf16, #tpu.memory_space<vmem>>, vector<2x1024xbf16>
    %1 = arith.extf %0 : vector<2x1024xbf16> to vector<2x1024xf32>
    %c0_1 = arith.constant 0 : index
    %c0_2 = arith.constant 0 : index
    %2 = vector.load %arg2[%c0_1, %c0_2] : memref<2x1xf32, #tpu.memory_space<vmem>>, vector<2x1xf32>
    %3 = vector.broadcast %2 : vector<2x1xf32> to vector<2x1024xf32>
    %4 = arith.mulf %1, %3 : vector<2x1024xf32>
    %c0_3 = arith.constant 0 : index
    %c0_4 = arith.constant 0 : index
    %5 = vector.load %arg3[%c0_3, %c0_4] : memref<2x1xf32, #tpu.memory_space<vmem>>, vector<2x1xf32>
    %6 = vector.broadcast %5 : vector<2x1xf32> to vector<2x1024xf32>
    %7 = arith.addf %4, %6 : vector<2x1024xf32>
    %cst = arith.constant 0.000000e+00 : f32
    %8 = vector.broadcast %cst : f32 to vector<2x1024xf32>
    %9 = arith.maximumf %7, %8 : vector<2x1024xf32>
    %c0_5 = arith.constant 0 : index
    %c0_6 = arith.constant 0 : index
    %10 = vector.load %arg4[%c0_5, %c0_6] : memref<16x2xbf16, #tpu.memory_space<vmem>>, vector<16x2xbf16>
    %11 = arith.truncf %9 : vector<2x1024xf32> to vector<2x1024xbf16>
    %cst_7 = arith.constant dense<0.000000e+00> : vector<16x1024xf32>
    %12 = tpu.matmul %10, %11, %cst_7 {dimension_numbers = #tpu.dot_dimension_numbers<[1], [0], [0], [1], [0, 0, 1, 1], [], []>} : vector<16x2xbf16>, vector<2x1024xbf16>, vector<16x1024xf32> -> vector<16x1024xf32>
    %c0_8 = arith.constant 0 : index
    %c0_9 = arith.constant 0 : index
    %13 = vector.load %arg5[%c0_8, %c0_9] : memref<16x1xf32, #tpu.memory_space<vmem>>, vector<16x1xf32>
    %14 = vector.broadcast %13 : vector<16x1xf32> to vector<16x1024xf32>
    %15 = arith.addf %12, %14 : vector<16x1024xf32>
    %c0_10 = arith.constant 0 : index
    %c0_11 = arith.constant 0 : index
    %16 = vector.load %arg6[%c0_10, %c0_11] : memref<16x1024xf32, #tpu.memory_space<vmem>>, vector<16x1024xf32>
    tpu.vector_store %arg6[%c0_10, %c0_11], %15 {strides = array<i32>} : memref<16x1024xf32, #tpu.memory_space<vmem>>, vector<16x1024xf32>,
    return
  }
  func.func @transform_0(%arg0: i32) -> (i32, i32) {
    %c0_i32 = arith.constant 0 : i32
    %c0_i32_0 = arith.constant 0 : i32
    return %c0_i32, %arg0 : i32, i32
  }
  func.func @transform_1(%arg0: i32) -> (i32, i32) {
    %c0_i32 = arith.constant 0 : i32
    %c0_i32_0 = arith.constant 0 : i32
    %c0_i32_1 = arith.constant 0 : i32
    return %c0_i32, %c0_i32_0 : i32, i32
  }
  func.func @transform_2(%arg0: i32) -> (i32, i32) {
    %c0_i32 = arith.constant 0 : i32
    %c0_i32_0 = arith.constant 0 : i32
    %c0_i32_1 = arith.constant 0 : i32
    return %c0_i32, %c0_i32_0 : i32, i32
  }
  func.func @transform_3(%arg0: i32) -> (i32, i32) {
    %c0_i32 = arith.constant 0 : i32
    %c0_i32_0 = arith.constant 0 : i32
    %c0_i32_1 = arith.constant 0 : i32
    return %c0_i32, %c0_i32_0 : i32, i32
  }
  func.func @transform_4(%arg0: i32) -> (i32, i32) {
    %c0_i32 = arith.constant 0 : i32
    %c0_i32_0 = arith.constant 0 : i32
    %c0_i32_1 = arith.constant 0 : i32
    return %c0_i32, %c0_i32_0 : i32, i32
  }
  func.func @transform_5(%arg0: i32) -> (i32, i32) {
    %c0_i32 = arith.constant 0 : i32
    %c0_i32_0 = arith.constant 0 : i32
    return %c0_i32, %arg0 : i32, i32
  }
}

</mosaic_0001>

<bundles_post_ra>
// kernel: tile.22
= control target key start
LH: loop header
LB: loop body
LE: loop exit
PB: predicated region body
PF: predicated region fallthrough
CT: control target
= control target key end

     0   :  { %s22_s0 = inlined_call_operand.vmem [shape: f32[2], index: 0, kind: input, shape index: {}]   ;;  %s23_s1 = inlined_call_operand.vmem [shape: f32[8,1,1,2], index: 1, kind: output, shape index: {}]  }
   0x1   :  { %v4_v0 = vld [vmem:[%s22_s0] ss:$0 sm:$0xff] }
   0x2   :  { %5 = vst [vmem:[%s23_s1] sm:$0xff] %v4_v0 }

// kernel: tile.0
= control target key start
LH: loop header
LB: loop body
LE: loop exit
PB: predicated region body
PF: predicated region fallthrough
CT: control target
= control target key end

     0   :  { %vm3_vm0 = vcmask 7168   ;;  %s13_s9 = smov 127   ;;  %s33_s0 = inlined_call_operand.vmem [shape: f32[8,1,1,2], index: 0, kind: input, shape index: {}]   ;;  %s34_s1 = inlined_call_operand.vmem [shape: f32[16,1], index: 1, kind: output, shape index: {}]  }
   0x1   :  { %v2_v0 = vld [vmem:[%s33_s0] sm:$0xff]  }
   0x2   :  { %4 = vst.msk [vmem:[%s34_s1] ss:$2 sm:$0xff] %vm3_vm0, %v2_v0   ;;  %6 = vrot.lane.b32.xlu0 %v2_v0, %s13_s9 }
  0x74   :  { %v7_v1 = vpop.permute.xlu0 %6  }
  0x75   :  { %11 = vst.msk [vmem:[%s34_s1 + $0x1] ss:$2 sm:$0xff] %vm3_vm0, %v7_v1  }

// kernel: synthesis_layer_forward.5
= control target key start
LH: loop header
LB: loop body
LE: loop exit
PB: predicated region body
PF: predicated region fallthrough
CT: control target
= control target key end

     0   :  { %v276_v0 = vmov 0   ;;  %v277_v3 = vmov 269488144   ;;  %vm102_vm0 = vcmask 1040384   ;;  %vm98_vm1 = vcmask 15360   ;;  %s390_s1 = inlined_call_operand.vmem [shape: f32[2,1], index: 1, kind: input, shape index: {}]   ;;  %s391_s2 = inlined_call_operand.vmem [shape: f32[2,1], index: 2, kind: input, shape index: {}]   ;;  %s392_s4 = inlined_call_operand.vmem [shape: f32[16,1], index: 4, kind: input, shape index: {}]   ;;  %s393_s0 = inlined_call_operand.vmem [shape: bf16[2,1024], index: 0, kind: input, shape index: {}]   ;;  %s394_s3 = inlined_call_operand.vmem [shape: bf16[16,2], index: 3, kind: input, shape index: {}]   ;;  %s395_s5 = inlined_call_operand.vmem [shape: f32[16,1024], index: 5, kind: output, shape index: {}]  }
   0x1   :  { %274 = vset.pattern.permute.xlu0 %v276_v0  ;;  %v24_v1 = vld [vmem:[%s390_s1] sm:$0x3]  ;;  %275 = vset.pattern.permute.xlu1 %v276_v0  ;;  %v30_v4 = vunpack.c.l.s4 %v277_v3  ;;  %v82_v20 = vld [vmem:[%s392_s4 + $0x8] sm:$0xff] }
   0x2   :  { %27 = vperm.xlu0 %274, %v24_v1   ;;  %v36_v2 = vld [vmem:[%s391_s2] sm:$0x3] }
   0x3   :  { %v81_v5 = vld [vmem:[%s392_s4] sm:$0xff]  ;;  %v31_v7 = vunpack.c.0.s8 %v30_v4 }
   0x4   :  { %85 = vperm.xlu1 %275, %v81_v5   ;;  %v21_v8 = vld [vmem:[%s393_s0] sm:$0xff] }
   0x5   :  { %v22_v9 = vunpack.c.l.bf16 %v21_v8  ;;  %v23_v10 = vunpack.c.h.bf16 %v21_v8  ;;  %v271_v36 = vld [vmem:[%s394_s3] sm:$0xff] }
   0xa   :  { %39 = vperm.xlu0 %274, %v36_v2  }
   0xc   :  { %90 = vperm.xlu1 %275, %v82_v20  }
  0x74   :  { %v28_v6 = vpop.permute.xlu0 %27 }
  0x75   :  { %v32_v11 = vperm.slane %v28_v6, %v31_v7 }
  0x76   :  { %v86_v46 = vpop.permute.xlu1 %85 }
  0x77   :  { %v34_v13 = vmul.f32 %v32_v11, %v22_v9  ;;  %v35_v14 = vmul.f32 %v32_v11, %v23_v10 }
  0x7c   :  { %v40_v12 = vpop.permute.xlu0 %39 }
  0x7d   :  { %v44_v15 = vperm.slane %v40_v12, %v31_v7 }
  0x7e   :  { %v91_v51 = vpop.permute.xlu1 %90 }
  0x7f   :  { %v46_v16 = vadd.f32 %v44_v15, %v34_v13  ;;  %v47_v17 = vadd.f32 %v44_v15, %v35_v14 }
  0x81   :  { %v48_v18 = vmax.f32 %v46_v16, 0.0  ;;  %v49_v19 = vmax.f32 %v47_v17, 0.0 }
  0x83   :  { %54 = vst [vmem:[#allocation1] ss:$4 sm:$0xff] %v48_v18 }
  0x84   :  { %56 = vst [vmem:[#allocation1 + $0x20] ss:$4 sm:$0xff] %v49_v19 }
  0x8a   :  { %v57_v21 = vld.sshfl [vmem:[#allocation1] sm:$0xff pattern:$0x73625140]  ;;  %v58_v22 = vld.sshfl [vmem:[#allocation1 + $0x8] sm:$0xff pattern:$0x73625140] }
  0x8b   :  { %v73_v23 = vpack.c.bf16 %v57_v21, %v57_v21  ;;  %v74_v24 = vpack.c.bf16 %v58_v22, %v58_v22  ;;  %v59_v25 = vld.sshfl [vmem:[#allocation1 + $0x10] sm:$0xff pattern:$0x73625140]  ;;  %v60_v26 = vld.sshfl [vmem:[#allocation1 + $0x18] sm:$0xff pattern:$0x73625140] }
  0x8c   :  { %v75_v27 = vpack.c.bf16 %v59_v25, %v59_v25  ;;  %v76_v28 = vpack.c.bf16 %v60_v26, %v60_v26  ;;  %v61_v29 = vld.sshfl [vmem:[#allocation1 + $0x20] sm:$0xff pattern:$0x73625140]  ;;  %v62_v30 = vld.sshfl [vmem:[#allocation1 + $0x28] sm:$0xff pattern:$0x73625140] }
  0x8d   :  { %v104_v31 = vsel %vm102_vm0, %v73_v23, 0  ;;  %v107_v32 = vsel %vm102_vm0, %v74_v24, 0  ;;  %v77_v33 = vpack.c.bf16 %v61_v29, %v61_v29  ;;  %v78_v34 = vpack.c.bf16 %v62_v30, %v62_v30  ;;  %v63_v35 = vld.sshfl [vmem:[#allocation1 + $0x30] sm:$0xff pattern:$0x73625140] }
  0x8e   :  { %134 = vmatpush.bf16.msra.mxu0 %v104_v31  ;;  %148 = vmatpush.bf16.msra.mxu1 %v107_v32  ;;  %v110_v37 = vsel %vm102_vm0, %v75_v27, 0  ;;  %v113_v38 = vsel %vm102_vm0, %v76_v28, 0  ;;  %v79_v39 = vpack.c.bf16 %v63_v35, %v63_v35  ;;  %v64_v40 = vld.sshfl [vmem:[#allocation1 + $0x38] sm:$0xff pattern:$0x73625140] }
  0x8f   :  { %162 = vmatpush.bf16.msra.mxu2 %v110_v37  ;;  %176 = vmatpush.bf16.msra.mxu3 %v113_v38  ;;  %v116_v41 = vsel %vm102_vm0, %v77_v33, 0  ;;  %v119_v42 = vsel %vm102_vm0, %v78_v34, 0  ;;  %v80_v43 = vpack.c.bf16 %v64_v40, %v64_v40 }
  0x90   :  { %v122_v44 = vsel %vm102_vm0, %v79_v39, 0 }
  0x91   :  { %v125_v45 = vsel %vm102_vm0, %v80_v43, 0  ;;  %263 = vmatmul.msk.bf16.vlgmr.msra.gmra.mxu0 %vm98_vm1, %v271_v36  ;;  %264 = vmatmul.msk.bf16.vlgmr.msra.gmra.mxu1 %vm98_vm1, %v271_v36 }
  0x92   :  { %190 = vmatpush.bf16.msrb.mxu0 %v116_v41  ;;  %204 = vmatpush.bf16.msrb.mxu1 %v119_v42 }
  0x93   :  { %218 = vmatpush.bf16.msrb.mxu2 %v122_v44  ;;  %232 = vmatpush.bf16.msrb.mxu3 %v125_v45 }
  0x94   :  { %265 = vmatmul.msk.bf16.vlgmr.msra.gmra.mxu2 %vm98_vm1, %v271_v36  ;;  %266 = vmatmul.msk.bf16.vlgmr.msra.gmra.mxu3 %vm98_vm1, %v271_v36 }
  0xa1   :  { %267 = vmatmul.msk.bf16.vlgmr.msrb.gmra.mxu0 %vm98_vm1, %v271_v36  ;;  %268 = vmatmul.msk.bf16.vlgmr.msrb.gmra.mxu1 %vm98_vm1, %v271_v36 }
  0xa4   :  { %269 = vmatmul.msk.bf16.vlgmr.msrb.gmra.mxu2 %vm98_vm1, %v271_v36  ;;  %270 = vmatmul.msk.bf16.vlgmr.msrb.gmra.mxu3 %vm98_vm1, %v271_v36 }
 0x10e   :  { %v136_v47 = vpop.f32.mrf.mxu0  ;;  %v150_v49 = vpop.f32.mrf.mxu1 }
 0x10f   :  { %v137_v48 = vadd.f32 %v136_v47, %v86_v46  ;;  %v151_v50 = vadd.f32 %v150_v49, %v86_v46 }
 0x111   :  { %239 = vst [vmem:[%s395_s5] sm:$0xff] %v137_v48 }
 0x112   :  { %240 = vst [vmem:[%s395_s5 + $0x8] sm:$0xff] %v151_v50 }
 0x116   :  { %v138_v56 = vpop.f32.mrf.mxu0  ;;  %v152_v57 = vpop.f32.mrf.mxu1 }
 0x117   :  { %v164_v52 = vpop.f32.mrf.mxu2  ;;  %v178_v53 = vpop.f32.mrf.mxu3  ;;  %v139_v58 = vadd.f32 %v138_v56, %v91_v51  ;;  %v153_v59 = vadd.f32 %v152_v57, %v91_v51 }
 0x118   :  { %v165_v54 = vadd.f32 %v164_v52, %v86_v46  ;;  %v179_v55 = vadd.f32 %v178_v53, %v86_v46 }
 0x119   :  { %247 = vst [vmem:[%s395_s5 + $0x40] sm:$0xff] %v139_v58 }
 0x11a   :  { %241 = vst [vmem:[%s395_s5 + $0x10] sm:$0xff] %v165_v54 }
 0x11b   :  { %242 = vst [vmem:[%s395_s5 + $0x18] sm:$0xff] %v179_v55 }
 0x11c   :  { %248 = vst [vmem:[%s395_s5 + $0x48] sm:$0xff] %v153_v59 }
 0x11e   :  { %v192_v0 = vpop.f32.mrf.mxu0  ;;  %v206_v1 = vpop.f32.mrf.mxu1 }
 0x11f   :  { %v166_v60 = vpop.f32.mrf.mxu2  ;;  %v180_v61 = vpop.f32.mrf.mxu3  ;;  %v193_v2 = vadd.f32 %v192_v0, %v86_v46  ;;  %v207_v3 = vadd.f32 %v206_v1, %v86_v46 }
 0x120   :  { %v167_v62 = vadd.f32 %v166_v60, %v91_v51  ;;  %v181_v63 = vadd.f32 %v180_v61, %v91_v51 }
 0x121   :  { %243 = vst [vmem:[%s395_s5 + $0x20] sm:$0xff] %v193_v2 }
 0x122   :  { %249 = vst [vmem:[%s395_s5 + $0x50] sm:$0xff] %v167_v62 }
 0x123   :  { %250 = vst [vmem:[%s395_s5 + $0x58] sm:$0xff] %v181_v63 }
 0x124   :  { %244 = vst [vmem:[%s395_s5 + $0x28] sm:$0xff] %v207_v3 }
 0x126   :  { %v194_v8 = vpop.f32.mrf.mxu0  ;;  %v208_v9 = vpop.f32.mrf.mxu1 }
 0x127   :  { %v220_v4 = vpop.f32.mrf.mxu2  ;;  %v234_v5 = vpop.f32.mrf.mxu3  ;;  %v195_v10 = vadd.f32 %v194_v8, %v91_v51  ;;  %v209_v11 = vadd.f32 %v208_v9, %v91_v51 }
 0x128   :  { %v221_v6 = vadd.f32 %v220_v4, %v86_v46  ;;  %v235_v7 = vadd.f32 %v234_v5, %v86_v46 }
 0x129   :  { %251 = vst [vmem:[%s395_s5 + $0x60] sm:$0xff] %v195_v10 }
 0x12a   :  { %245 = vst [vmem:[%s395_s5 + $0x30] sm:$0xff] %v221_v6 }
 0x12b   :  { %246 = vst [vmem:[%s395_s5 + $0x38] sm:$0xff] %v235_v7 }
 0x12c   :  { %252 = vst [vmem:[%s395_s5 + $0x68] sm:$0xff] %v209_v11 }
 0x12f   :  { %v222_v12 = vpop.f32.mrf.mxu2  ;;  %v236_v13 = vpop.f32.mrf.mxu3 }
 0x130   :  { %v223_v14 = vadd.f32 %v222_v12, %v91_v51  ;;  %v237_v15 = vadd.f32 %v236_v13, %v91_v51 }
 0x132   :  { %253 = vst [vmem:[%s395_s5 + $0x70] sm:$0xff] %v223_v14 }
 0x133   :  { %254 = vst [vmem:[%s395_s5 + $0x78] sm:$0xff] %v237_v15 }

// kernel: synthesis_layer_forward.3
= control target key start
LH: loop header
LB: loop body
LE: loop exit
PB: predicated region body
PF: predicated region fallthrough
CT: control target
= control target key end

     0   :  { %s5483_s21 = smov 0   ;;  %s7308_s0 = inlined_call_operand.vmem [shape: bf16[6,2304], index: 0, kind: input, shape index: {}, may-alias: {0,1}]   ;;  %s7309_s1 = inlined_call_operand.vmem [shape: bf16[6,2304], index: 1, kind: input, shape index: {}, may-alias: {0,1}]   ;;  %s7310_s2 = inlined_call_operand.vmem [shape: bf16[1,2048], index: 2, kind: input, shape index: {}]   ;;  %s7311_s3 = inlined_call_operand.vmem [shape: bf16[27,2,6], index: 3, kind: input, shape index: {}]   ;;  %s7312_s4 = inlined_call_operand.vmem [shape: f32[2,1], index: 4, kind: input, shape index: {}]   ;;  %s7313_s5 = inlined_call_operand.vmem [shape: bf16[2,2048], index: 5, kind: output, shape index: {0}]   ;;  %s7314_s6 = inlined_call_operand.vmem [shape: f32[2,2,2], index: 6, kind: output, shape index: {1}]  }
   0x1 LB: > { %s5489_s22 = sadd.s32 4294967295, %s5428_s21   ;;  %p5133_p0 = scmp.ge.s32.totalorder %s5428_s21, 1  ;;  %s5428_s21 = sphi %s5483_s21, %s17_s21  }
   0x2   : > { %p253_p1 = scmp.lt.s32.totalorder %s5428_s21, 3 }
   0x4   : > { %p254_p2 = pnand %p5133_p0, %p253_p1 }
   0x5   : > { %s5494_s23 = sshll.u32 (!%p254_p2), %s5489_s22, 3  ;;  %s5430_s10 = smov (!%p254_p2), 127  }
   0x6   : > { %257 = sbr.rel (%p254_p2) target bundleno = 1265 (0x4f1), region = 40  ;;  %p306_p3 = scmp.lt.s32.totalorder (!%p254_p2), %s5494_s23, 17 }
   0x7   : > { %s5394_s24 = sadd.s32 (!%p254_p2), 8, %s5494_s23  ;;  %s5431_s11 = smov (!%p254_p2), 126  }
   0x8   : > { %p318_p4 = scmp.lt.s32.totalorder (!%p254_p2), %s5394_s24, 17  ;;  %s5432_s12 = smov (!%p254_p2), 120  }
   0x9   : > { %s5433_s13 = smov (!%p254_p2), 119   ;;  %s5434_s14 = smov (!%p254_p2), 118  }
   0xa   : > { %s5435_s15 = smov (!%p254_p2), 112   ;;  %s5436_s18 = smov (!%p254_p2), 111  }
   0xb   : > { %s307_s25 = scalar_select %p306_p3, %s5494_s23, 17  ;;  %vm399_vm0 = vcmask 1039360   ;;  %vm412_vm1 = vcmask 1042432   ;;  %v5142_v42 = vld [vmem:[%s7311_s3 + $0x1] sm:$0x1]  ;;  %vm408_vm2 = vcmask 48128  }
   0xc   : > { %s7316_s24 = smov (!%p318_p4, %s5394_s24), 17  ;;  %vm692_vm3 = vcmask 1031168   ;;  %vm860_vm4 = vcmask 982016   ;;  %s5438_s27 = smov 64   ;;  %vm1028_vm5 = vcmask 973824   ;;  %vm1196_vm6 = vcmask 965632  }
   0xd   : > { %s5135_s26 = sshll.u32 %s307_s25, 2  ;;  %s5138_s30 = sshll.u32 %s7316_s24, 2  ;;  %vm1364_vm7 = vcmask 916480   ;;  %vm1532_vm8 = vcmask 908288   ;;  %vm1700_vm9 = vcmask 900096   ;;  %vm1868_vm10 = vcmask 523264  }
   0xe   : > { %s309_s29 = scalar_lea.vmem %s7308_s0, %s5135_s26  ;;  %s321_s9 = scalar_lea.vmem %s7309_s1, %s5138_s30  ;;  %vm2036_vm11 = vcmask 515072   ;;  %vm2204_vm12 = vcmask 506880   ;;  %vm2372_vm13 = vcmask 457728   ;;  %vm2540_vm14 = vcmask 449536  }
   0xf   : > { %v341_v0 = vld [vmem:[%s309_s29 + $0x8] sm:$0x77]  ;;  %v340_v1 = vld [vmem:[%s309_s29] sm:$0x77]  ;;  %v343_v2 = vld [vmem:[%s309_s29 + $0x18] sm:$0x77] }
  0x10   : > { %345 = vst [vmem:[#allocation2 + $0x8] sm:$0x77] %v341_v0  ;;  %v342_v3 = vld [vmem:[%s309_s29 + $0x10] sm:$0x77]  ;;  %v348_v4 = vld [vmem:[%s321_s9] sm:$0x77] }
  0x11   : > { %344 = vst [vmem:[#allocation2] sm:$0x77] %v340_v1  ;;  %s5437_s24 = smov 110   ;;  %s5439_s28 = smov 63   ;;  %vm2708_vm15 = vcmask 441344  }
  0x12   : > { %347 = vst [vmem:[#allocation2 + $0x18] sm:$0x77] %v343_v2  ;;  %s5440_s7 = smov 62   ;;  %s5441_s16 = smov 56  }
  0x13   : > { %346 = vst [vmem:[#allocation2 + $0x10] sm:$0x77] %v342_v3  ;;  %s5442_s20 = smov 55   ;;  %s5443_s25 = smov 54  }
  0x14   : > { %349 = vst [vmem:[#allocation2 + $0x20] sm:$0x77] %v348_v4  ;;  %p326_p5 = scmp.lt.s32.totalorder %s5494_s23, 15  ;;  %p335_p6 = scmp.lt.s32.totalorder %s5489_s22, 1 }
  0x16   : > { %s7318_s23 = smov (!%p326_p5, %s5494_s23), 15  ;;  %s7320_s22 = smov (!%p335_p6, %s5489_s22), 1 }
  0x17   : > { %v352_v5 = vld [vmem:[#allocation2 + $0x8] sm:$0x77]  ;;  %s5141_s26 = sshll.u32 %s7320_s22, 1 }
  0x18   : > { %v365_v6 = vunpack.c.l.b16 %v352_v5  ;;  %v351_v7 = vld [vmem:[#allocation2] sm:$0x77]  ;;  %v366_v13 = vunpack.c.h.b16 %v352_v5 }
  0x19   : > { %v363_v8 = vunpack.c.l.b16 %v351_v7  ;;  %v364_v14 = vunpack.c.h.b16 %v351_v7  ;;  %v354_v16 = vld [vmem:[#allocation2 + $0x18] sm:$0x77]  ;;  %v350_v5 = vld [vmem:[%s7311_s3] sm:$0x1] }
  0x1a   : > { %v5505_v9 = vpack.c.b16 %v365_v6, %v365_v6  ;;  %v353_v10 = vld [vmem:[#allocation2 + $0x10] sm:$0x77]  ;;  %v369_v17 = vunpack.c.l.b16 %v354_v16  ;;  %v5517_v18 = vpack.c.b16 %v366_v13, %v366_v13  ;;  %v370_v21 = vunpack.c.h.b16 %v354_v16 }
  0x1b   : > { %v5507_v11 = vpack.c.b16 %v363_v8, %v363_v8  ;;  %v367_v12 = vunpack.c.l.b16 %v353_v10  ;;  %v5519_v19 = vpack.c.b16 %v364_v14, %v364_v14  ;;  %v357_v22 = vld [vmem:[#allocation2 + $0x20] sm:$0x7]  ;;  %v368_v23 = vunpack.c.h.b16 %v353_v10 }
  0x1c   : > { %385 = vrot.lane.b32.xlu0 %v5505_v9, %s5430_s10  ;;  %v5521_v20 = vpack.c.b16 %v369_v17, %v369_v17  ;;  %v371_v24 = vunpack.c.l.b16 %v357_v22  ;;  %v5529_v25 = vpack.c.b16 %v370_v21, %v370_v21  ;;  %v551_v48 = vsel %vm412_vm1, %v5505_v9, 0 }
  0x1d   : > { %381 = vrot.lane.b32.xlu1 %v5507_v11, %s5430_s10  ;;  %v5513_v15 = vpack.c.b16 %v367_v12, %v367_v12  ;;  %v5531_v26 = vpack.c.b16 %v368_v23, %v368_v23  ;;  %v545_v49 = vsel %vm412_vm1, %v5507_v11, 0  ;;  %v554_v56 = vsel %vm412_vm1, %v5517_v18, 0 }
  0x1e   : > { %v5533_v27 = vpack.c.b16 %v371_v24, %v371_v24  ;;  %v548_v57 = vsel %vm412_vm1, %v5519_v19, 0  ;;  %v563_v59 = vsel %vm412_vm1, %v5521_v20, 0  ;;  %v566_v62 = vsel %vm412_vm1, %v5529_v25, 0 }
  0x1f   : > { %389 = vrot.lane.b32.xlu2 %v5513_v15, %s5430_s10  ;;  %v557_v60 = vsel %vm412_vm1, %v5513_v15, 0  ;;  %v560_v63 = vsel %vm412_vm1, %v5531_v26, 0 }
  0x24   : > { %387 = vrot.lane.b32.xlu0 %v5517_v18, %s5430_s10 }
  0x25   : > { %383 = vrot.lane.b32.xlu1 %v5519_v19, %s5430_s10 }
  0x27   : > { %393 = vrot.lane.b32.xlu2 %v5521_v20, %s5430_s10 }
  0x2c   : > { %395 = vrot.lane.b32.xlu0 %v5529_v25, %s5430_s10 }
  0x2d   : > { %391 = vrot.lane.b32.xlu1 %v5531_v26, %s5430_s10 }
  0x2f   : > { %397 = vrot.lane.b32.xlu2 %v5533_v27, %s5430_s10 }
  0x34   : > { %678 = vrot.lane.b32.xlu0 %v5505_v9, %s5431_s11 }
  0x35   : > { %680 = vrot.lane.b32.xlu1 %v5517_v18, %s5431_s11 }
  0x37   : > { %674 = vrot.lane.b32.xlu2 %v5507_v11, %s5431_s11 }
  0x3c   : > { %676 = vrot.lane.b32.xlu0 %v5519_v19, %s5431_s11 }
  0x3d   : > { %682 = vrot.lane.b32.xlu1 %v5513_v15, %s5431_s11 }
  0x3f   : > { %686 = vrot.lane.b32.xlu2 %v5521_v20, %s5431_s11 }
  0x44   : > { %688 = vrot.lane.b32.xlu0 %v5529_v25, %s5431_s11 }
  0x45   : > { %684 = vrot.lane.b32.xlu1 %v5531_v26, %s5431_s11 }
  0x47   : > { %690 = vrot.lane.b32.xlu2 %v5533_v27, %s5431_s11 }
  0x4c   : > { %846 = vrot.lane.b32.xlu0 %v5505_v9, %s5432_s12 }
  0x4d   : > { %848 = vrot.lane.b32.xlu1 %v5517_v18, %s5432_s12 }
  0x4f   : > { %842 = vrot.lane.b32.xlu2 %v5507_v11, %s5432_s12 }
  0x54   : > { %844 = vrot.lane.b32.xlu0 %v5519_v19, %s5432_s12 }
  0x55   : > { %850 = vrot.lane.b32.xlu1 %v5513_v15, %s5432_s12 }
  0x57   : > { %854 = vrot.lane.b32.xlu2 %v5521_v20, %s5432_s12 }
  0x5c   : > { %856 = vrot.lane.b32.xlu0 %v5529_v25, %s5432_s12 }
  0x5d   : > { %852 = vrot.lane.b32.xlu1 %v5531_v26, %s5432_s12 }
  0x5f   : > { %858 = vrot.lane.b32.xlu2 %v5533_v27, %s5432_s12 }
  0x64   : > { %1014 = vrot.lane.b32.xlu0 %v5505_v9, %s5433_s13 }
  0x65   : > { %1016 = vrot.lane.b32.xlu1 %v5517_v18, %s5433_s13 }
  0x67   : > { %1010 = vrot.lane.b32.xlu2 %v5507_v11, %s5433_s13 }
  0x6c   : > { %1012 = vrot.lane.b32.xlu0 %v5519_v19, %s5433_s13 }
  0x6d   : > { %1018 = vrot.lane.b32.xlu1 %v5513_v15, %s5433_s13 }
  0x6f   : > { %1022 = vrot.lane.b32.xlu2 %v5521_v20, %s5433_s13 }
  0x74   : > { %1024 = vrot.lane.b32.xlu0 %v5529_v25, %s5433_s13 }
  0x75   : > { %1020 = vrot.lane.b32.xlu1 %v5531_v26, %s5433_s13 }
  0x77   : > { %1026 = vrot.lane.b32.xlu2 %v5533_v27, %s5433_s13 }
  0x79   : > { %v390_v28 = vpop.permute.xlu2 %389 }
  0x7c   : > { %1182 = vrot.lane.b32.xlu0 %v5505_v9, %s5434_s14 }
  0x7d   : > { %1184 = vrot.lane.b32.xlu1 %v5517_v18, %s5434_s14 }
  0x7f   : > { %1178 = vrot.lane.b32.xlu2 %v5507_v11, %s5434_s14 }
  0x81   : > { %v394_v31 = vpop.permute.xlu2 %393 }
  0x84   : > { %1180 = vrot.lane.b32.xlu0 %v5519_v19, %s5434_s14 }
  0x85   : > { %1186 = vrot.lane.b32.xlu1 %v5513_v15, %s5434_s14 }
  0x87   : > { %1190 = vrot.lane.b32.xlu2 %v5521_v20, %s5434_s14 }
  0x89   : > { %v398_v43 = vpop.permute.xlu2 %397 }
  0x8c   : > { %1192 = vrot.lane.b32.xlu0 %v5529_v25, %s5434_s14 }
  0x8d   : > { %1188 = vrot.lane.b32.xlu1 %v5531_v26, %s5434_s14 }
  0x8e   : > { %v386_v29 = vpop.permute.xlu0 %385 }
  0x8f   : > { %v382_v30 = vpop.permute.xlu1 %381  ;;  %1194 = vrot.lane.b32.xlu2 %v5533_v27, %s5434_s14 }
  0x91   : > { %v675_v0 = vpop.permute.xlu2 %674 }
  0x94   : > { %1350 = vrot.lane.b32.xlu0 %v5505_v9, %s5435_s15 }
  0x95   : > { %1352 = vrot.lane.b32.xlu1 %v5517_v18, %s5435_s15 }
  0x96   : > { %v388_v32 = vpop.permute.xlu0 %387 }
  0x97   : > { %v384_v33 = vpop.permute.xlu1 %383  ;;  %v402_v34 = vsel %vm399_vm0, %v386_v29, %v388_v32  ;;  %v403_v35 = vsel %vm399_vm0, %v388_v32, %v390_v28  ;;  %1346 = vrot.lane.b32.xlu2 %v5507_v11, %s5435_s15 }
  0x98   : > { %v400_v36 = vsel %vm399_vm0, %v382_v30, %v384_v33  ;;  %v401_v37 = vsel %vm399_vm0, %v384_v33, %v386_v29  ;;  %v420_v38 = vsel %vm412_vm1, %v402_v34, 0  ;;  %v423_v39 = vsel %vm412_vm1, %v403_v35, 0 }
  0x99   : > { %v414_v40 = vsel %vm412_vm1, %v400_v36, 0  ;;  %v417_v41 = vsel %vm412_vm1, %v401_v37, 0  ;;  %470 = vmatpush.bf16.msra.mxu2 %v420_v38  ;;  %483 = vmatpush.bf16.msra.mxu3 %v423_v39  ;;  %v687_v14 = vpop.permute.xlu2 %686 }
  0x9a   : > { %444 = vmatpush.bf16.msra.mxu0 %v414_v40  ;;  %457 = vmatpush.bf16.msra.mxu1 %v417_v41  ;;  %v5159_v40 = vld [vmem:[%s7311_s3 + $0x2] sm:$0x1] }
  0x9c   : > { %5145 = vmatmul.msk.bf16.vlgmr.msra.gmra.mxu2 %vm408_vm2, %v5142_v42  ;;  %5146 = vmatmul.msk.bf16.vlgmr.msra.gmra.mxu3 %vm408_vm2, %v5142_v42 }
  0x9d   : > { %5143 = vmatmul.msk.bf16.vlgmr.msra.gmra.mxu0 %vm408_vm2, %v5142_v42  ;;  %5144 = vmatmul.msk.bf16.vlgmr.msra.gmra.mxu1 %vm408_vm2, %v5142_v42 }
  0x9e   : > { %v396_v44 = vpop.permute.xlu0 %395  ;;  %1348 = vrot.lane.b32.xlu0 %v5519_v19, %s5435_s15  ;;  %1354 = vrot.lane.b32.xlu1 %v5513_v15, %s5435_s15 }
  0x9f   : > { %v392_v45 = vpop.permute.xlu1 %391  ;;  %v406_v46 = vsel %vm399_vm0, %v394_v31, %v396_v44  ;;  %v407_v47 = vsel %vm399_vm0, %v396_v44, %v398_v43  ;;  %1358 = vrot.lane.b32.xlu2 %v5521_v20, %s5435_s15 }
  0xa0   : > { %v404_v50 = vsel %vm399_vm0, %v390_v28, %v392_v45  ;;  %v405_v51 = vsel %vm399_vm0, %v392_v45, %v394_v31  ;;  %v432_v52 = vsel %vm412_vm1, %v406_v46, 0  ;;  %v435_v53 = vsel %vm412_vm1, %v407_v47, 0 }
  0xa1   : > { %v426_v54 = vsel %vm412_vm1, %v404_v50, 0  ;;  %v429_v55 = vsel %vm412_vm1, %v405_v51, 0  ;;  %522 = vmatpush.bf16.msrb.mxu2 %v432_v52  ;;  %535 = vmatpush.bf16.msrb.mxu3 %v435_v53  ;;  %v691_v21 = vpop.permute.xlu2 %690 }
  0xa2   : > { %496 = vmatpush.bf16.msrb.mxu0 %v426_v54  ;;  %509 = vmatpush.bf16.msrb.mxu1 %v429_v55 }
  0xa5   : > { %601 = vmatpush.bf16.msra.mxu2 %v551_v48  ;;  %614 = vmatpush.bf16.msra.mxu3 %v554_v56 }
  0xa6   : > { %575 = vmatpush.bf16.msra.mxu0 %v545_v49  ;;  %588 = vmatpush.bf16.msra.mxu1 %v548_v57  ;;  %v679_v58 = vpop.permute.xlu0 %678 }
  0xa7   : > { %1356 = vrot.lane.b32.xlu1 %v5531_v26, %s5435_s15  ;;  %1360 = vrot.lane.b32.xlu0 %v5529_v25, %s5435_s15  ;;  %v681_v61 = vpop.permute.xlu1 %680 }
  0xa8   : > { %1362 = vrot.lane.b32.xlu2 %v5533_v27, %s5435_s15  ;;  %v695_v3 = vsel %vm692_vm3, %v679_v58, %v681_v61 }
  0xa9   : > { %v711_v10 = vsel %vm412_vm1, %v695_v3, 0  ;;  %v843_v35 = vpop.permute.xlu2 %842 }
  0xac   : > { %5149 = vmatmul.msk.bf16.vlgmr.msrb.gmra.mxu2 %vm408_vm2, %v5142_v42  ;;  %5150 = vmatmul.msk.bf16.vlgmr.msrb.gmra.mxu3 %vm408_vm2, %v5142_v42 }
  0xad   : > { %5147 = vmatmul.msk.bf16.vlgmr.msrb.gmra.mxu0 %vm408_vm2, %v5142_v42  ;;  %5148 = vmatmul.msk.bf16.vlgmr.msrb.gmra.mxu1 %vm408_vm2, %v5142_v42 }
  0xae   : > { %653 = vmatpush.bf16.msrb.mxu2 %v563_v59  ;;  %627 = vmatpush.bf16.msrb.mxu0 %v557_v60  ;;  %v677_v1 = vpop.permute.xlu0 %676 }
  0xaf   : > { %666 = vmatpush.bf16.msrb.mxu3 %v566_v62  ;;  %640 = vmatpush.bf16.msrb.mxu1 %v560_v63  ;;  %v683_v2 = vpop.permute.xlu1 %682  ;;  %v694_v4 = vsel %vm692_vm3, %v677_v1, %v679_v58  ;;  %v693_v7 = vsel %vm692_vm3, %v675_v0, %v677_v1 }
  0xb0   : > { %1518 = vrot.lane.b32.xlu0 %v5505_v9, %s5436_s18  ;;  %1520 = vrot.lane.b32.xlu1 %v5517_v18, %s5436_s18  ;;  %v696_v6 = vsel %vm692_vm3, %v681_v61, %v683_v2  ;;  %v708_v8 = vsel %vm412_vm1, %v694_v4, 0  ;;  %v705_v13 = vsel %vm412_vm1, %v693_v7, 0 }
  0xb1   : > { %1514 = vrot.lane.b32.xlu2 %v5507_v11, %s5436_s18  ;;  %v714_v12 = vsel %vm412_vm1, %v696_v6, 0  ;;  %v855_v47 = vpop.permute.xlu2 %854 }
  0xb6   : > { %v689_v16 = vpop.permute.xlu0 %688 }
  0xb7   : > { %v685_v17 = vpop.permute.xlu1 %684  ;;  %v699_v24 = vsel %vm692_vm3, %v687_v14, %v689_v16  ;;  %v700_v28 = vsel %vm692_vm3, %v689_v16, %v691_v21 }
  0xb8   : > { %1516 = vrot.lane.b32.xlu0 %v5519_v19, %s5436_s18  ;;  %1522 = vrot.lane.b32.xlu1 %v5513_v15, %s5436_s18  ;;  %v697_v22 = vsel %vm692_vm3, %v683_v2, %v685_v17  ;;  %v698_v23 = vsel %vm692_vm3, %v685_v17, %v687_v14  ;;  %v723_v32 = vsel %vm412_vm1, %v699_v24, 0  ;;  %v726_v33 = vsel %vm412_vm1, %v700_v28, 0  ;;  %v5168_v2 = vld [vmem:[%s7311_s3 + $0x3] sm:$0x1] }
  0xb9   : > { %1526 = vrot.lane.b32.xlu2 %v5521_v20, %s5436_s18  ;;  %v717_v29 = vsel %vm412_vm1, %v697_v22, 0  ;;  %v720_v30 = vsel %vm412_vm1, %v698_v23, 0  ;;  %v859_v50 = vpop.permute.xlu2 %858 }
  0xbc   : > { %5153 = vmatmul.msk.bf16.vlgmr.msra.gmra.mxu2 %vm408_vm2, %v350_v5  ;;  %5154 = vmatmul.msk.bf16.vlgmr.msra.gmra.mxu3 %vm408_vm2, %v350_v5 }
  0xbd   : > { %5151 = vmatmul.msk.bf16.vlgmr.msra.gmra.mxu0 %vm408_vm2, %v350_v5  ;;  %5152 = vmatmul.msk.bf16.vlgmr.msra.gmra.mxu1 %vm408_vm2, %v350_v5 }
  0xbe   : > { %748 = vmatpush.bf16.msra.mxu1 %v708_v8  ;;  %761 = vmatpush.bf16.msra.mxu2 %v711_v10  ;;  %v847_v31 = vpop.permute.xlu0 %846 }
  0xbf   : > { %774 = vmatpush.bf16.msra.mxu3 %v714_v12  ;;  %735 = vmatpush.bf16.msra.mxu0 %v705_v13  ;;  %v849_v34 = vpop.permute.xlu1 %848 }
  0xc0   : > { %1524 = vrot.lane.b32.xlu1 %v5531_v26, %s5436_s18  ;;  %1528 = vrot.lane.b32.xlu0 %v5529_v25, %s5436_s18  ;;  %v863_v38 = vsel %vm860_vm4, %v847_v31, %v849_v34 }
  0xc1   : > { %1530 = vrot.lane.b32.xlu2 %v5533_v27, %s5436_s18  ;;  %v879_v44 = vsel %vm412_vm1, %v863_v38, 0  ;;  %v1011_v61 = vpop.permute.xlu2 %1010 }
  0xc6   : > { %v845_v36 = vpop.permute.xlu0 %844 }
  0xc7   : > { %v851_v37 = vpop.permute.xlu1 %850  ;;  %v862_v39 = vsel %vm860_vm4, %v845_v36, %v847_v31  ;;  %v861_v42 = vsel %vm860_vm4, %v843_v35, %v845_v36 }
  0xc8   : > { %1686 = vrot.lane.b32.xlu0 %v5505_v9, %s5437_s24  ;;  %1688 = vrot.lane.b32.xlu1 %v5517_v18, %s5437_s24  ;;  %v864_v41 = vsel %vm860_vm4, %v849_v34, %v851_v37  ;;  %v876_v43 = vsel %vm412_vm1, %v862_v39, 0  ;;  %v873_v46 = vsel %vm412_vm1, %v861_v42, 0 }
  0xc9   : > { %1682 = vrot.lane.b32.xlu2 %v5507_v11, %s5437_s24  ;;  %v882_v45 = vsel %vm412_vm1, %v864_v41, 0  ;;  %v1023_v10 = vpop.permute.xlu2 %1022 }
  0xcc   : > { %5157 = vmatmul.msk.bf16.vlgmr.msrb.gmra.mxu2 %vm408_vm2, %v350_v5  ;;  %5158 = vmatmul.msk.bf16.vlgmr.msrb.gmra.mxu3 %vm408_vm2, %v350_v5 }
  0xcd   : > { %5155 = vmatmul.msk.bf16.vlgmr.msrb.gmra.mxu0 %vm408_vm2, %v350_v5  ;;  %5156 = vmatmul.msk.bf16.vlgmr.msrb.gmra.mxu1 %vm408_vm2, %v350_v5 }
  0xce   : > { %787 = vmatpush.bf16.msrb.mxu0 %v717_v29  ;;  %800 = vmatpush.bf16.msrb.mxu1 %v720_v30  ;;  %v857_v48 = vpop.permute.xlu0 %856 }
  0xcf   : > { %813 = vmatpush.bf16.msrb.mxu2 %v723_v32  ;;  %826 = vmatpush.bf16.msrb.mxu3 %v726_v33  ;;  %v853_v49 = vpop.permute.xlu1 %852  ;;  %v867_v53 = vsel %vm860_vm4, %v855_v47, %v857_v48  ;;  %v868_v54 = vsel %vm860_vm4, %v857_v48, %v859_v50 }
  0xd0   : > { %1684 = vrot.lane.b32.xlu0 %v5519_v19, %s5437_s24  ;;  %1690 = vrot.lane.b32.xlu1 %v5513_v15, %s5437_s24  ;;  %v865_v51 = vsel %vm860_vm4, %v851_v37, %v853_v49  ;;  %v866_v52 = vsel %vm860_vm4, %v853_v49, %v855_v47  ;;  %v891_v58 = vsel %vm412_vm1, %v867_v53, 0  ;;  %v894_v59 = vsel %vm412_vm1, %v868_v54, 0  ;;  %v5177_v37 = vld [vmem:[%s7311_s3 + $0x4] sm:$0x1] }
  0xd1   : > { %1694 = vrot.lane.b32.xlu2 %v5521_v20, %s5437_s24  ;;  %v885_v55 = vsel %vm412_vm1, %v865_v51, 0  ;;  %v888_v56 = vsel %vm412_vm1, %v866_v52, 0  ;;  %v1027_v14 = vpop.permute.xlu2 %1026 }
  0xd6   : > { %v1015_v57 = vpop.permute.xlu0 %1014 }
  0xd7   : > { %v1017_v60 = vpop.permute.xlu1 %1016 }
  0xd8   : > { %1692 = vrot.lane.b32.xlu1 %v5531_v26, %s5437_s24  ;;  %1696 = vrot.lane.b32.xlu0 %v5529_v25, %s5437_s24  ;;  %v1031_v0 = vsel %vm1028_vm5, %v1015_v57, %v1017_v60 }
  0xd9   : > { %1698 = vrot.lane.b32.xlu2 %v5533_v27, %s5437_s24  ;;  %v1047_v6 = vsel %vm412_vm1, %v1031_v0, 0  ;;  %v1179_v32 = vpop.permute.xlu2 %1178 }
  0xdc   : > { %5162 = vmatmul.msk.bf16.vlgmr.msra.gmra.mxu2 %vm408_vm2, %v5159_v40  ;;  %5163 = vmatmul.msk.bf16.vlgmr.msra.gmra.mxu3 %vm408_vm2, %v5159_v40 }
  0xdd   : > { %5160 = vmatmul.msk.bf16.vlgmr.msra.gmra.mxu0 %vm408_vm2, %v5159_v40  ;;  %5161 = vmatmul.msk.bf16.vlgmr.msra.gmra.mxu1 %vm408_vm2, %v5159_v40 }
  0xde   : > { %916 = vmatpush.bf16.msra.mxu1 %v876_v43  ;;  %929 = vmatpush.bf16.msra.mxu2 %v879_v44  ;;  %v1013_v62 = vpop.permute.xlu0 %1012 }
  0xdf   : > { %942 = vmatpush.bf16.msra.mxu3 %v882_v45  ;;  %903 = vmatpush.bf16.msra.mxu0 %v873_v46  ;;  %v1019_v63 = vpop.permute.xlu1 %1018  ;;  %v1030_v1 = vsel %vm1028_vm5, %v1013_v62, %v1015_v57  ;;  %v1029_v4 = vsel %vm1028_vm5, %v1011_v61, %v1013_v62 }
  0xe0   : > { %1854 = vrot.lane.b32.xlu0 %v5505_v9, %s5438_s27  ;;  %1856 = vrot.lane.b32.xlu1 %v5517_v18, %s5438_s27  ;;  %v1032_v3 = vsel %vm1028_vm5, %v1017_v60, %v1019_v63  ;;  %v1044_v5 = vsel %vm412_vm1, %v1030_v1, 0  ;;  %v1041_v8 = vsel %vm412_vm1, %v1029_v4, 0 }
  0xe1   : > { %1850 = vrot.lane.b32.xlu2 %v5507_v11, %s5438_s27  ;;  %v1050_v7 = vsel %vm412_vm1, %v1032_v3, 0  ;;  %v1191_v46 = vpop.permute.xlu2 %1190 }
  0xe6   : > { %v1025_v12 = vpop.permute.xlu0 %1024 }
  0xe7   : > { %v1021_v13 = vpop.permute.xlu1 %1020  ;;  %v1035_v21 = vsel %vm1028_vm5, %v1023_v10, %v1025_v12  ;;  %v1036_v22 = vsel %vm1028_vm5, %v1025_v12, %v1027_v14 }
  0xe8   : > { %1852 = vrot.lane.b32.xlu0 %v5519_v19, %s5438_s27  ;;  %1858 = vrot.lane.b32.xlu1 %v5513_v15, %s5438_s27  ;;  %v1033_v16 = vsel %vm1028_vm5, %v1019_v63, %v1021_v13  ;;  %v1034_v17 = vsel %vm1028_vm5, %v1021_v13, %v1023_v10  ;;  %v1059_v29 = vsel %vm412_vm1, %v1035_v21, 0  ;;  %v1062_v30 = vsel %vm412_vm1, %v1036_v22, 0  ;;  %v5186_v21 = vld [vmem:[%s7311_s3 + $0x5] sm:$0x1] }
  0xe9   : > { %1862 = vrot.lane.b32.xlu2 %v5521_v20, %s5438_s27  ;;  %v1053_v23 = vsel %vm412_vm1, %v1033_v16, 0  ;;  %v1056_v24 = vsel %vm412_vm1, %v1034_v17, 0  ;;  %v1195_v53 = vpop.permute.xlu2 %1194 }
  0xec   : > { %5166 = vmatmul.msk.bf16.vlgmr.msrb.gmra.mxu2 %vm408_vm2, %v5159_v40  ;;  %5167 = vmatmul.msk.bf16.vlgmr.msrb.gmra.mxu3 %vm408_vm2, %v5159_v40 }
  0xed   : > { %5164 = vmatmul.msk.bf16.vlgmr.msrb.gmra.mxu0 %vm408_vm2, %v5159_v40  ;;  %5165 = vmatmul.msk.bf16.vlgmr.msrb.gmra.mxu1 %vm408_vm2, %v5159_v40 }
  0xee   : > { %955 = vmatpush.bf16.msrb.mxu0 %v885_v55  ;;  %968 = vmatpush.bf16.msrb.mxu1 %v888_v56  ;;  %v1183_v28 = vpop.permute.xlu0 %1182 }
  0xef   : > { %981 = vmatpush.bf16.msrb.mxu2 %v891_v58  ;;  %994 = vmatpush.bf16.msrb.mxu3 %v894_v59  ;;  %v1185_v31 = vpop.permute.xlu1 %1184 }
  0xf0   : > { %1860 = vrot.lane.b32.xlu1 %v5531_v26, %s5438_s27  ;;  %1864 = vrot.lane.b32.xlu0 %v5529_v25, %s5438_s27  ;;  %v1199_v35 = vsel %vm1196_vm6, %v1183_v28, %v1185_v31 }
  0xf1   : > { %1866 = vrot.lane.b32.xlu2 %v5533_v27, %s5438_s27  ;;  %v1215_v43 = vsel %vm412_vm1, %v1199_v35, 0 }
  0xf6   : > { %v1181_v33 = vpop.permute.xlu0 %1180 }
  0xf7   : > { %v1187_v34 = vpop.permute.xlu1 %1186  ;;  %v1198_v36 = vsel %vm1196_vm6, %v1181_v33, %v1183_v28  ;;  %v1197_v39 = vsel %vm1196_vm6, %v1179_v32, %v1181_v33 }
  0xf8   : > { %2022 = vrot.lane.b32.xlu0 %v5505_v9, %s5439_s28  ;;  %2024 = vrot.lane.b32.xlu1 %v5517_v18, %s5439_s28  ;;  %v1200_v38 = vsel %vm1196_vm6, %v1185_v31, %v1187_v34  ;;  %v1212_v42 = vsel %vm412_vm1, %v1198_v36, 0  ;;  %v1209_v45 = vsel %vm412_vm1, %v1197_v39, 0 }
  0xf9   : > { %2018 = vrot.lane.b32.xlu2 %v5507_v11, %s5439_s28  ;;  %v1218_v44 = vsel %vm412_vm1, %v1200_v38, 0 }
  0xfc   : > { %5171 = vmatmul.msk.bf16.vlgmr.msra.gmra.mxu2 %vm408_vm2, %v5168_v2  ;;  %5172 = vmatmul.msk.bf16.vlgmr.msra.gmra.mxu3 %vm408_vm2, %v5168_v2 }
  0xfd   : > { %5169 = vmatmul.msk.bf16.vlgmr.msra.gmra.mxu0 %vm408_vm2, %v5168_v2  ;;  %5170 = vmatmul.msk.bf16.vlgmr.msra.gmra.mxu1 %vm408_vm2, %v5168_v2 }
  0xfe   : > { %1084 = vmatpush.bf16.msra.mxu1 %v1044_v5  ;;  %1097 = vmatpush.bf16.msra.mxu2 %v1047_v6  ;;  %v1193_v49 = vpop.permute.xlu0 %1192  ;;  %v1347_v6 = vpop.permute.xlu2 %1346 }
  0xff   : > { %1110 = vmatpush.bf16.msra.mxu3 %v1050_v7  ;;  %1071 = vmatpush.bf16.msra.mxu0 %v1041_v8  ;;  %v1189_v52 = vpop.permute.xlu1 %1188  ;;  %v1203_v58 = vsel %vm1196_vm6, %v1191_v46, %v1193_v49  ;;  %v1204_v59 = vsel %vm1196_vm6, %v1193_v49, %v1195_v53 }
 0x100   : > { %2020 = vrot.lane.b32.xlu0 %v5519_v19, %s5439_s28  ;;  %2026 = vrot.lane.b32.xlu1 %v5513_v15, %s5439_s28  ;;  %v1201_v56 = vsel %vm1196_vm6, %v1187_v34, %v1189_v52  ;;  %v1202_v57 = vsel %vm1196_vm6, %v1189_v52, %v1191_v46  ;;  %v1227_v1 = vsel %vm412_vm1, %v1203_v58, 0 }
 0x101   : > { %2030 = vrot.lane.b32.xlu2 %v5521_v20, %s5439_s28  ;;  %v1221_v62 = vsel %vm412_vm1, %v1201_v56, 0  ;;  %v1224_v63 = vsel %vm412_vm1, %v1202_v57, 0 }
 0x106   : > { %v1351_v0 = vpop.permute.xlu0 %1350  ;;  %v1359_v35 = vpop.permute.xlu2 %1358 }
 0x107   : > { %v1353_v3 = vpop.permute.xlu1 %1352 }
 0x108   : > { %2028 = vrot.lane.b32.xlu1 %v5531_v26, %s5439_s28  ;;  %2032 = vrot.lane.b32.xlu0 %v5529_v25, %s5439_s28  ;;  %v1367_v16 = vsel %vm1364_vm7, %v1351_v0, %v1353_v3 }
 0x109   : > { %2034 = vrot.lane.b32.xlu2 %v5533_v27, %s5439_s28  ;;  %v1383_v32 = vsel %vm412_vm1, %v1367_v16, 0  ;;  %s5444_s28 = smov 48  }
 0x10c   : > { %5175 = vmatmul.msk.bf16.vlgmr.msrb.gmra.mxu2 %vm408_vm2, %v5168_v2  ;;  %5176 = vmatmul.msk.bf16.vlgmr.msrb.gmra.mxu3 %vm408_vm2, %v5168_v2 }
 0x10d   : > { %5173 = vmatmul.msk.bf16.vlgmr.msrb.gmra.mxu0 %vm408_vm2, %v5168_v2  ;;  %5174 = vmatmul.msk.bf16.vlgmr.msrb.gmra.mxu1 %vm408_vm2, %v5168_v2  ;;  %v1230_v2 = vsel %vm412_vm1, %v1204_v59, 0 }
 0x10e   : > { %1123 = vmatpush.bf16.msrb.mxu0 %v1053_v23  ;;  %1136 = vmatpush.bf16.msrb.mxu1 %v1056_v24 }
 0x10f   : > { %1149 = vmatpush.bf16.msrb.mxu2 %v1059_v29  ;;  %1162 = vmatpush.bf16.msrb.mxu3 %v1062_v30 }
 0x110   : > { %2190 = vrot.lane.b32.xlu0 %v5505_v9, %s5440_s7  ;;  %2192 = vrot.lane.b32.xlu1 %v5517_v18, %s5440_s7  ;;  %v1349_v10 = vpop.permute.xlu0 %1348  ;;  %v1355_v12 = vpop.permute.xlu1 %1354 }
 0x111   : > { %2186 = vrot.lane.b32.xlu2 %v5507_v11, %s5440_s7  ;;  %v1366_v17 = vsel %vm1364_vm7, %v1349_v10, %v1351_v0  ;;  %v1368_v22 = vsel %vm1364_vm7, %v1353_v3, %v1355_v12  ;;  %v1365_v23 = vsel %vm1364_vm7, %v1347_v6, %v1349_v10 }
 0x112   : > { %v1380_v31 = vsel %vm412_vm1, %v1366_v17, 0  ;;  %v1386_v33 = vsel %vm412_vm1, %v1368_v22, 0  ;;  %v1377_v34 = vsel %vm412_vm1, %v1365_v23, 0 }
 0x118   : > { %2188 = vrot.lane.b32.xlu0 %v5519_v19, %s5440_s7  ;;  %2194 = vrot.lane.b32.xlu1 %v5513_v15, %s5440_s7 }
 0x119   : > { %2198 = vrot.lane.b32.xlu2 %v5521_v20, %s5440_s7 }
 0x11a   : > { %v5837_v40 = vpop.f32.mrf.mxu0  ;;  %v5839_v41 = vpop.f32.mrf.mxu1 }
 0x11c   : > { %5180 = vmatmul.msk.bf16.vlgmr.msra.gmra.mxu2 %vm408_vm2, %v5177_v37  ;;  %5181 = vmatmul.msk.bf16.vlgmr.msra.gmra.mxu3 %vm408_vm2, %v5177_v37 }
 0x11d   : > { %5178 = vmatmul.msk.bf16.vlgmr.msra.gmra.mxu0 %vm408_vm2, %v5177_v37  ;;  %5179 = vmatmul.msk.bf16.vlgmr.msra.gmra.mxu1 %vm408_vm2, %v5177_v37 }
 0x11e   : > { %1252 = vmatpush.bf16.msra.mxu1 %v1212_v42  ;;  %1265 = vmatpush.bf16.msra.mxu2 %v1215_v43  ;;  %v1357_v43 = vpop.permute.xlu1 %1356 }
 0x11f   : > { %v5849_v47 = vpop.f32.mrf.mxu2  ;;  %v5851_v48 = vpop.f32.mrf.mxu3  ;;  %1278 = vmatpush.bf16.msra.mxu3 %v1218_v44  ;;  %1239 = vmatpush.bf16.msra.mxu0 %v1209_v45 }
 0x120   : > { %2196 = vrot.lane.b32.xlu1 %v5531_v26, %s5440_s7  ;;  %2200 = vrot.lane.b32.xlu0 %v5529_v25, %s5440_s7  ;;  %v1363_v44 = vpop.permute.xlu2 %1362 }
 0x121   : > { %2202 = vrot.lane.b32.xlu2 %v5533_v27, %s5440_s7  ;;  %s5445_s7 = smov 47  }
 0x122   : > { %v448_v50 = vpop.f32.mrf.mxu0  ;;  %v461_v51 = vpop.f32.mrf.mxu1 }
 0x127   : > { %v474_v54 = vpop.f32.mrf.mxu2  ;;  %v487_v55 = vpop.f32.mrf.mxu3 }
 0x128   : > { %2358 = vrot.lane.b32.xlu0 %v5505_v9, %s5441_s16  ;;  %2360 = vrot.lane.b32.xlu1 %v5517_v18, %s5441_s16 }
 0x129   : > { %2354 = vrot.lane.b32.xlu2 %v5507_v11, %s5441_s16 }
 0x12a   : > { %v5869_v60 = vpop.f32.mrf.mxu0  ;;  %v5871_v61 = vpop.f32.mrf.mxu1 }
 0x12c   : > { %5184 = vmatmul.msk.bf16.vlgmr.msrb.gmra.mxu2 %vm408_vm2, %v5177_v37  ;;  %5185 = vmatmul.msk.bf16.vlgmr.msrb.gmra.mxu3 %vm408_vm2, %v5177_v37 }
 0x12d   : > { %5182 = vmatmul.msk.bf16.vlgmr.msrb.gmra.mxu0 %vm408_vm2, %v5177_v37  ;;  %5183 = vmatmul.msk.bf16.vlgmr.msrb.gmra.mxu1 %vm408_vm2, %v5177_v37 }
 0x12e   : > { %1291 = vmatpush.bf16.msrb.mxu0 %v1221_v62  ;;  %1304 = vmatpush.bf16.msrb.mxu1 %v1224_v63  ;;  %v1521_v62 = vpop.permute.xlu1 %1520 }
 0x12f   : > { %v5881_v4 = vpop.f32.mrf.mxu2  ;;  %v5883_v5 = vpop.f32.mrf.mxu3  ;;  %1317 = vmatpush.bf16.msrb.mxu2 %v1227_v1  ;;  %1330 = vmatpush.bf16.msrb.mxu3 %v1230_v2 }
 0x130   : > { %2356 = vrot.lane.b32.xlu0 %v5519_v19, %s5441_s16  ;;  %2362 = vrot.lane.b32.xlu1 %v5513_v15, %s5441_s16  ;;  %v1515_v1 = vpop.permute.xlu2 %1514 }
 0x131   : > { %2366 = vrot.lane.b32.xlu2 %v5521_v20, %s5441_s16 }
 0x132   : > { %v500_v7 = vpop.f32.mrf.mxu0  ;;  %v513_v8 = vpop.f32.mrf.mxu1 }
 0x136   : > { %v1523_v7 = vpop.permute.xlu1 %1522 }
 0x137   : > { %v526_v13 = vpop.f32.mrf.mxu2  ;;  %v539_v14 = vpop.f32.mrf.mxu3 }
 0x138   : > { %2364 = vrot.lane.b32.xlu1 %v5531_v26, %s5441_s16  ;;  %2368 = vrot.lane.b32.xlu0 %v5529_v25, %s5441_s16  ;;  %v1536_v13 = vsel %vm1532_vm8, %v1521_v62, %v1523_v7 }
 0x139   : > { %2370 = vrot.lane.b32.xlu2 %v5533_v27, %s5441_s16  ;;  %s5446_s16 = smov 46  }
 0x13a   : > { %v577_v24 = vpop.f32.mrf.mxu0  ;;  %v590_v28 = vpop.f32.mrf.mxu1 }
 0x13b   : > { %v5905_v29 = vadd.f32 %v577_v24, %v5837_v40  ;;  %v5908_v30 = vadd.f32 %v590_v28, %v5839_v41  ;;  %v1361_v40 = vpop.permute.xlu0 %1360  ;;  %v1554_v28 = vsel %vm412_vm1, %v1536_v13, 0 }
 0x13c   : > { %5189 = vmatmul.msk.bf16.vlgmr.msra.gmra.mxu2 %vm408_vm2, %v5186_v21  ;;  %5190 = vmatmul.msk.bf16.vlgmr.msra.gmra.mxu3 %vm408_vm2, %v5186_v21  ;;  %v1371_v49 = vsel %vm1364_vm7, %v1359_v35, %v1361_v40  ;;  %v1372_v50 = vsel %vm1364_vm7, %v1361_v40, %v1363_v44 }
 0x13d   : > { %5187 = vmatmul.msk.bf16.vlgmr.msra.gmra.mxu0 %vm408_vm2, %v5186_v21  ;;  %5188 = vmatmul.msk.bf16.vlgmr.msra.gmra.mxu1 %vm408_vm2, %v5186_v21  ;;  %v1395_v58 = vsel %vm412_vm1, %v1371_v49, 0  ;;  %v1398_v59 = vsel %vm412_vm1, %v1372_v50, 0 }
 0x13e   : > { %1420 = vmatpush.bf16.msra.mxu1 %v1380_v31  ;;  %1433 = vmatpush.bf16.msra.mxu2 %v1383_v32  ;;  %v1527_v32 = vpop.permute.xlu2 %1526  ;;  %v1525_v40 = vpop.permute.xlu1 %1524 }
 0x13f   : > { %v603_v36 = vpop.f32.mrf.mxu2  ;;  %v616_v37 = vpop.f32.mrf.mxu3  ;;  %1446 = vmatpush.bf16.msra.mxu3 %v1386_v33  ;;  %1407 = vmatpush.bf16.msra.mxu0 %v1377_v34 }
 0x140   : > { %v5919_v38 = vadd.f32 %v603_v36, %v5849_v47  ;;  %v5922_v39 = vadd.f32 %v616_v37, %v5851_v48  ;;  %2526 = vrot.lane.b32.xlu0 %v5505_v9, %s5442_s20  ;;  %2528 = vrot.lane.b32.xlu1 %v5517_v18, %s5442_s20  ;;  %v1369_v47 = vsel %vm1364_vm7, %v1355_v12, %v1357_v43  ;;  %v5195_v12 = vld [vmem:[%s7311_s3 + $0x6] sm:$0x1] }
 0x141   : > { %2522 = vrot.lane.b32.xlu2 %v5507_v11, %s5442_s20  ;;  %v1370_v48 = vsel %vm1364_vm7, %v1357_v43, %v1359_v35  ;;  %v1389_v55 = vsel %vm412_vm1, %v1369_v47, 0  ;;  %v1537_v43 = vsel %vm1532_vm8, %v1523_v7, %v1525_v40  ;;  %v5204_v7 = vld [vmem:[%s7311_s3 + $0x7] sm:$0x1] }
 0x142   : > { %v579_v41 = vpop.f32.mrf.mxu0  ;;  %v592_v42 = vpop.f32.mrf.mxu1  ;;  %v1392_v56 = vsel %vm412_vm1, %v1370_v48, 0  ;;  %v1557_v50 = vsel %vm412_vm1, %v1537_v43, 0 }
 0x143   : > { %v1519_v57 = vpop.permute.xlu0 %1518 }
 0x146   : > { %v1531_v41 = vpop.permute.xlu2 %1530 }
 0x147   : > { %v605_v45 = vpop.f32.mrf.mxu2  ;;  %v618_v46 = vpop.f32.mrf.mxu3 }
 0x148   : > { %2524 = vrot.lane.b32.xlu0 %v5519_v19, %s5442_s20  ;;  %2530 = vrot.lane.b32.xlu1 %v5513_v15, %s5442_s20 }
 0x149   : > { %2534 = vrot.lane.b32.xlu2 %v5521_v20, %s5442_s20 }
 0x14a   : > { %v629_v51 = vpop.f32.mrf.mxu0  ;;  %v642_v52 = vpop.f32.mrf.mxu1 }
 0x14b   : > { %v5941_v53 = vadd.f32 %v629_v51, %v5869_v60  ;;  %v5944_v54 = vadd.f32 %v642_v52, %v5871_v61  ;;  %v1517_v6 = vpop.permute.xlu0 %1516 }
 0x14c   : > { %5193 = vmatmul.msk.bf16.vlgmr.msrb.gmra.mxu2 %vm408_vm2, %v5186_v21  ;;  %5194 = vmatmul.msk.bf16.vlgmr.msrb.gmra.mxu3 %vm408_vm2, %v5186_v21  ;;  %v1534_v10 = vsel %vm1532_vm8, %v1517_v6, %v1519_v57  ;;  %v1533_v14 = vsel %vm1532_vm8, %v1515_v1, %v1517_v6 }
 0x14d   : > { %5191 = vmatmul.msk.bf16.vlgmr.msrb.gmra.mxu0 %vm408_vm2, %v5186_v21  ;;  %5192 = vmatmul.msk.bf16.vlgmr.msrb.gmra.mxu1 %vm408_vm2, %v5186_v21  ;;  %v1548_v23 = vsel %vm412_vm1, %v1534_v10, 0  ;;  %v1545_v31 = vsel %vm412_vm1, %v1533_v14, 0 }
 0x14e   : > { %1459 = vmatpush.bf16.msrb.mxu0 %v1389_v55  ;;  %1472 = vmatpush.bf16.msrb.mxu1 %v1392_v56 }
 0x14f   : > { %v655_v60 = vpop.f32.mrf.mxu2  ;;  %v668_v61 = vpop.f32.mrf.mxu3  ;;  %1485 = vmatpush.bf16.msrb.mxu2 %v1395_v58  ;;  %1498 = vmatpush.bf16.msrb.mxu3 %v1398_v59 }
 0x150   : > { %v5955_v63 = vadd.f32 %v655_v60, %v5881_v4  ;;  %v5958_v0 = vadd.f32 %v668_v61, %v5883_v5  ;;  %2532 = vrot.lane.b32.xlu1 %v5531_v26, %s5442_s20  ;;  %2536 = vrot.lane.b32.xlu0 %v5529_v25, %s5442_s20  ;;  %v1535_v5 = vsel %vm1532_vm8, %v1519_v57, %v1521_v62  ;;  %v1689_v57 = vpop.permute.xlu1 %1688  ;;  %v1683_v62 = vpop.permute.xlu2 %1682 }
 0x151   : > { %2538 = vrot.lane.b32.xlu2 %v5533_v27, %s5442_s20  ;;  %v1551_v24 = vsel %vm412_vm1, %v1535_v5, 0 }
 0x152   : > { %v631_v2 = vpop.f32.mrf.mxu0  ;;  %v644_v3 = vpop.f32.mrf.mxu1 }
 0x153   : > { %v1529_v35 = vpop.permute.xlu0 %1528 }
 0x154   : > { %v1539_v44 = vsel %vm1532_vm8, %v1527_v32, %v1529_v35  ;;  %v1540_v45 = vsel %vm1532_vm8, %v1529_v35, %v1531_v41 }
 0x155   : > { %v1563_v55 = vsel %vm412_vm1, %v1539_v44, 0  ;;  %v1566_v56 = vsel %vm412_vm1, %v1540_v45, 0 }
 0x157   : > { %v657_v4 = vpop.f32.mrf.mxu2  ;;  %v670_v8 = vpop.f32.mrf.mxu3 }
 0x158   : > { %2694 = vrot.lane.b32.xlu0 %v5505_v9, %s5443_s25  ;;  %2696 = vrot.lane.b32.xlu1 %v5517_v18, %s5443_s25 }
 0x159   : > { %2690 = vrot.lane.b32.xlu2 %v5507_v11, %s5443_s25 }
 0x15a   : > { %v737_v16 = vpop.f32.mrf.mxu0  ;;  %v750_v17 = vpop.f32.mrf.mxu1 }
 0x15b   : > { %v5980_v21 = vadd.f32 %v737_v16, %v5905_v29  ;;  %v5983_v22 = vadd.f32 %v750_v17, %v5908_v30  ;;  %v1687_v52 = vpop.permute.xlu0 %1686 }
 0x15c   : > { %5198 = vmatmul.msk.bf16.vlgmr.msra.gmra.mxu2 %vm408_vm2, %v5195_v12  ;;  %5199 = vmatmul.msk.bf16.vlgmr.msra.gmra.mxu3 %vm408_vm2, %v5195_v12 }
 0x15d   : > { %5196 = vmatmul.msk.bf16.vlgmr.msra.gmra.mxu0 %vm408_vm2, %v5195_v12  ;;  %5197 = vmatmul.msk.bf16.vlgmr.msra.gmra.mxu1 %vm408_vm2, %v5195_v12 }
 0x15e   : > { %1588 = vmatpush.bf16.msra.mxu1 %v1548_v23  ;;  %1601 = vmatpush.bf16.msra.mxu2 %v1551_v24  ;;  %v1695_v24 = vpop.permute.xlu2 %1694 }
 0x15f   : > { %v763_v29 = vpop.f32.mrf.mxu2  ;;  %v776_v30 = vpop.f32.mrf.mxu3  ;;  %1614 = vmatpush.bf16.msra.mxu3 %v1554_v28  ;;  %1575 = vmatpush.bf16.msra.mxu0 %v1545_v31 }
 0x160   : > { %v5994_v33 = vadd.f32 %v763_v29, %v5919_v38  ;;  %v5997_v34 = vadd.f32 %v776_v30, %v5922_v39  ;;  %2692 = vrot.lane.b32.xlu0 %v5519_v19, %s5443_s25  ;;  %2698 = vrot.lane.b32.xlu1 %v5513_v15, %s5443_s25  ;;  %v1538_v39 = vsel %vm1532_vm8, %v1525_v40, %v1527_v32 }
 0x161   : > { %2702 = vrot.lane.b32.xlu2 %v5521_v20, %s5443_s25  ;;  %v1560_v51 = vsel %vm412_vm1, %v1538_v39, 0 }
 0x162   : > { %v739_v36 = vpop.f32.mrf.mxu0  ;;  %v752_v37 = vpop.f32.mrf.mxu1 }
 0x163   : > { %v1685_v1 = vpop.permute.xlu0 %1684 }
 0x164   : > { %v1702_v6 = vsel %vm1700_vm9, %v1685_v1, %v1687_v52  ;;  %v1701_v8 = vsel %vm1700_vm9, %v1683_v62, %v1685_v1 }
 0x165   : > { %v1716_v14 = vsel %vm412_vm1, %v1702_v6, 0  ;;  %v1713_v23 = vsel %vm412_vm1, %v1701_v8, 0 }
 0x166   : > { %v1699_v36 = vpop.permute.xlu2 %1698 }
 0x167   : > { %v765_v42 = vpop.f32.mrf.mxu2  ;;  %v778_v38 = vpop.f32.mrf.mxu3 }
 0x168   : > { %2700 = vrot.lane.b32.xlu1 %v5531_v26, %s5443_s25  ;;  %2704 = vrot.lane.b32.xlu0 %v5529_v25, %s5443_s25 }
 0x169   : > { %2706 = vrot.lane.b32.xlu2 %v5533_v27, %s5443_s25 }
 0x16a   : > { %v789_v46 = vpop.f32.mrf.mxu0  ;;  %v802_v47 = vpop.f32.mrf.mxu1 }
 0x16b   : > { %v6016_v48 = vadd.f32 %v789_v46, %v5941_v53  ;;  %v6019_v49 = vadd.f32 %v802_v47, %v5944_v54  ;;  %v1697_v32 = vpop.permute.xlu0 %1696 }
 0x16c   : > { %5202 = vmatmul.msk.bf16.vlgmr.msrb.gmra.mxu2 %vm408_vm2, %v5195_v12  ;;  %5203 = vmatmul.msk.bf16.vlgmr.msrb.gmra.mxu3 %vm408_vm2, %v5195_v12  ;;  %v1707_v41 = vsel %vm1700_vm9, %v1695_v24, %v1697_v32  ;;  %v1708_v42 = vsel %vm1700_vm9, %v1697_v32, %v1699_v36 }
 0x16d   : > { %5200 = vmatmul.msk.bf16.vlgmr.msrb.gmra.mxu0 %vm408_vm2, %v5195_v12  ;;  %5201 = vmatmul.msk.bf16.vlgmr.msrb.gmra.mxu1 %vm408_vm2, %v5195_v12 }
 0x16e   : > { %1627 = vmatpush.bf16.msrb.mxu0 %v1557_v50  ;;  %1640 = vmatpush.bf16.msrb.mxu1 %v1560_v51  ;;  %v1731_v50 = vsel %vm412_vm1, %v1707_v41, 0  ;;  %v1734_v51 = vsel %vm412_vm1, %v1708_v42, 0 }
 0x16f   : > { %v815_v53 = vpop.f32.mrf.mxu2  ;;  %v828_v54 = vpop.f32.mrf.mxu3  ;;  %1653 = vmatpush.bf16.msrb.mxu2 %v1563_v55  ;;  %1666 = vmatpush.bf16.msrb.mxu3 %v1566_v56 }
 0x170   : > { %v6030_v58 = vadd.f32 %v815_v53, %v5955_v63  ;;  %v6033_v59 = vadd.f32 %v828_v54, %v5958_v0  ;;  %2862 = vrot.lane.b32.xlu0 %v5505_v9, %s5444_s28  ;;  %2864 = vrot.lane.b32.xlu1 %v5517_v18, %s5444_s28  ;;  %v1691_v63 = vpop.permute.xlu1 %1690  ;;  %v1703_v0 = vsel %vm1700_vm9, %v1687_v52, %v1689_v57 }
 0x171   : > { %2858 = vrot.lane.b32.xlu2 %v5507_v11, %s5444_s28  ;;  %v1704_v4 = vsel %vm1700_vm9, %v1689_v57, %v1691_v63  ;;  %v1719_v16 = vsel %vm412_vm1, %v1703_v0, 0  ;;  %v1851_v57 = vpop.permute.xlu2 %1850 }
 0x172   : > { %v791_v60 = vpop.f32.mrf.mxu0  ;;  %v804_v61 = vpop.f32.mrf.mxu1  ;;  %v1722_v17 = vsel %vm412_vm1, %v1704_v4, 0 }
 0x173   : > { %v1855_v47 = vpop.permute.xlu0 %1854 }
 0x177   : > { %v817_v2 = vpop.f32.mrf.mxu2  ;;  %v830_v3 = vpop.f32.mrf.mxu3 }
 0x178   : > { %2860 = vrot.lane.b32.xlu0 %v5519_v19, %s5444_s28  ;;  %2866 = vrot.lane.b32.xlu1 %v5513_v15, %s5444_s28  ;;  %v1693_v35 = vpop.permute.xlu1 %1692 }
 0x179   : > { %2870 = vrot.lane.b32.xlu2 %v5521_v20, %s5444_s28  ;;  %v1705_v40 = vsel %vm1700_vm9, %v1691_v63, %v1693_v35  ;;  %v5213_v63 = vld [vmem:[%s7311_s3 + $0x8] sm:$0x1] }
 0x17a   : > { %v905_v5 = vpop.f32.mrf.mxu0  ;;  %v918_v10 = vpop.f32.mrf.mxu1  ;;  %v1725_v45 = vsel %vm412_vm1, %v1705_v40, 0 }
 0x17b   : > { %v6055_v12 = vadd.f32 %v905_v5, %v5980_v21  ;;  %v6058_v13 = vadd.f32 %v918_v10, %v5983_v22  ;;  %v1853_v62 = vpop.permute.xlu0 %1852 }
 0x17c   : > { %5207 = vmatmul.msk.bf16.vlgmr.msra.gmra.mxu2 %vm408_vm2, %v5204_v7  ;;  %5208 = vmatmul.msk.bf16.vlgmr.msra.gmra.mxu3 %vm408_vm2, %v5204_v7  ;;  %v1870_v1 = vsel %vm1868_vm10, %v1853_v62, %v1855_v47  ;;  %v1869_v3 = vsel %vm1868_vm10, %v1851_v57, %v1853_v62 }
 0x17d   : > { %5205 = vmatmul.msk.bf16.vlgmr.msra.gmra.mxu0 %vm408_vm2, %v5204_v7  ;;  %5206 = vmatmul.msk.bf16.vlgmr.msra.gmra.mxu1 %vm408_vm2, %v5204_v7  ;;  %v1884_v8 = vsel %vm412_vm1, %v1870_v1, 0 }
 0x17e   : > { %1756 = vmatpush.bf16.msra.mxu1 %v1716_v14  ;;  %1769 = vmatpush.bf16.msra.mxu2 %v1719_v16  ;;  %v1881_v14 = vsel %vm412_vm1, %v1869_v3, 0  ;;  %v1863_v16 = vpop.permute.xlu2 %1862 }
 0x17f   : > { %v931_v21 = vpop.f32.mrf.mxu2  ;;  %v944_v22 = vpop.f32.mrf.mxu3  ;;  %1782 = vmatpush.bf16.msra.mxu3 %v1722_v17  ;;  %1743 = vmatpush.bf16.msra.mxu0 %v1713_v23 }
 0x180   : > { %v6069_v28 = vadd.f32 %v931_v21, %v5994_v33  ;;  %v6072_v31 = vadd.f32 %v944_v22, %v5997_v34  ;;  %2868 = vrot.lane.b32.xlu1 %v5531_v26, %s5444_s28  ;;  %2872 = vrot.lane.b32.xlu0 %v5529_v25, %s5444_s28  ;;  %v1706_v34 = vsel %vm1700_vm9, %v1693_v35, %v1695_v24  ;;  %v1857_v52 = vpop.permute.xlu1 %1856 }
 0x181   : > { %2874 = vrot.lane.b32.xlu2 %v5533_v27, %s5444_s28  ;;  %v1728_v46 = vsel %vm412_vm1, %v1706_v34, 0 }
 0x182   : > { %v907_v29 = vpop.f32.mrf.mxu0  ;;  %v920_v30 = vpop.f32.mrf.mxu1 }
 0x183   : > { %v1865_v24 = vpop.permute.xlu0 %1864 }
 0x184   : > { %v1875_v36 = vsel %vm1868_vm10, %v1863_v16, %v1865_v24 }
 0x186   : > { %v1867_v29 = vpop.permute.xlu2 %1866 }
 0x187   : > { %v933_v37 = vpop.f32.mrf.mxu2  ;;  %v946_v33 = vpop.f32.mrf.mxu3 }
 0x188   : > { %3030 = vrot.lane.b32.xlu0 %v5505_v9, %s5445_s7  ;;  %3032 = vrot.lane.b32.xlu1 %v5517_v18, %s5445_s7  ;;  %v1876_v37 = vsel %vm1868_vm10, %v1865_v24, %v1867_v29 }
 0x189   : > { %3026 = vrot.lane.b32.xlu2 %v5507_v11, %s5445_s7 }
 0x18a   : > { %v957_v38 = vpop.f32.mrf.mxu0  ;;  %v970_v43 = vpop.f32.mrf.mxu1 }
 0x18b   : > { %v6085_v39 = vadd.f32 %v957_v38, %v6016_v48  ;;  %v6088_v44 = vadd.f32 %v970_v43, %v6019_v49  ;;  %v2023_v43 = vpop.permute.xlu0 %2022 }
 0x18c   : > { %5211 = vmatmul.msk.bf16.vlgmr.msrb.gmra.mxu2 %vm408_vm2, %v5204_v7  ;;  %5212 = vmatmul.msk.bf16.vlgmr.msrb.gmra.mxu3 %vm408_vm2, %v5204_v7 }
 0x18d   : > { %5209 = vmatmul.msk.bf16.vlgmr.msrb.gmra.mxu0 %vm408_vm2, %v5204_v7  ;;  %5210 = vmatmul.msk.bf16.vlgmr.msrb.gmra.mxu1 %vm408_vm2, %v5204_v7 }
 0x18e   : > { %1795 = vmatpush.bf16.msrb.mxu0 %v1725_v45  ;;  %1808 = vmatpush.bf16.msrb.mxu1 %v1728_v46  ;;  %v1899_v45 = vsel %vm412_vm1, %v1875_v36, 0  ;;  %v1902_v46 = vsel %vm412_vm1, %v1876_v37, 0 }
 0x18f   : > { %v983_v48 = vpop.f32.mrf.mxu2  ;;  %v996_v49 = vpop.f32.mrf.mxu3  ;;  %1821 = vmatpush.bf16.msrb.mxu2 %v1731_v50  ;;  %1834 = vmatpush.bf16.msrb.mxu3 %v1734_v51 }
 0x190   : > { %v6099_v55 = vadd.f32 %v983_v48, %v6030_v58  ;;  %v6102_v56 = vadd.f32 %v996_v49, %v6033_v59  ;;  %v1859_v58 = vpop.permute.xlu1 %1858  ;;  %v1871_v59 = vsel %vm1868_vm10, %v1855_v47, %v1857_v52  ;;  %3028 = vrot.lane.b32.xlu0 %v5519_v19, %s5445_s7  ;;  %3034 = vrot.lane.b32.xlu1 %v5513_v15, %s5445_s7 }
 0x191   : > { %v1872_v2 = vsel %vm1868_vm10, %v1857_v52, %v1859_v58  ;;  %3038 = vrot.lane.b32.xlu2 %v5521_v20, %s5445_s7  ;;  %v1887_v5 = vsel %vm412_vm1, %v1871_v59, 0  ;;  %v2019_v52 = vpop.permute.xlu2 %2018 }
 0x192   : > { %v959_v53 = vpop.f32.mrf.mxu0  ;;  %v972_v54 = vpop.f32.mrf.mxu1  ;;  %v1890_v10 = vsel %vm412_vm1, %v1872_v2, 0 }
 0x193   : > { %v2021_v57 = vpop.permute.xlu0 %2020 }
 0x194   : > { %v2038_v62 = vsel %vm2036_vm11, %v2021_v57, %v2023_v43 }
 0x195   : > { %v2052_v59 = vsel %vm412_vm1, %v2038_v62, 0 }
 0x197   : > { %v985_v60 = vpop.f32.mrf.mxu2  ;;  %v998_v61 = vpop.f32.mrf.mxu3 }
 0x198   : > { %3036 = vrot.lane.b32.xlu1 %v5531_v26, %s5445_s7  ;;  %3040 = vrot.lane.b32.xlu0 %v5529_v25, %s5445_s7  ;;  %v1861_v32 = vpop.permute.xlu1 %1860 }
 0x199   : > { %3042 = vrot.lane.b32.xlu2 %v5533_v27, %s5445_s7  ;;  %v1873_v35 = vsel %vm1868_vm10, %v1859_v58, %v1861_v32 }
 0x19a   : > { %v1073_v0 = vpop.f32.mrf.mxu0  ;;  %v1086_v6 = vpop.f32.mrf.mxu1  ;;  %v1893_v42 = vsel %vm412_vm1, %v1873_v35, 0 }
 0x19b   : > { %v6124_v7 = vadd.f32 %v1073_v0, %v6055_v12  ;;  %v6127_v4 = vadd.f32 %v1086_v6, %v6058_v13 }
 0x19c   : > { %5216 = vmatmul.msk.bf16.vlgmr.msra.gmra.mxu2 %vm408_vm2, %v5213_v63  ;;  %5217 = vmatmul.msk.bf16.vlgmr.msra.gmra.mxu3 %vm408_vm2, %v5213_v63 }
 0x19d   : > { %5214 = vmatmul.msk.bf16.vlgmr.msra.gmra.mxu0 %vm408_vm2, %v5213_v63  ;;  %5215 = vmatmul.msk.bf16.vlgmr.msra.gmra.mxu1 %vm408_vm2, %v5213_v63 }
 0x19e   : > { %1924 = vmatpush.bf16.msra.mxu1 %v1884_v8  ;;  %1937 = vmatpush.bf16.msra.mxu2 %v1887_v5 }
 0x19f   : > { %v1099_v12 = vpop.f32.mrf.mxu2  ;;  %v1112_v13 = vpop.f32.mrf.mxu3  ;;  %1950 = vmatpush.bf16.msra.mxu3 %v1890_v10  ;;  %1911 = vmatpush.bf16.msra.mxu0 %v1881_v14 }
 0x1a0   : > { %v6138_v17 = vadd.f32 %v1099_v12, %v6069_v28  ;;  %v6141_v23 = vadd.f32 %v1112_v13, %v6072_v31  ;;  %v1874_v31 = vsel %vm1868_vm10, %v1861_v32, %v1863_v16  ;;  %v2025_v47 = vpop.permute.xlu1 %2024  ;;  %3198 = vrot.lane.b32.xlu0 %v5505_v9, %s5446_s16  ;;  %3200 = vrot.lane.b32.xlu1 %v5517_v18, %s5446_s16  ;;  %v5222_v9 = vld [vmem:[%s7311_s3 + $0x9] sm:$0x1]  ;;  %vm2876_vm10 = vcmask 392192  }
 0x1a1   : > { %v1896_v38 = vsel %vm412_vm1, %v1874_v31, 0  ;;  %3194 = vrot.lane.b32.xlu2 %v5507_v11, %s5446_s16  ;;  %v2037_v18 = vsel %vm2036_vm11, %v2019_v52, %v2021_v57 }
 0x1a2   : > { %v1075_v21 = vpop.f32.mrf.mxu0  ;;  %v1088_v22 = vpop.f32.mrf.mxu1 }
 0x1a7   : > { %v1101_v30 = vpop.f32.mrf.mxu2  ;;  %v1114_v28 = vpop.f32.mrf.mxu3 }
 0x1a8   : > { %3196 = vrot.lane.b32.xlu0 %v5519_v19, %s5446_s16  ;;  %3202 = vrot.lane.b32.xlu1 %v5513_v15, %s5446_s16 }
 0x1a9   : > { %3206 = vrot.lane.b32.xlu2 %v5521_v20, %s5446_s16  ;;  %v2049_v20 = vsel %vm412_vm1, %v2037_v18, 0 }
 0x1aa   : > { %v1125_v33 = vpop.f32.mrf.mxu0  ;;  %v1138_v40 = vpop.f32.mrf.mxu1 }
 0x1ab   : > { %v6154_v34 = vadd.f32 %v1125_v33, %v6085_v39  ;;  %v6157_v41 = vadd.f32 %v1138_v40, %v6088_v44 }
 0x1ac   : > { %5220 = vmatmul.msk.bf16.vlgmr.msrb.gmra.mxu2 %vm408_vm2, %v5213_v63  ;;  %5221 = vmatmul.msk.bf16.vlgmr.msrb.gmra.mxu3 %vm408_vm2, %v5213_v63 }
 0x1ad   : > { %5218 = vmatmul.msk.bf16.vlgmr.msrb.gmra.mxu0 %vm408_vm2, %v5213_v63  ;;  %5219 = vmatmul.msk.bf16.vlgmr.msrb.gmra.mxu1 %vm408_vm2, %v5213_v63  ;;  %v2031_v63 = vpop.permute.xlu2 %2030 }
 0x1ae   : > { %1963 = vmatpush.bf16.msrb.mxu0 %v1893_v42  ;;  %1976 = vmatpush.bf16.msrb.mxu1 %v1896_v38 }
 0x1af   : > { %v1151_v39 = vpop.f32.mrf.mxu2  ;;  %v1164_v44 = vpop.f32.mrf.mxu3  ;;  %1989 = vmatpush.bf16.msrb.mxu2 %v1899_v45  ;;  %2002 = vmatpush.bf16.msrb.mxu3 %v1902_v46 }
 0x1b0   : > { %v6168_v50 = vadd.f32 %v1151_v39, %v6099_v55  ;;  %v6171_v51 = vadd.f32 %v1164_v44, %v6102_v56  ;;  %v2027_v55 = vpop.permute.xlu1 %2026  ;;  %v2039_v56 = vsel %vm2036_vm11, %v2023_v43, %v2025_v47  ;;  %3204 = vrot.lane.b32.xlu1 %v5531_v26, %s5446_s16  ;;  %3208 = vrot.lane.b32.xlu0 %v5529_v25, %s5446_s16 }
 0x1b1   : > { %v2040_v11 = vsel %vm2036_vm11, %v2025_v47, %v2027_v55  ;;  %v2055_v15 = vsel %vm412_vm1, %v2039_v56, 0  ;;  %3210 = vrot.lane.b32.xlu2 %v5533_v27, %s5446_s16  ;;  %v5231_v47 = vld [vmem:[%s7311_s3 + $0xa] sm:$0x1] }
 0x1b2   : > { %v1127_v48 = vpop.f32.mrf.mxu0  ;;  %v1140_v49 = vpop.f32.mrf.mxu1  ;;  %v2058_v1 = vsel %vm412_vm1, %v2040_v11, 0 }
 0x1b5   : > { %v2035_v10 = vpop.permute.xlu2 %2034 }
 0x1b7   : > { %v1153_v53 = vpop.f32.mrf.mxu2  ;;  %v1166_v54 = vpop.f32.mrf.mxu3 }
 0x1b8   : > { %v2029_v5 = vpop.permute.xlu1 %2028 }
 0x1b9   : > { %v2041_v12 = vsel %vm2036_vm11, %v2027_v55, %v2029_v5  ;;  %v2042_v13 = vsel %vm2036_vm11, %v2029_v5, %v2031_v63 }
 0x1ba   : > { %v1241_v58 = vpop.f32.mrf.mxu0  ;;  %v1254_v60 = vpop.f32.mrf.mxu1  ;;  %v2061_v21 = vsel %vm412_vm1, %v2041_v12, 0  ;;  %v2064_v22 = vsel %vm412_vm1, %v2042_v13, 0 }
 0x1bb   : > { %v6193_v61 = vadd.f32 %v1241_v58, %v6124_v7  ;;  %v6196_v19 = vadd.f32 %v1254_v60, %v6127_v4  ;;  %v2033_v7 = vpop.permute.xlu0 %2032 }
 0x1bc   : > { %5225 = vmatmul.msk.bf16.vlgmr.msra.gmra.mxu2 %vm408_vm2, %v5222_v9  ;;  %5226 = vmatmul.msk.bf16.vlgmr.msra.gmra.mxu3 %vm408_vm2, %v5222_v9  ;;  %v2044_v26 = vsel %vm2036_vm11, %v2033_v7, %v2035_v10 }
 0x1bd   : > { %5223 = vmatmul.msk.bf16.vlgmr.msra.gmra.mxu0 %vm408_vm2, %v5222_v9  ;;  %5224 = vmatmul.msk.bf16.vlgmr.msra.gmra.mxu1 %vm408_vm2, %v5222_v9  ;;  %v2070_v30 = vsel %vm412_vm1, %v2044_v26, 0  ;;  %v2187_v33 = vpop.permute.xlu2 %2186 }
 0x1be   : > { %2092 = vmatpush.bf16.msra.mxu1 %v2052_v59  ;;  %2105 = vmatpush.bf16.msra.mxu2 %v2055_v15 }
 0x1bf   : > { %v1267_v2 = vpop.f32.mrf.mxu2  ;;  %v1280_v3 = vpop.f32.mrf.mxu3  ;;  %2118 = vmatpush.bf16.msra.mxu3 %v2058_v1  ;;  %2079 = vmatpush.bf16.msra.mxu0 %v2049_v20 }
 0x1c0   : > { %v6207_v0 = vadd.f32 %v1267_v2, %v6138_v17  ;;  %v6210_v6 = vadd.f32 %v1280_v3, %v6141_v23  ;;  %v2043_v17 = vsel %vm2036_vm11, %v2031_v63, %v2033_v7  ;;  %v2193_v28 = vpop.permute.xlu1 %2192  ;;  %vm3044_vm11 = vcmask 384000  }
 0x1c1   : > { %v2067_v29 = vsel %vm412_vm1, %v2043_v17, 0 }
 0x1c2   : > { %v1243_v4 = vpop.f32.mrf.mxu0  ;;  %v1256_v8 = vpop.f32.mrf.mxu1 }
 0x1c3   : > { %v2191_v32 = vpop.permute.xlu0 %2190 }
 0x1c4   : > { %v2207_v45 = vsel %vm2204_vm12, %v2191_v32, %v2193_v28 }
 0x1c5   : > { %v2223_v49 = vsel %vm412_vm1, %v2207_v45, 0  ;;  %v2199_v54 = vpop.permute.xlu2 %2198 }
 0x1c7   : > { %v1269_v14 = vpop.f32.mrf.mxu2  ;;  %v1282_v16 = vpop.f32.mrf.mxu3 }
 0x1c8   : > { %v2195_v42 = vpop.permute.xlu1 %2194 }
 0x1c9   : > { %v2208_v39 = vsel %vm2204_vm12, %v2193_v28, %v2195_v42  ;;  %v5240_v28 = vld [vmem:[%s7311_s3 + $0xb] sm:$0x1] }
 0x1ca   : > { %v1293_v23 = vpop.f32.mrf.mxu0  ;;  %v1306_v25 = vpop.f32.mrf.mxu1  ;;  %v2226_v55 = vsel %vm412_vm1, %v2208_v39, 0 }
 0x1cb   : > { %v6223_v24 = vadd.f32 %v1293_v23, %v6154_v34  ;;  %v6226_v27 = vadd.f32 %v1306_v25, %v6157_v41  ;;  %v2189_v41 = vpop.permute.xlu0 %2188 }
 0x1cc   : > { %5229 = vmatmul.msk.bf16.vlgmr.msrb.gmra.mxu2 %vm408_vm2, %v5222_v9  ;;  %5230 = vmatmul.msk.bf16.vlgmr.msrb.gmra.mxu3 %vm408_vm2, %v5222_v9  ;;  %v2206_v46 = vsel %vm2204_vm12, %v2189_v41, %v2191_v32  ;;  %v2205_v44 = vsel %vm2204_vm12, %v2187_v33, %v2189_v41 }
 0x1cd   : > { %5227 = vmatmul.msk.bf16.vlgmr.msrb.gmra.mxu0 %vm408_vm2, %v5222_v9  ;;  %5228 = vmatmul.msk.bf16.vlgmr.msrb.gmra.mxu1 %vm408_vm2, %v5222_v9  ;;  %v2220_v57 = vsel %vm412_vm1, %v2206_v46, 0  ;;  %v2217_v53 = vsel %vm412_vm1, %v2205_v44, 0 }
 0x1ce   : > { %2131 = vmatpush.bf16.msrb.mxu0 %v2061_v21  ;;  %2144 = vmatpush.bf16.msrb.mxu1 %v2064_v22 }
 0x1cf   : > { %v1319_v35 = vpop.f32.mrf.mxu2  ;;  %v1332_v31 = vpop.f32.mrf.mxu3  ;;  %2157 = vmatpush.bf16.msrb.mxu2 %v2067_v29  ;;  %2170 = vmatpush.bf16.msrb.mxu3 %v2070_v30 }
 0x1d0   : > { %v6237_v36 = vadd.f32 %v1319_v35, %v6168_v50  ;;  %v6240_v37 = vadd.f32 %v1332_v31, %v6171_v51 }
 0x1d2   : > { %v1295_v40 = vpop.f32.mrf.mxu0  ;;  %v1308_v34 = vpop.f32.mrf.mxu1 }
 0x1d3   : > { %v2201_v18 = vpop.permute.xlu0 %2200 }
 0x1d4   : > { %v2211_v63 = vsel %vm2204_vm12, %v2199_v54, %v2201_v18 }
 0x1d5   : > { %v2235_v10 = vsel %vm412_vm1, %v2211_v63, 0 }
 0x1d7   : > { %v1321_v38 = vpop.f32.mrf.mxu2  ;;  %v1334_v43 = vpop.f32.mrf.mxu3 }
 0x1da   : > { %v1409_v50 = vpop.f32.mrf.mxu0  ;;  %v1422_v51 = vpop.f32.mrf.mxu1 }
 0x1db   : > { %v6250_v52 = vadd.f32 %v1409_v50, %v6193_v61  ;;  %v6253_v48 = vadd.f32 %v1422_v51, %v6196_v19  ;;  %v2197_v61 = vpop.permute.xlu1 %2196  ;;  %v2203_v19 = vpop.permute.xlu2 %2202 }
 0x1dc   : > { %5234 = vmatmul.msk.bf16.vlgmr.msra.gmra.mxu2 %vm408_vm2, %v5231_v47  ;;  %5235 = vmatmul.msk.bf16.vlgmr.msra.gmra.mxu3 %vm408_vm2, %v5231_v47  ;;  %v2209_v1 = vsel %vm2204_vm12, %v2195_v42, %v2197_v61  ;;  %v2210_v20 = vsel %vm2204_vm12, %v2197_v61, %v2199_v54  ;;  %v2212_v2 = vsel %vm2204_vm12, %v2201_v18, %v2203_v19  ;;  %v2359_v5 = vpop.permute.xlu0 %2358  ;;  %vm3212_vm12 = vcmask 375808  }
 0x1dd   : > { %5232 = vmatmul.msk.bf16.vlgmr.msra.gmra.mxu0 %vm408_vm2, %v5231_v47  ;;  %5233 = vmatmul.msk.bf16.vlgmr.msra.gmra.mxu1 %vm408_vm2, %v5231_v47  ;;  %v2229_v4 = vsel %vm412_vm1, %v2209_v1, 0  ;;  %v2232_v8 = vsel %vm412_vm1, %v2210_v20, 0  ;;  %v2238_v14 = vsel %vm412_vm1, %v2212_v2, 0 }
 0x1de   : > { %2260 = vmatpush.bf16.msra.mxu1 %v2220_v57  ;;  %2273 = vmatpush.bf16.msra.mxu2 %v2223_v49 }
 0x1df   : > { %v1435_v56 = vpop.f32.mrf.mxu2  ;;  %v1448_v62 = vpop.f32.mrf.mxu3  ;;  %2286 = vmatpush.bf16.msra.mxu3 %v2226_v55  ;;  %2247 = vmatpush.bf16.msra.mxu0 %v2217_v53 }
 0x1e0   : > { %v6264_v9 = vadd.f32 %v1435_v56, %v6207_v0  ;;  %v6267_v11 = vadd.f32 %v1448_v62, %v6210_v6 }
 0x1e2   : > { %v1411_v58 = vpop.f32.mrf.mxu0  ;;  %v1424_v60 = vpop.f32.mrf.mxu1 }
 0x1e3   : > { %v2361_v16 = vpop.permute.xlu1 %2360  ;;  %v2355_v23 = vpop.permute.xlu2 %2354 }
 0x1e4   : > { %v2375_v29 = vsel %vm2372_vm13, %v2359_v5, %v2361_v16 }
 0x1e5   : > { %v2391_v34 = vsel %vm412_vm1, %v2375_v29, 0 }
 0x1e7   : > { %v1437_v15 = vpop.f32.mrf.mxu2  ;;  %v1450_v59 = vpop.f32.mrf.mxu3 }
 0x1ea   : > { %v1461_v3 = vpop.f32.mrf.mxu0  ;;  %v1474_v0 = vpop.f32.mrf.mxu1 }
 0x1eb   : > { %v6274_v6 = vadd.f32 %v1461_v3, %v6223_v24  ;;  %v6277_v7 = vadd.f32 %v1474_v0, %v6226_v27  ;;  %v2357_v27 = vpop.permute.xlu0 %2356  ;;  %v2363_v21 = vpop.permute.xlu1 %2362 }
 0x1ec   : > { %5238 = vmatmul.msk.bf16.vlgmr.msrb.gmra.mxu2 %vm408_vm2, %v5231_v47  ;;  %5239 = vmatmul.msk.bf16.vlgmr.msrb.gmra.mxu3 %vm408_vm2, %v5231_v47  ;;  %v2374_v30 = vsel %vm2372_vm13, %v2357_v27, %v2359_v5  ;;  %v2376_v35 = vsel %vm2372_vm13, %v2361_v16, %v2363_v21  ;;  %v2373_v31 = vsel %vm2372_vm13, %v2355_v23, %v2357_v27  ;;  %v2367_v43 = vpop.permute.xlu2 %2366  ;;  %v5249_v16 = vld [vmem:[%s7311_s3 + $0xc] sm:$0x1] }
 0x1ed   : > { %5236 = vmatmul.msk.bf16.vlgmr.msrb.gmra.mxu0 %vm408_vm2, %v5231_v47  ;;  %5237 = vmatmul.msk.bf16.vlgmr.msrb.gmra.mxu1 %vm408_vm2, %v5231_v47  ;;  %v2388_v41 = vsel %vm412_vm1, %v2374_v30, 0  ;;  %v2394_v42 = vsel %vm412_vm1, %v2376_v35, 0  ;;  %v2385_v38 = vsel %vm412_vm1, %v2373_v31, 0 }
 0x1ee   : > { %2299 = vmatpush.bf16.msrb.mxu0 %v2229_v4  ;;  %2312 = vmatpush.bf16.msrb.mxu1 %v2232_v8 }
 0x1ef   : > { %v1487_v12 = vpop.f32.mrf.mxu2  ;;  %v1500_v13 = vpop.f32.mrf.mxu3  ;;  %2325 = vmatpush.bf16.msrb.mxu2 %v2235_v10  ;;  %2338 = vmatpush.bf16.msrb.mxu3 %v2238_v14 }
 0x1f0   : > { %v6288_v17 = vadd.f32 %v1487_v12, %v6237_v36  ;;  %v6291_v26 = vadd.f32 %v1500_v13, %v6240_v37 }
 0x1f2   : > { %v1463_v25 = vpop.f32.mrf.mxu0  ;;  %v1476_v24 = vpop.f32.mrf.mxu1 }
 0x1f3   : > { %v2369_v44 = vpop.permute.xlu0 %2368 }
 0x1f4   : > { %v2379_v54 = vsel %vm2372_vm13, %v2367_v43, %v2369_v44 }
 0x1f5   : > { %v2403_v19 = vsel %vm412_vm1, %v2379_v54, 0 }
 0x1f7   : > { %v1489_v22 = vpop.f32.mrf.mxu2  ;;  %v1502_v32 = vpop.f32.mrf.mxu3 }
 0x1fa   : > { %v1577_v36 = vpop.f32.mrf.mxu0  ;;  %v1590_v37 = vpop.f32.mrf.mxu1 }
 0x1fb   : > { %v6301_v33 = vadd.f32 %v1577_v36, %v6250_v52  ;;  %v6304_v40 = vadd.f32 %v1590_v37, %v6253_v48  ;;  %v2365_v52 = vpop.permute.xlu1 %2364  ;;  %v2371_v48 = vpop.permute.xlu2 %2370 }
 0x1fc   : > { %5243 = vmatmul.msk.bf16.vlgmr.msra.gmra.mxu2 %vm408_vm2, %v5240_v28  ;;  %5244 = vmatmul.msk.bf16.vlgmr.msra.gmra.mxu3 %vm408_vm2, %v5240_v28  ;;  %v2377_v55 = vsel %vm2372_vm13, %v2363_v21, %v2365_v52  ;;  %v2378_v53 = vsel %vm2372_vm13, %v2365_v52, %v2367_v43  ;;  %v2380_v56 = vsel %vm2372_vm13, %v2369_v44, %v2371_v48  ;;  %v2527_v61 = vpop.permute.xlu0 %2526 }
 0x1fd   : > { %5241 = vmatmul.msk.bf16.vlgmr.msra.gmra.mxu0 %vm408_vm2, %v5240_v28  ;;  %5242 = vmatmul.msk.bf16.vlgmr.msra.gmra.mxu1 %vm408_vm2, %v5240_v28  ;;  %v2397_v58 = vsel %vm412_vm1, %v2377_v55, 0  ;;  %v2400_v60 = vsel %vm412_vm1, %v2378_v53, 0  ;;  %v2406_v15 = vsel %vm412_vm1, %v2380_v56, 0 }
 0x1fe   : > { %2428 = vmatpush.bf16.msra.mxu1 %v2388_v41  ;;  %2441 = vmatpush.bf16.msra.mxu2 %v2391_v34 }
 0x1ff   : > { %v1603_v45 = vpop.f32.mrf.mxu2  ;;  %v1616_v46 = vpop.f32.mrf.mxu3  ;;  %2454 = vmatpush.bf16.msra.mxu3 %v2394_v42  ;;  %2415 = vmatpush.bf16.msra.mxu0 %v2385_v38 }
 0x200   : > { %v6315_v47 = vadd.f32 %v1603_v45, %v6264_v9  ;;  %v6318_v39 = vadd.f32 %v1616_v46, %v6267_v11 }
 0x202   : > { %v1579_v50 = vpop.f32.mrf.mxu0  ;;  %v1592_v51 = vpop.f32.mrf.mxu1 }
 0x203   : > { %v2529_v59 = vpop.permute.xlu1 %2528  ;;  %v2523_v3 = vpop.permute.xlu2 %2522 }
 0x204   : > { %v2543_v10 = vsel %vm2540_vm14, %v2527_v61, %v2529_v59 }
 0x205   : > { %v2559_v24 = vsel %vm412_vm1, %v2543_v10, 0 }
 0x207   : > { %v1605_v49 = vpop.f32.mrf.mxu2  ;;  %v1618_v57 = vpop.f32.mrf.mxu3 }
 0x20a   : > { %v1629_v62 = vpop.f32.mrf.mxu0  ;;  %v1642_v9 = vpop.f32.mrf.mxu1 }
 0x20b   : > { %v6325_v11 = vadd.f32 %v1629_v62, %v6274_v6  ;;  %v6328_v18 = vadd.f32 %v1642_v9, %v6277_v7  ;;  %v2525_v7 = vpop.permute.xlu0 %2524  ;;  %v2531_v4 = vpop.permute.xlu1 %2530 }
 0x20c   : > { %5247 = vmatmul.msk.bf16.vlgmr.msrb.gmra.mxu2 %vm408_vm2, %v5240_v28  ;;  %5248 = vmatmul.msk.bf16.vlgmr.msrb.gmra.mxu3 %vm408_vm2, %v5240_v28  ;;  %v2542_v14 = vsel %vm2540_vm14, %v2525_v7, %v2527_v61  ;;  %v2544_v12 = vsel %vm2540_vm14, %v2529_v59, %v2531_v4  ;;  %v2541_v13 = vsel %vm2540_vm14, %v2523_v3, %v2525_v7  ;;  %v2535_v32 = vpop.permute.xlu2 %2534  ;;  %v5258_v59 = vld [vmem:[%s7311_s3 + $0xd] sm:$0x1] }
 0x20d   : > { %5245 = vmatmul.msk.bf16.vlgmr.msrb.gmra.mxu0 %vm408_vm2, %v5240_v28  ;;  %5246 = vmatmul.msk.bf16.vlgmr.msrb.gmra.mxu1 %vm408_vm2, %v5240_v28  ;;  %v2556_v27 = vsel %vm412_vm1, %v2542_v14, 0  ;;  %v2562_v21 = vsel %vm412_vm1, %v2544_v12, 0  ;;  %v2553_v22 = vsel %vm412_vm1, %v2541_v13, 0 }
 0x20e   : > { %2467 = vmatpush.bf16.msrb.mxu0 %v2397_v58  ;;  %2480 = vmatpush.bf16.msrb.mxu1 %v2400_v60 }
 0x20f   : > { %v1655_v1 = vpop.f32.mrf.mxu2  ;;  %v1668_v20 = vpop.f32.mrf.mxu3  ;;  %2493 = vmatpush.bf16.msrb.mxu2 %v2403_v19  ;;  %2506 = vmatpush.bf16.msrb.mxu3 %v2406_v15 }
 0x210   : > { %v6339_v63 = vadd.f32 %v1655_v1, %v6288_v17  ;;  %v6342_v2 = vadd.f32 %v1668_v20, %v6291_v26 }
 0x212   : > { %v1631_v0 = vpop.f32.mrf.mxu0  ;;  %v1644_v6 = vpop.f32.mrf.mxu1 }
 0x213   : > { %v2537_v31 = vpop.permute.xlu0 %2536 }
 0x214   : > { %v2547_v43 = vsel %vm2540_vm14, %v2535_v32, %v2537_v31 }
 0x215   : > { %v2571_v48 = vsel %vm412_vm1, %v2547_v43, 0 }
 0x217   : > { %v1657_v8 = vpop.f32.mrf.mxu2  ;;  %v1670_v5 = vpop.f32.mrf.mxu3 }
 0x21a   : > { %v1745_v17 = vpop.f32.mrf.mxu0  ;;  %v1758_v26 = vpop.f32.mrf.mxu1 }
 0x21b   : > { %v6352_v23 = vadd.f32 %v1745_v17, %v6301_v33  ;;  %v6355_v25 = vadd.f32 %v1758_v26, %v6304_v40  ;;  %v2533_v33 = vpop.permute.xlu1 %2532  ;;  %v2539_v40 = vpop.permute.xlu2 %2538 }
 0x21c   : > { %5252 = vmatmul.msk.bf16.vlgmr.msra.gmra.mxu2 %vm408_vm2, %v5249_v16  ;;  %5253 = vmatmul.msk.bf16.vlgmr.msra.gmra.mxu3 %vm408_vm2, %v5249_v16  ;;  %v2545_v42 = vsel %vm2540_vm14, %v2531_v4, %v2533_v33  ;;  %v2546_v38 = vsel %vm2540_vm14, %v2533_v33, %v2535_v32  ;;  %v2548_v45 = vsel %vm2540_vm14, %v2537_v31, %v2539_v40  ;;  %v2695_v52 = vpop.permute.xlu0 %2694 }
 0x21d   : > { %5250 = vmatmul.msk.bf16.vlgmr.msra.gmra.mxu0 %vm408_vm2, %v5249_v16  ;;  %5251 = vmatmul.msk.bf16.vlgmr.msra.gmra.mxu1 %vm408_vm2, %v5249_v16  ;;  %v2565_v50 = vsel %vm412_vm1, %v2545_v42, 0  ;;  %v2568_v51 = vsel %vm412_vm1, %v2546_v38, 0  ;;  %v2574_v49 = vsel %vm412_vm1, %v2548_v45, 0  ;;  %v3528_v42 = vld [vmem:[#allocation2 + $0xc] sm:$0x77] }
 0x21e   : > { %2596 = vmatpush.bf16.msra.mxu1 %v2556_v27  ;;  %2609 = vmatpush.bf16.msra.mxu2 %v2559_v24  ;;  %v3539_v38 = vunpack.c.l.b16 %v3528_v42  ;;  %v3540_v43 = vunpack.c.h.b16 %v3528_v42 }
 0x21f   : > { %v1771_v29 = vpop.f32.mrf.mxu2  ;;  %v1784_v30 = vpop.f32.mrf.mxu3  ;;  %2622 = vmatpush.bf16.msra.mxu3 %v2562_v21  ;;  %2583 = vmatpush.bf16.msra.mxu0 %v2553_v22 }
 0x220   : > { %v6366_v28 = vadd.f32 %v1771_v29, %v6315_v47  ;;  %v6369_v35 = vadd.f32 %v1784_v30, %v6318_v39 }
 0x222   : > { %v1747_v36 = vpop.f32.mrf.mxu0  ;;  %v1760_v37 = vpop.f32.mrf.mxu1 }
 0x223   : > { %v2697_v57 = vpop.permute.xlu1 %2696  ;;  %v2691_v62 = vpop.permute.xlu2 %2690 }
 0x224   : > { %v2711_v19 = vsel %vm2708_vm15, %v2695_v52, %v2697_v57 }
 0x225   : > { %v2727_v6 = vsel %vm412_vm1, %v2711_v19, 0 }
 0x227   : > { %v1773_v34 = vpop.f32.mrf.mxu2  ;;  %v1786_v41 = vpop.f32.mrf.mxu3 }
 0x22a   : > { %v1797_v46 = vpop.f32.mrf.mxu0  ;;  %v1810_v47 = vpop.f32.mrf.mxu1 }
 0x22b   : > { %v6376_v39 = vadd.f32 %v1797_v46, %v6325_v11  ;;  %v6379_v44 = vadd.f32 %v1810_v47, %v6328_v18  ;;  %v2693_v18 = vpop.permute.xlu0 %2692  ;;  %v2699_v58 = vpop.permute.xlu1 %2698 }
 0x22c   : > { %5256 = vmatmul.msk.bf16.vlgmr.msrb.gmra.mxu2 %vm408_vm2, %v5249_v16  ;;  %5257 = vmatmul.msk.bf16.vlgmr.msrb.gmra.mxu3 %vm408_vm2, %v5249_v16  ;;  %v2710_v15 = vsel %vm2708_vm15, %v2693_v18, %v2695_v52  ;;  %v2712_v1 = vsel %vm2708_vm15, %v2697_v57, %v2699_v58  ;;  %v2709_v20 = vsel %vm2708_vm15, %v2691_v62, %v2693_v18  ;;  %v2703_v5 = vpop.permute.xlu2 %2702  ;;  %v3529_v57 = vld [vmem:[#allocation2 + $0x14] sm:$0x77] }
 0x22d   : > { %5254 = vmatmul.msk.bf16.vlgmr.msrb.gmra.mxu0 %vm408_vm2, %v5249_v16  ;;  %5255 = vmatmul.msk.bf16.vlgmr.msrb.gmra.mxu1 %vm408_vm2, %v5249_v16  ;;  %v2724_v7 = vsel %vm412_vm1, %v2710_v15, 0  ;;  %v2730_v4 = vsel %vm412_vm1, %v2712_v1, 0  ;;  %v2721_v8 = vsel %vm412_vm1, %v2709_v20, 0 }
 0x22e   : > { %2635 = vmatpush.bf16.msrb.mxu0 %v2565_v50  ;;  %2648 = vmatpush.bf16.msrb.mxu1 %v2568_v51  ;;  %v6448_v50 = vpack.c.b16 %v3540_v43, %v3540_v43 }
 0x22f   : > { %v1823_v55 = vpop.f32.mrf.mxu2  ;;  %v1836_v53 = vpop.f32.mrf.mxu3  ;;  %2661 = vmatpush.bf16.msrb.mxu2 %v2571_v48  ;;  %2674 = vmatpush.bf16.msrb.mxu3 %v2574_v49  ;;  %v6454_v49 = vld [vmem:[#allocation2 + $0x4] sm:$0x77] }
 0x230   : > { %v6390_v54 = vadd.f32 %v1823_v55, %v6339_v63  ;;  %v6393_v56 = vadd.f32 %v1836_v53, %v6342_v2  ;;  %3561 = vrot.lane.b32.xlu1 %v6448_v50, %s5430_s10  ;;  %v3538_v55 = vunpack.c.h.b16 %v6454_v49  ;;  %v3541_v53 = vunpack.c.l.b16 %v3529_v57 }
 0x232   : > { %v1799_v9 = vpop.f32.mrf.mxu0  ;;  %v1812_v11 = vpop.f32.mrf.mxu1  ;;  %v6457_v62 = vpack.c.b16 %v3538_v55, %v3538_v55  ;;  %v3537_v55 = vunpack.c.l.b16 %v6454_v49  ;;  %v5276_v49 = vld [vmem:[%s7311_s3 + $0xf] sm:$0x1] }
 0x233   : > { %v2705_v13 = vpop.permute.xlu0 %2704  ;;  %v6459_v9 = vpack.c.b16 %v3541_v53, %v3541_v53 }
 0x234   : > { %v2715_v32 = vsel %vm2708_vm15, %v2703_v5, %v2705_v13  ;;  %v6534_v53 = vpack.c.b16 %v3537_v55, %v3537_v55 }
 0x235   : > { %v2739_v40 = vsel %vm412_vm1, %v2715_v32, 0 }
 0x236   : > { %3555 = vrot.lane.b32.xlu2 %v6534_v53, %s5430_s10 }
 0x237   : > { %v1825_v60 = vpop.f32.mrf.mxu2  ;;  %v1838_v61 = vpop.f32.mrf.mxu3 }
 0x238   : > { %v5267_v61 = vld [vmem:[%s7311_s3 + $0xe] sm:$0x1]  ;;  %3563 = vrot.lane.b32.xlu1 %v6459_v9, %s5430_s10 }
 0x23a   : > { %v1913_v63 = vpop.f32.mrf.mxu0  ;;  %v1926_v2 = vpop.f32.mrf.mxu1 }
 0x23b   : > { %v6403_v3 = vadd.f32 %v1913_v63, %v6352_v23  ;;  %v6406_v0 = vadd.f32 %v1926_v2, %v6355_v25  ;;  %v2701_v23 = vpop.permute.xlu1 %2700  ;;  %v2707_v25 = vpop.permute.xlu2 %2706 }
 0x23c   : > { %5261 = vmatmul.msk.bf16.vlgmr.msra.gmra.mxu2 %vm408_vm2, %v5258_v59  ;;  %5262 = vmatmul.msk.bf16.vlgmr.msra.gmra.mxu3 %vm408_vm2, %v5258_v59  ;;  %v2713_v21 = vsel %vm2708_vm15, %v2699_v58, %v2701_v23  ;;  %v2714_v22 = vsel %vm2708_vm15, %v2701_v23, %v2703_v5  ;;  %v2716_v29 = vsel %vm2708_vm15, %v2705_v13, %v2707_v25  ;;  %v2863_v33 = vpop.permute.xlu0 %2862  ;;  %v6496_v25 = vld [vmem:[#allocation2 + $0x1c] sm:$0x77] }
 0x23d   : > { %5259 = vmatmul.msk.bf16.vlgmr.msra.gmra.mxu0 %vm408_vm2, %v5258_v59  ;;  %5260 = vmatmul.msk.bf16.vlgmr.msra.gmra.mxu1 %vm408_vm2, %v5258_v59  ;;  %v2733_v36 = vsel %vm412_vm1, %v2713_v21, 0  ;;  %v2736_v37 = vsel %vm412_vm1, %v2714_v22, 0  ;;  %v2742_v34 = vsel %vm412_vm1, %v2716_v29, 0 }
 0x23e   : > { %2764 = vmatpush.bf16.msra.mxu1 %v2724_v7  ;;  %2777 = vmatpush.bf16.msra.mxu2 %v2727_v6 }
 0x23f   : > { %v1939_v10 = vpop.f32.mrf.mxu2  ;;  %v1952_v14 = vpop.f32.mrf.mxu3  ;;  %2790 = vmatpush.bf16.msra.mxu3 %v2730_v4  ;;  %2751 = vmatpush.bf16.msra.mxu0 %v2721_v8 }
 0x240   : > { %v6417_v16 = vadd.f32 %v1939_v10, %v6366_v28  ;;  %v6420_v12 = vadd.f32 %v1952_v14, %v6369_v35 }
 0x242   : > { %v1915_v17 = vpop.f32.mrf.mxu0  ;;  %v1928_v26 = vpop.f32.mrf.mxu1 }
 0x243   : > { %v2865_v41 = vpop.permute.xlu1 %2864  ;;  %v2859_v51 = vpop.permute.xlu2 %2858 }
 0x244   : > { %v2879_v58 = vsel %vm2876_vm10, %v2863_v33, %v2865_v41 }
 0x245   : > { %v2895_v2 = vsel %vm412_vm1, %v2879_v58, 0 }
 0x247   : > { %v1941_v24 = vpop.f32.mrf.mxu2  ;;  %v1954_v27 = vpop.f32.mrf.mxu3 }
 0x248   : > { %v3544_v24 = vunpack.c.h.b16 %v6496_v25 }
 0x24a   : > { %v1965_v30 = vpop.f32.mrf.mxu0  ;;  %v1978_v28 = vpop.f32.mrf.mxu1  ;;  %v6499_v21 = vpack.c.b16 %v3544_v24, %v3544_v24 }
 0x24b   : > { %v6427_v35 = vadd.f32 %v1965_v30, %v6376_v39  ;;  %v6430_v31 = vadd.f32 %v1978_v28, %v6379_v44  ;;  %v6446_v44 = vpack.c.b16 %v3539_v38, %v3539_v38  ;;  %v2871_v8 = vpop.permute.xlu2 %2870 }
 0x24c   : > { %5265 = vmatmul.msk.bf16.vlgmr.msrb.gmra.mxu2 %vm408_vm2, %v5258_v59  ;;  %5266 = vmatmul.msk.bf16.vlgmr.msrb.gmra.mxu3 %vm408_vm2, %v5258_v59 }
 0x24d   : > { %5263 = vmatmul.msk.bf16.vlgmr.msrb.gmra.mxu0 %vm408_vm2, %v5258_v59  ;;  %5264 = vmatmul.msk.bf16.vlgmr.msrb.gmra.mxu1 %vm408_vm2, %v5258_v59 }
 0x24e   : > { %2803 = vmatpush.bf16.msrb.mxu0 %v2733_v36  ;;  %2816 = vmatpush.bf16.msrb.mxu1 %v2736_v37 }
 0x24f   : > { %v1991_v45 = vpop.f32.mrf.mxu2  ;;  %v2004_v46 = vpop.f32.mrf.mxu3  ;;  %2829 = vmatpush.bf16.msrb.mxu2 %v2739_v40  ;;  %2842 = vmatpush.bf16.msrb.mxu3 %v2742_v34 }
 0x250   : > { %v6441_v47 = vadd.f32 %v1991_v45, %v6390_v54  ;;  %v6444_v39 = vadd.f32 %v2004_v46, %v6393_v56  ;;  %3559 = vrot.lane.b32.xlu0 %v6446_v44, %s5430_s10  ;;  %v2861_v54 = vpop.permute.xlu0 %2860  ;;  %v2867_v56 = vpop.permute.xlu1 %2866 }
 0x251   : > { %v2878_v60 = vsel %vm2876_vm10, %v2861_v54, %v2863_v33  ;;  %v2880_v19 = vsel %vm2876_vm10, %v2865_v41, %v2867_v56  ;;  %v2877_v15 = vsel %vm2876_vm10, %v2859_v51, %v2861_v54 }
 0x252   : > { %v1967_v52 = vpop.f32.mrf.mxu0  ;;  %v1980_v48 = vpop.f32.mrf.mxu1  ;;  %v2892_v6 = vsel %vm412_vm1, %v2878_v60, 0  ;;  %v2898_v7 = vsel %vm412_vm1, %v2880_v19, 0  ;;  %v2889_v4 = vsel %vm412_vm1, %v2877_v15, 0 }
 0x253   : > { %v2875_v22 = vpop.permute.xlu2 %2874 }
 0x257   : > { %v1993_v11 = vpop.f32.mrf.mxu2  ;;  %v2006_v18 = vpop.f32.mrf.mxu3 }
 0x258   : > { %3557 = vrot.lane.b32.xlu0 %v6457_v62, %s5430_s10  ;;  %v2873_v17 = vpop.permute.xlu0 %2872  ;;  %v2869_v27 = vpop.permute.xlu1 %2868 }
 0x259   : > { %v2882_v29 = vsel %vm2876_vm10, %v2869_v27, %v2871_v8  ;;  %v2883_v30 = vsel %vm2876_vm10, %v2871_v8, %v2873_v17  ;;  %v2884_v28 = vsel %vm2876_vm10, %v2873_v17, %v2875_v22 }
 0x25a   : > { %v2081_v59 = vpop.f32.mrf.mxu0  ;;  %v2094_v1 = vpop.f32.mrf.mxu1  ;;  %v2904_v41 = vsel %vm412_vm1, %v2882_v29, 0  ;;  %v2907_v38 = vsel %vm412_vm1, %v2883_v30, 0  ;;  %v2910_v43 = vsel %vm412_vm1, %v2884_v28, 0 }
 0x25b   : > { %v6473_v20 = vadd.f32 %v2081_v59, %v6403_v3  ;;  %v6476_v63 = vadd.f32 %v2094_v1, %v6406_v0  ;;  %v3542_v3 = vunpack.c.h.b16 %v3529_v57  ;;  %v3027_v52 = vpop.permute.xlu2 %3026 }
 0x25c   : > { %5270 = vmatmul.msk.bf16.vlgmr.msra.gmra.mxu2 %vm408_vm2, %v5267_v61  ;;  %5271 = vmatmul.msk.bf16.vlgmr.msra.gmra.mxu3 %vm408_vm2, %v5267_v61 }
 0x25d   : > { %5268 = vmatmul.msk.bf16.vlgmr.msra.gmra.mxu0 %vm408_vm2, %v5267_v61  ;;  %5269 = vmatmul.msk.bf16.vlgmr.msra.gmra.mxu1 %vm408_vm2, %v5267_v61  ;;  %v6486_v10 = vpack.c.b16 %v3542_v3, %v3542_v3 }
 0x25e   : > { %2932 = vmatpush.bf16.msra.mxu1 %v2892_v6  ;;  %2945 = vmatpush.bf16.msra.mxu2 %v2895_v2  ;;  %v3543_v6 = vunpack.c.l.b16 %v6496_v25  ;;  %v3531_v25 = vld [vmem:[#allocation2 + $0x24] sm:$0x7] }
 0x25f   : > { %v2107_v0 = vpop.f32.mrf.mxu2  ;;  %v2120_v5 = vpop.f32.mrf.mxu3  ;;  %2958 = vmatpush.bf16.msra.mxu3 %v2898_v7  ;;  %2919 = vmatpush.bf16.msra.mxu0 %v2889_v4  ;;  %v3545_v24 = vunpack.c.l.b16 %v3531_v25 }
 0x260   : > { %v6489_v14 = vadd.f32 %v2107_v0, %v6417_v16  ;;  %v6492_v13 = vadd.f32 %v2120_v5, %v6420_v12  ;;  %3565 = vrot.lane.b32.xlu1 %v6486_v10, %s5430_s10  ;;  %3569 = vrot.lane.b32.xlu0 %v6499_v21, %s5430_s10  ;;  %v2881_v12 = vsel %vm2876_vm10, %v2867_v56, %v2869_v27  ;;  %v3031_v42 = vpop.permute.xlu0 %3030  ;;  %v3033_v45 = vpop.permute.xlu1 %3032 }
 0x261   : > { %v2901_v34 = vsel %vm412_vm1, %v2881_v12, 0  ;;  %v3047_v11 = vsel %vm3044_vm11, %v3031_v42, %v3033_v45 }
 0x262   : > { %v2083_v26 = vpop.f32.mrf.mxu0  ;;  %v2096_v23 = vpop.f32.mrf.mxu1  ;;  %v3063_v15 = vsel %vm412_vm1, %v3047_v11, 0  ;;  %v5285_v11 = vld [vmem:[%s7311_s3 + $0x10] sm:$0x1] }
 0x263   : > { %v3039_v8 = vpop.permute.xlu2 %3038 }
 0x267   : > { %v2109_v32 = vpop.f32.mrf.mxu2  ;;  %v2122_v16 = vpop.f32.mrf.mxu3 }
 0x268   : > { %3728 = vrot.lane.b32.xlu1 %v6448_v50, %s5431_s11  ;;  %3726 = vrot.lane.b32.xlu0 %v6446_v44, %s5431_s11  ;;  %v3029_v54 = vpop.permute.xlu0 %3028 }
 0x269   : > { %v3046_v18 = vsel %vm3044_vm11, %v3029_v54, %v3031_v42  ;;  %v3045_v60 = vsel %vm3044_vm11, %v3027_v52, %v3029_v54 }
 0x26a   : > { %v2133_v36 = vpop.f32.mrf.mxu0  ;;  %v2146_v37 = vpop.f32.mrf.mxu1  ;;  %v3060_v2 = vsel %vm412_vm1, %v3046_v18, 0  ;;  %v3057_v4 = vsel %vm412_vm1, %v3045_v60, 0 }
 0x26b   : > { %v6510_v33 = vadd.f32 %v2133_v36, %v6427_v35  ;;  %v6513_v40 = vadd.f32 %v2146_v37, %v6430_v31  ;;  %v3043_v22 = vpop.permute.xlu2 %3042 }
 0x26c   : > { %5274 = vmatmul.msk.bf16.vlgmr.msrb.gmra.mxu2 %vm408_vm2, %v5267_v61  ;;  %5275 = vmatmul.msk.bf16.vlgmr.msrb.gmra.mxu3 %vm408_vm2, %v5267_v61 }
 0x26d   : > { %5272 = vmatmul.msk.bf16.vlgmr.msrb.gmra.mxu0 %vm408_vm2, %v5267_v61  ;;  %5273 = vmatmul.msk.bf16.vlgmr.msrb.gmra.mxu1 %vm408_vm2, %v5267_v61 }
 0x26e   : > { %2971 = vmatpush.bf16.msrb.mxu0 %v2901_v34  ;;  %2984 = vmatpush.bf16.msrb.mxu1 %v2904_v41 }
 0x26f   : > { %v2159_v35 = vpop.f32.mrf.mxu2  ;;  %v2172_v31 = vpop.f32.mrf.mxu3  ;;  %2997 = vmatpush.bf16.msrb.mxu2 %v2907_v38  ;;  %3010 = vmatpush.bf16.msrb.mxu3 %v2910_v43 }
 0x270   : > { %v6524_v46 = vadd.f32 %v2159_v35, %v6441_v47  ;;  %v6527_v51 = vadd.f32 %v2172_v31, %v6444_v39  ;;  %3730 = vrot.lane.b32.xlu1 %v6459_v9, %s5431_s11  ;;  %v3035_v47 = vpop.permute.xlu1 %3034  ;;  %3724 = vrot.lane.b32.xlu0 %v6457_v62, %s5431_s11  ;;  %v3041_v17 = vpop.permute.xlu0 %3040 }
 0x271   : > { %v3048_v58 = vsel %vm3044_vm11, %v3033_v45, %v3035_v47  ;;  %v3051_v29 = vsel %vm3044_vm11, %v3039_v8, %v3041_v17  ;;  %v3052_v30 = vsel %vm3044_vm11, %v3041_v17, %v3043_v22 }
 0x272   : > { %v2135_v48 = vpop.f32.mrf.mxu0  ;;  %v2148_v57 = vpop.f32.mrf.mxu1  ;;  %v3066_v7 = vsel %vm412_vm1, %v3048_v58, 0  ;;  %v3075_v43 = vsel %vm412_vm1, %v3051_v29, 0  ;;  %v3078_v45 = vsel %vm412_vm1, %v3052_v30, 0 }
 0x273   : > { %v3195_v48 = vpop.permute.xlu2 %3194 }
 0x277   : > { %v2161_v39 = vpop.f32.mrf.mxu2  ;;  %v2174_v56 = vpop.f32.mrf.mxu3 }
 0x278   : > { %3732 = vrot.lane.b32.xlu1 %v6486_v10, %s5431_s11  ;;  %3736 = vrot.lane.b32.xlu0 %v6499_v21, %s5431_s11  ;;  %v3037_v27 = vpop.permute.xlu1 %3036  ;;  %v3199_v38 = vpop.permute.xlu0 %3198 }
 0x279   : > { %v3049_v16 = vsel %vm3044_vm11, %v3035_v47, %v3037_v27  ;;  %v3050_v12 = vsel %vm3044_vm11, %v3037_v27, %v3039_v8 }
 0x27a   : > { %v2249_v61 = vpop.f32.mrf.mxu0  ;;  %v2262_v19 = vpop.f32.mrf.mxu1  ;;  %v3069_v41 = vsel %vm412_vm1, %v3049_v16, 0  ;;  %v3072_v42 = vsel %vm412_vm1, %v3050_v12, 0 }
 0x27b   : > { %v6551_v59 = vadd.f32 %v2249_v61, %v6473_v20  ;;  %v6554_v1 = vadd.f32 %v2262_v19, %v6476_v63  ;;  %v6564_v20 = vpack.c.b16 %v3543_v6, %v3543_v6 }
 0x27c   : > { %5279 = vmatmul.msk.bf16.vlgmr.msra.gmra.mxu2 %vm408_vm2, %v5276_v49  ;;  %5280 = vmatmul.msk.bf16.vlgmr.msra.gmra.mxu3 %vm408_vm2, %v5276_v49 }
 0x27d   : > { %5277 = vmatmul.msk.bf16.vlgmr.msra.gmra.mxu0 %vm408_vm2, %v5276_v49  ;;  %5278 = vmatmul.msk.bf16.vlgmr.msra.gmra.mxu1 %vm408_vm2, %v5276_v49 }
 0x27e   : > { %3100 = vmatpush.bf16.msra.mxu1 %v3060_v2  ;;  %3113 = vmatpush.bf16.msra.mxu2 %v3063_v15 }
 0x27f   : > { %v2275_v63 = vpop.f32.mrf.mxu2  ;;  %v2288_v3 = vpop.f32.mrf.mxu3  ;;  %3126 = vmatpush.bf16.msra.mxu3 %v3066_v7  ;;  %3087 = vmatpush.bf16.msra.mxu0 %v3057_v4 }
 0x280   : > { %v6567_v0 = vadd.f32 %v2275_v63, %v6489_v14  ;;  %v6570_v5 = vadd.f32 %v2288_v3, %v6492_v13  ;;  %3567 = vrot.lane.b32.xlu2 %v6564_v20, %s5430_s10  ;;  %3895 = vrot.lane.b32.xlu1 %v6448_v50, %s5432_s12  ;;  %v6578_v14 = vpack.c.b16 %v3545_v24, %v3545_v24  ;;  %v3201_v35 = vpop.permute.xlu1 %3200  ;;  %v3197_v54 = vpop.permute.xlu0 %3196 }
 0x281   : > { %3893 = vrot.lane.b32.xlu0 %v6446_v44, %s5432_s12  ;;  %v3214_v56 = vsel %vm3212_vm12, %v3197_v54, %v3199_v38  ;;  %v3207_v4 = vpop.permute.xlu2 %3206 }
 0x282   : > { %v2251_v26 = vpop.f32.mrf.mxu0  ;;  %v2264_v23 = vpop.f32.mrf.mxu1  ;;  %v3228_v2 = vsel %vm412_vm1, %v3214_v56, 0 }
 0x287   : > { %v2277_v13 = vpop.f32.mrf.mxu2  ;;  %v2290_v32 = vpop.f32.mrf.mxu3 }
 0x288   : > { %3571 = vrot.lane.b32.xlu2 %v6578_v14, %s5430_s10  ;;  %3897 = vrot.lane.b32.xlu1 %v6459_v9, %s5432_s12  ;;  %v3203_v47 = vpop.permute.xlu1 %3202  ;;  %v3209_v23 = vpop.permute.xlu0 %3208 }
 0x289   : > { %3891 = vrot.lane.b32.xlu0 %v6457_v62, %s5432_s12  ;;  %v3216_v18 = vsel %vm3212_vm12, %v3201_v35, %v3203_v47  ;;  %v3211_v25 = vpop.permute.xlu2 %3210  ;;  %v3219_v22 = vsel %vm3212_vm12, %v3207_v4, %v3209_v23 }
 0x28a   : > { %v2301_v28 = vpop.f32.mrf.mxu0  ;;  %v2314_v36 = vpop.f32.mrf.mxu1  ;;  %v3234_v6 = vsel %vm412_vm1, %v3216_v18, 0  ;;  %v3220_v13 = vsel %vm3212_vm12, %v3209_v23, %v3211_v25 }
 0x28b   : > { %v6591_v37 = vadd.f32 %v2301_v28, %v6510_v33  ;;  %v6594_v34 = vadd.f32 %v2314_v36, %v6513_v40  ;;  %v3243_v36 = vsel %vm412_vm1, %v3219_v22, 0 }
 0x28c   : > { %5283 = vmatmul.msk.bf16.vlgmr.msrb.gmra.mxu2 %vm408_vm2, %v5276_v49  ;;  %5284 = vmatmul.msk.bf16.vlgmr.msrb.gmra.mxu3 %vm408_vm2, %v5276_v49 }
 0x28d   : > { %5281 = vmatmul.msk.bf16.vlgmr.msrb.gmra.mxu0 %vm408_vm2, %v5276_v49  ;;  %5282 = vmatmul.msk.bf16.vlgmr.msrb.gmra.mxu1 %vm408_vm2, %v5276_v49  ;;  %v3213_v49 = vsel %vm3212_vm12, %v3195_v48, %v3197_v54 }
 0x28e   : > { %3139 = vmatpush.bf16.msrb.mxu0 %v3069_v41  ;;  %3152 = vmatpush.bf16.msrb.mxu1 %v3072_v42  ;;  %v3225_v7 = vsel %vm412_vm1, %v3213_v49, 0  ;;  %v3246_v41 = vsel %vm412_vm1, %v3220_v13, 0 }
 0x28f   : > { %v2327_v33 = vpop.f32.mrf.mxu2  ;;  %v2340_v40 = vpop.f32.mrf.mxu3  ;;  %3165 = vmatpush.bf16.msrb.mxu2 %v3075_v43  ;;  %3178 = vmatpush.bf16.msrb.mxu3 %v3078_v45 }
 0x290   : > { %v6605_v31 = vadd.f32 %v2327_v33, %v6524_v46  ;;  %v6608_v52 = vadd.f32 %v2340_v40, %v6527_v51  ;;  %3722 = vrot.lane.b32.xlu2 %v6534_v53, %s5431_s11  ;;  %3899 = vrot.lane.b32.xlu1 %v6486_v10, %s5432_s12  ;;  %v3215_v51 = vsel %vm3212_vm12, %v3199_v38, %v3201_v35  ;;  %v3205_v26 = vpop.permute.xlu1 %3204  ;;  %v3363_v35 = vld [vmem:[#allocation2 + $0xc] sm:$0x77]  ;;  %v3362_v33 = vld [vmem:[#allocation2 + $0x4] sm:$0x77] }
 0x291   : > { %3903 = vrot.lane.b32.xlu0 %v6499_v21, %s5432_s12  ;;  %v3231_v15 = vsel %vm412_vm1, %v3215_v51, 0  ;;  %v3217_v27 = vsel %vm3212_vm12, %v3203_v47, %v3205_v26  ;;  %v3372_v40 = vunpack.c.l.b16 %v3363_v35  ;;  %v3370_v48 = vunpack.c.l.b16 %v3362_v33  ;;  %v5294_v51 = vld [vmem:[%s7311_s3 + $0x11] sm:$0x1] }
 0x292   : > { %v2303_v57 = vpop.f32.mrf.mxu0  ;;  %v2316_v55 = vpop.f32.mrf.mxu1  ;;  %v3237_v30 = vsel %vm412_vm1, %v3217_v27, 0 }
 0x293   : > { %v3371_v57 = vunpack.c.h.b16 %v3362_v33  ;;  %v3380_v54 = vpack.c.b16 %v3372_v40, %v3372_v40  ;;  %v3378_v47 = vpack.c.b16 %v3370_v48, %v3370_v48 }
 0x297   : > { %v2329_v46 = vpop.f32.mrf.mxu2  ;;  %v2342_v39 = vpop.f32.mrf.mxu3 }
 0x298   : > { %3734 = vrot.lane.b32.xlu2 %v6564_v20, %s5431_s11  ;;  %4062 = vrot.lane.b32.xlu1 %v6448_v50, %s5433_s13  ;;  %v3379_v39 = vpack.c.b16 %v3371_v57, %v3371_v57 }
 0x299   : > { %4060 = vrot.lane.b32.xlu0 %v6446_v44, %s5433_s13 }
 0x29a   : > { %v2417_v58 = vpop.f32.mrf.mxu0  ;;  %v2430_v60 = vpop.f32.mrf.mxu1 }
 0x29b   : > { %v6630_v61 = vadd.f32 %v2417_v58, %v6551_v59  ;;  %v6633_v19 = vadd.f32 %v2430_v60, %v6554_v1  ;;  %v3396_v58 = vsel %vm412_vm1, %v3380_v54, 0  ;;  %v3390_v60 = vsel %vm412_vm1, %v3378_v47, 0 }
 0x29c   : > { %5288 = vmatmul.msk.bf16.vlgmr.msra.gmra.mxu2 %vm408_vm2, %v5285_v11  ;;  %5289 = vmatmul.msk.bf16.vlgmr.msra.gmra.mxu3 %vm408_vm2, %v5285_v11 }
 0x29d   : > { %5286 = vmatmul.msk.bf16.vlgmr.msra.gmra.mxu0 %vm408_vm2, %v5285_v11  ;;  %5287 = vmatmul.msk.bf16.vlgmr.msra.gmra.mxu1 %vm408_vm2, %v5285_v11 }
 0x29e   : > { %3268 = vmatpush.bf16.msra.mxu1 %v3228_v2  ;;  %3281 = vmatpush.bf16.msra.mxu2 %v3231_v15  ;;  %v3393_v2 = vsel %vm412_vm1, %v3379_v39, 0 }
 0x29f   : > { %v2443_v59 = vpop.f32.mrf.mxu2  ;;  %v2456_v1 = vpop.f32.mrf.mxu3  ;;  %3294 = vmatpush.bf16.msra.mxu3 %v3234_v6  ;;  %3255 = vmatpush.bf16.msra.mxu0 %v3225_v7 }
 0x2a0   : > { %v6644_v8 = vadd.f32 %v2443_v59, %v6567_v0  ;;  %v6647_v63 = vadd.f32 %v2456_v1, %v6570_v5  ;;  %3738 = vrot.lane.b32.xlu2 %v6578_v14, %s5431_s11  ;;  %4064 = vrot.lane.b32.xlu1 %v6459_v9, %s5433_s13  ;;  %v3218_v5 = vsel %vm3212_vm12, %v3205_v26, %v3207_v4  ;;  %v3365_v1 = vld [vmem:[#allocation2 + $0x1c] sm:$0x77] }
 0x2a1   : > { %4058 = vrot.lane.b32.xlu0 %v6457_v62, %s5433_s13  ;;  %v3240_v28 = vsel %vm412_vm1, %v3218_v5, 0 }
 0x2a2   : > { %v2419_v3 = vpop.f32.mrf.mxu0  ;;  %v2432_v17 = vpop.f32.mrf.mxu1 }
 0x2a3   : > { %v3364_v3 = vld [vmem:[#allocation2 + $0x14] sm:$0x77]  ;;  %v3376_v17 = vunpack.c.l.b16 %v3365_v1 }
 0x2a4   : > { %v3374_v26 = vunpack.c.l.b16 %v3364_v3  ;;  %v3375_v23 = vunpack.c.h.b16 %v3364_v3 }
 0x2a6   : > { %v3383_v5 = vpack.c.b16 %v3375_v23, %v3375_v23 }
 0x2a7   : > { %v2445_v24 = vpop.f32.mrf.mxu2  ;;  %v2458_v0 = vpop.f32.mrf.mxu3 }
 0x2a8   : > { %3889 = vrot.lane.b32.xlu2 %v6534_v53, %s5432_s12  ;;  %4066 = vrot.lane.b32.xlu1 %v6486_v10, %s5433_s13  ;;  %v3384_v24 = vpack.c.b16 %v3376_v17, %v3376_v17  ;;  %v3382_v0 = vpack.c.b16 %v3374_v26, %v3374_v26 }
 0x2a9   : > { %4070 = vrot.lane.b32.xlu0 %v6499_v21, %s5433_s13 }
 0x2aa   : > { %v2469_v32 = vpop.f32.mrf.mxu0  ;;  %v2482_v16 = vpop.f32.mrf.mxu1 }
 0x2ab   : > { %v6666_v12 = vadd.f32 %v2469_v32, %v6591_v37  ;;  %v6669_v29 = vadd.f32 %v2482_v16, %v6594_v34 }
 0x2ac   : > { %5292 = vmatmul.msk.bf16.vlgmr.msrb.gmra.mxu2 %vm408_vm2, %v5285_v11  ;;  %5293 = vmatmul.msk.bf16.vlgmr.msrb.gmra.mxu3 %vm408_vm2, %v5285_v11 }
 0x2ad   : > { %5290 = vmatmul.msk.bf16.vlgmr.msrb.gmra.mxu0 %vm408_vm2, %v5285_v11  ;;  %5291 = vmatmul.msk.bf16.vlgmr.msrb.gmra.mxu1 %vm408_vm2, %v5285_v11 }
 0x2ae   : > { %3307 = vmatpush.bf16.msrb.mxu0 %v3237_v30  ;;  %3320 = vmatpush.bf16.msrb.mxu1 %v3240_v28  ;;  %v3408_v28 = vsel %vm412_vm1, %v3384_v24, 0 }
 0x2af   : > { %v2495_v37 = vpop.f32.mrf.mxu2  ;;  %v2508_v34 = vpop.f32.mrf.mxu3  ;;  %3333 = vmatpush.bf16.msrb.mxu2 %v3243_v36  ;;  %3346 = vmatpush.bf16.msrb.mxu3 %v3246_v41  ;;  %v3402_v36 = vsel %vm412_vm1, %v3382_v0, 0 }
 0x2b0   : > { %v6680_v42 = vadd.f32 %v2495_v37, %v6605_v31  ;;  %v6683_v38 = vadd.f32 %v2508_v34, %v6608_v52  ;;  %3901 = vrot.lane.b32.xlu2 %v6564_v20, %s5432_s12  ;;  %4229 = vrot.lane.b32.xlu1 %v6448_v50, %s5434_s14  ;;  %v3373_v31 = vunpack.c.h.b16 %v3363_v35  ;;  %v3562_v41 = vpop.permute.xlu1 %3561  ;;  %v3405_v34 = vsel %vm412_vm1, %v3383_v5, 0  ;;  %v3556_v35 = vpop.permute.xlu2 %3555 }
 0x2b1   : > { %4227 = vrot.lane.b32.xlu0 %v6446_v44, %s5434_s14 }
 0x2b2   : > { %v2471_v43 = vpop.f32.mrf.mxu0  ;;  %v2484_v45 = vpop.f32.mrf.mxu1  ;;  %v3381_v46 = vpack.c.b16 %v3373_v31, %v3373_v31 }
 0x2b4   : > { %v3399_v15 = vsel %vm412_vm1, %v3381_v46, 0 }
 0x2b7   : > { %v2497_v55 = vpop.f32.mrf.mxu2  ;;  %v2510_v52 = vpop.f32.mrf.mxu3 }
 0x2b8   : > { %3905 = vrot.lane.b32.xlu2 %v6578_v14, %s5432_s12  ;;  %4231 = vrot.lane.b32.xlu1 %v6459_v9, %s5434_s14  ;;  %v3564_v31 = vpop.permute.xlu1 %3563  ;;  %v5303_v52 = vld [vmem:[%s7311_s3 + $0x12] sm:$0x1] }
 0x2b9   : > { %4225 = vrot.lane.b32.xlu0 %v6457_v62, %s5434_s14  ;;  %v3576_v54 = vsel %vm399_vm0, %v3562_v41, %v3564_v31 }
 0x2ba   : > { %v2585_v56 = vpop.f32.mrf.mxu0  ;;  %v2598_v11 = vpop.f32.mrf.mxu1 }
 0x2bb   : > { %v6701_v18 = vadd.f32 %v2585_v56, %v6630_v61  ;;  %v6704_v49 = vadd.f32 %v2598_v11, %v6633_v19 }
 0x2bc   : > { %5297 = vmatmul.msk.bf16.vlgmr.msra.gmra.mxu2 %vm408_vm2, %v5294_v51  ;;  %5298 = vmatmul.msk.bf16.vlgmr.msra.gmra.mxu3 %vm408_vm2, %v5294_v51 }
 0x2bd   : > { %5295 = vmatmul.msk.bf16.vlgmr.msra.gmra.mxu0 %vm408_vm2, %v5294_v51  ;;  %5296 = vmatmul.msk.bf16.vlgmr.msra.gmra.mxu1 %vm408_vm2, %v5294_v51 }
 0x2be   : > { %3446 = vmatpush.bf16.msra.mxu2 %v3396_v58  ;;  %3420 = vmatpush.bf16.msra.mxu0 %v3390_v60  ;;  %v3594_v60 = vsel %vm412_vm1, %v3576_v54, 0 }
 0x2bf   : > { %v2611_v61 = vpop.f32.mrf.mxu2  ;;  %v2624_v19 = vpop.f32.mrf.mxu3  ;;  %3459 = vmatpush.bf16.msra.mxu3 %v3399_v15  ;;  %3433 = vmatpush.bf16.msra.mxu1 %v3393_v2 }
 0x2c0   : > { %v6715_v6 = vadd.f32 %v2611_v61, %v6644_v8  ;;  %v6718_v7 = vadd.f32 %v2624_v19, %v6647_v63  ;;  %4056 = vrot.lane.b32.xlu2 %v6534_v53, %s5433_s13  ;;  %4233 = vrot.lane.b32.xlu1 %v6486_v10, %s5434_s14  ;;  %v3377_v8 = vunpack.c.h.b16 %v3365_v1 }
 0x2c1   : > { %4237 = vrot.lane.b32.xlu0 %v6499_v21, %s5434_s14 }
 0x2c2   : > { %v2587_v4 = vpop.f32.mrf.mxu0  ;;  %v2600_v59 = vpop.f32.mrf.mxu1  ;;  %v3385_v27 = vpack.c.b16 %v3377_v8, %v3377_v8 }
 0x2c3   : > { %v3560_v30 = vpop.permute.xlu0 %3559 }
 0x2c4   : > { %v3411_v37 = vsel %vm412_vm1, %v3385_v27, 0  ;;  %v3575_v55 = vsel %vm399_vm0, %v3560_v30, %v3562_v41 }
 0x2c5   : > { %v3591_v11 = vsel %vm412_vm1, %v3575_v55, 0 }
 0x2c7   : > { %v2613_v25 = vpop.f32.mrf.mxu2  ;;  %v2626_v63 = vpop.f32.mrf.mxu3 }
 0x2c8   : > { %4068 = vrot.lane.b32.xlu2 %v6564_v20, %s5433_s13  ;;  %4396 = vrot.lane.b32.xlu1 %v6448_v50, %s5435_s15 }
 0x2c9   : > { %4394 = vrot.lane.b32.xlu0 %v6446_v44, %s5435_s15 }
 0x2ca   : > { %v2637_v22 = vpop.f32.mrf.mxu0  ;;  %v2650_v13 = vpop.f32.mrf.mxu1 }
 0x2cb   : > { %v6733_v32 = vadd.f32 %v2637_v22, %v6666_v12  ;;  %v6736_v16 = vadd.f32 %v2650_v13, %v6669_v29  ;;  %v3558_v48 = vpop.permute.xlu0 %3557 }
 0x2cc   : > { %5301 = vmatmul.msk.bf16.vlgmr.msrb.gmra.mxu2 %vm408_vm2, %v5294_v51  ;;  %5302 = vmatmul.msk.bf16.vlgmr.msrb.gmra.mxu3 %vm408_vm2, %v5294_v51  ;;  %v3573_v47 = vsel %vm399_vm0, %v3556_v35, %v3558_v48 }
 0x2cd   : > { %5299 = vmatmul.msk.bf16.vlgmr.msrb.gmra.mxu0 %vm408_vm2, %v5294_v51  ;;  %5300 = vmatmul.msk.bf16.vlgmr.msrb.gmra.mxu1 %vm408_vm2, %v5294_v51  ;;  %v3585_v15 = vsel %vm412_vm1, %v3573_v47, 0 }
 0x2ce   : > { %3498 = vmatpush.bf16.msrb.mxu2 %v3408_v28  ;;  %3472 = vmatpush.bf16.msrb.mxu0 %v3402_v36 }
 0x2cf   : > { %v2663_v12 = vpop.f32.mrf.mxu2  ;;  %v2676_v29 = vpop.f32.mrf.mxu3  ;;  %3511 = vmatpush.bf16.msrb.mxu3 %v3411_v37  ;;  %3485 = vmatpush.bf16.msrb.mxu1 %v3405_v34 }
 0x2d0   : > { %v6747_v43 = vadd.f32 %v2663_v12, %v6680_v42  ;;  %v6750_v45 = vadd.f32 %v2676_v29, %v6683_v38  ;;  %4072 = vrot.lane.b32.xlu2 %v6578_v14, %s5433_s13  ;;  %4398 = vrot.lane.b32.xlu1 %v6459_v9, %s5435_s15  ;;  %v3574_v38 = vsel %vm399_vm0, %v3558_v48, %v3560_v30  ;;  %s328_s13 = scalar_lea.vmem %s7310_s2, %s7318_s23 }
 0x2d1   : > { %4392 = vrot.lane.b32.xlu0 %v6457_v62, %s5435_s15  ;;  %v3588_v58 = vsel %vm412_vm1, %v3574_v38, 0 }
 0x2d2   : > { %v2639_v33 = vpop.f32.mrf.mxu0  ;;  %v2652_v40 = vpop.f32.mrf.mxu1 }
 0x2d3   : > { %v3570_v4 = vpop.permute.xlu0 %3569  ;;  %v3566_v3 = vpop.permute.xlu1 %3565 }
 0x2d4   : > { %v3577_v8 = vsel %vm399_vm0, %v3564_v31, %v3566_v3  ;;  %v5312_v31 = vld [vmem:[%s7311_s3 + $0x13] sm:$0x1] }
 0x2d5   : > { %v3597_v5 = vsel %vm412_vm1, %v3577_v8, 0 }
 0x2d7   : > { %v2665_v57 = vpop.f32.mrf.mxu2  ;;  %v2678_v42 = vpop.f32.mrf.mxu3 }
 0x2d8   : > { %4223 = vrot.lane.b32.xlu2 %v6534_v53, %s5434_s14  ;;  %4400 = vrot.lane.b32.xlu1 %v6486_v10, %s5435_s15 }
 0x2d9   : > { %4404 = vrot.lane.b32.xlu0 %v6499_v21, %s5435_s15 }
 0x2da   : > { %v2753_v46 = vpop.f32.mrf.mxu0  ;;  %v2766_v39 = vpop.f32.mrf.mxu1 }
 0x2db   : > { %v6772_v51 = vadd.f32 %v2753_v46, %v6701_v18  ;;  %v6775_v56 = vadd.f32 %v2766_v39, %v6704_v49  ;;  %v3568_v2 = vpop.permute.xlu2 %3567  ;;  %v3727_v13 = vpop.permute.xlu0 %3726 }
 0x2dc   : > { %5306 = vmatmul.msk.bf16.vlgmr.msra.gmra.mxu2 %vm408_vm2, %v5303_v52  ;;  %5307 = vmatmul.msk.bf16.vlgmr.msra.gmra.mxu3 %vm408_vm2, %v5303_v52  ;;  %v3579_v23 = vsel %vm399_vm0, %v3568_v2, %v3570_v4  ;;  %v3729_v36 = vpop.permute.xlu1 %3728 }
 0x2dd   : > { %5304 = vmatmul.msk.bf16.vlgmr.msra.gmra.mxu0 %vm408_vm2, %v5303_v52  ;;  %5305 = vmatmul.msk.bf16.vlgmr.msra.gmra.mxu1 %vm408_vm2, %v5303_v52  ;;  %v3603_v30 = vsel %vm412_vm1, %v3579_v23, 0  ;;  %v3742_v48 = vsel %vm692_vm3, %v3727_v13, %v3729_v36 }
 0x2de   : > { %3628 = vmatpush.bf16.msra.mxu1 %v3588_v58  ;;  %3641 = vmatpush.bf16.msra.mxu2 %v3591_v11  ;;  %v3758_v47 = vsel %vm412_vm1, %v3742_v48, 0 }
 0x2df   : > { %v2779_v18 = vpop.f32.mrf.mxu2  ;;  %v2792_v49 = vpop.f32.mrf.mxu3  ;;  %3654 = vmatpush.bf16.msra.mxu3 %v3594_v60  ;;  %3615 = vmatpush.bf16.msra.mxu0 %v3585_v15 }
 0x2e0   : > { %v6786_v61 = vadd.f32 %v2779_v18, %v6715_v6  ;;  %v6789_v19 = vadd.f32 %v2792_v49, %v6718_v7  ;;  %4235 = vrot.lane.b32.xlu2 %v6564_v20, %s5434_s14  ;;  %4563 = vrot.lane.b32.xlu1 %v6448_v50, %s5436_s18  ;;  %v3578_v7 = vsel %vm399_vm0, %v3566_v3, %v3568_v2 }
 0x2e1   : > { %4561 = vrot.lane.b32.xlu0 %v6446_v44, %s5436_s18  ;;  %v3600_v22 = vsel %vm412_vm1, %v3578_v7, 0 }
 0x2e2   : > { %v2755_v59 = vpop.f32.mrf.mxu0  ;;  %v2768_v1 = vpop.f32.mrf.mxu1 }
 0x2e3   : > { %v3572_v17 = vpop.permute.xlu2 %3571  ;;  %v3725_v35 = vpop.permute.xlu0 %3724 }
 0x2e4   : > { %v3580_v25 = vsel %vm399_vm0, %v3570_v4, %v3572_v17  ;;  %v3731_v33 = vpop.permute.xlu1 %3730  ;;  %vm4926_vm0 = vcmask 1041408  }
 0x2e5   : > { %v3606_v28 = vsel %vm412_vm1, %v3580_v25, 0  ;;  %v3743_v57 = vsel %vm692_vm3, %v3729_v36, %v3731_v33 }
 0x2e6   : > { %v3761_v39 = vsel %vm412_vm1, %v3743_v57, 0 }
 0x2e7   : > { %v2781_v26 = vpop.f32.mrf.mxu2  ;;  %v2794_v6 = vpop.f32.mrf.mxu3 }
 0x2e8   : > { %4239 = vrot.lane.b32.xlu2 %v6578_v14, %s5434_s14  ;;  %4565 = vrot.lane.b32.xlu1 %v6459_v9, %s5436_s18 }
 0x2e9   : > { %4559 = vrot.lane.b32.xlu0 %v6457_v62, %s5436_s18 }
 0x2ea   : > { %v2805_v63 = vpop.f32.mrf.mxu0  ;;  %v2818_v24 = vpop.f32.mrf.mxu1 }
 0x2eb   : > { %v6808_v0 = vadd.f32 %v2805_v63, %v6733_v32  ;;  %v6811_v27 = vadd.f32 %v2818_v24, %v6736_v16  ;;  %v3723_v34 = vpop.permute.xlu2 %3722  ;;  %v3737_v15 = vpop.permute.xlu0 %3736 }
 0x2ec   : > { %5310 = vmatmul.msk.bf16.vlgmr.msrb.gmra.mxu2 %vm408_vm2, %v5303_v52  ;;  %5311 = vmatmul.msk.bf16.vlgmr.msrb.gmra.mxu3 %vm408_vm2, %v5303_v52  ;;  %v3740_v42 = vsel %vm692_vm3, %v3723_v34, %v3725_v35  ;;  %v3733_v49 = vpop.permute.xlu1 %3732 }
 0x2ed   : > { %5308 = vmatmul.msk.bf16.vlgmr.msrb.gmra.mxu0 %vm408_vm2, %v5303_v52  ;;  %5309 = vmatmul.msk.bf16.vlgmr.msrb.gmra.mxu1 %vm408_vm2, %v5303_v52  ;;  %v3752_v11 = vsel %vm412_vm1, %v3740_v42, 0  ;;  %v3744_v1 = vsel %vm692_vm3, %v3731_v33, %v3733_v49 }
 0x2ee   : > { %3667 = vmatpush.bf16.msrb.mxu0 %v3597_v5  ;;  %3680 = vmatpush.bf16.msrb.mxu1 %v3600_v22  ;;  %v3764_v8 = vsel %vm412_vm1, %v3744_v1, 0 }
 0x2ef   : > { %v2831_v32 = vpop.f32.mrf.mxu2  ;;  %v2844_v16 = vpop.f32.mrf.mxu3  ;;  %3693 = vmatpush.bf16.msrb.mxu2 %v3603_v30  ;;  %3706 = vmatpush.bf16.msrb.mxu3 %v3606_v28 }
 0x2f0   : > { %v6822_v41 = vadd.f32 %v2831_v32, %v6747_v43  ;;  %v6825_v37 = vadd.f32 %v2844_v16, %v6750_v45  ;;  %4390 = vrot.lane.b32.xlu2 %v6534_v53, %s5435_s15  ;;  %4567 = vrot.lane.b32.xlu1 %v6486_v10, %s5436_s18  ;;  %v3741_v45 = vsel %vm692_vm3, %v3725_v35, %v3727_v13 }
 0x2f1   : > { %4571 = vrot.lane.b32.xlu0 %v6499_v21, %s5436_s18  ;;  %v3755_v46 = vsel %vm412_vm1, %v3741_v45, 0 }
 0x2f2   : > { %v2807_v12 = vpop.f32.mrf.mxu0  ;;  %v2820_v29 = vpop.f32.mrf.mxu1 }
 0x2f3   : > { %v3735_v58 = vpop.permute.xlu2 %3734 }
 0x2f7   : > { %v2833_v40 = vpop.f32.mrf.mxu2  ;;  %v2846_v43 = vpop.f32.mrf.mxu3 }
 0x2f8   : > { %4402 = vrot.lane.b32.xlu2 %v6564_v20, %s5435_s15  ;;  %4730 = vrot.lane.b32.xlu1 %v6448_v50, %s5437_s24 }
 0x2f9   : > { %4728 = vrot.lane.b32.xlu0 %v6446_v44, %s5437_s24  ;;  %v3746_v44 = vsel %vm692_vm3, %v3735_v58, %v3737_v15 }
 0x2fa   : > { %v2921_v55 = vpop.f32.mrf.mxu0  ;;  %v2934_v38 = vpop.f32.mrf.mxu1  ;;  %v3770_v23 = vsel %vm412_vm1, %v3746_v44, 0 }
 0x2fb   : > { %v6847_v52 = vadd.f32 %v2921_v55, %v6772_v51  ;;  %v6850_v54 = vadd.f32 %v2934_v38, %v6775_v56  ;;  %v3739_v4 = vpop.permute.xlu2 %3738 }
 0x2fc   : > { %5315 = vmatmul.msk.bf16.vlgmr.msra.gmra.mxu2 %vm408_vm2, %v5312_v31  ;;  %5316 = vmatmul.msk.bf16.vlgmr.msra.gmra.mxu3 %vm408_vm2, %v5312_v31  ;;  %v3747_v3 = vsel %vm692_vm3, %v3737_v15, %v3739_v4 }
 0x2fd   : > { %5313 = vmatmul.msk.bf16.vlgmr.msra.gmra.mxu0 %vm408_vm2, %v5312_v31  ;;  %5314 = vmatmul.msk.bf16.vlgmr.msra.gmra.mxu1 %vm408_vm2, %v5312_v31  ;;  %v3773_v25 = vsel %vm412_vm1, %v3747_v3, 0 }
 0x2fe   : > { %3795 = vmatpush.bf16.msra.mxu1 %v3755_v46  ;;  %3808 = vmatpush.bf16.msra.mxu2 %v3758_v47 }
 0x2ff   : > { %v2947_v50 = vpop.f32.mrf.mxu2  ;;  %v2960_v51 = vpop.f32.mrf.mxu3  ;;  %3821 = vmatpush.bf16.msra.mxu3 %v3761_v39  ;;  %3782 = vmatpush.bf16.msra.mxu0 %v3752_v11 }
 0x300   : > { %v6861_v56 = vadd.f32 %v2947_v50, %v6786_v61  ;;  %v6864_v60 = vadd.f32 %v2960_v51, %v6789_v19  ;;  %4406 = vrot.lane.b32.xlu2 %v6578_v14, %s5435_s15  ;;  %4732 = vrot.lane.b32.xlu1 %v6459_v9, %s5437_s24  ;;  %v3745_v19 = vsel %vm692_vm3, %v3733_v49, %v3735_v58  ;;  %vm4928_vm3 = vcmask 1044484   ;;  %s333_s15 = scalar_lea.vmem %s7313_s5, %s7318_s23 }
 0x301   : > { %4726 = vrot.lane.b32.xlu0 %v6457_v62, %s5437_s24  ;;  %v3767_v7 = vsel %vm412_vm1, %v3745_v19, 0  ;;  %v3894_v62 = vpop.permute.xlu0 %3893 }
 0x302   : > { %v2923_v2 = vpop.f32.mrf.mxu0  ;;  %v2936_v18 = vpop.f32.mrf.mxu1 }
 0x303   : > { %v3890_v5 = vpop.permute.xlu2 %3889 }
 0x307   : > { %v2949_v59 = vpop.f32.mrf.mxu2  ;;  %v2962_v61 = vpop.f32.mrf.mxu3 }
 0x308   : > { %4557 = vrot.lane.b32.xlu2 %v6534_v53, %s5436_s18  ;;  %4734 = vrot.lane.b32.xlu1 %v6486_v10, %s5437_s24  ;;  %v3896_v10 = vpop.permute.xlu1 %3895 }
 0x309   : > { %4738 = vrot.lane.b32.xlu0 %v6499_v21, %s5437_s24  ;;  %v3892_v30 = vpop.permute.xlu0 %3891  ;;  %v3909_v16 = vsel %vm860_vm4, %v3894_v62, %v3896_v10 }
 0x30a   : > { %v2973_v17 = vpop.f32.mrf.mxu0  ;;  %v2986_v9 = vpop.f32.mrf.mxu1  ;;  %v3907_v34 = vsel %vm860_vm4, %v3890_v5, %v3892_v30  ;;  %v3925_v40 = vsel %vm412_vm1, %v3909_v16, 0 }
 0x30b   : > { %v6883_v26 = vadd.f32 %v2973_v17, %v6808_v0  ;;  %v6886_v6 = vadd.f32 %v2986_v9, %v6811_v27  ;;  %v3919_v45 = vsel %vm412_vm1, %v3907_v34, 0 }
 0x30c   : > { %5319 = vmatmul.msk.bf16.vlgmr.msrb.gmra.mxu2 %vm408_vm2, %v5312_v31  ;;  %5320 = vmatmul.msk.bf16.vlgmr.msrb.gmra.mxu3 %vm408_vm2, %v5312_v31 }
 0x30d   : > { %5317 = vmatmul.msk.bf16.vlgmr.msrb.gmra.mxu0 %vm408_vm2, %v5312_v31  ;;  %5318 = vmatmul.msk.bf16.vlgmr.msrb.gmra.mxu1 %vm408_vm2, %v5312_v31  ;;  %v3902_v31 = vpop.permute.xlu2 %3901 }
 0x30e   : > { %3834 = vmatpush.bf16.msrb.mxu0 %v3764_v8  ;;  %3847 = vmatpush.bf16.msrb.mxu1 %v3767_v7 }
 0x30f   : > { %v2999_v63 = vpop.f32.mrf.mxu2  ;;  %v3012_v24 = vpop.f32.mrf.mxu3  ;;  %3860 = vmatpush.bf16.msrb.mxu2 %v3770_v23  ;;  %3873 = vmatpush.bf16.msrb.mxu3 %v3773_v25 }
 0x310   : > { %v6897_v0 = vadd.f32 %v2999_v63, %v6822_v41  ;;  %v6900_v27 = vadd.f32 %v3012_v24, %v6825_v37  ;;  %4569 = vrot.lane.b32.xlu2 %v6564_v20, %s5436_s18  ;;  %v3898_v28 = vpop.permute.xlu1 %3897  ;;  %v3908_v41 = vsel %vm860_vm4, %v3892_v30, %v3894_v62  ;;  %v5321_v37 = vld [vmem:[%s7311_s3 + $0x14] sm:$0x1]  ;;  %v5330_v63 = vld [vmem:[%s7311_s3 + $0x15] sm:$0x1] }
 0x311   : > { %v3910_v21 = vsel %vm860_vm4, %v3896_v10, %v3898_v28  ;;  %v3922_v43 = vsel %vm412_vm1, %v3908_v41, 0 }
 0x312   : > { %v2975_v22 = vpop.f32.mrf.mxu0  ;;  %v2988_v13 = vpop.f32.mrf.mxu1  ;;  %v3928_v48 = vsel %vm412_vm1, %v3910_v21, 0 }
 0x315   : > { %v3906_v39 = vpop.permute.xlu2 %3905 }
 0x317   : > { %v3001_v36 = vpop.f32.mrf.mxu2  ;;  %v3014_v32 = vpop.f32.mrf.mxu3 }
 0x318   : > { %4573 = vrot.lane.b32.xlu2 %v6578_v14, %s5436_s18  ;;  %v3900_v46 = vpop.permute.xlu1 %3899 }
 0x319   : > { %v3911_v50 = vsel %vm860_vm4, %v3898_v28, %v3900_v46  ;;  %v3912_v51 = vsel %vm860_vm4, %v3900_v46, %v3902_v31 }
 0x31a   : > { %v3089_v12 = vpop.f32.mrf.mxu0  ;;  %v3102_v29 = vpop.f32.mrf.mxu1  ;;  %v3931_v49 = vsel %vm412_vm1, %v3911_v50, 0  ;;  %v3934_v4 = vsel %vm412_vm1, %v3912_v51, 0 }
 0x31b   : > { %v6916_v35 = vadd.f32 %v3089_v12, %v6847_v52  ;;  %v6919_v33 = vadd.f32 %v3102_v29, %v6850_v54  ;;  %v3904_v52 = vpop.permute.xlu0 %3903 }
 0x31c   : > { %5324 = vmatmul.msk.bf16.vlgmr.msra.gmra.mxu2 %vm408_vm2, %v5321_v37  ;;  %5325 = vmatmul.msk.bf16.vlgmr.msra.gmra.mxu3 %vm408_vm2, %v5321_v37 }
 0x31d   : > { %5322 = vmatmul.msk.bf16.vlgmr.msra.gmra.mxu0 %vm408_vm2, %v5321_v37  ;;  %5323 = vmatmul.msk.bf16.vlgmr.msra.gmra.mxu1 %vm408_vm2, %v5321_v37  ;;  %v4057_v9 = vpop.permute.xlu2 %4056 }
 0x31e   : > { %3962 = vmatpush.bf16.msra.mxu1 %v3922_v43  ;;  %3975 = vmatpush.bf16.msra.mxu2 %v3925_v40 }
 0x31f   : > { %v3115_v57 = vpop.f32.mrf.mxu2  ;;  %v3128_v42 = vpop.f32.mrf.mxu3  ;;  %3988 = vmatpush.bf16.msra.mxu3 %v3928_v48  ;;  %3949 = vmatpush.bf16.msra.mxu0 %v3919_v45 }
 0x320   : > { %v6930_v55 = vadd.f32 %v3115_v57, %v6861_v56  ;;  %v6933_v38 = vadd.f32 %v3128_v42, %v6864_v60  ;;  %4724 = vrot.lane.b32.xlu2 %v6534_v53, %s5437_s24  ;;  %v3913_v56 = vsel %vm860_vm4, %v3902_v31, %v3904_v52  ;;  %v3914_v60 = vsel %vm860_vm4, %v3904_v52, %v3906_v39  ;;  %v4063_v1 = vpop.permute.xlu1 %4062 }
 0x321   : > { %v3940_v61 = vsel %vm412_vm1, %v3914_v60, 0  ;;  %vm4932_vm4 = vcmask 1046534  }
 0x322   : > { %v3091_v54 = vpop.f32.mrf.mxu0  ;;  %v3104_v47 = vpop.f32.mrf.mxu1 }
 0x323   : > { %v4061_v59 = vpop.permute.xlu0 %4060 }
 0x324   : > { %v4076_v25 = vsel %vm1028_vm5, %v4061_v59, %v4063_v1 }
 0x325   : > { %v4092_v13 = vsel %vm412_vm1, %v4076_v25, 0  ;;  %v4069_v32 = vpop.permute.xlu2 %4068 }
 0x327   : > { %v3117_v11 = vpop.f32.mrf.mxu2  ;;  %v3130_v58 = vpop.f32.mrf.mxu3 }
 0x328   : > { %4736 = vrot.lane.b32.xlu2 %v6564_v20, %s5437_s24  ;;  %v3937_v20 = vsel %vm412_vm1, %v3913_v56, 0  ;;  %v4065_v7 = vpop.permute.xlu1 %4064 }
 0x329   : > { %v4077_v24 = vsel %vm1028_vm5, %v4063_v1, %v4065_v7  ;;  %v5339_v1 = vld [vmem:[%s7311_s3 + $0x16] sm:$0x1] }
 0x32a   : > { %v3141_v15 = vpop.f32.mrf.mxu0  ;;  %v3154_v53 = vpop.f32.mrf.mxu1  ;;  %v4095_v28 = vsel %vm412_vm1, %v4077_v24, 0 }
 0x32b   : > { %v6944_v2 = vadd.f32 %v3141_v15, %v6883_v26  ;;  %v6947_v18 = vadd.f32 %v3154_v53, %v6886_v6  ;;  %v4059_v8 = vpop.permute.xlu0 %4058 }
 0x32c   : > { %5328 = vmatmul.msk.bf16.vlgmr.msrb.gmra.mxu2 %vm408_vm2, %v5321_v37  ;;  %5329 = vmatmul.msk.bf16.vlgmr.msrb.gmra.mxu3 %vm408_vm2, %v5321_v37  ;;  %v4075_v10 = vsel %vm1028_vm5, %v4059_v8, %v4061_v59 }
 0x32d   : > { %5326 = vmatmul.msk.bf16.vlgmr.msrb.gmra.mxu0 %vm408_vm2, %v5321_v37  ;;  %5327 = vmatmul.msk.bf16.vlgmr.msrb.gmra.mxu1 %vm408_vm2, %v5321_v37  ;;  %v4089_v30 = vsel %vm412_vm1, %v4075_v10, 0 }
 0x32e   : > { %4001 = vmatpush.bf16.msrb.mxu0 %v3931_v49  ;;  %4014 = vmatpush.bf16.msrb.mxu1 %v3934_v4 }
 0x32f   : > { %v3167_v19 = vpop.f32.mrf.mxu2  ;;  %v3180_v44 = vpop.f32.mrf.mxu3  ;;  %4027 = vmatpush.bf16.msrb.mxu2 %v3937_v20  ;;  %4040 = vmatpush.bf16.msrb.mxu3 %v3940_v61 }
 0x330   : > { %v6958_v3 = vadd.f32 %v3167_v19, %v6897_v0  ;;  %v6961_v17 = vadd.f32 %v3180_v44, %v6900_v27  ;;  %4740 = vrot.lane.b32.xlu2 %v6578_v14, %s5437_s24  ;;  %v4074_v0 = vsel %vm1028_vm5, %v4057_v9, %v4059_v8  ;;  %s338_s24 = scalar_lea.vmem %s7314_s6, %s5141_s26 }
 0x331   : > { %v4086_v36 = vsel %vm412_vm1, %v4074_v0, 0 }
 0x332   : > { %v3143_v26 = vpop.f32.mrf.mxu0  ;;  %v3156_v6 = vpop.f32.mrf.mxu1 }
 0x333   : > { %v4071_v34 = vpop.permute.xlu0 %4070 }
 0x334   : > { %v4080_v31 = vsel %vm1028_vm5, %v4069_v32, %v4071_v34 }
 0x335   : > { %v4104_v39 = vsel %vm412_vm1, %v4080_v31, 0 }
 0x337   : > { %v3169_v62 = vpop.f32.mrf.mxu2  ;;  %v3182_v23 = vpop.f32.mrf.mxu3 }
 0x33a   : > { %v3257_v14 = vpop.f32.mrf.mxu0  ;;  %v3270_v27 = vpop.f32.mrf.mxu1 }
 0x33b   : > { %v6973_v5 = vadd.f32 %v3257_v14, %v6916_v35  ;;  %v6976_v22 = vadd.f32 %v3270_v27, %v6919_v33  ;;  %v4067_v35 = vpop.permute.xlu1 %4066  ;;  %v4073_v33 = vpop.permute.xlu2 %4072 }
 0x33c   : > { %5333 = vmatmul.msk.bf16.vlgmr.msra.gmra.mxu2 %vm408_vm2, %v5330_v63  ;;  %5334 = vmatmul.msk.bf16.vlgmr.msra.gmra.mxu3 %vm408_vm2, %v5330_v63  ;;  %v4078_v48 = vsel %vm1028_vm5, %v4065_v7, %v4067_v35  ;;  %v4079_v45 = vsel %vm1028_vm5, %v4067_v35, %v4069_v32  ;;  %v4081_v57 = vsel %vm1028_vm5, %v4071_v34, %v4073_v33  ;;  %v4228_v46 = vpop.permute.xlu0 %4227  ;;  %vm4936_vm5 = vcmask 1045508  }
 0x33d   : > { %5331 = vmatmul.msk.bf16.vlgmr.msra.gmra.mxu0 %vm408_vm2, %v5330_v63  ;;  %5332 = vmatmul.msk.bf16.vlgmr.msra.gmra.mxu1 %vm408_vm2, %v5330_v63  ;;  %v4098_v54 = vsel %vm412_vm1, %v4078_v48, 0  ;;  %v4101_v47 = vsel %vm412_vm1, %v4079_v45, 0  ;;  %v4107_v11 = vsel %vm412_vm1, %v4081_v57, 0 }
 0x33e   : > { %4129 = vmatpush.bf16.msra.mxu1 %v4089_v30  ;;  %4142 = vmatpush.bf16.msra.mxu2 %v4092_v13 }
 0x33f   : > { %v3283_v16 = vpop.f32.mrf.mxu2  ;;  %v3296_v41 = vpop.f32.mrf.mxu3  ;;  %4155 = vmatpush.bf16.msra.mxu3 %v4095_v28  ;;  %4116 = vmatpush.bf16.msra.mxu0 %v4086_v36 }
 0x340   : > { %v6987_v37 = vadd.f32 %v3283_v16, %v6930_v55  ;;  %v6990_v21 = vadd.f32 %v3296_v41, %v6933_v38 }
 0x342   : > { %v3259_v12 = vpop.f32.mrf.mxu0  ;;  %v3272_v29 = vpop.f32.mrf.mxu1 }
 0x343   : > { %v4230_v58 = vpop.permute.xlu1 %4229  ;;  %v4224_v15 = vpop.permute.xlu2 %4223 }
 0x344   : > { %v4243_v20 = vsel %vm1196_vm6, %v4228_v46, %v4230_v58 }
 0x345   : > { %v4259_v6 = vsel %vm412_vm1, %v4243_v20, 0 }
 0x347   : > { %v3285_v40 = vpop.f32.mrf.mxu2  ;;  %v3298_v43 = vpop.f32.mrf.mxu3 }
 0x34a   : > { %v3309_v42 = vpop.f32.mrf.mxu0  ;;  %v3322_v55 = vpop.f32.mrf.mxu1 }
 0x34b   : > { %v6997_v38 = vadd.f32 %v3309_v42, %v6944_v2  ;;  %v7000_v52 = vadd.f32 %v3322_v55, %v6947_v18  ;;  %v4226_v18 = vpop.permute.xlu0 %4225  ;;  %v4232_v49 = vpop.permute.xlu1 %4231 }
 0x34c   : > { %5337 = vmatmul.msk.bf16.vlgmr.msrb.gmra.mxu2 %vm408_vm2, %v5330_v63  ;;  %5338 = vmatmul.msk.bf16.vlgmr.msrb.gmra.mxu3 %vm408_vm2, %v5330_v63  ;;  %v4242_v61 = vsel %vm1196_vm6, %v4226_v18, %v4228_v46  ;;  %v4244_v19 = vsel %vm1196_vm6, %v4230_v58, %v4232_v49  ;;  %v4241_v44 = vsel %vm1196_vm6, %v4224_v15, %v4226_v18  ;;  %v4236_v23 = vpop.permute.xlu2 %4235  ;;  %v5348_v58 = vld [vmem:[%s7311_s3 + $0x17] sm:$0x1] }
 0x34d   : > { %5335 = vmatmul.msk.bf16.vlgmr.msrb.gmra.mxu0 %vm408_vm2, %v5330_v63  ;;  %5336 = vmatmul.msk.bf16.vlgmr.msrb.gmra.mxu1 %vm408_vm2, %v5330_v63  ;;  %v4256_v8 = vsel %vm412_vm1, %v4242_v61, 0  ;;  %v4262_v7 = vsel %vm412_vm1, %v4244_v19, 0  ;;  %v4253_v62 = vsel %vm412_vm1, %v4241_v44, 0 }
 0x34e   : > { %4168 = vmatpush.bf16.msrb.mxu0 %v4098_v54  ;;  %4181 = vmatpush.bf16.msrb.mxu1 %v4101_v47 }
 0x34f   : > { %v3335_v50 = vpop.f32.mrf.mxu2  ;;  %v3348_v51 = vpop.f32.mrf.mxu3  ;;  %4194 = vmatpush.bf16.msrb.mxu2 %v4104_v39  ;;  %4207 = vmatpush.bf16.msrb.mxu3 %v4107_v11 }
 0x350   : > { %v7011_v56 = vadd.f32 %v3335_v50, %v6958_v3  ;;  %v7014_v60 = vadd.f32 %v3348_v51, %v6961_v17 }
 0x352   : > { %v3311_v53 = vpop.f32.mrf.mxu0  ;;  %v3324_v2 = vpop.f32.mrf.mxu1 }
 0x353   : > { %v4238_v0 = vpop.permute.xlu0 %4237 }
 0x354   : > { %v4247_v32 = vsel %vm1196_vm6, %v4236_v23, %v4238_v0 }
 0x355   : > { %v4271_v33 = vsel %vm412_vm1, %v4247_v32, 0 }
 0x357   : > { %v3337_v4 = vpop.f32.mrf.mxu2  ;;  %v3350_v59 = vpop.f32.mrf.mxu3 }
 0x35a   : > { %v3422_v3 = vpop.f32.mrf.mxu0  ;;  %v3435_v17 = vpop.f32.mrf.mxu1 }
 0x35b   : > { %v7024_v9 = vadd.f32 %v3422_v3, %v6973_v5  ;;  %v7027_v26 = vadd.f32 %v3435_v17, %v6976_v22  ;;  %v4234_v5 = vpop.permute.xlu1 %4233  ;;  %v4240_v22 = vpop.permute.xlu2 %4239 }
 0x35c   : > { %5342 = vmatmul.msk.bf16.vlgmr.msra.gmra.mxu2 %vm408_vm2, %v5339_v1  ;;  %5343 = vmatmul.msk.bf16.vlgmr.msra.gmra.mxu3 %vm408_vm2, %v5339_v1  ;;  %v4245_v28 = vsel %vm1196_vm6, %v4232_v49, %v4234_v5  ;;  %v4246_v36 = vsel %vm1196_vm6, %v4234_v5, %v4236_v23  ;;  %v4248_v16 = vsel %vm1196_vm6, %v4238_v0, %v4240_v22  ;;  %v4395_v35 = vpop.permute.xlu0 %4394  ;;  %vm4938_vm6 = vcmask 1043456  }
 0x35d   : > { %5340 = vmatmul.msk.bf16.vlgmr.msra.gmra.mxu0 %vm408_vm2, %v5339_v1  ;;  %5341 = vmatmul.msk.bf16.vlgmr.msra.gmra.mxu1 %vm408_vm2, %v5339_v1  ;;  %v4265_v12 = vsel %vm412_vm1, %v4245_v28, 0  ;;  %v4268_v29 = vsel %vm412_vm1, %v4246_v36, 0  ;;  %v4274_v40 = vsel %vm412_vm1, %v4248_v16, 0 }
 0x35e   : > { %4296 = vmatpush.bf16.msra.mxu1 %v4256_v8  ;;  %4309 = vmatpush.bf16.msra.mxu2 %v4259_v6 }
 0x35f   : > { %v3448_v25 = vpop.f32.mrf.mxu2  ;;  %v3461_v10 = vpop.f32.mrf.mxu3  ;;  %4322 = vmatpush.bf16.msra.mxu3 %v4262_v7  ;;  %4283 = vmatpush.bf16.msra.mxu0 %v4253_v62 }
 0x360   : > { %v7038_v63 = vadd.f32 %v3448_v25, %v6987_v37  ;;  %v7041_v24 = vadd.f32 %v3461_v10, %v6990_v21 }
 0x362   : > { %v3424_v14 = vpop.f32.mrf.mxu0  ;;  %v3437_v27 = vpop.f32.mrf.mxu1 }
 0x363   : > { %v4397_v43 = vpop.permute.xlu1 %4396  ;;  %v4391_v42 = vpop.permute.xlu2 %4390 }
 0x364   : > { %v4410_v39 = vsel %vm1364_vm7, %v4395_v35, %v4397_v43 }
 0x365   : > { %v4426_v2 = vsel %vm412_vm1, %v4410_v39, 0 }
 0x367   : > { %v3450_v13 = vpop.f32.mrf.mxu2  ;;  %v3463_v30 = vpop.f32.mrf.mxu3 }
 0x36a   : > { %v3474_v41 = vpop.f32.mrf.mxu0  ;;  %v3487_v37 = vpop.f32.mrf.mxu1 }
 0x36b   : > { %v7048_v21 = vadd.f32 %v3474_v41, %v6997_v38  ;;  %v7051_v34 = vadd.f32 %v3487_v37, %v7000_v52  ;;  %v4393_v52 = vpop.permute.xlu0 %4392  ;;  %v4399_v54 = vpop.permute.xlu1 %4398 }
 0x36c   : > { %5346 = vmatmul.msk.bf16.vlgmr.msrb.gmra.mxu2 %vm408_vm2, %v5339_v1  ;;  %5347 = vmatmul.msk.bf16.vlgmr.msrb.gmra.mxu3 %vm408_vm2, %v5339_v1  ;;  %v4409_v11 = vsel %vm1364_vm7, %v4393_v52, %v4395_v35  ;;  %v4411_v50 = vsel %vm1364_vm7, %v4397_v43, %v4399_v54  ;;  %v4408_v51 = vsel %vm1364_vm7, %v4391_v42, %v4393_v52  ;;  %v4403_v59 = vpop.permute.xlu2 %4402  ;;  %v5357_v43 = vld [vmem:[%s7311_s3 + $0x18] sm:$0x1] }
 0x36d   : > { %5344 = vmatmul.msk.bf16.vlgmr.msrb.gmra.mxu0 %vm408_vm2, %v5339_v1  ;;  %5345 = vmatmul.msk.bf16.vlgmr.msrb.gmra.mxu1 %vm408_vm2, %v5339_v1  ;;  %v4423_v18 = vsel %vm412_vm1, %v4409_v11, 0  ;;  %v4429_v49 = vsel %vm412_vm1, %v4411_v50, 0  ;;  %v4420_v4 = vsel %vm412_vm1, %v4408_v51, 0 }
 0x36e   : > { %4335 = vmatpush.bf16.msrb.mxu0 %v4265_v12  ;;  %4348 = vmatpush.bf16.msrb.mxu1 %v4268_v29 }
 0x36f   : > { %v3500_v48 = vpop.f32.mrf.mxu2  ;;  %v3513_v45 = vpop.f32.mrf.mxu3  ;;  %4361 = vmatpush.bf16.msrb.mxu2 %v4271_v33  ;;  %4374 = vmatpush.bf16.msrb.mxu3 %v4274_v40 }
 0x370   : > { %v7062_v31 = vadd.f32 %v3500_v48, %v7011_v56  ;;  %v7065_v57 = vadd.f32 %v3513_v45, %v7014_v60 }
 0x372   : > { %v3476_v55 = vpop.f32.mrf.mxu0  ;;  %v3489_v38 = vpop.f32.mrf.mxu1 }
 0x373   : > { %v4405_v44 = vpop.permute.xlu0 %4404 }
 0x374   : > { %v4414_v23 = vsel %vm1364_vm7, %v4403_v59, %v4405_v44 }
 0x375   : > { %v4438_v22 = vsel %vm412_vm1, %v4414_v23, 0 }
 0x377   : > { %v3502_v47 = vpop.f32.mrf.mxu2  ;;  %v3515_v46 = vpop.f32.mrf.mxu3 }
 0x37a   : > { %v3617_v56 = vpop.f32.mrf.mxu0  ;;  %v3630_v60 = vpop.f32.mrf.mxu1 }
 0x37b   : > { %v7075_v15 = vadd.f32 %v3617_v56, %v7024_v9  ;;  %v7078_v53 = vadd.f32 %v3630_v60, %v7027_v26  ;;  %v4401_v9 = vpop.permute.xlu1 %4400  ;;  %v4407_v26 = vpop.permute.xlu2 %4406 }
 0x37c   : > { %5351 = vmatmul.msk.bf16.vlgmr.msra.gmra.mxu2 %vm408_vm2, %v5348_v58  ;;  %5352 = vmatmul.msk.bf16.vlgmr.msra.gmra.mxu3 %vm408_vm2, %v5348_v58  ;;  %v4412_v7 = vsel %vm1364_vm7, %v4399_v54, %v4401_v9  ;;  %v4413_v62 = vsel %vm1364_vm7, %v4401_v9, %v4403_v59  ;;  %v4415_v25 = vsel %vm1364_vm7, %v4405_v44, %v4407_v26  ;;  %v4562_v5 = vpop.permute.xlu0 %4561  ;;  %vm5021_vm7 = vcmask 7168  }
 0x37d   : > { %5349 = vmatmul.msk.bf16.vlgmr.msra.gmra.mxu0 %vm408_vm2, %v5348_v58  ;;  %5350 = vmatmul.msk.bf16.vlgmr.msra.gmra.mxu1 %vm408_vm2, %v5348_v58  ;;  %v4432_v14 = vsel %vm412_vm1, %v4412_v7, 0  ;;  %v4435_v27 = vsel %vm412_vm1, %v4413_v62, 0  ;;  %v4441_v13 = vsel %vm412_vm1, %v4415_v25, 0 }
 0x37e   : > { %4463 = vmatpush.bf16.msra.mxu1 %v4423_v18  ;;  %4476 = vmatpush.bf16.msra.mxu2 %v4426_v2 }
 0x37f   : > { %v3643_v20 = vpop.f32.mrf.mxu2  ;;  %v3656_v61 = vpop.f32.mrf.mxu3  ;;  %4489 = vmatpush.bf16.msra.mxu3 %v4429_v49  ;;  %4450 = vmatpush.bf16.msra.mxu0 %v4420_v4 }
 0x380   : > { %v7089_v1 = vadd.f32 %v3643_v20, %v7038_v63  ;;  %v7092_v19 = vadd.f32 %v3656_v61, %v7041_v24 }
 0x382   : > { %v3619_v3 = vpop.f32.mrf.mxu0  ;;  %v3632_v17 = vpop.f32.mrf.mxu1 }
 0x383   : > { %v4564_v30 = vpop.permute.xlu1 %4563  ;;  %v4558_v41 = vpop.permute.xlu2 %4557 }
 0x384   : > { %v4577_v33 = vsel %vm1532_vm8, %v4562_v5, %v4564_v30 }
 0x385   : > { %v4593_v38 = vsel %vm412_vm1, %v4577_v33, 0 }
 0x387   : > { %v3645_v6 = vpop.f32.mrf.mxu2  ;;  %v3658_v8 = vpop.f32.mrf.mxu3 }
 0x38a   : > { %v3669_v10 = vpop.f32.mrf.mxu0  ;;  %v3682_v63 = vpop.f32.mrf.mxu1 }
 0x38b   : > { %v7099_v24 = vadd.f32 %v3669_v10, %v7048_v21  ;;  %v7102_v0 = vadd.f32 %v3682_v63, %v7051_v34  ;;  %v4560_v34 = vpop.permute.xlu0 %4559  ;;  %v4566_v12 = vpop.permute.xlu1 %4565 }
 0x38c   : > { %5355 = vmatmul.msk.bf16.vlgmr.msrb.gmra.mxu2 %vm408_vm2, %v5348_v58  ;;  %5356 = vmatmul.msk.bf16.vlgmr.msrb.gmra.mxu3 %vm408_vm2, %v5348_v58  ;;  %v4576_v40 = vsel %vm1532_vm8, %v4560_v34, %v4562_v5  ;;  %v4578_v48 = vsel %vm1532_vm8, %v4564_v30, %v4566_v12  ;;  %v4575_v45 = vsel %vm1532_vm8, %v4558_v41, %v4560_v34  ;;  %v4570_v46 = vpop.permute.xlu2 %4569  ;;  %v5366_v30 = vld [vmem:[%s7311_s3 + $0x19] sm:$0x1] }
 0x38d   : > { %5353 = vmatmul.msk.bf16.vlgmr.msrb.gmra.mxu0 %vm408_vm2, %v5348_v58  ;;  %5354 = vmatmul.msk.bf16.vlgmr.msrb.gmra.mxu1 %vm408_vm2, %v5348_v58  ;;  %v4590_v52 = vsel %vm412_vm1, %v4576_v40, 0  ;;  %v4596_v54 = vsel %vm412_vm1, %v4578_v48, 0  ;;  %v4587_v47 = vsel %vm412_vm1, %v4575_v45, 0 }
 0x38e   : > { %4502 = vmatpush.bf16.msrb.mxu0 %v4432_v14  ;;  %4515 = vmatpush.bf16.msrb.mxu1 %v4435_v27 }
 0x38f   : > { %v3695_v28 = vpop.f32.mrf.mxu2  ;;  %v3708_v36 = vpop.f32.mrf.mxu3  ;;  %4528 = vmatpush.bf16.msrb.mxu2 %v4438_v22  ;;  %4541 = vmatpush.bf16.msrb.mxu3 %v4441_v13 }
 0x390   : > { %v7113_v32 = vadd.f32 %v3695_v28, %v7062_v31  ;;  %v7116_v16 = vadd.f32 %v3708_v36, %v7065_v57 }
 0x392   : > { %v3671_v37 = vpop.f32.mrf.mxu0  ;;  %v3684_v21 = vpop.f32.mrf.mxu1 }
 0x393   : > { %v4572_v51 = vpop.permute.xlu0 %4571 }
 0x394   : > { %v4581_v59 = vsel %vm1532_vm8, %v4570_v46, %v4572_v51 }
 0x395   : > { %v4605_v26 = vsel %vm412_vm1, %v4581_v59, 0 }
 0x397   : > { %v3697_v29 = vpop.f32.mrf.mxu2  ;;  %v3710_v35 = vpop.f32.mrf.mxu3 }
 0x39a   : > { %v3784_v31 = vpop.f32.mrf.mxu0  ;;  %v3797_v57 = vpop.f32.mrf.mxu1 }
 0x39b   : > { %v7126_v42 = vadd.f32 %v3784_v31, %v7075_v15  ;;  %v7129_v55 = vadd.f32 %v3797_v57, %v7078_v53  ;;  %v4568_v15 = vpop.permute.xlu1 %4567  ;;  %v4574_v53 = vpop.permute.xlu2 %4573 }
 0x39c   : > { %5360 = vmatmul.msk.bf16.vlgmr.msra.gmra.mxu2 %vm408_vm2, %v5357_v43  ;;  %5361 = vmatmul.msk.bf16.vlgmr.msra.gmra.mxu3 %vm408_vm2, %v5357_v43  ;;  %v4579_v49 = vsel %vm1532_vm8, %v4566_v12, %v4568_v15  ;;  %v4580_v4 = vsel %vm1532_vm8, %v4568_v15, %v4570_v46  ;;  %v4582_v20 = vsel %vm1532_vm8, %v4572_v51, %v4574_v53  ;;  %v4729_v9 = vpop.permute.xlu0 %4728  ;;  %vm5023_vm8 = vcmask 9216  }
 0x39d   : > { %5358 = vmatmul.msk.bf16.vlgmr.msra.gmra.mxu0 %vm408_vm2, %v5357_v43  ;;  %5359 = vmatmul.msk.bf16.vlgmr.msra.gmra.mxu1 %vm408_vm2, %v5357_v43  ;;  %v4599_v3 = vsel %vm412_vm1, %v4579_v49, 0  ;;  %v4602_v17 = vsel %vm412_vm1, %v4580_v4, 0  ;;  %v4608_v6 = vsel %vm412_vm1, %v4582_v20, 0 }
 0x39e   : > { %4630 = vmatpush.bf16.msra.mxu1 %v4590_v52  ;;  %4643 = vmatpush.bf16.msra.mxu2 %v4593_v38 }
 0x39f   : > { %v3810_v39 = vpop.f32.mrf.mxu2  ;;  %v3823_v11 = vpop.f32.mrf.mxu3  ;;  %4656 = vmatpush.bf16.msra.mxu3 %v4596_v54  ;;  %4617 = vmatpush.bf16.msra.mxu0 %v4587_v47  ;;  %v4889_v54 = vld [vmem:[%s7312_s4] sm:$0x3] }
 0x3a0   : > { %v7140_v58 = vadd.f32 %v3810_v39, %v7089_v1  ;;  %v7143_v50 = vadd.f32 %v3823_v11, %v7092_v19  ;;  %v5447_v39 = vmov 0  }
 0x3a1   : > { %5421 = vset.pattern.permute.xlu0 %v5447_v39 }
 0x3a2   : > { %v3786_v56 = vpop.f32.mrf.mxu0  ;;  %v3799_v60 = vpop.f32.mrf.mxu1  ;;  %4892 = vperm.xlu0 %5421, %v4889_v54  }
 0x3a3   : > { %v4731_v8 = vpop.permute.xlu1 %4730  ;;  %v4725_v10 = vpop.permute.xlu2 %4724 }
 0x3a4   : > { %v4744_v22 = vsel %vm1700_vm9, %v4729_v9, %v4731_v8 }
 0x3a5   : > { %v4760_v21 = vsel %vm412_vm1, %v4744_v22, 0 }
 0x3a7   : > { %v3812_v2 = vpop.f32.mrf.mxu2  ;;  %v3825_v18 = vpop.f32.mrf.mxu3 }
 0x3aa   : > { %v3836_v61 = vpop.f32.mrf.mxu0  ;;  %v3849_v1 = vpop.f32.mrf.mxu1 }
 0x3ab   : > { %v7150_v19 = vadd.f32 %v3836_v61, %v7099_v24  ;;  %v7153_v44 = vadd.f32 %v3849_v1, %v7102_v0  ;;  %v4727_v0 = vpop.permute.xlu0 %4726  ;;  %v4733_v14 = vpop.permute.xlu1 %4732 }
 0x3ac   : > { %5364 = vmatmul.msk.bf16.vlgmr.msrb.gmra.mxu2 %vm408_vm2, %v5357_v43  ;;  %5365 = vmatmul.msk.bf16.vlgmr.msrb.gmra.mxu3 %vm408_vm2, %v5357_v43  ;;  %v4743_v13 = vsel %vm1700_vm9, %v4727_v0, %v4729_v9  ;;  %v4745_v28 = vsel %vm1700_vm9, %v4731_v8, %v4733_v14  ;;  %v4742_v36 = vsel %vm1700_vm9, %v4725_v10, %v4727_v0  ;;  %v4737_v35 = vpop.permute.xlu2 %4736 }
 0x3ad   : > { %5362 = vmatmul.msk.bf16.vlgmr.msrb.gmra.mxu0 %vm408_vm2, %v5357_v43  ;;  %5363 = vmatmul.msk.bf16.vlgmr.msrb.gmra.mxu1 %vm408_vm2, %v5357_v43  ;;  %v4757_v34 = vsel %vm412_vm1, %v4743_v13, 0  ;;  %v4763_v12 = vsel %vm412_vm1, %v4745_v28, 0  ;;  %v4754_v29 = vsel %vm412_vm1, %v4742_v36, 0 }
 0x3ae   : > { %4669 = vmatpush.bf16.msrb.mxu0 %v4599_v3  ;;  %4682 = vmatpush.bf16.msrb.mxu1 %v4602_v17  ;;  %v5375_v3 = vld [vmem:[%s7311_s3 + $0x1a] sm:$0x1] }
 0x3af   : > { %v3862_v7 = vpop.f32.mrf.mxu2  ;;  %v3875_v62 = vpop.f32.mrf.mxu3  ;;  %4695 = vmatpush.bf16.msrb.mxu2 %v4605_v26  ;;  %4708 = vmatpush.bf16.msrb.mxu3 %v4608_v6 }
 0x3b0   : > { %v7164_v23 = vadd.f32 %v3862_v7, %v7113_v32  ;;  %v7167_v25 = vadd.f32 %v3875_v62, %v7116_v16 }
 0x3b2   : > { %v3838_v63 = vpop.f32.mrf.mxu0  ;;  %v3851_v24 = vpop.f32.mrf.mxu1 }
 0x3b3   : > { %v4735_v57 = vpop.permute.xlu1 %4734 }
 0x3b4   : > { %v4746_v47 = vsel %vm1700_vm9, %v4733_v14, %v4735_v57  ;;  %v4747_v46 = vsel %vm1700_vm9, %v4735_v57, %v4737_v35 }
 0x3b5   : > { %v4766_v15 = vsel %vm412_vm1, %v4746_v47, 0  ;;  %v4769_v53 = vsel %vm412_vm1, %v4747_v46, 0 }
 0x3b7   : > { %v3864_v27 = vpop.f32.mrf.mxu2  ;;  %v3877_v5 = vpop.f32.mrf.mxu3 }
 0x3ba   : > { %v3951_v32 = vpop.f32.mrf.mxu0  ;;  %v3964_v16 = vpop.f32.mrf.mxu1 }
 0x3bb   : > { %v4046_v41 = vadd.f32 %v3951_v32, %v7126_v42  ;;  %v4047_v37 = vadd.f32 %v3964_v16, %v7129_v55  ;;  %v4739_v42 = vpop.permute.xlu0 %4738  ;;  %v4741_v55 = vpop.permute.xlu2 %4740 }
 0x3bc   : > { %5369 = vmatmul.msk.bf16.vlgmr.msra.gmra.mxu2 %vm408_vm2, %v5366_v30  ;;  %5370 = vmatmul.msk.bf16.vlgmr.msra.gmra.mxu3 %vm408_vm2, %v5366_v30  ;;  %v4748_v11 = vsel %vm1700_vm9, %v4737_v35, %v4739_v42 }
 0x3bd   : > { %5367 = vmatmul.msk.bf16.vlgmr.msra.gmra.mxu0 %vm408_vm2, %v5366_v30  ;;  %5368 = vmatmul.msk.bf16.vlgmr.msra.gmra.mxu1 %vm408_vm2, %v5366_v30  ;;  %v4772_v2 = vsel %vm412_vm1, %v4748_v11, 0 }
 0x3be   : > { %4797 = vmatpush.bf16.msra.mxu1 %v4757_v34  ;;  %4810 = vmatpush.bf16.msra.mxu2 %v4760_v21 }
 0x3bf   : > { %v3977_v33 = vpop.f32.mrf.mxu2  ;;  %v3990_v40 = vpop.f32.mrf.mxu3  ;;  %4823 = vmatpush.bf16.msra.mxu3 %v4763_v12  ;;  %4784 = vmatpush.bf16.msra.mxu0 %v4754_v29 }
 0x3c0   : > { %v4048_v43 = vadd.f32 %v3977_v33, %v7140_v58  ;;  %v4049_v48 = vadd.f32 %v3990_v40, %v7143_v50  ;;  %v4749_v58 = vsel %vm1700_vm9, %v4739_v42, %v4741_v55 }
 0x3c1   : > { %v4775_v18 = vsel %vm412_vm1, %v4749_v58, 0  ;;  %vm4918_vm1 = vcmask 1040384  }
 0x3c2   : > { %v3953_v45 = vpop.f32.mrf.mxu0  ;;  %v3966_v31 = vpop.f32.mrf.mxu1 }
 0x3c7   : > { %v3979_v38 = vpop.f32.mrf.mxu2  ;;  %v3992_v52 = vpop.f32.mrf.mxu3 }
 0x3ca   : > { %v4003_v50 = vpop.f32.mrf.mxu0  ;;  %v4016_v51 = vpop.f32.mrf.mxu1 }
 0x3cb   : > { %v4050_v56 = vadd.f32 %v4003_v50, %v7150_v19  ;;  %v4051_v60 = vadd.f32 %v4016_v51, %v7153_v44 }
 0x3cc   : > { %5373 = vmatmul.msk.bf16.vlgmr.msrb.gmra.mxu2 %vm408_vm2, %v5366_v30  ;;  %5374 = vmatmul.msk.bf16.vlgmr.msrb.gmra.mxu3 %vm408_vm2, %v5366_v30 }
 0x3cd   : > { %5371 = vmatmul.msk.bf16.vlgmr.msrb.gmra.mxu0 %vm408_vm2, %v5366_v30  ;;  %5372 = vmatmul.msk.bf16.vlgmr.msrb.gmra.mxu1 %vm408_vm2, %v5366_v30 }
 0x3ce   : > { %4836 = vmatpush.bf16.msrb.mxu0 %v4766_v15  ;;  %4849 = vmatpush.bf16.msrb.mxu1 %v4769_v53 }
 0x3cf   : > { %v4029_v49 = vpop.f32.mrf.mxu2  ;;  %v4042_v4 = vpop.f32.mrf.mxu3  ;;  %4862 = vmatpush.bf16.msrb.mxu2 %v4772_v2  ;;  %4875 = vmatpush.bf16.msrb.mxu3 %v4775_v18 }
 0x3d0   : > { %v4052_v59 = vadd.f32 %v4029_v49, %v7164_v23  ;;  %v4053_v20 = vadd.f32 %v4042_v4, %v7167_v25 }
 0x3d2   : > { %v4005_v61 = vpop.f32.mrf.mxu0  ;;  %v4018_v1 = vpop.f32.mrf.mxu1 }
 0x3d7   : > { %v4031_v19 = vpop.f32.mrf.mxu2  ;;  %v4044_v44 = vpop.f32.mrf.mxu3 }
 0x3da   : > { %v4118_v17 = vpop.f32.mrf.mxu0  ;;  %v4131_v9 = vpop.f32.mrf.mxu1 }
 0x3db   : > { %v4213_v26 = vadd.f32 %v4118_v17, %v4046_v41  ;;  %v4214_v6 = vadd.f32 %v4131_v9, %v4047_v37 }
 0x3dc   : > { %5378 = vmatmul.msk.bf16.vlgmr.msra.gmra.mxu2 %vm408_vm2, %v5375_v3  ;;  %5379 = vmatmul.msk.bf16.vlgmr.msra.gmra.mxu3 %vm408_vm2, %v5375_v3 }
 0x3dd   : > { %5376 = vmatmul.msk.bf16.vlgmr.msra.gmra.mxu0 %vm408_vm2, %v5375_v3  ;;  %5377 = vmatmul.msk.bf16.vlgmr.msra.gmra.mxu1 %vm408_vm2, %v5375_v3 }
 0x3df   : > { %v4144_v8 = vpop.f32.mrf.mxu2  ;;  %v4157_v7 = vpop.f32.mrf.mxu3 }
 0x3e0   : > { %v4215_v62 = vadd.f32 %v4144_v8, %v4048_v43  ;;  %v4216_v23 = vadd.f32 %v4157_v7, %v4049_v48 }
 0x3e2   : > { %v4120_v25 = vpop.f32.mrf.mxu0  ;;  %v4133_v10 = vpop.f32.mrf.mxu1 }
 0x3e7   : > { %v4146_v63 = vpop.f32.mrf.mxu2  ;;  %v4159_v24 = vpop.f32.mrf.mxu3 }
 0x3ea   : > { %v4170_v0 = vpop.f32.mrf.mxu0  ;;  %v4183_v14 = vpop.f32.mrf.mxu1 }
 0x3eb   : > { %v4217_v27 = vadd.f32 %v4170_v0, %v4050_v56  ;;  %v4218_v5 = vadd.f32 %v4183_v14, %v4051_v60 }
 0x3ec   : > { %5382 = vmatmul.msk.bf16.vlgmr.msrb.gmra.mxu2 %vm408_vm2, %v5375_v3  ;;  %5383 = vmatmul.msk.bf16.vlgmr.msrb.gmra.mxu3 %vm408_vm2, %v5375_v3 }
 0x3ed   : > { %5380 = vmatmul.msk.bf16.vlgmr.msrb.gmra.mxu0 %vm408_vm2, %v5375_v3  ;;  %5381 = vmatmul.msk.bf16.vlgmr.msrb.gmra.mxu1 %vm408_vm2, %v5375_v3  ;;  %vm4922_vm2 = vcmask 1042434  }
 0x3ef   : > { %v4196_v22 = vpop.f32.mrf.mxu2  ;;  %v4209_v13 = vpop.f32.mrf.mxu3 }
 0x3f0   : > { %v4219_v30 = vadd.f32 %v4196_v22, %v4052_v59  ;;  %v4220_v28 = vadd.f32 %v4209_v13, %v4053_v20 }
 0x3f2   : > { %v4172_v36 = vpop.f32.mrf.mxu0  ;;  %v4185_v32 = vpop.f32.mrf.mxu1 }
 0x3f7   : > { %v4198_v16 = vpop.f32.mrf.mxu2  ;;  %v4211_v41 = vpop.f32.mrf.mxu3 }
 0x3fa   : > { %v4285_v37 = vpop.f32.mrf.mxu0  ;;  %v4298_v21 = vpop.f32.mrf.mxu1 }
 0x3fb   : > { %v4380_v34 = vadd.f32 %v4285_v37, %v4213_v26  ;;  %v4381_v12 = vadd.f32 %v4298_v21, %v4214_v6 }
 0x3ff   : > { %v4311_v29 = vpop.f32.mrf.mxu2  ;;  %v4324_v35 = vpop.f32.mrf.mxu3 }
 0x400   : > { %v4382_v33 = vadd.f32 %v4311_v29, %v4215_v62  ;;  %v4383_v40 = vadd.f32 %v4324_v35, %v4216_v23 }
 0x402   : > { %v4287_v43 = vpop.f32.mrf.mxu0  ;;  %v4300_v48 = vpop.f32.mrf.mxu1 }
 0x407   : > { %v4313_v45 = vpop.f32.mrf.mxu2  ;;  %v4326_v31 = vpop.f32.mrf.mxu3 }
 0x40a   : > { %v4337_v57 = vpop.f32.mrf.mxu0  ;;  %v4350_v42 = vpop.f32.mrf.mxu1 }
 0x40b   : > { %v7218_v55 = vadd.f32 %v4337_v57, %v4217_v27  ;;  %v4385_v38 = vadd.f32 %v4350_v42, %v4218_v5  ;;  %v4942_v5 = vld [vmem:[%s328_s13] sm:$0xff] }
 0x40f   : > { %v4363_v52 = vpop.f32.mrf.mxu2  ;;  %v4376_v54 = vpop.f32.mrf.mxu3 }
 0x410   : > { %v7220_v47 = vadd.f32 %v4363_v52, %v4219_v30  ;;  %v7222_v46 = vadd.f32 %v4376_v54, %v4220_v28  ;;  %v4943_v30 = vunpack.c.l.bf16 %v4942_v5 }
 0x412   : > { %v4339_v39 = vpop.f32.mrf.mxu0  ;;  %v4352_v11 = vpop.f32.mrf.mxu1  ;;  %v4947_v32 = vperm.slane %v4943_v30, 0  ;;  %v4948_v16 = vperm.slane %v4943_v30, 2  ;;  %v4949_v43 = vperm.slane %v4943_v30, 4  ;;  %v4950_v48 = vperm.slane %v4943_v30, 6 }
 0x414   : > { %v4964_v29 = vperm.slane %v4948_v16, 0  ;;  %v7248_v35 = vpop.permute.xlu0 %4892  ;;  %v4965_v11 = vperm.slane %v4949_v43, 0 }
 0x417   : > { %v4365_v58 = vpop.f32.mrf.mxu2  ;;  %v4378_v50 = vpop.f32.mrf.mxu3 }
 0x418   : > { %v4966_v58 = vperm.slane %v4950_v48, 0  ;;  %v7252_v50 = vunpack.c.h.bf16 %v4942_v5 }
 0x41a   : > { %v4452_v51 = vpop.f32.mrf.mxu0  ;;  %v4465_v56 = vpop.f32.mrf.mxu1 }
 0x41b   : > { %v4547_v60 = vadd.f32 %v4452_v51, %v4380_v34  ;;  %v4548_v15 = vadd.f32 %v4465_v56, %v4381_v12  ;;  %v4963_v12 = vperm.slane %v4947_v32, 0 }
 0x41f   : > { %v4478_v53 = vpop.f32.mrf.mxu2  ;;  %v4491_v2 = vpop.f32.mrf.mxu3 }
 0x420   : > { %v4549_v18 = vadd.f32 %v4478_v53, %v4382_v33  ;;  %v4550_v49 = vadd.f32 %v4491_v2, %v4383_v40 }
 0x422   : > { %v4454_v4 = vpop.f32.mrf.mxu0  ;;  %v4467_v59 = vpop.f32.mrf.mxu1 }
 0x427   : > { %v4480_v20 = vpop.f32.mrf.mxu2  ;;  %v4493_v61 = vpop.f32.mrf.mxu3 }
 0x42a   : > { %v7224_v1 = vpop.f32.mrf.mxu0  ;;  %v4517_v19 = vpop.f32.mrf.mxu1 }
 0x42b   : > { %v7226_v44 = vadd.f32 %v4517_v19, %v4385_v38 }
 0x42f   : > { %v7228_v3 = vpop.f32.mrf.mxu2  ;;  %v7230_v17 = vpop.f32.mrf.mxu3 }
 0x432   : > { %v4506_v9 = vpop.f32.mrf.mxu0  ;;  %v4519_v26 = vpop.f32.mrf.mxu1 }
 0x437   : > { %v4532_v6 = vpop.f32.mrf.mxu2  ;;  %v4545_v8 = vpop.f32.mrf.mxu3 }
 0x43a   : > { %v4619_v7 = vpop.f32.mrf.mxu0  ;;  %v4632_v62 = vpop.f32.mrf.mxu1 }
 0x43b   : > { %v4714_v21 = vadd.f32 %v4619_v7, %v4547_v60  ;;  %v4715_v34 = vadd.f32 %v4632_v62, %v4548_v15  ;;  %v4551_v7 = vadd.f32 %v7224_v1, %v7218_v55 }
 0x43f   : > { %v4645_v23 = vpop.f32.mrf.mxu2  ;;  %v4658_v25 = vpop.f32.mrf.mxu3 }
 0x440   : > { %v4716_v57 = vadd.f32 %v4645_v23, %v4549_v18  ;;  %v4717_v39 = vadd.f32 %v4658_v25, %v4550_v49 }
 0x442   : > { %v4621_v10 = vpop.f32.mrf.mxu0  ;;  %v4634_v63 = vpop.f32.mrf.mxu1 }
 0x443   : > { %v4951_v63 = vperm.slane %v7252_v50, 0 }
 0x447   : > { %v4647_v24 = vpop.f32.mrf.mxu2  ;;  %v4660_v0 = vpop.f32.mrf.mxu3 }
 0x448   : > { %v4952_v24 = vperm.slane %v7252_v50, 2 }
 0x44a   : > { %v7236_v14 = vpop.f32.mrf.mxu0  ;;  %v7238_v27 = vpop.f32.mrf.mxu1 }
 0x44f   : > { %v7244_v22 = vpop.f32.mrf.mxu2  ;;  %v7246_v13 = vpop.f32.mrf.mxu3 }
 0x452   : > { %v4673_v28 = vpop.f32.mrf.mxu0  ;;  %v4686_v36 = vpop.f32.mrf.mxu1 }
 0x457   : > { %v4699_v41 = vpop.f32.mrf.mxu2  ;;  %v4712_v37 = vpop.f32.mrf.mxu3 }
 0x45a   : > { %v4786_v33 = vpop.f32.mrf.mxu0  ;;  %v4799_v40 = vpop.f32.mrf.mxu1 }
 0x45b   : > { %v4881_v45 = vadd.f32 %v4786_v33, %v4714_v21  ;;  %v4882_v31 = vadd.f32 %v4799_v40, %v4715_v34  ;;  %v4718_v34 = vadd.f32 %v7236_v14, %v4551_v7  ;;  %v4967_v33 = vperm.slane %v4951_v63, 0 }
 0x45c   : > { %v4954_v14 = vperm.slane %v7252_v50, 6 }
 0x45d   : > { %v4971_v42 = vmul.f32 %v4963_v12, %v4881_v45  ;;  %v4972_v38 = vmul.f32 %v4964_v29, %v4882_v31  ;;  %v4895_v52 = vadd.f32 %v7248_v35, %v4881_v45  ;;  %v4896_v54 = vadd.f32 %v7248_v35, %v4882_v31 }
 0x45e   : > { %v4719_v12 = vadd.f32 %v7238_v27, %v7226_v44  ;;  %v4968_v45 = vperm.slane %v4952_v24, 0  ;;  %v4553_v44 = vadd.f32 %v7228_v3, %v7220_v47  ;;  %v4554_v27 = vadd.f32 %v7230_v17, %v7222_v46 }
 0x45f   : > { %v4979_v51 = vsel %vm4926_vm0, %v4971_v42, 0.0  ;;  %v4996_v56 = vmul.f32 %v4971_v42, %v4971_v42  ;;  %v4980_v60 = vsel %vm4926_vm0, %v4972_v38, 0.0  ;;  %v4997_v15 = vmul.f32 %v4972_v38, %v4972_v38  ;;  %v4812_v53 = vpop.f32.mrf.mxu2  ;;  %v4825_v2 = vpop.f32.mrf.mxu3 }
 0x460   : > { %v4981_v18 = vadd.f32 %v4980_v60, %v4979_v51  ;;  %v4903_v4 = vpack.c.bf16 %v4896_v54, %v4895_v52  ;;  %v4883_v59 = vadd.f32 %v4812_v53, %v4716_v57  ;;  %v4884_v20 = vadd.f32 %v4825_v2, %v4717_v39 }
 0x461   : > { %v5004_v61 = vsel %vm4926_vm0, %v4996_v56, 0.0  ;;  %v5005_v49 = vsel %vm4926_vm0, %v4997_v15, 0.0  ;;  %v4953_v38 = vperm.slane %v7252_v50, 4  ;;  %v4720_v56 = vadd.f32 %v7244_v22, %v4553_v44 }
 0x462   : > { %v5006_v19 = vadd.f32 %v5005_v49, %v5004_v61  ;;  %v4897_v9 = vadd.f32 %v7248_v35, %v4883_v59  ;;  %v4973_v26 = vmul.f32 %v4965_v11, %v4883_v59  ;;  %v4788_v6 = vpop.f32.mrf.mxu0  ;;  %v4801_v8 = vpop.f32.mrf.mxu1  ;;  %v4898_v62 = vadd.f32 %v7248_v35, %v4884_v20 }
 0x463   : > { %v4974_v23 = vmul.f32 %v4966_v58, %v4884_v20  ;;  %v4911_v0 = vrot.slane %v4903_v4, 3  ;;  %v4721_v60 = vadd.f32 %v7246_v13, %v4554_v27  ;;  %v4969_v15 = vperm.slane %v4953_v38, 0 }
 0x464   : > { %v4982_v25 = vsel %vm4926_vm0, %v4973_v26, 0.0  ;;  %v4998_v10 = vmul.f32 %v4973_v26, %v4973_v26  ;;  %v4904_v30 = vpack.c.bf16 %v4898_v62, %v4897_v9  ;;  %v4970_v3 = vperm.slane %v4954_v14, 0 }
 0x465   : > { %v4983_v5 = vadd.f32 %v4982_v25, %v4981_v18  ;;  %v4999_v28 = vmul.f32 %v4974_v23, %v4974_v23  ;;  %v4984_v55 = vsel %vm4926_vm0, %v4974_v23, 0.0  ;;  %v4921_v40 = vsel %vm4918_vm1, %v4903_v4, %v4911_v0 }
 0x466   : > { %v5007_v36 = vsel %vm4926_vm0, %v4998_v10, 0.0  ;;  %v4912_v32 = vrot.slane %v4904_v30, 6  ;;  %v4913_v16 = vrot.slane %v4904_v30, 1 }
 0x467   : > { %v5008_v1 = vadd.f32 %v5007_v36, %v5006_v19  ;;  %v4985_v41 = vadd.f32 %v4984_v55, %v4983_v5  ;;  %v4814_v37 = vpop.f32.mrf.mxu2  ;;  %v4827_v21 = vpop.f32.mrf.mxu3  ;;  %v5009_v29 = vsel %vm4926_vm0, %v4999_v28, 0.0 }
 0x468   : > { %v4925_v43 = vsel %vm4922_vm2, %v4912_v32, %v4913_v16 }
 0x469   : > { %v5010_v48 = vadd.f32 %v5009_v29, %v5008_v1  ;;  %v7272_v31 = vsel %vm4926_vm0, %v4921_v40, %v4925_v43 }
 0x46a   : > { %v4838_v57 = vpop.f32.mrf.mxu0  ;;  %v4851_v42 = vpop.f32.mrf.mxu1 }
 0x46b   : > { %v4885_v52 = vadd.f32 %v4838_v57, %v4718_v34  ;;  %v4886_v54 = vadd.f32 %v4851_v42, %v4719_v12 }
 0x46d   : > { %v4899_v39 = vadd.f32 %v7248_v35, %v4885_v52  ;;  %v4975_v11 = vmul.f32 %v4967_v33, %v4885_v52  ;;  %v4900_v58 = vadd.f32 %v7248_v35, %v4886_v54  ;;  %v4976_v51 = vmul.f32 %v4968_v45, %v4886_v54 }
 0x46f   : > { %v4986_v53 = vsel %vm4926_vm0, %v4975_v11, 0.0  ;;  %v5000_v50 = vmul.f32 %v4975_v11, %v4975_v11  ;;  %v4905_v2 = vpack.c.bf16 %v4900_v58, %v4899_v39  ;;  %v4864_v18 = vpop.f32.mrf.mxu2  ;;  %v4877_v47 = vpop.f32.mrf.mxu3  ;;  %v5001_v46 = vmul.f32 %v4976_v51, %v4976_v51 }
 0x470   : > { %v4987_v4 = vadd.f32 %v4986_v53, %v4985_v41  ;;  %v4887_v17 = vadd.f32 %v4864_v18, %v4720_v56  ;;  %v4888_v59 = vadd.f32 %v4877_v47, %v4721_v60  ;;  %v4988_v61 = vsel %vm4926_vm0, %v4976_v51, 0.0 }
 0x471   : > { %v5011_v20 = vsel %vm4926_vm0, %v5000_v50, 0.0  ;;  %v5013_v26 = vsel %vm4926_vm0, %v5001_v46, 0.0  ;;  %v4914_v62 = vrot.slane %v4905_v2, 4  ;;  %v4915_v25 = vrot.slane %v4905_v2, 7 }
 0x472   : > { %v5012_v49 = vadd.f32 %v5011_v20, %v5010_v48  ;;  %v4989_v22 = vadd.f32 %v4988_v61, %v4987_v4  ;;  %v4901_v13 = vadd.f32 %v7248_v35, %v4887_v17  ;;  %v4840_v19 = vpop.f32.mrf.mxu0  ;;  %v4853_v9 = vpop.f32.mrf.mxu1  ;;  %v4977_v6 = vmul.f32 %v4969_v15, %v4887_v17 }
 0x473   : > { %v4902_v8 = vadd.f32 %v7248_v35, %v4888_v59  ;;  %v4978_v7 = vmul.f32 %v4970_v3, %v4888_v59  ;;  %v4931_v41 = vsel %vm4928_vm3, %v4914_v62, %v4915_v25 }
 0x474   : > { %v5014_v23 = vadd.f32 %v5013_v26, %v5012_v49  ;;  %v4990_v10 = vsel %vm4926_vm0, %v4977_v6, 0.0  ;;  %v5002_v63 = vmul.f32 %v4977_v6, %v4977_v6 }
 0x475   : > { %v4906_v24 = vpack.c.bf16 %v4902_v8, %v4901_v13  ;;  %v4991_v0 = vadd.f32 %v4990_v10, %v4989_v22  ;;  %v5003_v5 = vmul.f32 %v4978_v7, %v4978_v7  ;;  %v4992_v35 = vsel %vm4926_vm0, %v4978_v7, 0.0 }
 0x476   : > { %v5015_v30 = vsel %vm4926_vm0, %v5002_v63, 0.0 }
 0x477   : > { %v4916_v28 = vrot.slane %v4906_v24, 2  ;;  %v4917_v36 = vrot.slane %v4906_v24, 5  ;;  %v4866_v55 = vpop.f32.mrf.mxu2  ;;  %v4879_v1 = vpop.f32.mrf.mxu3  ;;  %v4993_v32 = vadd.f32 %v4992_v35, %v4991_v0  ;;  %v5016_v16 = vadd.f32 %v5015_v30, %v5014_v23 }
 0x478   : > { %v5017_v21 = vsel %vm4926_vm0, %v5003_v5, 0.0 }
 0x479   : > { %v4935_v37 = vsel %vm4932_vm4, %v4916_v28, %v4917_v36  ;;  %4994 = vadd.xlane.f32.xlu1 %v4993_v32  ;;  %v5018_v12 = vadd.f32 %v5017_v21, %v5016_v16 }
 0x47a   : > { %v4937_v34 = vsel %vm4936_vm5, %v4931_v41, %v4935_v37 }
 0x47b   : > { %v4939_v29 = vsel %vm4938_vm6, %v7272_v31, %v4937_v34  ;;  %5019 = vadd.xlane.f32.xlu2 %v5018_v12 }
 0x47c   : > { %4941 = vst [vmem:[%s333_s15] sm:$0xff] %v4939_v29 }
 0x4ec   : > { %v4995_v33 = vpop.xlane.xlu1 %4994 }
 0x4ee   : > { %v5020_v40 = vpop.xlane.xlu2 %5019 }
 0x4ef   : > { %v5022_v43 = vsel %vm5021_vm7, %v4995_v33, %v5020_v40 }
 0x4f0   : > { %5024 = vst.msk [vmem:[%s338_s24] sm:$0x3] %vm5023_vm8, %v5022_v43 }
 0x4f1 PF: > { %s17_s21 = sadd.s32 1, %s5428_s21  }
 0x4f2   : > { %p14_p7 = scmp.ge.s32.totalorder %s17_s21, 4  }
 0x4f4   :  { %16 = sbr.rel (!%p14_p7) target bundleno = 1 (0x1), region = 114 }

// kernel: synthesis_layer_forward.4
= control target key start
LH: loop header
LB: loop body
LE: loop exit
PB: predicated region body
PF: predicated region fallthrough
CT: control target
= control target key end

     0   :  { %v5628_v0 = vmov 0   ;;  %v5629_v3 = vmov 269488144   ;;  %vm118_vm0 = vcmask 1040384   ;;  %vm122_vm1 = vcmask 1042434   ;;  %s5633_s12 = smov 119   ;;  %s8118_s5 = inlined_call_operand.vmem [shape: f32[2,1], index: 5, kind: input, shape index: {}]   ;;  %s8119_s6 = inlined_call_operand.vmem [shape: f32[2,1], index: 6, kind: input, shape index: {}]   ;;  %s8120_s0 = inlined_call_operand.vmem [shape: bf16[2,2048], index: 0, kind: input, shape index: {}, may-alias: {0,1}]   ;;  %s8121_s1 = inlined_call_operand.vmem [shape: bf16[2,2048], index: 1, kind: input, shape index: {}, may-alias: {0,1}]   ;;  %s8122_s3 = inlined_call_operand.vmem [shape: bf16[27,2,2], index: 3, kind: input, shape index: {}]   ;;  %s8123_s4 = inlined_call_operand.vmem [shape: f32[2,1], index: 4, kind: input, shape index: {}]   ;;  %s8124_s2 = inlined_call_operand.vmem [shape: bf16[1,1024], index: 2, kind: input, shape index: {}]   ;;  %s8125_s7 = inlined_call_operand.vmem [shape: bf16[2,1024], index: 7, kind: output, shape index: {0}]   ;;  %s8126_s8 = inlined_call_operand.vmem [shape: f32[1,2,2], index: 8, kind: output, shape index: {1}]  }
   0x1   :  { %5625 = vset.pattern.permute.xlu0 %v5628_v0  ;;  %v53_v1 = vld [vmem:[%s8118_s5] sm:$0x3]  ;;  %5626 = vset.pattern.permute.xlu2 %v5628_v0  ;;  %v63_v4 = vunpack.c.l.s4 %v5629_v3  ;;  %v5363_v11 = vld [vmem:[%s8121_s1 + $0x8] sm:$0x3]  ;;  %vm126_vm2 = vcmask 1041408   ;;  %vm128_vm3 = vcmask 1044484  }
   0x2   :  { %60 = vperm.xlu0 %5625, %v53_v1   ;;  %v54_v2 = vld [vmem:[%s8119_s6] sm:$0x3]  ;;  %v143_v16 = vunpack.c.l.bf16 %v5363_v11  ;;  %vm132_vm4 = vcmask 1046534   ;;  %vm8128_vm5 = vcmask 1045508   ;;  %vm8127_vm6 = vcmask 1043456   ;;  %s5631_s1 = smov 126  }
   0x3   :  { %v64_v6 = vunpack.c.0.s8 %v63_v4  ;;  %v55_v7 = vld [vmem:[%s8120_s0] sm:$0xff]  ;;  %s5630_s0 = smov 127   ;;  %s5632_s6 = smov 120   ;;  %vm206_vm7 = vcmask 1039360   ;;  %vm215_vm8 = vcmask 15360   ;;  %vm523_vm9 = vcmask 1031168  }
   0x4   :  { %v56_v8 = vunpack.c.l.bf16 %v55_v7  ;;  %v57_v9 = vunpack.c.h.bf16 %v55_v7  ;;  %s5634_s13 = smov 118   ;;  %s5635_s16 = smov 112   ;;  %vm715_vm10 = vcmask 982016   ;;  %vm907_vm11 = vcmask 973824  }
   0x5   :  { %s5636_s19 = smov 111   ;;  %s5637_s20 = smov 110   ;;  %vm1099_vm12 = vcmask 965632   ;;  %vm1291_vm13 = vcmask 916480   ;;  %vm1483_vm14 = vcmask 908288   ;;  %vm1675_vm15 = vcmask 900096  }
   0x6   :  { %s5638_s23 = smov 64   ;;  %s5639_s26 = smov 63  }
   0x7   :  { %s5640_s29 = smov 62   ;;  %s5641_s30 = smov 56  }
   0x8   :  { %s5642_s11 = smov 55   ;;  %s5643_s15 = smov 54  }
   0x9   :  { %s5644_s21 = smov 48   ;;  %s5645_s22 = smov 47  }
   0xa   :  { %71 = vperm.xlu0 %5625, %v54_v2   ;;  %s5646_s25 = smov 46  }
  0x74   :  { %v61_v5 = vpop.permute.xlu0 %60 }
  0x75   :  { %v65_v10 = vperm.slane %v61_v5, %v64_v6 }
  0x77   :  { %v67_v13 = vmul.f32 %v65_v10, %v56_v8  ;;  %v68_v14 = vmul.f32 %v65_v10, %v57_v9  ;;  %v144_v21 = vmul.f32 %v143_v16, %v65_v10 }
  0x7c   :  { %v72_v12 = vpop.permute.xlu0 %71 }
  0x7d   :  { %v76_v15 = vperm.slane %v72_v12, %v64_v6 }
  0x7f   :  { %v78_v17 = vadd.f32 %v76_v15, %v67_v13  ;;  %v79_v18 = vadd.f32 %v76_v15, %v68_v14  ;;  %v145_v22 = vadd.f32 %v144_v21, %v76_v15 }
  0x81   :  { %v80_v19 = vmax.f32 %v78_v17, 0.0  ;;  %v81_v20 = vmax.f32 %v79_v18, 0.0  ;;  %v146_v23 = vmax.f32 %v145_v22, 0.0 }
  0x83   :  { %84 = vst [vmem:[#allocation1] ss:$4 sm:$0xff] %v80_v19 }
  0x84   :  { %86 = vst [vmem:[#allocation1 + $0x20] ss:$4 sm:$0xff] %v81_v20 }
  0x8a   :  { %v87_v24 = vld.sshfl [vmem:[#allocation1] sm:$0xff pattern:$0x73625140]  ;;  %v88_v25 = vld.sshfl [vmem:[#allocation1 + $0x8] sm:$0xff pattern:$0x73625140] }
  0x8b   :  { %v89_v26 = vld.sshfl [vmem:[#allocation1 + $0x10] sm:$0xff pattern:$0x73625140]  ;;  %v90_v27 = vld.sshfl [vmem:[#allocation1 + $0x18] sm:$0xff pattern:$0x73625140]  ;;  %v103_v28 = vpack.c.bf16 %v88_v25, %v87_v24 }
  0x8c   :  { %148 = vst [vmem:[#allocation1] ss:$4 sm:$0xff] %v146_v23  ;;  %v91_v29 = vld.sshfl [vmem:[#allocation1 + $0x20] sm:$0xff pattern:$0x73625140]  ;;  %v104_v30 = vpack.c.bf16 %v90_v27, %v89_v26 }
  0x8d   :  { %v92_v31 = vld.sshfl [vmem:[#allocation1 + $0x28] sm:$0xff pattern:$0x73625140]  ;;  %v93_v32 = vld.sshfl [vmem:[#allocation1 + $0x30] sm:$0xff pattern:$0x73625140] }
  0x8e   :  { %v94_v33 = vld.sshfl [vmem:[#allocation1 + $0x38] sm:$0xff pattern:$0x73625140]  ;;  %v105_v34 = vpack.c.bf16 %v92_v31, %v91_v29  ;;  %v111_v35 = vrot.slane %v103_v28, 3  ;;  %v112_v36 = vrot.slane %v104_v30, 6  ;;  %v113_v37 = vrot.slane %v104_v30, 1 }
  0x8f   :  { %v106_v38 = vpack.c.bf16 %v94_v33, %v93_v32 }
  0x90   :  { %v114_v39 = vrot.slane %v105_v34, 4  ;;  %v115_v40 = vrot.slane %v105_v34, 7  ;;  %v121_v41 = vsel %vm118_vm0, %v103_v28, %v111_v35  ;;  %v125_v42 = vsel %vm122_vm1, %v112_v36, %v113_v37 }
  0x91   :  { %v116_v43 = vrot.slane %v106_v38, 2  ;;  %v117_v44 = vrot.slane %v106_v38, 5  ;;  %v127_v45 = vsel %vm126_vm2, %v121_v41, %v125_v42 }
  0x92   :  { %v131_v46 = vsel %vm128_vm3, %v114_v39, %v115_v40 }
  0x93   :  { %v135_v47 = vsel %vm132_vm4, %v116_v43, %v117_v44  ;;  %v149_v48 = vld.sshfl [vmem:[#allocation1] sm:$0xff pattern:$0x73625140]  ;;  %v150_v49 = vld.sshfl [vmem:[#allocation1 + $0x8] sm:$0xff pattern:$0x73625140] }
  0x94   :  { %v137_v50 = vsel %vm8128_vm5, %v131_v46, %v135_v47  ;;  %v153_v51 = vpack.c.bf16 %v150_v49, %v149_v48  ;;  %vm2059_vm5 = vcmask 515072  }
  0x95   :  { %v5711_v52 = vsel %vm8127_vm6, %v127_v45, %v137_v50  ;;  %vm1867_vm6 = vcmask 523264  }
  0x96   :  { %141 = vst [vmem:[#allocation2] sm:$0xff] %v5711_v52  ;;  %v155_v53 = vrot.slane %v153_v51, 3 }
  0x97   :  { %167 = vst [vmem:[#allocation1] ss:$9 sm:$0xff] %v5711_v52 }
  0x98   :  { %v158_v54 = vsel %vm118_vm0, %v153_v51, %v155_v53 }
  0x99   :  { %160 = vst [vmem:[#allocation2 + $0x8] sm:$0x3] %v158_v54 }
  0x9e   :  { %v176_v55 = vld [vmem:[#allocation1 + $0x24] sm:$0xff]  ;;  %v172_v56 = vld [vmem:[#allocation1 + $0x12] sm:$0xff]  ;;  %v174_v59 = vld [vmem:[#allocation1 + $0x1b] sm:$0xff] }
  0x9f   :  { %v168_v57 = vld [vmem:[#allocation1] sm:$0xff]  ;;  %196 = vrot.lane.b32.xlu0 %v176_v55, %s5630_s0  ;;  %192 = vrot.lane.b32.xlu1 %v172_v56, %s5630_s0  ;;  %v178_v58 = vld [vmem:[#allocation1 + $0x2d] sm:$0xff]  ;;  %v180_v61 = vld [vmem:[#allocation1 + $0x36] sm:$0xff] }
  0xa0   :  { %188 = vrot.lane.b32.xlu2 %v168_v57, %s5630_s0  ;;  %v170_v60 = vld [vmem:[#allocation1 + $0x9] sm:$0xff]  ;;  %v182_v62 = vld [vmem:[#allocation1 + $0x3f] sm:$0xff] }
  0xa1   :  { %v165_v63 = vld [vmem:[#allocation2 + $0x8] sm:$0x1] }
  0xa2   :  { %185 = vst [vmem:[#allocation1] ss:$9 sm:$0xff] %v165_v63  ;;  %v482_v17 = vld [vmem:[#allocation2 + $0x8] sm:$0x1] }
  0xa3   :  { %v674_v27 = vld [vmem:[#allocation2 + $0x8] sm:$0x1] }
  0xa4   :  { %v866_v37 = vld [vmem:[#allocation2 + $0x8] sm:$0x1] }
  0xa5   :  { %v1058_v47 = vld [vmem:[#allocation2 + $0x8] sm:$0x1] }
  0xa6   :  { %v1250_v56 = vld [vmem:[#allocation2 + $0x8] sm:$0x1] }
  0xa7   :  { %198 = vrot.lane.b32.xlu0 %v178_v58, %s5630_s0  ;;  %194 = vrot.lane.b32.xlu1 %v174_v59, %s5630_s0 }
  0xa8   :  { %190 = vrot.lane.b32.xlu2 %v170_v60, %s5630_s0 }
  0xa9   :  { %v186_v0 = vld [vmem:[#allocation1] sm:$0xff] }
  0xaa   :  { %347 = vst [vmem:[#allocation1] ss:$9 sm:$0xff] %v5711_v52 }
  0xaf   :  { %200 = vrot.lane.b32.xlu1 %v180_v61, %s5630_s0  ;;  %v5787_v61 = vld [vmem:[%s8122_s3 + $0x1] sm:$0x1] }
  0xb0   :  { %202 = vrot.lane.b32.xlu2 %v182_v62, %s5630_s0 }
  0xb1   :  { %v5725_v1 = vld [vmem:[#allocation1] sm:$0xff]  ;;  %v5727_v2 = vld [vmem:[#allocation1 + $0x9] sm:$0xff]  ;;  %v5729_v3 = vld [vmem:[#allocation1 + $0x12] sm:$0xff] }
  0xb2   :  { %v5731_v4 = vld [vmem:[#allocation1 + $0x1b] sm:$0xff]  ;;  %v5733_v5 = vld [vmem:[#allocation1 + $0x24] sm:$0xff]  ;;  %v5735_v6 = vld [vmem:[#allocation1 + $0x2d] sm:$0xff] }
  0xb3   :  { %v5737_v7 = vld [vmem:[#allocation1 + $0x36] sm:$0xff]  ;;  %v5739_v8 = vld [vmem:[#allocation1 + $0x3f] sm:$0xff] }
  0xb4   :  { %484 = vst [vmem:[#allocation1] ss:$9 sm:$0xff] %v5711_v52 }
  0xb7   :  { %204 = vrot.lane.b32.xlu1 %v186_v0, %s5630_s0 }
  0xbb   :  { %v491_v9 = vld [vmem:[#allocation1 + $0x1b] sm:$0xff]  ;;  %v489_v10 = vld [vmem:[#allocation1 + $0x12] sm:$0xff]  ;;  %v493_v11 = vld [vmem:[#allocation1 + $0x24] sm:$0xff] }
  0xbc   :  { %511 = vrot.lane.b32.xlu0 %v491_v9, %s5631_s1  ;;  %509 = vrot.lane.b32.xlu2 %v489_v10, %s5631_s1  ;;  %v487_v12 = vld [vmem:[#allocation1 + $0x9] sm:$0xff]  ;;  %v485_v13 = vld [vmem:[#allocation1] sm:$0xff]  ;;  %v497_v16 = vld [vmem:[#allocation1 + $0x36] sm:$0xff] }
  0xbd   :  { %v495_v14 = vld [vmem:[#allocation1 + $0x2d] sm:$0xff]  ;;  %v499_v15 = vld [vmem:[#allocation1 + $0x3f] sm:$0xff] }
  0xbe   :  { %502 = vst [vmem:[#allocation1] ss:$9 sm:$0xff] %v482_v17 }
  0xbf   :  { %505 = vrot.lane.b32.xlu1 %v485_v13, %s5631_s1 }
  0xc4   :  { %513 = vrot.lane.b32.xlu0 %v493_v11, %s5631_s1  ;;  %507 = vrot.lane.b32.xlu2 %v487_v12, %s5631_s1 }
  0xc5   :  { %v503_v18 = vld [vmem:[#allocation1] sm:$0xff] }
  0xc6   :  { %676 = vst [vmem:[#allocation1] ss:$9 sm:$0xff] %v5711_v52 }
  0xc7   :  { %517 = vrot.lane.b32.xlu1 %v497_v16, %s5631_s1 }
  0xcc   :  { %515 = vrot.lane.b32.xlu0 %v495_v14, %s5631_s1  ;;  %519 = vrot.lane.b32.xlu2 %v499_v15, %s5631_s1 }
  0xcd   :  { %v683_v19 = vld [vmem:[#allocation1 + $0x1b] sm:$0xff]  ;;  %v681_v20 = vld [vmem:[#allocation1 + $0x12] sm:$0xff]  ;;  %v685_v21 = vld [vmem:[#allocation1 + $0x24] sm:$0xff] }
  0xce   :  { %v679_v22 = vld [vmem:[#allocation1 + $0x9] sm:$0xff]  ;;  %v677_v23 = vld [vmem:[#allocation1] sm:$0xff]  ;;  %v689_v26 = vld [vmem:[#allocation1 + $0x36] sm:$0xff] }
  0xcf   :  { %v687_v24 = vld [vmem:[#allocation1 + $0x2d] sm:$0xff]  ;;  %521 = vrot.lane.b32.xlu1 %v503_v18, %s5631_s1  ;;  %v691_v25 = vld [vmem:[#allocation1 + $0x3f] sm:$0xff] }
  0xd0   :  { %694 = vst [vmem:[#allocation1] ss:$9 sm:$0xff] %v674_v27 }
  0xd4   :  { %703 = vrot.lane.b32.xlu0 %v683_v19, %s5632_s6  ;;  %701 = vrot.lane.b32.xlu2 %v681_v20, %s5632_s6 }
  0xd7   :  { %697 = vrot.lane.b32.xlu1 %v677_v23, %s5632_s6  ;;  %v695_v28 = vld [vmem:[#allocation1] sm:$0xff] }
  0xd8   :  { %868 = vst [vmem:[#allocation1] ss:$9 sm:$0xff] %v5711_v52 }
  0xdc   :  { %705 = vrot.lane.b32.xlu0 %v685_v21, %s5632_s6  ;;  %699 = vrot.lane.b32.xlu2 %v679_v22, %s5632_s6  ;;  %v1442_v21 = vld [vmem:[#allocation2 + $0x8] sm:$0x1] }
  0xdf   :  { %709 = vrot.lane.b32.xlu1 %v689_v26, %s5632_s6  ;;  %v875_v29 = vld [vmem:[#allocation1 + $0x1b] sm:$0xff]  ;;  %v873_v30 = vld [vmem:[#allocation1 + $0x12] sm:$0xff]  ;;  %v877_v31 = vld [vmem:[#allocation1 + $0x24] sm:$0xff] }
  0xe0   :  { %v871_v32 = vld [vmem:[#allocation1 + $0x9] sm:$0xff]  ;;  %v869_v33 = vld [vmem:[#allocation1] sm:$0xff]  ;;  %v881_v36 = vld [vmem:[#allocation1 + $0x36] sm:$0xff] }
  0xe1   :  { %v879_v34 = vld [vmem:[#allocation1 + $0x2d] sm:$0xff]  ;;  %v883_v35 = vld [vmem:[#allocation1 + $0x3f] sm:$0xff] }
  0xe2   :  { %886 = vst [vmem:[#allocation1] ss:$9 sm:$0xff] %v866_v37 }
  0xe4   :  { %707 = vrot.lane.b32.xlu0 %v687_v24, %s5632_s6  ;;  %711 = vrot.lane.b32.xlu2 %v691_v25, %s5632_s6 }
  0xe7   :  { %713 = vrot.lane.b32.xlu1 %v695_v28, %s5632_s6 }
  0xe9   :  { %v887_v38 = vld [vmem:[#allocation1] sm:$0xff] }
  0xea   :  { %1060 = vst [vmem:[#allocation1] ss:$9 sm:$0xff] %v5711_v52 }
  0xec   :  { %895 = vrot.lane.b32.xlu0 %v875_v29, %s5633_s12  ;;  %893 = vrot.lane.b32.xlu2 %v873_v30, %s5633_s12 }
  0xef   :  { %889 = vrot.lane.b32.xlu1 %v869_v33, %s5633_s12  ;;  %v367_v33 = vsel %vm118_vm0, %v5733_v5, 0  ;;  %v361_v5 = vsel %vm118_vm0, %v5727_v2, 0  ;;  %v369_v2 = vsel %vm118_vm0, %v5735_v6, 0  ;;  %v365_v6 = vsel %vm118_vm0, %v5731_v4, 0 }
  0xf0   :  { %v371_v4 = vsel %vm118_vm0, %v5737_v7, 0 }
  0xf1   :  { %v1067_v39 = vld [vmem:[#allocation1 + $0x1b] sm:$0xff]  ;;  %v1065_v40 = vld [vmem:[#allocation1 + $0x12] sm:$0xff]  ;;  %v1069_v41 = vld [vmem:[#allocation1 + $0x24] sm:$0xff] }
  0xf2   :  { %v1063_v42 = vld [vmem:[#allocation1 + $0x9] sm:$0xff]  ;;  %v1061_v43 = vld [vmem:[#allocation1] sm:$0xff]  ;;  %v1073_v46 = vld [vmem:[#allocation1 + $0x36] sm:$0xff] }
  0xf3   :  { %v1071_v44 = vld [vmem:[#allocation1 + $0x2d] sm:$0xff]  ;;  %v1075_v45 = vld [vmem:[#allocation1 + $0x3f] sm:$0xff] }
  0xf4   :  { %897 = vrot.lane.b32.xlu0 %v877_v31, %s5633_s12  ;;  %891 = vrot.lane.b32.xlu2 %v871_v32, %s5633_s12  ;;  %1078 = vst [vmem:[#allocation1] ss:$9 sm:$0xff] %v1058_v47  ;;  %v359_v31 = vsel %vm118_vm0, %v5725_v1, 0 }
  0xf7   :  { %901 = vrot.lane.b32.xlu1 %v881_v36, %s5633_s12 }
  0xfa   :  { %v189_v48 = vpop.permute.xlu2 %188 }
  0xfb   :  { %v1079_v49 = vld [vmem:[#allocation1] sm:$0xff] }
  0xfc   :  { %899 = vrot.lane.b32.xlu0 %v879_v34, %s5633_s12  ;;  %903 = vrot.lane.b32.xlu2 %v883_v35, %s5633_s12  ;;  %1252 = vst [vmem:[#allocation1] ss:$9 sm:$0xff] %v5711_v52 }
  0xff   :  { %905 = vrot.lane.b32.xlu1 %v887_v38, %s5633_s12  ;;  %v363_v38 = vsel %vm118_vm0, %v5729_v3, 0 }
 0x102   :  { %v191_v50 = vpop.permute.xlu2 %190 }
 0x103   :  { %v207_v51 = vsel %vm206_vm7, %v189_v48, %v191_v50  ;;  %v1259_v53 = vld [vmem:[#allocation1 + $0x1b] sm:$0xff]  ;;  %v1257_v54 = vld [vmem:[#allocation1 + $0x12] sm:$0xff]  ;;  %v5775_v55 = vld [vmem:[#allocation1 + $0x24] sm:$0xff] }
 0x104   :  { %1087 = vrot.lane.b32.xlu0 %v1067_v39, %s5634_s13  ;;  %1085 = vrot.lane.b32.xlu2 %v1065_v40, %s5634_s13  ;;  %v220_v57 = vsel %vm118_vm0, %v207_v51, 0  ;;  %v5780_v58 = vld [vmem:[#allocation1 + $0x9] sm:$0xff]  ;;  %v1253_v59 = vld [vmem:[#allocation1] sm:$0xff]  ;;  %v5791_v63 = vld [vmem:[#allocation1 + $0x36] sm:$0xff] }
 0x105   :  { %v5782_v60 = vld [vmem:[#allocation1 + $0x2d] sm:$0xff]  ;;  %250 = vmatpush.bf16.msra.mxu0 %v220_v57  ;;  %v5789_v62 = vld [vmem:[#allocation1 + $0x3f] sm:$0xff] }
 0x106   :  { %1270 = vst [vmem:[#allocation1] ss:$9 sm:$0xff] %v1250_v56  ;;  %v1634_v48 = vld [vmem:[#allocation2 + $0x8] sm:$0x1] }
 0x107   :  { %1081 = vrot.lane.b32.xlu1 %v1061_v43, %s5634_s13 }
 0x108   :  { %5365 = vmatmul.msk.bf16.vlgmr.msra.gmra.mxu0 %vm215_vm8, %v5787_v61 }
 0x10a   :  { %v203_v30 = vpop.permute.xlu2 %202 }
 0x10c   :  { %1089 = vrot.lane.b32.xlu0 %v1069_v41, %s5634_s13  ;;  %1083 = vrot.lane.b32.xlu2 %v1063_v42, %s5634_s13 }
 0x10d   :  { %v5798_v0 = vld [vmem:[#allocation1] sm:$0xff] }
 0x10e   :  { %1444 = vst [vmem:[#allocation1] ss:$9 sm:$0xff] %v5711_v52 }
 0x10f   :  { %1093 = vrot.lane.b32.xlu1 %v1073_v46, %s5634_s13 }
 0x111   :  { %v197_v9 = vpop.permute.xlu0 %196  ;;  %v193_v10 = vpop.permute.xlu1 %192 }
 0x112   :  { %v208_v11 = vsel %vm206_vm7, %v191_v50, %v193_v10 }
 0x113   :  { %v223_v12 = vsel %vm118_vm0, %v208_v11, 0 }
 0x114   :  { %1091 = vrot.lane.b32.xlu0 %v1071_v44, %s5634_s13  ;;  %1095 = vrot.lane.b32.xlu2 %v1075_v45, %s5634_s13 }
 0x115   :  { %263 = vmatpush.bf16.msra.mxu1 %v223_v12  ;;  %v5806_v13 = vld [vmem:[#allocation1 + $0x1b] sm:$0xff]  ;;  %v5808_v14 = vld [vmem:[#allocation1 + $0x12] sm:$0xff]  ;;  %v5810_v15 = vld [vmem:[#allocation1 + $0x24] sm:$0xff] }
 0x116   :  { %v5812_v16 = vld [vmem:[#allocation1 + $0x9] sm:$0xff]  ;;  %v5814_v17 = vld [vmem:[#allocation1] sm:$0xff]  ;;  %v5821_v20 = vld [vmem:[#allocation1 + $0x36] sm:$0xff]  ;;  %v5859_v39 = vpop.permute.xlu2 %509 }
 0x117   :  { %v5816_v18 = vld [vmem:[#allocation1 + $0x2d] sm:$0xff]  ;;  %1097 = vrot.lane.b32.xlu1 %v1079_v49, %s5634_s13  ;;  %v5819_v19 = vld [vmem:[#allocation1 + $0x3f] sm:$0xff] }
 0x118   :  { %5366 = vmatmul.msk.bf16.vlgmr.msra.gmra.mxu1 %vm215_vm8, %v5787_v61  ;;  %1462 = vst [vmem:[#allocation1] ss:$9 sm:$0xff] %v1442_v21 }
 0x119   :  { %v199_v22 = vpop.permute.xlu0 %198  ;;  %v195_v23 = vpop.permute.xlu1 %194 }
 0x11a   :  { %v209_v24 = vsel %vm206_vm7, %v193_v10, %v195_v23  ;;  %v210_v25 = vsel %vm206_vm7, %v195_v23, %v197_v9  ;;  %v211_v26 = vsel %vm206_vm7, %v197_v9, %v199_v22 }
 0x11b   :  { %v226_v27 = vsel %vm118_vm0, %v209_v24, 0  ;;  %v229_v28 = vsel %vm118_vm0, %v210_v25, 0  ;;  %v232_v29 = vsel %vm118_vm0, %v211_v26, 0 }
 0x11c   :  { %1279 = vrot.lane.b32.xlu0 %v1259_v53, %s5635_s16  ;;  %1277 = vrot.lane.b32.xlu2 %v1257_v54, %s5635_s16  ;;  %v5894_v53 = vld [vmem:[%s8122_s3] sm:$0x1] }
 0x11d   :  { %276 = vmatpush.bf16.msra.mxu2 %v226_v27  ;;  %289 = vmatpush.bf16.msra.mxu3 %v229_v28 }
 0x11e   :  { %302 = vmatpush.bf16.msrb.mxu0 %v232_v29  ;;  %v508_v54 = vpop.permute.xlu2 %507 }
 0x11f   :  { %1273 = vrot.lane.b32.xlu1 %v1253_v59, %s5635_s16  ;;  %v5836_v32 = vld [vmem:[#allocation1] sm:$0xff]  ;;  %v525_v7 = vsel %vm523_vm9, %v508_v54, %v5859_v39 }
 0x120   :  { %5367 = vmatmul.msk.bf16.vlgmr.msra.gmra.mxu2 %vm215_vm8, %v5787_v61  ;;  %5368 = vmatmul.msk.bf16.vlgmr.msra.gmra.mxu3 %vm215_vm8, %v5787_v61  ;;  %1636 = vst [vmem:[#allocation1] ss:$9 sm:$0xff] %v5711_v52 }
 0x121   :  { %5369 = vmatmul.msk.bf16.vlgmr.msrb.gmra.mxu0 %vm215_vm8, %v5787_v61  ;;  %v201_v1 = vpop.permute.xlu1 %200 }
 0x122   :  { %382 = vmatpush.bf16.msra.mxu0 %v359_v31  ;;  %v212_v34 = vsel %vm206_vm7, %v199_v22, %v201_v1  ;;  %v213_v35 = vsel %vm206_vm7, %v201_v1, %v203_v30 }
 0x123   :  { %v235_v36 = vsel %vm118_vm0, %v212_v34, 0  ;;  %v238_v37 = vsel %vm118_vm0, %v213_v35, 0 }
 0x124   :  { %1281 = vrot.lane.b32.xlu0 %v5775_v55, %s5635_s16  ;;  %1275 = vrot.lane.b32.xlu2 %v5780_v58, %s5635_s16  ;;  %v373_v55 = vsel %vm118_vm0, %v5739_v8, 0 }
 0x125   :  { %315 = vmatpush.bf16.msrb.mxu1 %v235_v36  ;;  %328 = vmatpush.bf16.msrb.mxu2 %v238_v37 }
 0x126   :  { %434 = vmatpush.bf16.msrb.mxu0 %v367_v33  ;;  %v520_v9 = vpop.permute.xlu2 %519 }
 0x127   :  { %1285 = vrot.lane.b32.xlu1 %v5791_v63, %s5635_s16  ;;  %v5863_v40 = vld [vmem:[#allocation1 + $0x1b] sm:$0xff]  ;;  %v5865_v41 = vld [vmem:[#allocation1 + $0x12] sm:$0xff]  ;;  %v5867_v42 = vld [vmem:[#allocation1 + $0x24] sm:$0xff] }
 0x128   :  { %5370 = vmatmul.msk.bf16.vlgmr.msrb.gmra.mxu1 %vm215_vm8, %v5787_v61  ;;  %v5873_v3 = vld [vmem:[#allocation1 + $0x9] sm:$0xff]  ;;  %v5875_v43 = vld [vmem:[#allocation1] sm:$0xff]  ;;  %v5881_v47 = vld [vmem:[#allocation1 + $0x36] sm:$0xff] }
 0x129   :  { %395 = vmatpush.bf16.msra.mxu1 %v361_v5  ;;  %408 = vmatpush.bf16.msra.mxu2 %v363_v38  ;;  %v5877_v44 = vld [vmem:[#allocation1 + $0x2d] sm:$0xff]  ;;  %v205_v45 = vpop.permute.xlu1 %204  ;;  %v5879_v46 = vld [vmem:[#allocation1 + $0x3f] sm:$0xff] }
 0x12a   :  { %v214_v49 = vsel %vm206_vm7, %v203_v30, %v205_v45  ;;  %1654 = vst [vmem:[#allocation1] ss:$9 sm:$0xff] %v1634_v48  ;;  %v2018_v38 = vld [vmem:[#allocation2 + $0x8] sm:$0x1] }
 0x12b   :  { %v241_v50 = vsel %vm118_vm0, %v214_v49, 0 }
 0x12c   :  { %1283 = vrot.lane.b32.xlu0 %v5782_v60, %s5635_s16  ;;  %1287 = vrot.lane.b32.xlu2 %v5789_v62, %s5635_s16  ;;  %v539_v60 = vsel %vm118_vm0, %v525_v7, 0 }
 0x12d   :  { %447 = vmatpush.bf16.msrb.mxu1 %v369_v2  ;;  %341 = vmatpush.bf16.msrb.mxu3 %v241_v50 }
 0x12e   :  { %v512_v51 = vpop.permute.xlu0 %511  ;;  %v702_v27 = vpop.permute.xlu2 %701 }
 0x12f   :  { %1289 = vrot.lane.b32.xlu1 %v5798_v0, %s5635_s16  ;;  %v526_v21 = vsel %vm523_vm9, %v5859_v39, %v512_v51 }
 0x130   :  { %5371 = vmatmul.msk.bf16.vlgmr.msrb.gmra.mxu2 %vm215_vm8, %v5787_v61  ;;  %5372 = vmatmul.msk.bf16.vlgmr.msrb.gmra.mxu3 %vm215_vm8, %v5787_v61 }
 0x131   :  { %421 = vmatpush.bf16.msra.mxu3 %v365_v6  ;;  %460 = vmatpush.bf16.msrb.mxu2 %v371_v4  ;;  %v506_v56 = vpop.permute.xlu1 %505  ;;  %v5908_v57 = vld [vmem:[#allocation1] sm:$0xff] }
 0x132   :  { %5373 = vmatmul.msk.bf16.vlgmr.msra.gmra.mxu0 %vm215_vm8, %v5894_v53  ;;  %v524_v58 = vsel %vm523_vm9, %v506_v56, %v508_v54  ;;  %1828 = vst [vmem:[#allocation1] ss:$9 sm:$0xff] %v5711_v52 }
 0x133   :  { %v536_v59 = vsel %vm118_vm0, %v524_v58, 0 }
 0x134   :  { %1471 = vrot.lane.b32.xlu0 %v5806_v13, %s5636_s19  ;;  %1469 = vrot.lane.b32.xlu2 %v5808_v14, %s5636_s19 }
 0x135   :  { %473 = vmatpush.bf16.msrb.mxu3 %v373_v55  ;;  %566 = vmatpush.bf16.msra.mxu0 %v536_v59 }
 0x136   :  { %v514_v8 = vpop.permute.xlu0 %513  ;;  %v700_v39 = vpop.permute.xlu2 %699 }
 0x137   :  { %1465 = vrot.lane.b32.xlu1 %v5814_v17, %s5636_s19  ;;  %v1826_v17 = vld [vmem:[#allocation2 + $0x8] sm:$0x1]  ;;  %v527_v22 = vsel %vm523_vm9, %v512_v51, %v514_v8  ;;  %v717_v49 = vsel %vm715_vm10, %v700_v39, %v702_v27 }
 0x138   :  { %5374 = vmatmul.msk.bf16.vlgmr.msra.gmra.mxu1 %vm215_vm8, %v5894_v53  ;;  %v731_v51 = vsel %vm118_vm0, %v717_v49, 0 }
 0x139   :  { %579 = vmatpush.bf16.msra.mxu1 %v539_v60  ;;  %v518_v61 = vpop.permute.xlu1 %517  ;;  %v5924_v62 = vld [vmem:[#allocation1 + $0x1b] sm:$0xff]  ;;  %v5926_v63 = vld [vmem:[#allocation1 + $0x12] sm:$0xff]  ;;  %v5928_v0 = vld [vmem:[#allocation1 + $0x24] sm:$0xff] }
 0x13a   :  { %v5930_v10 = vld [vmem:[#allocation1 + $0x9] sm:$0xff]  ;;  %v5932_v11 = vld [vmem:[#allocation1] sm:$0xff]  ;;  %v5938_v14 = vld [vmem:[#allocation1 + $0x36] sm:$0xff]  ;;  %v530_v35 = vsel %vm523_vm9, %v518_v61, %v520_v9 }
 0x13b   :  { %v5934_v12 = vld [vmem:[#allocation1 + $0x2d] sm:$0xff]  ;;  %v5936_v13 = vld [vmem:[#allocation1 + $0x3f] sm:$0xff]  ;;  %v554_v45 = vsel %vm118_vm0, %v530_v35, 0 }
 0x13c   :  { %1473 = vrot.lane.b32.xlu0 %v5810_v15, %s5636_s19  ;;  %1467 = vrot.lane.b32.xlu2 %v5812_v16, %s5636_s19  ;;  %1846 = vst [vmem:[#allocation1] ss:$9 sm:$0xff] %v1826_v17  ;;  %v542_v15 = vsel %vm118_vm0, %v526_v21, 0  ;;  %v545_v16 = vsel %vm118_vm0, %v527_v22, 0 }
 0x13e   :  { %v516_v23 = vpop.permute.xlu0 %515 }
 0x13f   :  { %v528_v24 = vsel %vm523_vm9, %v514_v8, %v516_v23  ;;  %1477 = vrot.lane.b32.xlu1 %v5821_v20, %s5636_s19  ;;  %v529_v28 = vsel %vm523_vm9, %v516_v23, %v518_v61  ;;  %v2210_v8 = vld [vmem:[#allocation2 + $0x8] sm:$0x1] }
 0x140   :  { %5375 = vmatmul.msk.bf16.vlgmr.msra.gmra.mxu2 %vm215_vm8, %v5894_v53  ;;  %5376 = vmatmul.msk.bf16.vlgmr.msra.gmra.mxu3 %vm215_vm8, %v5894_v53  ;;  %v548_v25 = vsel %vm118_vm0, %v528_v24, 0  ;;  %v551_v30 = vsel %vm118_vm0, %v529_v28, 0 }
 0x141   :  { %592 = vmatpush.bf16.msra.mxu2 %v542_v15  ;;  %605 = vmatpush.bf16.msra.mxu3 %v545_v16  ;;  %v522_v26 = vpop.permute.xlu1 %521  ;;  %v6080_v16 = vld [vmem:[%s8122_s3 + $0x3] sm:$0x1] }
 0x142   :  { %5377 = vmatmul.msk.bf16.vlgmr.msrb.gmra.mxu0 %vm215_vm8, %v5894_v53  ;;  %v531_v36 = vsel %vm523_vm9, %v520_v9, %v522_v26 }
 0x143   :  { %618 = vmatpush.bf16.msrb.mxu0 %v548_v25  ;;  %v5959_v20 = vld [vmem:[#allocation1] sm:$0xff]  ;;  %v557_v2 = vsel %vm118_vm0, %v531_v36, 0  ;;  %v2402_v36 = vld [vmem:[#allocation2 + $0x8] sm:$0x1] }
 0x144   :  { %1475 = vrot.lane.b32.xlu0 %v5816_v18, %s5636_s19  ;;  %1479 = vrot.lane.b32.xlu2 %v5819_v19, %s5636_s19  ;;  %2020 = vst [vmem:[#allocation1] ss:$9 sm:$0xff] %v5711_v52 }
 0x146   :  { %v704_v29 = vpop.permute.xlu0 %703 }
 0x147   :  { %1481 = vrot.lane.b32.xlu1 %v5836_v32, %s5636_s19 }
 0x148   :  { %5378 = vmatmul.msk.bf16.vlgmr.msrb.gmra.mxu1 %vm215_vm8, %v5894_v53 }
 0x149   :  { %631 = vmatpush.bf16.msrb.mxu1 %v551_v30  ;;  %v698_v19 = vpop.permute.xlu1 %697 }
 0x14b   :  { %v5972_v31 = vld [vmem:[#allocation1 + $0x1b] sm:$0xff]  ;;  %v5974_v18 = vld [vmem:[#allocation1 + $0x12] sm:$0xff]  ;;  %v5976_v33 = vld [vmem:[#allocation1 + $0x24] sm:$0xff] }
 0x14c   :  { %1663 = vrot.lane.b32.xlu0 %v5863_v40, %s5637_s20  ;;  %1661 = vrot.lane.b32.xlu2 %v5865_v41, %s5637_s20  ;;  %v5982_v32 = vld [vmem:[#allocation1 + $0x9] sm:$0xff]  ;;  %v5984_v1 = vld [vmem:[#allocation1] sm:$0xff]  ;;  %v5992_v5 = vld [vmem:[#allocation1 + $0x36] sm:$0xff]  ;;  %v716_v40 = vsel %vm715_vm10, %v698_v19, %v700_v39 }
 0x14d   :  { %v5986_v34 = vld [vmem:[#allocation1 + $0x2d] sm:$0xff]  ;;  %v5990_v37 = vld [vmem:[#allocation1 + $0x3f] sm:$0xff] }
 0x14e   :  { %2038 = vst [vmem:[#allocation1] ss:$9 sm:$0xff] %v2018_v38  ;;  %v6000_v41 = vld [vmem:[%s8122_s3 + $0x2] sm:$0x1]  ;;  %v706_v48 = vpop.permute.xlu0 %705 }
 0x14f   :  { %1657 = vrot.lane.b32.xlu1 %v5875_v43, %s5637_s20  ;;  %v728_v43 = vsel %vm118_vm0, %v716_v40, 0  ;;  %v719_v54 = vsel %vm715_vm10, %v704_v29, %v706_v48 }
 0x150   :  { %5379 = vmatmul.msk.bf16.vlgmr.msrb.gmra.mxu2 %vm215_vm8, %v5894_v53  ;;  %5380 = vmatmul.msk.bf16.vlgmr.msrb.gmra.mxu3 %vm215_vm8, %v5894_v53  ;;  %v737_v61 = vsel %vm118_vm0, %v719_v54, 0 }
 0x151   :  { %644 = vmatpush.bf16.msrb.mxu2 %v554_v45  ;;  %657 = vmatpush.bf16.msrb.mxu3 %v557_v2  ;;  %v710_v6 = vpop.permute.xlu1 %709 }
 0x152   :  { %5382 = vmatmul.msk.bf16.vlgmr.msra.gmra.mxu0 %vm215_vm8, %v6000_v41 }
 0x153   :  { %758 = vmatpush.bf16.msra.mxu0 %v728_v43 }
 0x154   :  { %1665 = vrot.lane.b32.xlu0 %v5867_v42, %s5637_s20  ;;  %1659 = vrot.lane.b32.xlu2 %v5873_v3, %s5637_s20  ;;  %v712_v42 = vpop.permute.xlu2 %711  ;;  %v718_v3 = vsel %vm715_vm10, %v702_v27, %v704_v29 }
 0x155   :  { %v6016_v50 = vld [vmem:[#allocation1] sm:$0xff]  ;;  %v734_v60 = vsel %vm118_vm0, %v718_v3, 0 }
 0x156   :  { %2212 = vst [vmem:[#allocation1] ss:$9 sm:$0xff] %v5711_v52  ;;  %v708_v53 = vpop.permute.xlu0 %707 }
 0x157   :  { %1669 = vrot.lane.b32.xlu1 %v5881_v47, %s5637_s20  ;;  %v721_v21 = vsel %vm715_vm10, %v708_v53, %v710_v6 }
 0x158   :  { %5383 = vmatmul.msk.bf16.vlgmr.msra.gmra.mxu1 %vm215_vm8, %v6000_v41  ;;  %v743_v24 = vsel %vm118_vm0, %v721_v21, 0 }
 0x159   :  { %771 = vmatpush.bf16.msra.mxu1 %v731_v51  ;;  %v714_v9 = vpop.permute.xlu1 %713 }
 0x15c   :  { %1667 = vrot.lane.b32.xlu0 %v5877_v44, %s5637_s20  ;;  %1671 = vrot.lane.b32.xlu2 %v5879_v46, %s5637_s20  ;;  %v720_v44 = vsel %vm715_vm10, %v706_v48, %v708_v53  ;;  %v894_v17 = vpop.permute.xlu2 %893 }
 0x15d   :  { %v6030_v47 = vld [vmem:[#allocation1 + $0x1b] sm:$0xff]  ;;  %v6032_v4 = vld [vmem:[#allocation1 + $0x12] sm:$0xff]  ;;  %v6034_v55 = vld [vmem:[#allocation1 + $0x24] sm:$0xff] }
 0x15e   :  { %v6036_v56 = vld [vmem:[#allocation1 + $0x9] sm:$0xff]  ;;  %v6038_v58 = vld [vmem:[#allocation1] sm:$0xff]  ;;  %v6047_v7 = vld [vmem:[#allocation1 + $0x36] sm:$0xff]  ;;  %v896_v23 = vpop.permute.xlu0 %895 }
 0x15f   :  { %v6040_v59 = vld [vmem:[#allocation1 + $0x2d] sm:$0xff]  ;;  %1673 = vrot.lane.b32.xlu1 %v5908_v57, %s5637_s20  ;;  %v6045_v46 = vld [vmem:[#allocation1 + $0x3f] sm:$0xff]  ;;  %v740_v57 = vsel %vm118_vm0, %v720_v44, 0 }
 0x160   :  { %5384 = vmatmul.msk.bf16.vlgmr.msra.gmra.mxu2 %vm215_vm8, %v6000_v41  ;;  %5385 = vmatmul.msk.bf16.vlgmr.msra.gmra.mxu3 %vm215_vm8, %v6000_v41  ;;  %2230 = vst [vmem:[#allocation1] ss:$9 sm:$0xff] %v2210_v8 }
 0x161   :  { %784 = vmatpush.bf16.msra.mxu2 %v734_v60  ;;  %797 = vmatpush.bf16.msra.mxu3 %v737_v61  ;;  %v2594_v60 = vld [vmem:[#allocation2 + $0x8] sm:$0x1] }
 0x162   :  { %5386 = vmatmul.msk.bf16.vlgmr.msrb.gmra.mxu0 %vm215_vm8, %v6000_v41 }
 0x163   :  { %810 = vmatpush.bf16.msrb.mxu0 %v740_v57 }
 0x164   :  { %1855 = vrot.lane.b32.xlu0 %v5924_v62, %s5638_s23  ;;  %1853 = vrot.lane.b32.xlu2 %v5926_v63, %s5638_s23  ;;  %v890_v62 = vpop.permute.xlu1 %889  ;;  %v722_v63 = vsel %vm715_vm10, %v710_v6, %v712_v42  ;;  %v892_v15 = vpop.permute.xlu2 %891 }
 0x165   :  { %v908_v25 = vsel %vm907_vm11, %v890_v62, %v892_v15  ;;  %v746_v28 = vsel %vm118_vm0, %v722_v63, 0  ;;  %v909_v40 = vsel %vm907_vm11, %v892_v15, %v894_v17 }
 0x166   :  { %v898_v38 = vpop.permute.xlu0 %897  ;;  %v920_v39 = vsel %vm118_vm0, %v908_v25, 0  ;;  %v923_v2 = vsel %vm118_vm0, %v909_v40, 0 }
 0x167   :  { %1849 = vrot.lane.b32.xlu1 %v5932_v11, %s5638_s23  ;;  %v6065_v22 = vld [vmem:[#allocation1] sm:$0xff]  ;;  %v723_v11 = vsel %vm715_vm10, %v712_v42, %v714_v9 }
 0x168   :  { %5387 = vmatmul.msk.bf16.vlgmr.msrb.gmra.mxu1 %vm215_vm8, %v6000_v41  ;;  %2404 = vst [vmem:[#allocation1] ss:$9 sm:$0xff] %v5711_v52  ;;  %v749_v27 = vsel %vm118_vm0, %v723_v11, 0 }
 0x169   :  { %823 = vmatpush.bf16.msrb.mxu1 %v743_v24 }
 0x16c   :  { %1857 = vrot.lane.b32.xlu0 %v5928_v0, %s5638_s23  ;;  %1851 = vrot.lane.b32.xlu2 %v5930_v10, %s5638_s23  ;;  %v904_v48 = vpop.permute.xlu2 %903 }
 0x16f   :  { %1861 = vrot.lane.b32.xlu1 %v5938_v14, %s5638_s23  ;;  %v6085_v0 = vld [vmem:[#allocation1 + $0x1b] sm:$0xff]  ;;  %v6087_v26 = vld [vmem:[#allocation1 + $0x12] sm:$0xff]  ;;  %v6089_v10 = vld [vmem:[#allocation1 + $0x24] sm:$0xff] }
 0x170   :  { %5388 = vmatmul.msk.bf16.vlgmr.msrb.gmra.mxu2 %vm215_vm8, %v6000_v41  ;;  %5389 = vmatmul.msk.bf16.vlgmr.msrb.gmra.mxu3 %vm215_vm8, %v6000_v41  ;;  %v6097_v29 = vld [vmem:[#allocation1 + $0x9] sm:$0xff]  ;;  %v6099_v30 = vld [vmem:[#allocation1] sm:$0xff]  ;;  %v6105_v35 = vld [vmem:[#allocation1 + $0x36] sm:$0xff]  ;;  %v902_v41 = vpop.permute.xlu1 %901 }
 0x171   :  { %v6101_v14 = vld [vmem:[#allocation1 + $0x2d] sm:$0xff]  ;;  %836 = vmatpush.bf16.msrb.mxu2 %v746_v28  ;;  %849 = vmatpush.bf16.msrb.mxu3 %v749_v27  ;;  %v6103_v19 = vld [vmem:[#allocation1 + $0x3f] sm:$0xff] }
 0x172   :  { %5391 = vmatmul.msk.bf16.vlgmr.msra.gmra.mxu0 %vm215_vm8, %v6080_v16  ;;  %2422 = vst [vmem:[#allocation1] ss:$9 sm:$0xff] %v2402_v36 }
 0x173   :  { %950 = vmatpush.bf16.msra.mxu0 %v920_v39 }
 0x174   :  { %1859 = vrot.lane.b32.xlu0 %v5934_v12, %s5638_s23  ;;  %1863 = vrot.lane.b32.xlu2 %v5936_v13, %s5638_s23  ;;  %v900_v12 = vpop.permute.xlu0 %899  ;;  %v910_v13 = vsel %vm907_vm11, %v894_v17, %v896_v23  ;;  %v1086_v61 = vpop.permute.xlu2 %1085 }
 0x175   :  { %v912_v43 = vsel %vm907_vm11, %v898_v38, %v900_v12  ;;  %v913_v9 = vsel %vm907_vm11, %v900_v12, %v902_v41 }
 0x176   :  { %v935_v21 = vsel %vm118_vm0, %v913_v9, 0 }
 0x177   :  { %1865 = vrot.lane.b32.xlu1 %v5959_v20, %s5638_s23  ;;  %v911_v20 = vsel %vm907_vm11, %v896_v23, %v898_v38  ;;  %v2786_v38 = vld [vmem:[#allocation2 + $0x8] sm:$0x1] }
 0x178   :  { %5392 = vmatmul.msk.bf16.vlgmr.msra.gmra.mxu1 %vm215_vm8, %v6080_v16  ;;  %v929_v49 = vsel %vm118_vm0, %v911_v20, 0  ;;  %v906_v42 = vpop.permute.xlu1 %905 }
 0x179   :  { %963 = vmatpush.bf16.msra.mxu1 %v923_v2  ;;  %v6120_v45 = vld [vmem:[#allocation1] sm:$0xff] }
 0x17a   :  { %2596 = vst [vmem:[#allocation1] ss:$9 sm:$0xff] %v5711_v52 }
 0x17c   :  { %2047 = vrot.lane.b32.xlu0 %v5972_v31, %s5639_s26  ;;  %2045 = vrot.lane.b32.xlu2 %v5974_v18, %s5639_s26  ;;  %v926_v31 = vsel %vm118_vm0, %v910_v13, 0  ;;  %v1088_v17 = vpop.permute.xlu0 %1087  ;;  %v1084_v62 = vpop.permute.xlu2 %1083 }
 0x17d   :  { %v1101_v39 = vsel %vm1099_vm12, %v1084_v62, %v1086_v61  ;;  %v1102_v20 = vsel %vm1099_vm12, %v1086_v61, %v1088_v17 }
 0x17f   :  { %2041 = vrot.lane.b32.xlu1 %v5984_v1, %s5639_s26  ;;  %v932_v1 = vsel %vm118_vm0, %v912_v43, 0 }
 0x180   :  { %5393 = vmatmul.msk.bf16.vlgmr.msra.gmra.mxu2 %vm215_vm8, %v6080_v16  ;;  %5394 = vmatmul.msk.bf16.vlgmr.msra.gmra.mxu3 %vm215_vm8, %v6080_v16 }
 0x181   :  { %976 = vmatpush.bf16.msra.mxu2 %v926_v31  ;;  %989 = vmatpush.bf16.msra.mxu3 %v929_v49  ;;  %v6138_v18 = vld [vmem:[#allocation1 + $0x1b] sm:$0xff]  ;;  %v6140_v6 = vld [vmem:[#allocation1 + $0x12] sm:$0xff]  ;;  %v6142_v51 = vld [vmem:[#allocation1 + $0x24] sm:$0xff] }
 0x182   :  { %5395 = vmatmul.msk.bf16.vlgmr.msrb.gmra.mxu0 %vm215_vm8, %v6080_v16  ;;  %v6147_v53 = vld [vmem:[#allocation1 + $0x9] sm:$0xff]  ;;  %v6149_v3 = vld [vmem:[#allocation1] sm:$0xff]  ;;  %v6155_v8 = vld [vmem:[#allocation1 + $0x36] sm:$0xff] }
 0x183   :  { %v6151_v54 = vld [vmem:[#allocation1 + $0x2d] sm:$0xff]  ;;  %1002 = vmatpush.bf16.msrb.mxu0 %v932_v1  ;;  %v6153_v44 = vld [vmem:[#allocation1 + $0x3f] sm:$0xff] }
 0x184   :  { %2049 = vrot.lane.b32.xlu0 %v5976_v33, %s5639_s26  ;;  %2043 = vrot.lane.b32.xlu2 %v5982_v32, %s5639_s26  ;;  %2614 = vst [vmem:[#allocation1] ss:$9 sm:$0xff] %v2594_v60  ;;  %v1082_v33 = vpop.permute.xlu1 %1081  ;;  %v914_v32 = vsel %vm907_vm11, %v902_v41, %v904_v48  ;;  %v1090_v15 = vpop.permute.xlu0 %1089 }
 0x185   :  { %v6162_v57 = vpop.f32.mrf.mxu0  ;;  %v1100_v63 = vsel %vm1099_vm12, %v1082_v33, %v1084_v62  ;;  %v938_v11 = vsel %vm118_vm0, %v914_v32, 0  ;;  %v1096_v12 = vpop.permute.xlu2 %1095  ;;  %v1103_v43 = vsel %vm1099_vm12, %v1088_v17, %v1090_v15 }
 0x187   :  { %2053 = vrot.lane.b32.xlu1 %v5992_v5, %s5639_s26  ;;  %v915_v5 = vsel %vm907_vm11, %v904_v48, %v906_v42 }
 0x188   :  { %5396 = vmatmul.msk.bf16.vlgmr.msrb.gmra.mxu1 %vm215_vm8, %v6080_v16 }
 0x189   :  { %1015 = vmatpush.bf16.msrb.mxu1 %v935_v21 }
 0x18b   :  { %v6169_v23 = vld [vmem:[#allocation1] sm:$0xff] }
 0x18c   :  { %2051 = vrot.lane.b32.xlu0 %v5986_v34, %s5639_s26  ;;  %2055 = vrot.lane.b32.xlu2 %v5990_v37, %s5639_s26  ;;  %2788 = vst [vmem:[#allocation1] ss:$9 sm:$0xff] %v5711_v52  ;;  %v6184_v34 = vld [vmem:[%s8122_s3 + $0x4] sm:$0x1]  ;;  %v941_v37 = vsel %vm118_vm0, %v915_v5, 0  ;;  %v1092_v13 = vpop.permute.xlu0 %1091 }
 0x18d   :  { %v254_v24 = vpop.f32.mrf.mxu0  ;;  %v1104_v49 = vsel %vm1099_vm12, %v1090_v15, %v1092_v13  ;;  %v6250_v61 = vpop.permute.xlu2 %1277 }
 0x18e   :  { %v1124_v1 = vsel %vm118_vm0, %v1104_v49, 0 }
 0x18f   :  { %2057 = vrot.lane.b32.xlu1 %v6016_v50, %s5639_s26  ;;  %v1112_v50 = vsel %vm118_vm0, %v1100_v63, 0 }
 0x190   :  { %5397 = vmatmul.msk.bf16.vlgmr.msrb.gmra.mxu2 %vm215_vm8, %v6080_v16  ;;  %5398 = vmatmul.msk.bf16.vlgmr.msrb.gmra.mxu3 %vm215_vm8, %v6080_v16 }
 0x191   :  { %1028 = vmatpush.bf16.msrb.mxu2 %v938_v11  ;;  %1041 = vmatpush.bf16.msrb.mxu3 %v941_v37  ;;  %v2978_v37 = vld [vmem:[#allocation2 + $0x8] sm:$0x1] }
 0x192   :  { %5400 = vmatmul.msk.bf16.vlgmr.msra.gmra.mxu0 %vm215_vm8, %v6184_v34 }
 0x193   :  { %1142 = vmatpush.bf16.msra.mxu0 %v1112_v50  ;;  %v6195_v25 = vld [vmem:[#allocation1 + $0x1b] sm:$0xff]  ;;  %v6197_v27 = vld [vmem:[#allocation1 + $0x12] sm:$0xff]  ;;  %v6199_v28 = vld [vmem:[#allocation1 + $0x24] sm:$0xff] }
 0x194   :  { %2239 = vrot.lane.b32.xlu0 %v6030_v47, %s5640_s29  ;;  %2237 = vrot.lane.b32.xlu2 %v6032_v4, %s5640_s29  ;;  %v6205_v16 = vld [vmem:[#allocation1 + $0x9] sm:$0xff]  ;;  %v6207_v36 = vld [vmem:[#allocation1] sm:$0xff]  ;;  %v6216_v48 = vld [vmem:[#allocation1 + $0x36] sm:$0xff]  ;;  %v1094_v47 = vpop.permute.xlu1 %1093  ;;  %v1115_v4 = vsel %vm118_vm0, %v1101_v39, 0  ;;  %v6277_v11 = vpop.permute.xlu0 %1279 }
 0x195   :  { %v6210_v40 = vpop.f32.mrf.mxu1  ;;  %v6212_v41 = vld [vmem:[#allocation1 + $0x2d] sm:$0xff]  ;;  %v6214_v2 = vld [vmem:[#allocation1 + $0x3f] sm:$0xff]  ;;  %v1105_v9 = vsel %vm1099_vm12, %v1092_v13, %v1094_v47 }
 0x196   :  { %2806 = vst [vmem:[#allocation1] ss:$9 sm:$0xff] %v2786_v38  ;;  %v1127_v15 = vsel %vm118_vm0, %v1105_v9, 0 }
 0x197   :  { %2233 = vrot.lane.b32.xlu1 %v6038_v58, %s5640_s29 }
 0x198   :  { %5401 = vmatmul.msk.bf16.vlgmr.msra.gmra.mxu1 %vm215_vm8, %v6184_v34 }
 0x199   :  { %1155 = vmatpush.bf16.msra.mxu1 %v1115_v4 }
 0x19c   :  { %2241 = vrot.lane.b32.xlu0 %v6034_v55, %s5640_s29  ;;  %2235 = vrot.lane.b32.xlu2 %v6036_v56, %s5640_s29  ;;  %v1118_v55 = vsel %vm118_vm0, %v1102_v20, 0  ;;  %v1121_v56 = vsel %vm118_vm0, %v1103_v43, 0  ;;  %v1276_v20 = vpop.permute.xlu2 %1275 }
 0x19d   :  { %v267_v58 = vpop.f32.mrf.mxu1  ;;  %v6229_v31 = vld [vmem:[#allocation1] sm:$0xff] }
 0x19e   :  { %2980 = vst [vmem:[#allocation1] ss:$9 sm:$0xff] %v5711_v52  ;;  %v6233_v42 = vpop.f32.mrf.mxu0  ;;  %v1098_v52 = vpop.permute.xlu1 %1097 }
 0x19f   :  { %2245 = vrot.lane.b32.xlu1 %v6047_v7, %s5640_s29  ;;  %v1107_v4 = vsel %vm1099_vm12, %v1096_v12, %v1098_v52 }
 0x1a0   :  { %5402 = vmatmul.msk.bf16.vlgmr.msra.gmra.mxu2 %vm215_vm8, %v6184_v34  ;;  %5403 = vmatmul.msk.bf16.vlgmr.msra.gmra.mxu3 %vm215_vm8, %v6184_v34 }
 0x1a1   :  { %1168 = vmatpush.bf16.msra.mxu2 %v1118_v55  ;;  %1181 = vmatpush.bf16.msra.mxu3 %v1121_v56  ;;  %v1282_v55 = vpop.permute.xlu0 %1281 }
 0x1a2   :  { %5404 = vmatmul.msk.bf16.vlgmr.msrb.gmra.mxu0 %vm215_vm8, %v6184_v34 }
 0x1a3   :  { %1194 = vmatpush.bf16.msrb.mxu0 %v1124_v1  ;;  %v6246_v7 = vpop.f32.mrf.mxu2  ;;  %v6248_v60 = vpop.f32.mrf.mxu3 }
 0x1a4   :  { %2243 = vrot.lane.b32.xlu0 %v6040_v59, %s5640_s29  ;;  %2247 = vrot.lane.b32.xlu2 %v6045_v46, %s5640_s29 }
 0x1a5   :  { %v6257_v17 = vpop.f32.mrf.mxu1  ;;  %v6259_v21 = vld [vmem:[#allocation1 + $0x1b] sm:$0xff]  ;;  %v6261_v33 = vld [vmem:[#allocation1 + $0x12] sm:$0xff]  ;;  %v6263_v32 = vld [vmem:[#allocation1 + $0x24] sm:$0xff] }
 0x1a6   :  { %v6265_v5 = vld [vmem:[#allocation1 + $0x9] sm:$0xff]  ;;  %v6267_v24 = vld [vmem:[#allocation1] sm:$0xff]  ;;  %v306_v59 = vpop.f32.mrf.mxu0  ;;  %v6275_v63 = vld [vmem:[#allocation1 + $0x36] sm:$0xff]  ;;  %v1274_v39 = vpop.permute.xlu1 %1273 }
 0x1a7   :  { %v6269_v62 = vld [vmem:[#allocation1 + $0x2d] sm:$0xff]  ;;  %2249 = vrot.lane.b32.xlu1 %v6065_v22, %s5640_s29  ;;  %v6273_v46 = vld [vmem:[#allocation1 + $0x3f] sm:$0xff]  ;;  %v1106_v22 = vsel %vm1099_vm12, %v1094_v47, %v1096_v12  ;;  %v1292_v43 = vsel %vm1291_vm13, %v1274_v39, %v1276_v20 }
 0x1a8   :  { %5405 = vmatmul.msk.bf16.vlgmr.msrb.gmra.mxu1 %vm215_vm8, %v6184_v34  ;;  %2998 = vst [vmem:[#allocation1] ss:$9 sm:$0xff] %v2978_v37  ;;  %v5627_v12 = vld [vmem:[#allocation2] sm:$0xff]  ;;  %v1304_v56 = vsel %vm118_vm0, %v1292_v43, 0 }
 0x1a9   :  { %1207 = vmatpush.bf16.msrb.mxu1 %v1127_v15 }
 0x1ab   :  { %v280_v50 = vpop.f32.mrf.mxu2  ;;  %v293_v38 = vpop.f32.mrf.mxu3 }
 0x1ac   :  { %2431 = vrot.lane.b32.xlu0 %v6085_v0, %s5641_s30  ;;  %2429 = vrot.lane.b32.xlu2 %v6087_v26, %s5641_s30  ;;  %v6294_v0 = vld [vmem:[%s8122_s3 + $0x5] sm:$0x1]  ;;  %v1133_v26 = vsel %vm118_vm0, %v1107_v4, 0  ;;  %v3170_v4 = vld [vmem:[#allocation2 + $0x8] sm:$0x1] }
 0x1ad   :  { %v319_v13 = vpop.f32.mrf.mxu1 }
 0x1ae   :  { %v1288_v13 = vpop.permute.xlu2 %1287 }
 0x1af   :  { %v384_v58 = vpop.f32.mrf.mxu0  ;;  %2425 = vrot.lane.b32.xlu1 %v6099_v30, %s5641_s30  ;;  %v6296_v49 = vld [vmem:[#allocation1] sm:$0xff]  ;;  %v1130_v30 = vsel %vm118_vm0, %v1106_v22, 0 }
 0x1b0   :  { %v6300_v47 = vadd.f32 %v384_v58, %v6162_v57  ;;  %5406 = vmatmul.msk.bf16.vlgmr.msrb.gmra.mxu2 %vm215_vm8, %v6184_v34  ;;  %5407 = vmatmul.msk.bf16.vlgmr.msrb.gmra.mxu3 %vm215_vm8, %v6184_v34  ;;  %3172 = vst [vmem:[#allocation1] ss:$9 sm:$0xff] %v5627_v12  ;;  %v1293_v34 = vsel %vm1291_vm13, %v1276_v20, %v6250_v61  ;;  %v1284_v58 = vpop.permute.xlu0 %1283 }
 0x1b1   :  { %1220 = vmatpush.bf16.msrb.mxu2 %v1130_v30  ;;  %1233 = vmatpush.bf16.msrb.mxu3 %v1133_v26  ;;  %v1294_v26 = vsel %vm1291_vm13, %v6250_v61, %v6277_v11  ;;  %v1295_v30 = vsel %vm1291_vm13, %v6277_v11, %v1282_v55 }
 0x1b2   :  { %5409 = vmatmul.msk.bf16.vlgmr.msra.gmra.mxu0 %vm215_vm8, %v6294_v0 }
 0x1b3   :  { %1334 = vmatpush.bf16.msra.mxu0 %v1304_v56  ;;  %v6310_v57 = vpop.f32.mrf.mxu2  ;;  %v6312_v52 = vpop.f32.mrf.mxu3 }
 0x1b4   :  { %2433 = vrot.lane.b32.xlu0 %v6089_v10, %s5641_s30  ;;  %2427 = vrot.lane.b32.xlu2 %v6097_v29, %s5641_s30  ;;  %v6331_v10 = vpop.permute.xlu1 %1285  ;;  %v1307_v29 = vsel %vm118_vm0, %v1293_v34, 0  ;;  %v1296_v34 = vsel %vm1291_vm13, %v1282_v55, %v1284_v58 }
 0x1b5   :  { %v397_v1 = vpop.f32.mrf.mxu1 }
 0x1b6   :  { %v6321_v9 = vadd.f32 %v397_v1, %v6210_v40 }
 0x1b7   :  { %v386_v59 = vpop.f32.mrf.mxu0  ;;  %2437 = vrot.lane.b32.xlu1 %v6105_v35, %s5641_s30  ;;  %v6325_v37 = vld [vmem:[#allocation1 + $0x1b] sm:$0xff]  ;;  %v6327_v15 = vld [vmem:[#allocation1 + $0x12] sm:$0xff]  ;;  %v6329_v50 = vld [vmem:[#allocation1 + $0x24] sm:$0xff] }
 0x1b8   :  { %5410 = vmatmul.msk.bf16.vlgmr.msra.gmra.mxu1 %vm215_vm8, %v6294_v0  ;;  %v6336_v38 = vld [vmem:[#allocation1 + $0x9] sm:$0xff]  ;;  %v6338_v40 = vld [vmem:[#allocation1] sm:$0xff]  ;;  %v6344_v22 = vld [vmem:[#allocation1 + $0x36] sm:$0xff] }
 0x1b9   :  { %v6340_v39 = vld [vmem:[#allocation1 + $0x2d] sm:$0xff]  ;;  %1347 = vmatpush.bf16.msra.mxu1 %v1307_v29  ;;  %v6342_v35 = vld [vmem:[#allocation1 + $0x3f] sm:$0xff]  ;;  %v6372_v29 = vpop.permute.xlu2 %1469 }
 0x1ba   :  { %3190 = vst [vmem:[#allocation1] ss:$9 sm:$0xff] %v3170_v4 }
 0x1bb   :  { %v332_v20 = vpop.f32.mrf.mxu2  ;;  %v345_v43 = vpop.f32.mrf.mxu3 }
 0x1bc   :  { %2435 = vrot.lane.b32.xlu0 %v6101_v14, %s5641_s30  ;;  %2439 = vrot.lane.b32.xlu2 %v6103_v19, %s5641_s30  ;;  %v1310_v14 = vsel %vm118_vm0, %v1294_v26, 0  ;;  %v1313_v19 = vsel %vm118_vm0, %v1295_v30, 0  ;;  %v1290_v11 = vpop.permute.xlu1 %1289 }
 0x1bd   :  { %v399_v56 = vpop.f32.mrf.mxu1 }
 0x1bf   :  { %v436_v1 = vpop.f32.mrf.mxu0  ;;  %2441 = vrot.lane.b32.xlu1 %v6120_v45, %s5641_s30  ;;  %v1316_v45 = vsel %vm118_vm0, %v1296_v34, 0 }
 0x1c0   :  { %v6359_v59 = vadd.f32 %v436_v1, %v6233_v42  ;;  %5411 = vmatmul.msk.bf16.vlgmr.msra.gmra.mxu2 %vm215_vm8, %v6294_v0  ;;  %5412 = vmatmul.msk.bf16.vlgmr.msra.gmra.mxu3 %vm215_vm8, %v6294_v0 }
 0x1c1   :  { %1360 = vmatpush.bf16.msra.mxu2 %v1310_v14  ;;  %1373 = vmatpush.bf16.msra.mxu3 %v1313_v19  ;;  %v6367_v61 = vld [vmem:[#allocation1] sm:$0xff] }
 0x1c2   :  { %5413 = vmatmul.msk.bf16.vlgmr.msrb.gmra.mxu0 %vm215_vm8, %v6294_v0  ;;  %3364 = vst [vmem:[#allocation1] ss:$9 sm:$0xff] %v5627_v12  ;;  %v1297_v12 = vsel %vm1291_vm13, %v1284_v58, %v6331_v10 }
 0x1c3   :  { %1386 = vmatpush.bf16.msrb.mxu0 %v1316_v45  ;;  %v410_v42 = vpop.f32.mrf.mxu2  ;;  %v423_v55 = vpop.f32.mrf.mxu3  ;;  %v3362_v45 = vld [vmem:[#allocation2 + $0x8] sm:$0x1] }
 0x1c4   :  { %2623 = vrot.lane.b32.xlu0 %v6138_v18, %s5642_s11  ;;  %2621 = vrot.lane.b32.xlu2 %v6140_v6, %s5642_s11  ;;  %v6379_v4 = vadd.f32 %v410_v42, %v6246_v7  ;;  %v6382_v20 = vadd.f32 %v423_v55, %v6248_v60  ;;  %v6391_v18 = vpop.permute.xlu0 %1471  ;;  %v1319_v6 = vsel %vm118_vm0, %v1297_v12, 0  ;;  %v1466_v42 = vpop.permute.xlu1 %1465  ;;  %v1298_v55 = vsel %vm1291_vm13, %v6331_v10, %v1288_v13 }
 0x1c5   :  { %v449_v43 = vpop.f32.mrf.mxu1  ;;  %v1299_v12 = vsel %vm1291_vm13, %v1288_v13, %v1290_v11  ;;  %v1322_v13 = vsel %vm118_vm0, %v1298_v55, 0 }
 0x1c6   :  { %v6387_v26 = vadd.f32 %v449_v43, %v6257_v17 }
 0x1c7   :  { %v438_v30 = vpop.f32.mrf.mxu0  ;;  %2617 = vrot.lane.b32.xlu1 %v6149_v3, %s5642_s11 }
 0x1c8   :  { %5414 = vmatmul.msk.bf16.vlgmr.msrb.gmra.mxu1 %vm215_vm8, %v6294_v0  ;;  %v1468_v30 = vpop.permute.xlu2 %1467 }
 0x1c9   :  { %1399 = vmatpush.bf16.msrb.mxu1 %v1319_v6  ;;  %v6396_v7 = vld [vmem:[#allocation1 + $0x1b] sm:$0xff]  ;;  %v6398_v60 = vld [vmem:[#allocation1 + $0x12] sm:$0xff]  ;;  %v6400_v58 = vld [vmem:[#allocation1 + $0x24] sm:$0xff]  ;;  %v1484_v6 = vsel %vm1483_vm14, %v1466_v42, %v1468_v30 }
 0x1ca   :  { %v6402_v17 = vld [vmem:[#allocation1 + $0x9] sm:$0xff]  ;;  %v6404_v56 = vld [vmem:[#allocation1] sm:$0xff]  ;;  %v6410_v19 = vld [vmem:[#allocation1 + $0x36] sm:$0xff]  ;;  %v1496_v11 = vsel %vm118_vm0, %v1484_v6, 0 }
 0x1cb   :  { %v6406_v34 = vld [vmem:[#allocation1 + $0x2d] sm:$0xff]  ;;  %v412_v3 = vpop.f32.mrf.mxu2  ;;  %v425_v1 = vpop.f32.mrf.mxu3  ;;  %v6408_v14 = vld [vmem:[#allocation1 + $0x3f] sm:$0xff] }
 0x1cc   :  { %2625 = vrot.lane.b32.xlu0 %v6142_v51, %s5642_s11  ;;  %2619 = vrot.lane.b32.xlu2 %v6147_v53, %s5642_s11  ;;  %3382 = vst [vmem:[#allocation1] ss:$9 sm:$0xff] %v3362_v45  ;;  %v6425_v51 = vld [vmem:[%s8122_s3 + $0x6] sm:$0x1]  ;;  %v1325_v53 = vsel %vm118_vm0, %v1299_v12, 0  ;;  %v6439_v1 = vld [vmem:[#allocation2 + $0x1] sm:$0xff]  ;;  %v1485_v12 = vsel %vm1483_vm14, %v1468_v30, %v6372_v29 }
 0x1cd   :  { %v451_v43 = vpop.f32.mrf.mxu1 }
 0x1cf   :  { %v568_v3 = vpop.f32.mrf.mxu0  ;;  %2629 = vrot.lane.b32.xlu1 %v6155_v8, %s5642_s11  ;;  %v1474_v8 = vpop.permute.xlu0 %1473 }
 0x1d0   :  { %v6429_v10 = vadd.f32 %v568_v3, %v6300_v47  ;;  %5415 = vmatmul.msk.bf16.vlgmr.msrb.gmra.mxu2 %vm215_vm8, %v6294_v0  ;;  %5416 = vmatmul.msk.bf16.vlgmr.msrb.gmra.mxu3 %vm215_vm8, %v6294_v0 }
 0x1d1   :  { %1412 = vmatpush.bf16.msrb.mxu2 %v1322_v13  ;;  %1425 = vmatpush.bf16.msrb.mxu3 %v1325_v53 }
 0x1d2   :  { %5418 = vmatmul.msk.bf16.vlgmr.msra.gmra.mxu0 %vm215_vm8, %v6425_v51 }
 0x1d3   :  { %1526 = vmatpush.bf16.msra.mxu0 %v1496_v11  ;;  %v462_v47 = vpop.f32.mrf.mxu2  ;;  %v475_v45 = vpop.f32.mrf.mxu3  ;;  %v6441_v42 = vld [vmem:[#allocation1] sm:$0xff] }
 0x1d4   :  { %2627 = vrot.lane.b32.xlu0 %v6151_v54, %s5642_s11  ;;  %2631 = vrot.lane.b32.xlu2 %v6153_v44, %s5642_s11  ;;  %v6448_v0 = vadd.f32 %v462_v47, %v6310_v57  ;;  %v6451_v55 = vadd.f32 %v475_v45, %v6312_v52  ;;  %3555 = vst [vmem:[#allocation1] ss:$9 sm:$0xff] %v6439_v1  ;;  %v6461_v54 = vpop.permute.xlu1 %1477  ;;  %v1499_v44 = vsel %vm118_vm0, %v1485_v12, 0  ;;  %v6466_v57 = vpop.permute.xlu2 %1479 }
 0x1d5   :  { %v581_v43 = vpop.f32.mrf.mxu1  ;;  %v1486_v12 = vsel %vm1483_vm14, %v6372_v29, %v6391_v18 }
 0x1d6   :  { %v6457_v6 = vadd.f32 %v581_v43, %v6321_v9  ;;  %v1487_v43 = vsel %vm1483_vm14, %v6391_v18, %v1474_v8  ;;  %v1502_v29 = vsel %vm118_vm0, %v1486_v12, 0 }
 0x1d7   :  { %v570_v3 = vpop.f32.mrf.mxu0  ;;  %2633 = vrot.lane.b32.xlu1 %v6169_v23, %s5642_s11  ;;  %v1476_v11 = vpop.permute.xlu0 %1475  ;;  %v1505_v18 = vsel %vm118_vm0, %v1487_v43, 0 }
 0x1d8   :  { %5419 = vmatmul.msk.bf16.vlgmr.msra.gmra.mxu1 %vm215_vm8, %v6425_v51 }
 0x1d9   :  { %1539 = vmatpush.bf16.msra.mxu1 %v1499_v44 }
 0x1db   :  { %v464_v52 = vpop.f32.mrf.mxu2  ;;  %v477_v30 = vpop.f32.mrf.mxu3  ;;  %v6468_v53 = vld [vmem:[#allocation1] sm:$0xff]  ;;  %v6470_v9 = vld [vmem:[#allocation1 + $0x9] sm:$0xff]  ;;  %v6472_v13 = vld [vmem:[#allocation1 + $0x12] sm:$0xff] }
 0x1dc   :  { %8129 = vst [vmem:[#allocation3_spill] sm:$0xff] %v6468_v53  ;;  %2815 = vrot.lane.b32.xlu0 %v6195_v25, %s5643_s15  ;;  %2813 = vrot.lane.b32.xlu2 %v6197_v27, %s5643_s15  ;;  %v6478_v23 = vld [vmem:[#allocation1 + $0x1b] sm:$0xff]  ;;  %v6480_v47 = vld [vmem:[#allocation1 + $0x24] sm:$0xff]  ;;  %v6482_v45 = vld [vmem:[#allocation1 + $0x2d] sm:$0xff]  ;;  %v1488_v27 = vsel %vm1483_vm14, %v1474_v8, %v1476_v11  ;;  %v1482_v8 = vpop.permute.xlu1 %1481 }
 0x1dd   :  { %8130 = vst [vmem:[#allocation4_spill] sm:$0xff] %v6470_v9  ;;  %v583_v3 = vpop.f32.mrf.mxu1  ;;  %v6489_v44 = vld [vmem:[#allocation1 + $0x36] sm:$0xff]  ;;  %v6491_v25 = vld [vmem:[#allocation1 + $0x3f] sm:$0xff] }
 0x1de   :  { %8131 = vst [vmem:[#allocation5_spill] sm:$0xff] %v6472_v13 }
 0x1df   :  { %8132 = vst [vmem:[#allocation6_spill] sm:$0xff] %v6478_v23  ;;  %v620_v52 = vpop.f32.mrf.mxu0  ;;  %2809 = vrot.lane.b32.xlu1 %v6207_v36, %s5643_s15  ;;  %v1508_v36 = vsel %vm118_vm0, %v1488_v27, 0  ;;  %v1489_v27 = vsel %vm1483_vm14, %v1476_v11, %v6461_v54  ;;  %v1491_v23 = vsel %vm1483_vm14, %v6466_v57, %v1482_v8 }
 0x1e0   :  { %8133 = vst [vmem:[#allocation7_spill] sm:$0xff] %v6480_v47  ;;  %v6498_v30 = vadd.f32 %v620_v52, %v6359_v59  ;;  %5420 = vmatmul.msk.bf16.vlgmr.msra.gmra.mxu2 %vm215_vm8, %v6425_v51  ;;  %5421 = vmatmul.msk.bf16.vlgmr.msra.gmra.mxu3 %vm215_vm8, %v6425_v51  ;;  %v6509_v52 = vpop.permute.xlu2 %1661 }
 0x1e1   :  { %8134 = vst [vmem:[#allocation8_spill] sm:$0xff] %v6482_v45  ;;  %1552 = vmatpush.bf16.msra.mxu2 %v1502_v29  ;;  %1565 = vmatpush.bf16.msra.mxu3 %v1505_v18  ;;  %v6544_v45 = vpop.permute.xlu0 %1663 }
 0x1e2   :  { %8135 = vst [vmem:[#allocation9_spill] sm:$0xff] %v6489_v44  ;;  %5422 = vmatmul.msk.bf16.vlgmr.msrb.gmra.mxu0 %vm215_vm8, %v6425_v51  ;;  %v3698_v44 = vld [vmem:[#allocation2 + $0x9] sm:$0x1] }
 0x1e3   :  { %8136 = vst [vmem:[#allocation10_spill] sm:$0xff] %v6491_v25  ;;  %1578 = vmatpush.bf16.msrb.mxu0 %v1508_v36  ;;  %v594_v59 = vpop.f32.mrf.mxu2  ;;  %v607_v3 = vpop.f32.mrf.mxu3 }
 0x1e4   :  { %3700 = vst [vmem:[#allocation1] ss:$9 sm:$0xff] %v6439_v1  ;;  %2817 = vrot.lane.b32.xlu0 %v6199_v28, %s5643_s15  ;;  %2811 = vrot.lane.b32.xlu2 %v6205_v16, %s5643_s15  ;;  %v6516_v12 = vadd.f32 %v594_v59, %v6379_v4  ;;  %v6519_v43 = vadd.f32 %v607_v3, %v6382_v20 }
 0x1e5   :  { %v633_v29 = vpop.f32.mrf.mxu1 }
 0x1e6   :  { %v6530_v28 = vadd.f32 %v633_v29, %v6387_v26  ;;  %v1511_v26 = vsel %vm118_vm0, %v1489_v27, 0 }
 0x1e7   :  { %v622_v20 = vpop.f32.mrf.mxu0  ;;  %2821 = vrot.lane.b32.xlu1 %v6216_v48, %s5643_s15  ;;  %v1490_v48 = vsel %vm1483_vm14, %v6461_v54, %v6466_v57  ;;  %v1517_v54 = vsel %vm118_vm0, %v1491_v23, 0 }
 0x1e8   :  { %5423 = vmatmul.msk.bf16.vlgmr.msrb.gmra.mxu1 %vm215_vm8, %v6425_v51  ;;  %v1658_v20 = vpop.permute.xlu1 %1657 }
 0x1e9   :  { %1591 = vmatpush.bf16.msrb.mxu1 %v1511_v26 }
 0x1eb   :  { %v6523_v18 = vld [vmem:[#allocation1 + $0x1b] sm:$0xff]  ;;  %v6525_v36 = vld [vmem:[#allocation1 + $0x12] sm:$0xff]  ;;  %v6527_v25 = vld [vmem:[#allocation1 + $0x24] sm:$0xff]  ;;  %v596_v29 = vpop.f32.mrf.mxu2  ;;  %v609_v47 = vpop.f32.mrf.mxu3 }
 0x1ec   :  { %v6532_v16 = vld [vmem:[#allocation1 + $0x9] sm:$0xff]  ;;  %v6534_v4 = vld [vmem:[#allocation1] sm:$0xff]  ;;  %v6542_v3 = vld [vmem:[#allocation1 + $0x36] sm:$0xff]  ;;  %2819 = vrot.lane.b32.xlu0 %v6212_v41, %s5643_s15  ;;  %2823 = vrot.lane.b32.xlu2 %v6214_v2, %s5643_s15 }
 0x1ed   :  { %v6536_v59 = vld [vmem:[#allocation1 + $0x2d] sm:$0xff]  ;;  %v6540_v11 = vld [vmem:[#allocation1 + $0x3f] sm:$0xff]  ;;  %v635_v13 = vpop.f32.mrf.mxu1  ;;  %v6564_v41 = vld [vmem:[%s8122_s3 + $0x7] sm:$0x1] }
 0x1ee   :  { %3718 = vst [vmem:[#allocation1] ss:$9 sm:$0xff] %v3698_v44  ;;  %v1660_v44 = vpop.permute.xlu2 %1659  ;;  %v1666_v13 = vpop.permute.xlu0 %1665 }
 0x1ef   :  { %v1676_v27 = vsel %vm1675_vm15, %v1658_v20, %v1660_v44  ;;  %v760_v47 = vpop.f32.mrf.mxu0  ;;  %2825 = vrot.lane.b32.xlu1 %v6229_v31, %s5643_s15  ;;  %v1514_v31 = vsel %vm118_vm0, %v1490_v48, 0  ;;  %v1677_v29 = vsel %vm1675_vm15, %v1660_v44, %v6509_v52 }
 0x1f0   :  { %v6570_v57 = vadd.f32 %v760_v47, %v6429_v10  ;;  %5424 = vmatmul.msk.bf16.vlgmr.msrb.gmra.mxu2 %vm215_vm8, %v6425_v51  ;;  %5425 = vmatmul.msk.bf16.vlgmr.msrb.gmra.mxu3 %vm215_vm8, %v6425_v51  ;;  %v1688_v8 = vsel %vm118_vm0, %v1676_v27, 0  ;;  %v6604_v47 = vpop.permute.xlu1 %1669 }
 0x1f1   :  { %1604 = vmatpush.bf16.msrb.mxu2 %v1514_v31  ;;  %1617 = vmatpush.bf16.msrb.mxu3 %v1517_v54 }
 0x1f2   :  { %5427 = vmatmul.msk.bf16.vlgmr.msra.gmra.mxu0 %vm215_vm8, %v6564_v41 }
 0x1f3   :  { %1718 = vmatpush.bf16.msra.mxu0 %v1688_v8  ;;  %v646_v10 = vpop.f32.mrf.mxu2  ;;  %v659_v23 = vpop.f32.mrf.mxu3  ;;  %v3889_v8 = vld [vmem:[#allocation2 + $0x9] sm:$0x1] }
 0x1f4   :  { %3007 = vrot.lane.b32.xlu0 %v6259_v21, %s5644_s21  ;;  %3005 = vrot.lane.b32.xlu2 %v6261_v33, %s5644_s21  ;;  %v6586_v51 = vadd.f32 %v646_v10, %v6448_v0  ;;  %v6589_v26 = vadd.f32 %v659_v23, %v6451_v55  ;;  %v1691_v55 = vsel %vm118_vm0, %v1677_v29, 0  ;;  %v1678_v29 = vsel %vm1675_vm15, %v6509_v52, %v6544_v45 }
 0x1f5   :  { %v6566_v2 = vld [vmem:[#allocation1] sm:$0xff]  ;;  %v773_v20 = vpop.f32.mrf.mxu1 }
 0x1f6   :  { %3891 = vst [vmem:[#allocation1] ss:$9 sm:$0xff] %v6439_v1  ;;  %v6594_v48 = vadd.f32 %v773_v20, %v6457_v6  ;;  %v1672_v10 = vpop.permute.xlu2 %1671 }
 0x1f7   :  { %v762_v27 = vpop.f32.mrf.mxu0  ;;  %3001 = vrot.lane.b32.xlu1 %v6267_v24, %s5644_s21 }
 0x1f8   :  { %5428 = vmatmul.msk.bf16.vlgmr.msra.gmra.mxu1 %vm215_vm8, %v6564_v41  ;;  %v1668_v27 = vpop.permute.xlu0 %1667 }
 0x1f9   :  { %1731 = vmatpush.bf16.msra.mxu1 %v1691_v55  ;;  %v1679_v55 = vsel %vm1675_vm15, %v6544_v45, %v1666_v13  ;;  %v1680_v53 = vsel %vm1675_vm15, %v1666_v13, %v1668_v27  ;;  %v1674_v45 = vpop.permute.xlu1 %1673 }
 0x1fb   :  { %v648_v23 = vpop.f32.mrf.mxu2  ;;  %v661_v20 = vpop.f32.mrf.mxu3 }
 0x1fc   :  { %3009 = vrot.lane.b32.xlu0 %v6263_v32, %s5644_s21  ;;  %3003 = vrot.lane.b32.xlu2 %v6265_v5, %s5644_s21  ;;  %v1694_v32 = vsel %vm118_vm0, %v1678_v29, 0  ;;  %v1697_v5 = vsel %vm118_vm0, %v1679_v55, 0 }
 0x1fd   :  { %v6598_v21 = vld [vmem:[#allocation1 + $0x1b] sm:$0xff]  ;;  %v6600_v33 = vld [vmem:[#allocation1 + $0x12] sm:$0xff]  ;;  %v6602_v0 = vld [vmem:[#allocation1 + $0x24] sm:$0xff]  ;;  %v775_v9 = vpop.f32.mrf.mxu1 }
 0x1fe   :  { %v6609_v44 = vld [vmem:[#allocation1 + $0x9] sm:$0xff]  ;;  %v6611_v6 = vld [vmem:[#allocation1] sm:$0xff]  ;;  %v6617_v31 = vld [vmem:[#allocation1 + $0x36] sm:$0xff]  ;;  %v6646_v13 = vpop.permute.xlu2 %1853 }
 0x1ff   :  { %v6613_v54 = vld [vmem:[#allocation1 + $0x2d] sm:$0xff]  ;;  %v6615_v24 = vld [vmem:[#allocation1 + $0x3f] sm:$0xff]  ;;  %3013 = vrot.lane.b32.xlu1 %v6275_v63, %s5644_s21  ;;  %v1700_v63 = vsel %vm118_vm0, %v1680_v53, 0  ;;  %v1681_v53 = vsel %vm1675_vm15, %v1668_v27, %v6604_v47 }
 0x200   :  { %3909 = vst [vmem:[#allocation1] ss:$9 sm:$0xff] %v3889_v8  ;;  %v812_v8 = vpop.f32.mrf.mxu0  ;;  %5429 = vmatmul.msk.bf16.vlgmr.msra.gmra.mxu2 %vm215_vm8, %v6564_v41  ;;  %5430 = vmatmul.msk.bf16.vlgmr.msra.gmra.mxu3 %vm215_vm8, %v6564_v41 }
 0x201   :  { %v6632_v23 = vadd.f32 %v812_v8, %v6498_v30  ;;  %1744 = vmatpush.bf16.msra.mxu2 %v1694_v32  ;;  %1757 = vmatpush.bf16.msra.mxu3 %v1697_v5 }
 0x202   :  { %5431 = vmatmul.msk.bf16.vlgmr.msrb.gmra.mxu0 %vm215_vm8, %v6564_v41 }
 0x203   :  { %1770 = vmatpush.bf16.msrb.mxu0 %v1700_v63  ;;  %v786_v30 = vpop.f32.mrf.mxu2  ;;  %v799_v52 = vpop.f32.mrf.mxu3 }
 0x204   :  { %3011 = vrot.lane.b32.xlu0 %v6269_v62, %s5644_s21  ;;  %3015 = vrot.lane.b32.xlu2 %v6273_v46, %s5644_s21  ;;  %v6653_v20 = vadd.f32 %v786_v30, %v6516_v12  ;;  %v6656_v29 = vadd.f32 %v799_v52, %v6519_v43  ;;  %v6665_v62 = vpop.permute.xlu0 %1855  ;;  %v1703_v46 = vsel %vm118_vm0, %v1681_v53, 0  ;;  %v4080_v53 = vld [vmem:[#allocation2 + $0x9] sm:$0x1] }
 0x205   :  { %v825_v55 = vpop.f32.mrf.mxu1 }
 0x206   :  { %v6661_v8 = vadd.f32 %v825_v55, %v6530_v28 }
 0x207   :  { %v6640_v9 = vld [vmem:[#allocation1] sm:$0xff]  ;;  %3017 = vrot.lane.b32.xlu1 %v6296_v49, %s5644_s21 }
 0x208   :  { %4082 = vst [vmem:[#allocation1] ss:$9 sm:$0xff] %v6439_v1  ;;  %v814_v32 = vpop.f32.mrf.mxu0  ;;  %5432 = vmatmul.msk.bf16.vlgmr.msrb.gmra.mxu1 %vm215_vm8, %v6564_v41 }
 0x209   :  { %1783 = vmatpush.bf16.msrb.mxu1 %v1703_v46  ;;  %v1850_v32 = vpop.permute.xlu1 %1849  ;;  %v1682_v46 = vsel %vm1675_vm15, %v6604_v47, %v1672_v10 }
 0x20b   :  { %v788_v49 = vpop.f32.mrf.mxu2  ;;  %v801_v30 = vpop.f32.mrf.mxu3 }
 0x20c   :  { %3199 = vrot.lane.b32.xlu0 %v6325_v37, %s5645_s22  ;;  %3197 = vrot.lane.b32.xlu2 %v6327_v15, %s5645_s22  ;;  %v1683_v49 = vsel %vm1675_vm15, %v1672_v10, %v1674_v45  ;;  %v6699_v37 = vld [vmem:[%s8122_s3 + $0x8] sm:$0x1]  ;;  %v1706_v10 = vsel %vm118_vm0, %v1682_v46, 0 }
 0x20d   :  { %v827_v30 = vpop.f32.mrf.mxu1  ;;  %v1709_v15 = vsel %vm118_vm0, %v1683_v49, 0 }
 0x20f   :  { %v6670_v12 = vld [vmem:[#allocation1 + $0x1b] sm:$0xff]  ;;  %v6672_v43 = vld [vmem:[#allocation1 + $0x12] sm:$0xff]  ;;  %v6674_v27 = vld [vmem:[#allocation1 + $0x24] sm:$0xff]  ;;  %3193 = vrot.lane.b32.xlu1 %v6338_v40, %s5645_s22  ;;  %v1858_v40 = vpop.permute.xlu0 %1857 }
 0x210   :  { %v6676_v28 = vld [vmem:[#allocation1 + $0x9] sm:$0xff]  ;;  %v6678_v5 = vld [vmem:[#allocation1] sm:$0xff]  ;;  %v6684_v55 = vld [vmem:[#allocation1 + $0x36] sm:$0xff]  ;;  %5433 = vmatmul.msk.bf16.vlgmr.msrb.gmra.mxu2 %vm215_vm8, %v6564_v41  ;;  %5434 = vmatmul.msk.bf16.vlgmr.msrb.gmra.mxu3 %vm215_vm8, %v6564_v41 }
 0x211   :  { %v6680_v63 = vld [vmem:[#allocation1 + $0x2d] sm:$0xff]  ;;  %v6682_v52 = vld [vmem:[#allocation1 + $0x3f] sm:$0xff]  ;;  %8139 = vst [vmem:[#allocation13_spill] sm:$0xff] %v6684_v55  ;;  %v952_v55 = vpop.f32.mrf.mxu0  ;;  %1796 = vmatpush.bf16.msrb.mxu2 %v1706_v10  ;;  %1809 = vmatpush.bf16.msrb.mxu3 %v1709_v15 }
 0x212   :  { %8137 = vst [vmem:[#allocation11_spill] sm:$0xff] %v6680_v63  ;;  %v6703_v47 = vadd.f32 %v952_v55, %v6570_v57  ;;  %5436 = vmatmul.msk.bf16.vlgmr.msra.gmra.mxu0 %vm215_vm8, %v6699_v37 }
 0x213   :  { %8138 = vst [vmem:[#allocation12_spill] sm:$0xff] %v6682_v52  ;;  %v1852_v52 = vpop.permute.xlu2 %1851  ;;  %v851_v57 = vpop.f32.mrf.mxu3 }
 0x214   :  { %4100 = vst [vmem:[#allocation1] ss:$9 sm:$0xff] %v4080_v53  ;;  %v1868_v63 = vsel %vm1867_vm6, %v1850_v32, %v1852_v52  ;;  %v838_v53 = vpop.f32.mrf.mxu2  ;;  %3201 = vrot.lane.b32.xlu0 %v6329_v50, %s5645_s22  ;;  %3195 = vrot.lane.b32.xlu2 %v6336_v38, %s5645_s22  ;;  %v6723_v32 = vadd.f32 %v851_v57, %v6589_v26  ;;  %v1862_v50 = vpop.permute.xlu1 %1861 }
 0x215   :  { %v1880_v45 = vsel %vm118_vm0, %v1868_v63, 0  ;;  %v6720_v41 = vadd.f32 %v838_v53, %v6586_v51  ;;  %v1869_v63 = vsel %vm1867_vm6, %v1852_v52, %v6646_v13  ;;  %v965_v46 = vpop.f32.mrf.mxu1 }
 0x216   :  { %1910 = vmatpush.bf16.msra.mxu0 %v1880_v45  ;;  %v6729_v49 = vadd.f32 %v965_v46, %v6594_v48  ;;  %v1883_v38 = vsel %vm118_vm0, %v1869_v63, 0  ;;  %v1870_v63 = vsel %vm1867_vm6, %v6646_v13, %v6665_v62  ;;  %v1871_v46 = vsel %vm1867_vm6, %v6665_v62, %v1858_v40 }
 0x217   :  { %3205 = vrot.lane.b32.xlu1 %v6344_v22, %s5645_s22  ;;  %v1860_v45 = vpop.permute.xlu0 %1859  ;;  %v1886_v13 = vsel %vm118_vm0, %v1870_v63, 0  ;;  %v1889_v62 = vsel %vm118_vm0, %v1871_v46, 0 }
 0x218   :  { %5437 = vmatmul.msk.bf16.vlgmr.msra.gmra.mxu1 %vm215_vm8, %v6699_v37 }
 0x219   :  { %v954_v30 = vpop.f32.mrf.mxu0  ;;  %1923 = vmatpush.bf16.msra.mxu1 %v1883_v38 }
 0x21b   :  { %v6713_v55 = vld [vmem:[#allocation1] sm:$0xff]  ;;  %v1864_v51 = vpop.permute.xlu2 %1863  ;;  %v853_v15 = vpop.f32.mrf.mxu3 }
 0x21c   :  { %4273 = vst [vmem:[#allocation1] ss:$9 sm:$0xff] %v6439_v1  ;;  %v840_v26 = vpop.f32.mrf.mxu2  ;;  %3203 = vrot.lane.b32.xlu0 %v6340_v39, %s5645_s22  ;;  %3207 = vrot.lane.b32.xlu2 %v6342_v35, %s5645_s22  ;;  %v1872_v35 = vsel %vm1867_vm6, %v1858_v40, %v1860_v45  ;;  %v1866_v40 = vpop.permute.xlu1 %1865 }
 0x21d   :  { %v967_v30 = vpop.f32.mrf.mxu1  ;;  %v4271_v26 = vld [vmem:[#allocation2 + $0x9] sm:$0x1] }
 0x21f   :  { %3209 = vrot.lane.b32.xlu1 %v6367_v61, %s5645_s22  ;;  %v1892_v61 = vsel %vm118_vm0, %v1872_v35, 0  ;;  %v1873_v35 = vsel %vm1867_vm6, %v1860_v45, %v1862_v50 }
 0x220   :  { %5438 = vmatmul.msk.bf16.vlgmr.msra.gmra.mxu2 %vm215_vm8, %v6699_v37  ;;  %5439 = vmatmul.msk.bf16.vlgmr.msra.gmra.mxu3 %vm215_vm8, %v6699_v37 }
 0x221   :  { %v1004_v15 = vpop.f32.mrf.mxu0  ;;  %1936 = vmatpush.bf16.msra.mxu2 %v1886_v13  ;;  %1949 = vmatpush.bf16.msra.mxu3 %v1889_v62 }
 0x222   :  { %5440 = vmatmul.msk.bf16.vlgmr.msrb.gmra.mxu0 %vm215_vm8, %v6699_v37 }
 0x223   :  { %v6736_v10 = vld [vmem:[#allocation1 + $0x1b] sm:$0xff]  ;;  %v6738_v52 = vld [vmem:[#allocation1 + $0x12] sm:$0xff]  ;;  %v6740_v48 = vld [vmem:[#allocation1 + $0x24] sm:$0xff]  ;;  %1962 = vmatpush.bf16.msrb.mxu0 %v1892_v61  ;;  %v991_v30 = vpop.f32.mrf.mxu3 }
 0x224   :  { %v6746_v22 = vld [vmem:[#allocation1 + $0x9] sm:$0xff]  ;;  %v6748_v53 = vld [vmem:[#allocation1] sm:$0xff]  ;;  %v6759_v39 = vld [vmem:[#allocation1 + $0x36] sm:$0xff]  ;;  %3391 = vrot.lane.b32.xlu0 %v6396_v7, %s5646_s25  ;;  %3389 = vrot.lane.b32.xlu2 %v6398_v60, %s5646_s25  ;;  %v6786_v46 = vadd.f32 %v991_v30, %v6656_v29  ;;  %v6797_v60 = vpop.permute.xlu0 %2047  ;;  %v2042_v61 = vpop.permute.xlu1 %2041 }
 0x225   :  { %v6750_v57 = vld [vmem:[#allocation1 + $0x2d] sm:$0xff]  ;;  %v6757_v38 = vld [vmem:[#allocation1 + $0x3f] sm:$0xff] }
 0x226   :  { %8140 = vst [vmem:[#allocation14_spill] sm:$0xff] %v6750_v57  ;;  %v6765_v57 = vadd.f32 %v1004_v15, %v6632_v23  ;;  %v978_v23 = vpop.f32.mrf.mxu2  ;;  %v1017_v15 = vpop.f32.mrf.mxu1 }
 0x227   :  { %4291 = vst [vmem:[#allocation1] ss:$9 sm:$0xff] %v4271_v26  ;;  %v6776_v26 = vpop.permute.xlu2 %2045  ;;  %v6783_v63 = vadd.f32 %v978_v23, %v6653_v20  ;;  %v6792_v62 = vadd.f32 %v1017_v15, %v6661_v8  ;;  %3385 = vrot.lane.b32.xlu1 %v6404_v56, %s5646_s25  ;;  %v1895_v20 = vsel %vm118_vm0, %v1873_v35, 0  ;;  %v1874_v8 = vsel %vm1867_vm6, %v1862_v50, %v1864_v51 }
 0x228   :  { %5441 = vmatmul.msk.bf16.vlgmr.msrb.gmra.mxu1 %vm215_vm8, %v6699_v37  ;;  %v1875_v56 = vsel %vm1867_vm6, %v1864_v51, %v1866_v40  ;;  %v6826_v51 = vld [vmem:[%s8122_s3 + $0x9] sm:$0x1]  ;;  %vm2251_vm6 = vcmask 506880  }
 0x229   :  { %v1006_v7 = vpop.f32.mrf.mxu0  ;;  %1975 = vmatpush.bf16.msrb.mxu1 %v1895_v20 }
 0x22a   :  { %v4462_v7 = vld [vmem:[#allocation2 + $0x9] sm:$0x1] }
 0x22b   :  { %v993_v45 = vpop.f32.mrf.mxu3 }
 0x22c   :  { %3393 = vrot.lane.b32.xlu0 %v6400_v58, %s5646_s25  ;;  %3387 = vrot.lane.b32.xlu2 %v6402_v17, %s5646_s25 }
 0x22e   :  { %v6789_v13 = vld [vmem:[#allocation1] sm:$0xff]  ;;  %v980_v29 = vpop.f32.mrf.mxu2  ;;  %v1019_v23 = vpop.f32.mrf.mxu1 }
 0x22f   :  { %4464 = vst [vmem:[#allocation1] ss:$9 sm:$0xff] %v6439_v1  ;;  %v2044_v20 = vpop.permute.xlu2 %2043  ;;  %3397 = vrot.lane.b32.xlu1 %v6410_v19, %s5646_s25  ;;  %v1898_v19 = vsel %vm118_vm0, %v1874_v8, 0 }
 0x230   :  { %v2060_v17 = vsel %vm2059_vm5, %v2042_v61, %v2044_v20  ;;  %5442 = vmatmul.msk.bf16.vlgmr.msrb.gmra.mxu2 %vm215_vm8, %v6699_v37  ;;  %5443 = vmatmul.msk.bf16.vlgmr.msrb.gmra.mxu3 %vm215_vm8, %v6699_v37  ;;  %v2050_v61 = vpop.permute.xlu0 %2049 }
 0x231   :  { %v1144_v50 = vpop.f32.mrf.mxu0  ;;  %1988 = vmatpush.bf16.msrb.mxu2 %v1898_v19  ;;  %v2063_v19 = vsel %vm2059_vm5, %v6797_v60, %v2050_v61 }
 0x232   :  { %5445 = vmatmul.msk.bf16.vlgmr.msra.gmra.mxu0 %vm215_vm8, %v6826_v51 }
 0x234   :  { %3395 = vrot.lane.b32.xlu0 %v6406_v34, %s5646_s25  ;;  %3399 = vrot.lane.b32.xlu2 %v6408_v14, %s5646_s25 }
 0x236   :  { %v6808_v30 = vld [vmem:[#allocation1 + $0x1b] sm:$0xff]  ;;  %v6810_v15 = vld [vmem:[#allocation1 + $0x12] sm:$0xff]  ;;  %v6812_v35 = vld [vmem:[#allocation1 + $0x24] sm:$0xff] }
 0x237   :  { %8141 = vst [vmem:[#allocation15_spill] sm:$0xff] %v6812_v35  ;;  %v6814_v29 = vld [vmem:[#allocation1 + $0x9] sm:$0xff]  ;;  %v6816_v58 = vld [vmem:[#allocation1] sm:$0xff]  ;;  %v6830_v23 = vld [vmem:[#allocation1 + $0x36] sm:$0xff]  ;;  %v6834_v35 = vadd.f32 %v1144_v50, %v6703_v47  ;;  %v1030_v47 = vpop.f32.mrf.mxu2  ;;  %3401 = vrot.lane.b32.xlu1 %v6441_v42, %s5646_s25  ;;  %v2062_v42 = vsel %vm2059_vm5, %v6776_v26, %v6797_v60 }
 0x238   :  { %8142 = vst [vmem:[#allocation16_spill] sm:$0xff] %v6814_v29  ;;  %v6818_v45 = vld [vmem:[#allocation1 + $0x2d] sm:$0xff]  ;;  %v6828_v40 = vld [vmem:[#allocation1 + $0x3f] sm:$0xff]  ;;  %v1901_v29 = vsel %vm118_vm0, %v1875_v56, 0  ;;  %v1043_v56 = vpop.f32.mrf.mxu3  ;;  %v6849_v37 = vadd.f32 %v1030_v47, %v6720_v41  ;;  %v2054_v41 = vpop.permute.xlu1 %2053  ;;  %5446 = vmatmul.msk.bf16.vlgmr.msra.gmra.mxu1 %vm215_vm8, %v6826_v51 }
 0x239   :  { %8143 = vst [vmem:[#allocation17_spill] sm:$0xff] %v6828_v40  ;;  %2001 = vmatpush.bf16.msrb.mxu3 %v1901_v29  ;;  %v2072_v40 = vsel %vm118_vm0, %v2060_v17, 0  ;;  %v6852_v8 = vadd.f32 %v1043_v56, %v6723_v32  ;;  %v1157_v29 = vpop.f32.mrf.mxu1  ;;  %v1146_v50 = vpop.f32.mrf.mxu0 }
 0x23a   :  { %4482 = vst [vmem:[#allocation1] ss:$9 sm:$0xff] %v4462_v7  ;;  %2102 = vmatpush.bf16.msra.mxu0 %v2072_v40  ;;  %v2061_v7 = vsel %vm2059_vm5, %v2044_v20, %v6776_v26  ;;  %v6857_v17 = vadd.f32 %v1157_v29, %v6729_v49  ;;  %v2056_v32 = vpop.permute.xlu2 %2055  ;;  %v2052_v49 = vpop.permute.xlu0 %2051  ;;  %v2081_v26 = vsel %vm118_vm0, %v2063_v19, 0 }
 0x23b   :  { %v2075_v14 = vsel %vm118_vm0, %v2061_v7, 0  ;;  %v2064_v56 = vsel %vm2059_vm5, %v2050_v61, %v2052_v49 }
 0x23c   :  { %2115 = vmatpush.bf16.msra.mxu1 %v2075_v14  ;;  %3727 = vrot.lane.b32.xlu0 %v6523_v18, %s5630_s0 }
 0x23d   :  { %3725 = vrot.lane.b32.xlu2 %v6525_v36, %s5630_s0  ;;  %v2078_v36 = vsel %vm118_vm0, %v2062_v42, 0  ;;  %v2084_v42 = vsel %vm118_vm0, %v2064_v56, 0 }
 0x23f   :  { %v1032_v20 = vpop.f32.mrf.mxu2  ;;  %3721 = vrot.lane.b32.xlu1 %v6534_v4, %s5630_s0 }
 0x240   :  { %v1045_v40 = vpop.f32.mrf.mxu3  ;;  %5447 = vmatmul.msk.bf16.vlgmr.msra.gmra.mxu2 %vm215_vm8, %v6826_v51  ;;  %5448 = vmatmul.msk.bf16.vlgmr.msra.gmra.mxu3 %vm215_vm8, %v6826_v51  ;;  %v2058_v19 = vpop.permute.xlu1 %2057 }
 0x241   :  { %v6861_v34 = vld [vmem:[#allocation1] sm:$0xff]  ;;  %v1159_v47 = vpop.f32.mrf.mxu1  ;;  %v1196_v7 = vpop.f32.mrf.mxu0  ;;  %2128 = vmatpush.bf16.msra.mxu2 %v2078_v36  ;;  %2141 = vmatpush.bf16.msra.mxu3 %v2081_v26  ;;  %v2065_v26 = vsel %vm2059_vm5, %v2052_v49, %v2054_v41  ;;  %v2067_v49 = vsel %vm2059_vm5, %v2056_v32, %v2058_v19 }
 0x242   :  { %4655 = vst [vmem:[#allocation1] ss:$9 sm:$0xff] %v6439_v1  ;;  %v6888_v14 = vadd.f32 %v1196_v7, %v6765_v57  ;;  %v4653_v57 = vld [vmem:[#allocation2 + $0x9] sm:$0x1]  ;;  %5449 = vmatmul.msk.bf16.vlgmr.msrb.gmra.mxu0 %vm215_vm8, %v6826_v51 }
 0x243   :  { %2154 = vmatpush.bf16.msrb.mxu0 %v2084_v42 }
 0x244   :  { %3729 = vrot.lane.b32.xlu0 %v6527_v25, %s5630_s0  ;;  %v2087_v25 = vsel %vm118_vm0, %v2065_v26, 0 }
 0x245   :  { %3723 = vrot.lane.b32.xlu2 %v6532_v16, %s5630_s0 }
 0x247   :  { %v1170_v47 = vpop.f32.mrf.mxu2  ;;  %3733 = vrot.lane.b32.xlu1 %v6542_v3, %s5630_s0  ;;  %v2066_v3 = vsel %vm2059_vm5, %v2054_v41, %v2056_v32  ;;  %v2093_v41 = vsel %vm118_vm0, %v2067_v49, 0  ;;  %vm2443_vm5 = vcmask 457728  }
 0x248   :  { %v1183_v7 = vpop.f32.mrf.mxu3  ;;  %v6914_v36 = vadd.f32 %v1170_v47, %v6783_v63  ;;  %5450 = vmatmul.msk.bf16.vlgmr.msrb.gmra.mxu1 %vm215_vm8, %v6826_v51 }
 0x249   :  { %v6879_v29 = vld [vmem:[#allocation1 + $0x1b] sm:$0xff]  ;;  %v6881_v18 = vld [vmem:[#allocation1 + $0x12] sm:$0xff]  ;;  %v6883_v50 = vld [vmem:[#allocation1 + $0x24] sm:$0xff]  ;;  %v6917_v56 = vadd.f32 %v1183_v7, %v6786_v46  ;;  %2167 = vmatpush.bf16.msrb.mxu1 %v2087_v25 }
 0x24a   :  { %v6894_v4 = vld [vmem:[#allocation1 + $0x9] sm:$0xff]  ;;  %v6896_v60 = vld [vmem:[#allocation1] sm:$0xff]  ;;  %v6902_v40 = vld [vmem:[#allocation1 + $0x36] sm:$0xff] }
 0x24b   :  { %8144 = vst [vmem:[#allocation18_spill] sm:$0xff] %v6894_v4  ;;  %v6898_v61 = vld [vmem:[#allocation1 + $0x2d] sm:$0xff]  ;;  %v6900_v20 = vld [vmem:[#allocation1 + $0x3f] sm:$0xff]  ;;  %v6907_v4 = vpop.permute.xlu2 %2237 }
 0x24c   :  { %8145 = vst [vmem:[#allocation19_spill] sm:$0xff] %v6898_v61  ;;  %v6926_v61 = vpop.permute.xlu0 %2239  ;;  %3731 = vrot.lane.b32.xlu0 %v6536_v59, %s5630_s0  ;;  %v6945_v59 = vld [vmem:[%s8122_s3 + $0xa] sm:$0x1] }
 0x24d   :  { %8146 = vst [vmem:[#allocation20_spill] sm:$0xff] %v6900_v20  ;;  %v1198_v20 = vpop.f32.mrf.mxu0  ;;  %3735 = vrot.lane.b32.xlu2 %v6540_v11, %s5630_s0  ;;  %v2090_v11 = vsel %vm118_vm0, %v2066_v3, 0 }
 0x24e   :  { %4673 = vst [vmem:[#allocation1] ss:$9 sm:$0xff] %v4653_v57  ;;  %v1209_v57 = vpop.f32.mrf.mxu1 }
 0x24f   :  { %v6921_v42 = vadd.f32 %v1209_v57, %v6792_v62  ;;  %v1172_v63 = vpop.f32.mrf.mxu2  ;;  %v2234_v62 = vpop.permute.xlu1 %2233  ;;  %3737 = vrot.lane.b32.xlu1 %v6566_v2, %s5630_s0 }
 0x250   :  { %v1185_v46 = vpop.f32.mrf.mxu3  ;;  %5451 = vmatmul.msk.bf16.vlgmr.msrb.gmra.mxu2 %vm215_vm8, %v6826_v51  ;;  %5452 = vmatmul.msk.bf16.vlgmr.msrb.gmra.mxu3 %vm215_vm8, %v6826_v51 }
 0x251   :  { %2180 = vmatpush.bf16.msrb.mxu2 %v2090_v11  ;;  %2193 = vmatpush.bf16.msrb.mxu3 %v2093_v41 }
 0x252   :  { %5454 = vmatmul.msk.bf16.vlgmr.msra.gmra.mxu0 %vm215_vm8, %v6945_v59 }
 0x253   :  { %v2236_v47 = vpop.permute.xlu2 %2235 }
 0x254   :  { %v2252_v7 = vsel %vm2251_vm6, %v2234_v62, %v2236_v47  ;;  %v2242_v25 = vpop.permute.xlu0 %2241  ;;  %3918 = vrot.lane.b32.xlu0 %v6598_v21, %s5631_s1  ;;  %v2253_v41 = vsel %vm2251_vm6, %v2236_v47, %v6907_v4 }
 0x255   :  { %v6930_v16 = vld [vmem:[#allocation1] sm:$0xff]  ;;  %v1336_v26 = vpop.f32.mrf.mxu0  ;;  %v2264_v63 = vsel %vm118_vm0, %v2252_v7, 0  ;;  %3916 = vrot.lane.b32.xlu2 %v6600_v33, %s5631_s1  ;;  %v2267_v21 = vsel %vm118_vm0, %v2253_v41, 0 }
 0x256   :  { %4846 = vst [vmem:[#allocation1] ss:$9 sm:$0xff] %v6439_v1  ;;  %v1211_v20 = vpop.f32.mrf.mxu1  ;;  %v6950_v32 = vadd.f32 %v1336_v26, %v6834_v35  ;;  %2294 = vmatpush.bf16.msra.mxu0 %v2264_v63  ;;  %v4844_v26 = vld [vmem:[#allocation2 + $0x9] sm:$0x1] }
 0x257   :  { %v1222_v51 = vpop.f32.mrf.mxu2  ;;  %3912 = vrot.lane.b32.xlu1 %v6611_v6, %s5631_s1  ;;  %v2246_v33 = vpop.permute.xlu1 %2245  ;;  %v2254_v6 = vsel %vm2251_vm6, %v6907_v4, %v6926_v61 }
 0x258   :  { %v1235_v3 = vpop.f32.mrf.mxu3  ;;  %v6980_v7 = vadd.f32 %v1222_v51, %v6849_v37  ;;  %5455 = vmatmul.msk.bf16.vlgmr.msra.gmra.mxu1 %vm215_vm8, %v6945_v59 }
 0x259   :  { %v6983_v11 = vadd.f32 %v1235_v3, %v6852_v8  ;;  %2307 = vmatpush.bf16.msra.mxu1 %v2267_v21 }
 0x25b   :  { %v2248_v37 = vpop.permute.xlu2 %2247 }
 0x25c   :  { %v2244_v47 = vpop.permute.xlu0 %2243  ;;  %3920 = vrot.lane.b32.xlu0 %v6602_v0, %s5631_s1  ;;  %v2270_v0 = vsel %vm118_vm0, %v2254_v6, 0 }
 0x25d   :  { %v6956_v2 = vld [vmem:[#allocation1 + $0x1b] sm:$0xff]  ;;  %v6958_v19 = vld [vmem:[#allocation1 + $0x12] sm:$0xff]  ;;  %v6960_v57 = vld [vmem:[#allocation1 + $0x24] sm:$0xff]  ;;  %3914 = vrot.lane.b32.xlu2 %v6609_v44, %s5631_s1 }
 0x25e   :  { %v6965_v35 = vld [vmem:[#allocation1 + $0x9] sm:$0xff]  ;;  %v6967_v46 = vld [vmem:[#allocation1] sm:$0xff]  ;;  %v6973_v20 = vld [vmem:[#allocation1 + $0x36] sm:$0xff]  ;;  %v1349_v63 = vpop.f32.mrf.mxu1 }
 0x25f   :  { %v6969_v62 = vld [vmem:[#allocation1 + $0x2d] sm:$0xff]  ;;  %v6971_v49 = vld [vmem:[#allocation1 + $0x3f] sm:$0xff]  ;;  %v1224_v8 = vpop.f32.mrf.mxu2  ;;  %3924 = vrot.lane.b32.xlu1 %v6617_v31, %s5631_s1 }
 0x260   :  { %8147 = vst [vmem:[#allocation21_spill] sm:$0xff] %v6969_v62  ;;  %v1338_v62 = vpop.f32.mrf.mxu0  ;;  %v1237_v51 = vpop.f32.mrf.mxu3  ;;  %5456 = vmatmul.msk.bf16.vlgmr.msra.gmra.mxu2 %vm215_vm8, %v6945_v59  ;;  %5457 = vmatmul.msk.bf16.vlgmr.msra.gmra.mxu3 %vm215_vm8, %v6945_v59 }
 0x261   :  { %8148 = vst [vmem:[#allocation22_spill] sm:$0xff] %v6971_v49  ;;  %v6988_v49 = vadd.f32 %v1349_v63, %v6857_v17  ;;  %v2255_v17 = vsel %vm2251_vm6, %v6926_v61, %v2242_v25  ;;  %2320 = vmatpush.bf16.msra.mxu2 %v2270_v0  ;;  %v2250_v61 = vpop.permute.xlu1 %2249 }
 0x262   :  { %4864 = vst [vmem:[#allocation1] ss:$9 sm:$0xff] %v4844_v26  ;;  %v2256_v26 = vsel %vm2251_vm6, %v2242_v25, %v2244_v47  ;;  %v2273_v44 = vsel %vm118_vm0, %v2255_v17, 0  ;;  %5458 = vmatmul.msk.bf16.vlgmr.msrb.gmra.mxu0 %vm215_vm8, %v6945_v59 }
 0x263   :  { %2333 = vmatpush.bf16.msra.mxu3 %v2273_v44  ;;  %v2276_v4 = vsel %vm118_vm0, %v2256_v26, 0  ;;  %v7028_v8 = vpop.permute.xlu2 %2429 }
 0x264   :  { %2346 = vmatpush.bf16.msrb.mxu0 %v2276_v4  ;;  %3922 = vrot.lane.b32.xlu0 %v6613_v54, %s5631_s1 }
 0x265   :  { %3926 = vrot.lane.b32.xlu2 %v6615_v24, %s5631_s1  ;;  %v5035_v24 = vld [vmem:[#allocation2 + $0x9] sm:$0x1] }
 0x266   :  { %v1351_v62 = vpop.f32.mrf.mxu1 }
 0x267   :  { %v1362_v31 = vpop.f32.mrf.mxu2  ;;  %3928 = vrot.lane.b32.xlu1 %v6640_v9, %s5631_s1  ;;  %v2259_v9 = vsel %vm2251_vm6, %v2248_v37, %v2250_v61 }
 0x268   :  { %v1388_v41 = vpop.f32.mrf.mxu0  ;;  %v1375_v25 = vpop.f32.mrf.mxu3  ;;  %v7035_v51 = vadd.f32 %v1362_v31, %v6914_v36  ;;  %5459 = vmatmul.msk.bf16.vlgmr.msrb.gmra.mxu1 %vm215_vm8, %v6945_v59 }
 0x269   :  { %v6995_v3 = vld [vmem:[#allocation1] sm:$0xff]  ;;  %v7038_v6 = vadd.f32 %v1375_v25, %v6917_v56  ;;  %v2432_v31 = vpop.permute.xlu0 %2431 }
 0x26a   :  { %5037 = vst [vmem:[#allocation1] ss:$9 sm:$0xff] %v6439_v1  ;;  %v7013_v1 = vadd.f32 %v1388_v41, %v6888_v14  ;;  %v2257_v41 = vsel %vm2251_vm6, %v2244_v47, %v2246_v33 }
 0x26b   :  { %v2279_v4 = vsel %vm118_vm0, %v2257_v41, 0  ;;  %v2428_v41 = vpop.permute.xlu2 %2427 }
 0x26c   :  { %2359 = vmatpush.bf16.msrb.mxu1 %v2279_v4  ;;  %4109 = vrot.lane.b32.xlu0 %v6670_v12, %s5632_s6  ;;  %v7071_v12 = vld [vmem:[%s8122_s3 + $0xb] sm:$0x1] }
 0x26d   :  { %4107 = vrot.lane.b32.xlu2 %v6672_v43, %s5632_s6 }
 0x26e   :  { %v1401_v0 = vpop.f32.mrf.mxu1 }
 0x26f   :  { %v7052_v36 = vadd.f32 %v1401_v0, %v6921_v42  ;;  %v1364_v47 = vpop.f32.mrf.mxu2  ;;  %v2258_v42 = vsel %vm2251_vm6, %v2246_v33, %v2248_v37  ;;  %4103 = vrot.lane.b32.xlu1 %v6678_v5, %s5632_s6  ;;  %v2285_v33 = vsel %vm118_vm0, %v2259_v9, 0  ;;  %vm2635_vm6 = vcmask 449536  }
 0x270   :  { %v1390_v56 = vpop.f32.mrf.mxu0  ;;  %v1377_v25 = vpop.f32.mrf.mxu3  ;;  %v2282_v43 = vsel %vm118_vm0, %v2258_v42, 0  ;;  %5460 = vmatmul.msk.bf16.vlgmr.msrb.gmra.mxu2 %vm215_vm8, %v6945_v59  ;;  %5461 = vmatmul.msk.bf16.vlgmr.msrb.gmra.mxu3 %vm215_vm8, %v6945_v59  ;;  %v2445_v47 = vsel %vm2443_vm5, %v2428_v41, %v7028_v8 }
 0x271   :  { %v7022_v63 = vld [vmem:[#allocation1 + $0x1b] sm:$0xff]  ;;  %v7024_v14 = vld [vmem:[#allocation1 + $0x12] sm:$0xff]  ;;  %v7026_v21 = vld [vmem:[#allocation1 + $0x24] sm:$0xff]  ;;  %2372 = vmatpush.bf16.msrb.mxu2 %v2282_v43  ;;  %2385 = vmatpush.bf16.msrb.mxu3 %v2285_v33  ;;  %v2434_v5 = vpop.permute.xlu0 %2433  ;;  %v2446_v43 = vsel %vm2443_vm5, %v7028_v8, %v2432_v31 }
 0x272   :  { %v7040_v17 = vld [vmem:[#allocation1 + $0x9] sm:$0xff]  ;;  %v7042_v62 = vld [vmem:[#allocation1] sm:$0xff]  ;;  %v7049_v54 = vld [vmem:[#allocation1 + $0x36] sm:$0xff]  ;;  %5463 = vmatmul.msk.bf16.vlgmr.msra.gmra.mxu0 %vm215_vm8, %v7071_v12  ;;  %v2447_v33 = vsel %vm2443_vm5, %v2432_v31, %v2434_v5 }
 0x273   :  { %v7044_v26 = vld [vmem:[#allocation1 + $0x2d] sm:$0xff]  ;;  %v7047_v44 = vld [vmem:[#allocation1 + $0x3f] sm:$0xff] }
 0x274   :  { %8149 = vst [vmem:[#allocation23_spill] sm:$0xff] %v7047_v44  ;;  %v2426_v44 = vpop.permute.xlu1 %2425  ;;  %4111 = vrot.lane.b32.xlu0 %v6674_v27, %s5632_s6  ;;  %v2459_v27 = vsel %vm118_vm0, %v2445_v47, 0  ;;  %v2462_v47 = vsel %vm118_vm0, %v2446_v43, 0 }
 0x275   :  { %5055 = vst [vmem:[#allocation1] ss:$9 sm:$0xff] %v5035_v24  ;;  %v2444_v24 = vsel %vm2443_vm5, %v2426_v44, %v2428_v41  ;;  %4105 = vrot.lane.b32.xlu2 %v6676_v28, %s5632_s6  ;;  %v8151_v41 = vld [vmem:[#allocation11_spill] sm:$0xff] }
 0x276   :  { %v1403_v0 = vpop.f32.mrf.mxu1  ;;  %v2456_v61 = vsel %vm118_vm0, %v2444_v24, 0 }
 0x277   :  { %2486 = vmatpush.bf16.msra.mxu0 %v2456_v61  ;;  %v1414_v44 = vpop.f32.mrf.mxu2  ;;  %v8150_v0 = vld [vmem:[#allocation13_spill] sm:$0xff] }
 0x278   :  { %v1528_v56 = vpop.f32.mrf.mxu0  ;;  %v1427_v4 = vpop.f32.mrf.mxu3  ;;  %4115 = vrot.lane.b32.xlu1 %v8150_v0, %s5632_s6  ;;  %5464 = vmatmul.msk.bf16.vlgmr.msra.gmra.mxu1 %vm215_vm8, %v7071_v12 }
 0x279   :  { %v7076_v37 = vadd.f32 %v1528_v56, %v6950_v32  ;;  %v7090_v32 = vadd.f32 %v1414_v44, %v6980_v7  ;;  %v7093_v59 = vadd.f32 %v1427_v4, %v6983_v11  ;;  %2499 = vmatpush.bf16.msra.mxu1 %v2459_v27  ;;  %v2440_v7 = vpop.permute.xlu2 %2439  ;;  %v2436_v56 = vpop.permute.xlu0 %2435 }
 0x27a   :  { %v2448_v44 = vsel %vm2443_vm5, %v2434_v5, %v2436_v56 }
 0x27b   :  { %v2468_v8 = vsel %vm118_vm0, %v2448_v44, 0 }
 0x27c   :  { %v2438_v28 = vpop.permute.xlu1 %2437  ;;  %4113 = vrot.lane.b32.xlu0 %v8151_v41, %s5632_s6 }
 0x27e   :  { %v1541_v25 = vpop.f32.mrf.mxu1 }
 0x27f   :  { %v7098_v42 = vadd.f32 %v1541_v25, %v6988_v49  ;;  %v1416_v11 = vpop.f32.mrf.mxu2  ;;  %v8152_v49 = vld [vmem:[#allocation12_spill] sm:$0xff]  ;;  %v2465_v25 = vsel %vm118_vm0, %v2447_v33, 0 }
 0x280   :  { %v1530_v9 = vpop.f32.mrf.mxu0  ;;  %v1429_v24 = vpop.f32.mrf.mxu3  ;;  %4117 = vrot.lane.b32.xlu2 %v8152_v49, %s5632_s6  ;;  %4119 = vrot.lane.b32.xlu1 %v6713_v55, %s5632_s6  ;;  %v2449_v11 = vsel %vm2443_vm5, %v2436_v56, %v2438_v28 }
 0x281   :  { %5465 = vmatmul.msk.bf16.vlgmr.msra.gmra.mxu2 %vm215_vm8, %v7071_v12  ;;  %5466 = vmatmul.msk.bf16.vlgmr.msra.gmra.mxu3 %vm215_vm8, %v7071_v12  ;;  %v2622_v0 = vpop.permute.xlu2 %2621  ;;  %v2624_v43 = vpop.permute.xlu0 %2623 }
 0x282   :  { %2512 = vmatpush.bf16.msra.mxu2 %v2462_v47  ;;  %2525 = vmatpush.bf16.msra.mxu3 %v2465_v25 }
 0x283   :  { %5467 = vmatmul.msk.bf16.vlgmr.msrb.gmra.mxu0 %vm215_vm8, %v7071_v12 }
 0x284   :  { %v2442_v31 = vpop.permute.xlu1 %2441  ;;  %2538 = vmatpush.bf16.msrb.mxu0 %v2468_v8  ;;  %4300 = vrot.lane.b32.xlu0 %v6736_v10, %s5633_s12  ;;  %v2471_v10 = vsel %vm118_vm0, %v2449_v11, 0 }
 0x286   :  { %v1543_v61 = vpop.f32.mrf.mxu1 }
 0x287   :  { %v1554_v55 = vpop.f32.mrf.mxu2 }
 0x288   :  { %v1580_v4 = vpop.f32.mrf.mxu0  ;;  %v1567_v5 = vpop.f32.mrf.mxu3  ;;  %4298 = vrot.lane.b32.xlu2 %v6738_v52, %s5633_s12  ;;  %4294 = vrot.lane.b32.xlu1 %v6748_v53, %s5633_s12  ;;  %v2451_v53 = vsel %vm2443_vm5, %v2440_v7, %v2442_v31 }
 0x289   :  { %v7118_v9 = vadd.f32 %v1580_v4, %v7013_v1  ;;  %v7132_v1 = vadd.f32 %v1554_v55, %v7035_v51  ;;  %v7135_v27 = vadd.f32 %v1567_v5, %v7038_v6  ;;  %5468 = vmatmul.msk.bf16.vlgmr.msrb.gmra.mxu1 %vm215_vm8, %v7071_v12  ;;  %v2620_v33 = vpop.permute.xlu2 %2619 }
 0x28a   :  { %2551 = vmatpush.bf16.msrb.mxu1 %v2471_v10  ;;  %v2637_v31 = vsel %vm2635_vm6, %v2620_v33, %v2622_v0 }
 0x28c   :  { %v2618_v6 = vpop.permute.xlu1 %2617  ;;  %4302 = vrot.lane.b32.xlu0 %v6740_v48, %s5633_s12  ;;  %v7158_v48 = vld [vmem:[%s8122_s3 + $0xc] sm:$0x1] }
 0x28d   :  { %v2636_v61 = vsel %vm2635_vm6, %v2618_v6, %v2620_v33  ;;  %v8155_v33 = vld [vmem:[#allocation16_spill] sm:$0xff] }
 0x28e   :  { %v1593_v24 = vpop.f32.mrf.mxu1  ;;  %v2648_v4 = vsel %vm118_vm0, %v2636_v61, 0 }
 0x28f   :  { %v7139_v41 = vadd.f32 %v1593_v24, %v7052_v36  ;;  %v1556_v52 = vpop.f32.mrf.mxu2  ;;  %v2450_v36 = vsel %vm2443_vm5, %v2438_v28, %v2440_v7  ;;  %v2477_v28 = vsel %vm118_vm0, %v2451_v53, 0  ;;  %v2651_v24 = vsel %vm118_vm0, %v2637_v31, 0 }
 0x290   :  { %v1582_v49 = vpop.f32.mrf.mxu0  ;;  %v1569_v51 = vpop.f32.mrf.mxu3  ;;  %4296 = vrot.lane.b32.xlu2 %v6746_v22, %s5633_s12  ;;  %4306 = vrot.lane.b32.xlu1 %v6759_v39, %s5633_s12  ;;  %v2474_v22 = vsel %vm118_vm0, %v2450_v36, 0  ;;  %vm2827_vm5 = vcmask 441344  }
 0x291   :  { %5469 = vmatmul.msk.bf16.vlgmr.msrb.gmra.mxu2 %vm215_vm8, %v7071_v12  ;;  %5470 = vmatmul.msk.bf16.vlgmr.msrb.gmra.mxu3 %vm215_vm8, %v7071_v12  ;;  %v2626_v39 = vpop.permute.xlu0 %2625 }
 0x292   :  { %2564 = vmatpush.bf16.msrb.mxu2 %v2474_v22  ;;  %2577 = vmatpush.bf16.msrb.mxu3 %v2477_v28 }
 0x293   :  { %5472 = vmatmul.msk.bf16.vlgmr.msra.gmra.mxu0 %vm215_vm8, %v7158_v48 }
 0x294   :  { %2678 = vmatpush.bf16.msra.mxu0 %v2648_v4  ;;  %v2630_v49 = vpop.permute.xlu1 %2629 }
 0x296   :  { %v1595_v56 = vpop.f32.mrf.mxu1 }
 0x297   :  { %v1606_v47 = vpop.f32.mrf.mxu2 }
 0x298   :  { %v1720_v44 = vpop.f32.mrf.mxu0  ;;  %v1619_v25 = vpop.f32.mrf.mxu3  ;;  %4308 = vrot.lane.b32.xlu2 %v6757_v38, %s5633_s12  ;;  %v7177_v8 = vadd.f32 %v1606_v47, %v7090_v32  ;;  %4310 = vrot.lane.b32.xlu1 %v6789_v13, %s5633_s12  ;;  %v2639_v13 = vsel %vm2635_vm6, %v2624_v43, %v2626_v39 }
 0x299   :  { %v7163_v7 = vadd.f32 %v1720_v44, %v7076_v37  ;;  %v8153_v37 = vld [vmem:[#allocation14_spill] sm:$0xff]  ;;  %v7180_v12 = vadd.f32 %v1619_v25, %v7093_v59  ;;  %5473 = vmatmul.msk.bf16.vlgmr.msra.gmra.mxu1 %vm215_vm8, %v7158_v48  ;;  %v2632_v38 = vpop.permute.xlu2 %2631  ;;  %v2628_v10 = vpop.permute.xlu0 %2627  ;;  %v2657_v53 = vsel %vm118_vm0, %v2639_v13, 0 }
 0x29a   :  { %4304 = vrot.lane.b32.xlu0 %v8153_v37, %s5633_s12  ;;  %2691 = vmatpush.bf16.msra.mxu1 %v2651_v24  ;;  %v2640_v51 = vsel %vm2635_vm6, %v2626_v39, %v2628_v10  ;;  %v2641_v22 = vsel %vm2635_vm6, %v2628_v10, %v2630_v49  ;;  %v2642_v31 = vsel %vm2635_vm6, %v2630_v49, %v2632_v38 }
 0x29b   :  { %v2663_v47 = vsel %vm118_vm0, %v2641_v22, 0 }
 0x29e   :  { %v1733_v55 = vpop.f32.mrf.mxu1 }
 0x29f   :  { %v7184_v5 = vadd.f32 %v1733_v55, %v7098_v42  ;;  %v1608_v32 = vpop.f32.mrf.mxu2  ;;  %v2638_v42 = vsel %vm2635_vm6, %v2622_v0, %v2624_v43  ;;  %v2634_v0 = vpop.permute.xlu1 %2633 }
 0x2a0   :  { %v1722_v11 = vpop.f32.mrf.mxu0  ;;  %v1621_v59 = vpop.f32.mrf.mxu3  ;;  %4489 = vrot.lane.b32.xlu2 %v6810_v15, %s5634_s13  ;;  %4485 = vrot.lane.b32.xlu1 %v6816_v58, %s5634_s13  ;;  %v2654_v36 = vsel %vm118_vm0, %v2638_v42, 0  ;;  %v2660_v15 = vsel %vm118_vm0, %v2640_v51, 0 }
 0x2a1   :  { %5474 = vmatmul.msk.bf16.vlgmr.msra.gmra.mxu2 %vm215_vm8, %v7158_v48  ;;  %5475 = vmatmul.msk.bf16.vlgmr.msra.gmra.mxu3 %vm215_vm8, %v7158_v48  ;;  %v2814_v56 = vpop.permute.xlu2 %2813  ;;  %v2816_v25 = vpop.permute.xlu0 %2815  ;;  %v2666_v59 = vsel %vm118_vm0, %v2642_v31, 0 }
 0x2a2   :  { %4491 = vrot.lane.b32.xlu0 %v6808_v30, %s5634_s13  ;;  %2704 = vmatpush.bf16.msra.mxu2 %v2654_v36 }
 0x2a3   :  { %2717 = vmatpush.bf16.msra.mxu3 %v2657_v53  ;;  %5476 = vmatmul.msk.bf16.vlgmr.msrb.gmra.mxu0 %vm215_vm8, %v7158_v48 }
 0x2a4   :  { %2730 = vmatpush.bf16.msrb.mxu0 %v2660_v15 }
 0x2a6   :  { %v1735_v52 = vpop.f32.mrf.mxu1 }
 0x2a7   :  { %v1746_v58 = vpop.f32.mrf.mxu2  ;;  %v2810_v37 = vpop.permute.xlu1 %2809 }
 0x2a8   :  { %v1772_v6 = vpop.f32.mrf.mxu0  ;;  %v1759_v43 = vpop.f32.mrf.mxu3  ;;  %4487 = vrot.lane.b32.xlu2 %v8155_v33, %s5634_s13  ;;  %v7217_v61 = vadd.f32 %v1746_v58, %v7132_v1  ;;  %4497 = vrot.lane.b32.xlu1 %v6830_v23, %s5634_s13  ;;  %v2643_v23 = vsel %vm2635_vm6, %v2632_v38, %v2634_v0  ;;  %v2830_v0 = vsel %vm2827_vm5, %v2814_v56, %v2816_v25  ;;  %vm3019_vm6 = vcmask 392192  }
 0x2a9   :  { %v7203_v30 = vadd.f32 %v1772_v6, %v7118_v9  ;;  %v8154_v9 = vld [vmem:[#allocation15_spill] sm:$0xff]  ;;  %v7220_v44 = vadd.f32 %v1759_v43, %v7135_v27  ;;  %5477 = vmatmul.msk.bf16.vlgmr.msrb.gmra.mxu1 %vm215_vm8, %v7158_v48  ;;  %v2812_v11 = vpop.permute.xlu2 %2811  ;;  %v2669_v49 = vsel %vm118_vm0, %v2643_v23, 0  ;;  %v2846_v33 = vsel %vm118_vm0, %v2830_v0, 0 }
 0x2aa   :  { %4493 = vrot.lane.b32.xlu0 %v8154_v9, %s5634_s13  ;;  %2743 = vmatpush.bf16.msrb.mxu1 %v2663_v47  ;;  %v2828_v24 = vsel %vm2827_vm5, %v2810_v37, %v2812_v11  ;;  %v2829_v52 = vsel %vm2827_vm5, %v2812_v11, %v2814_v56 }
 0x2ab   :  { %v2840_v10 = vsel %vm118_vm0, %v2828_v24, 0 }
 0x2ae   :  { %v1785_v28 = vpop.f32.mrf.mxu1 }
 0x2af   :  { %v7224_v39 = vadd.f32 %v1785_v28, %v7139_v41  ;;  %v1748_v1 = vpop.f32.mrf.mxu2  ;;  %v8156_v41 = vld [vmem:[#allocation17_spill] sm:$0xff]  ;;  %v2822_v53 = vpop.permute.xlu1 %2821 }
 0x2b0   :  { %v1774_v4 = vpop.f32.mrf.mxu0  ;;  %v1761_v27 = vpop.f32.mrf.mxu3  ;;  %4499 = vrot.lane.b32.xlu2 %v8156_v41, %s5634_s13  ;;  %4501 = vrot.lane.b32.xlu1 %v6861_v34, %s5634_s13 }
 0x2b1   :  { %5478 = vmatmul.msk.bf16.vlgmr.msrb.gmra.mxu2 %vm215_vm8, %v7158_v48  ;;  %5479 = vmatmul.msk.bf16.vlgmr.msrb.gmra.mxu3 %vm215_vm8, %v7158_v48  ;;  %v2818_v34 = vpop.permute.xlu0 %2817 }
 0x2b2   :  { %4495 = vrot.lane.b32.xlu0 %v6818_v45, %s5634_s13  ;;  %v7243_v45 = vld [vmem:[%s8122_s3 + $0xd] sm:$0x1]  ;;  %2756 = vmatpush.bf16.msrb.mxu2 %v2666_v59 }
 0x2b3   :  { %2769 = vmatpush.bf16.msrb.mxu3 %v2669_v49  ;;  %5481 = vmatmul.msk.bf16.vlgmr.msra.gmra.mxu0 %vm215_vm8, %v7243_v45 }
 0x2b4   :  { %2870 = vmatpush.bf16.msra.mxu0 %v2840_v10 }
 0x2b6   :  { %v1787_v55 = vpop.f32.mrf.mxu1 }
 0x2b7   :  { %v1798_v42 = vpop.f32.mrf.mxu2  ;;  %v2826_v28 = vpop.permute.xlu1 %2825 }
 0x2b8   :  { %v1912_v32 = vpop.f32.mrf.mxu0  ;;  %v1811_v13 = vpop.f32.mrf.mxu3  ;;  %4680 = vrot.lane.b32.xlu2 %v6881_v18, %s5635_s16  ;;  %4676 = vrot.lane.b32.xlu1 %v6896_v60, %s5635_s16  ;;  %v2831_v60 = vsel %vm2827_vm5, %v2816_v25, %v2818_v34  ;;  %v8159_v25 = vld [vmem:[#allocation20_spill] sm:$0xff] }
 0x2b9   :  { %v7248_v38 = vadd.f32 %v1912_v32, %v7163_v7  ;;  %v7262_v7 = vadd.f32 %v1798_v42, %v7177_v8  ;;  %v7265_v48 = vadd.f32 %v1811_v13, %v7180_v12  ;;  %5482 = vmatmul.msk.bf16.vlgmr.msra.gmra.mxu1 %vm215_vm8, %v7243_v45  ;;  %v2824_v18 = vpop.permute.xlu2 %2823  ;;  %v2820_v15 = vpop.permute.xlu0 %2819  ;;  %v2849_v22 = vsel %vm118_vm0, %v2831_v60, 0 }
 0x2ba   :  { %4682 = vrot.lane.b32.xlu0 %v6879_v29, %s5635_s16  ;;  %v2843_v29 = vsel %vm118_vm0, %v2829_v52, 0  ;;  %v2832_v43 = vsel %vm2827_vm5, %v2818_v34, %v2820_v15  ;;  %v2833_v37 = vsel %vm2827_vm5, %v2820_v15, %v2822_v53  ;;  %v8160_v15 = vld [vmem:[#allocation21_spill] sm:$0xff] }
 0x2bb   :  { %2883 = vmatpush.bf16.msra.mxu1 %v2843_v29  ;;  %v2852_v56 = vsel %vm118_vm0, %v2832_v43, 0  ;;  %v2855_v55 = vsel %vm118_vm0, %v2833_v37, 0 }
 0x2be   :  { %v1925_v51 = vpop.f32.mrf.mxu1 }
 0x2bf   :  { %v7269_v6 = vadd.f32 %v1925_v51, %v7184_v5  ;;  %v1800_v8 = vpop.f32.mrf.mxu2  ;;  %v8157_v5 = vld [vmem:[#allocation18_spill] sm:$0xff]  ;;  %v3002_v24 = vpop.permute.xlu1 %3001 }
 0x2c0   :  { %v1914_v36 = vpop.f32.mrf.mxu0  ;;  %v1813_v12 = vpop.f32.mrf.mxu3  ;;  %4678 = vrot.lane.b32.xlu2 %v8157_v5, %s5635_s16  ;;  %4688 = vrot.lane.b32.xlu1 %v6902_v40, %s5635_s16 }
 0x2c1   :  { %5483 = vmatmul.msk.bf16.vlgmr.msra.gmra.mxu2 %vm215_vm8, %v7243_v45  ;;  %5484 = vmatmul.msk.bf16.vlgmr.msra.gmra.mxu3 %vm215_vm8, %v7243_v45  ;;  %v3006_v47 = vpop.permute.xlu2 %3005  ;;  %v3008_v11 = vpop.permute.xlu0 %3007 }
 0x2c2   :  { %4684 = vrot.lane.b32.xlu0 %v6883_v50, %s5635_s16  ;;  %2896 = vmatpush.bf16.msra.mxu2 %v2846_v33  ;;  %v3022_v5 = vsel %vm3019_vm6, %v3006_v47, %v3008_v11 }
 0x2c3   :  { %2909 = vmatpush.bf16.msra.mxu3 %v2849_v22  ;;  %5485 = vmatmul.msk.bf16.vlgmr.msrb.gmra.mxu0 %vm215_vm8, %v7243_v45  ;;  %v3038_v43 = vsel %vm118_vm0, %v3022_v5, 0 }
 0x2c4   :  { %2922 = vmatpush.bf16.msrb.mxu0 %v2852_v56 }
 0x2c6   :  { %v1927_v58 = vpop.f32.mrf.mxu1 }
 0x2c7   :  { %v1938_v40 = vpop.f32.mrf.mxu2  ;;  %v3014_v8 = vpop.permute.xlu1 %3013 }
 0x2c8   :  { %v1964_v9 = vpop.f32.mrf.mxu0  ;;  %v1951_v4 = vpop.f32.mrf.mxu3  ;;  %4690 = vrot.lane.b32.xlu2 %v8159_v25, %s5635_s16  ;;  %v7302_v1 = vadd.f32 %v1938_v40, %v7217_v61  ;;  %4692 = vrot.lane.b32.xlu1 %v6930_v16, %s5635_s16  ;;  %v2835_v16 = vsel %vm2827_vm5, %v2824_v18, %v2826_v28 }
 0x2c9   :  { %v7288_v50 = vadd.f32 %v1964_v9, %v7203_v30  ;;  %v8158_v30 = vld [vmem:[#allocation19_spill] sm:$0xff]  ;;  %v7305_v27 = vadd.f32 %v1951_v4, %v7220_v44  ;;  %5486 = vmatmul.msk.bf16.vlgmr.msrb.gmra.mxu1 %vm215_vm8, %v7243_v45  ;;  %v3004_v59 = vpop.permute.xlu2 %3003  ;;  %v2861_v10 = vsel %vm118_vm0, %v2835_v16, 0 }
 0x2ca   :  { %4686 = vrot.lane.b32.xlu0 %v8158_v30, %s5635_s16  ;;  %2935 = vmatpush.bf16.msrb.mxu1 %v2855_v55  ;;  %v3020_v49 = vsel %vm3019_vm6, %v3002_v24, %v3004_v59  ;;  %v3021_v36 = vsel %vm3019_vm6, %v3004_v59, %v3006_v47  ;;  %v8162_v59 = vld [vmem:[#allocation23_spill] sm:$0xff] }
 0x2cb   :  { %v3032_v13 = vsel %vm118_vm0, %v3020_v49, 0 }
 0x2ce   :  { %v1977_v41 = vpop.f32.mrf.mxu1 }
 0x2cf   :  { %v7309_v31 = vadd.f32 %v1977_v41, %v7224_v39  ;;  %v1940_v61 = vpop.f32.mrf.mxu2  ;;  %v2834_v39 = vsel %vm2827_vm5, %v2822_v53, %v2824_v18  ;;  %v3018_v56 = vpop.permute.xlu1 %3017  ;;  %vm3211_vm5 = vcmask 384000  }
 0x2d0   :  { %v1966_v23 = vpop.f32.mrf.mxu0  ;;  %v1953_v44 = vpop.f32.mrf.mxu3  ;;  %4871 = vrot.lane.b32.xlu2 %v6958_v19, %s5636_s19  ;;  %4867 = vrot.lane.b32.xlu1 %v6967_v46, %s5636_s19  ;;  %v2858_v19 = vsel %vm118_vm0, %v2834_v39, 0 }
 0x2d1   :  { %5487 = vmatmul.msk.bf16.vlgmr.msrb.gmra.mxu2 %vm215_vm8, %v7243_v45  ;;  %5488 = vmatmul.msk.bf16.vlgmr.msrb.gmra.mxu3 %vm215_vm8, %v7243_v45  ;;  %v3010_v46 = vpop.permute.xlu0 %3009 }
 0x2d2   :  { %4873 = vrot.lane.b32.xlu0 %v6956_v2, %s5636_s19  ;;  %v7328_v2 = vld [vmem:[%s8122_s3 + $0xe] sm:$0x1]  ;;  %2948 = vmatpush.bf16.msrb.mxu2 %v2858_v19 }
 0x2d3   :  { %2961 = vmatpush.bf16.msrb.mxu3 %v2861_v10  ;;  %5490 = vmatmul.msk.bf16.vlgmr.msra.gmra.mxu0 %vm215_vm8, %v7328_v2 }
 0x2d4   :  { %3062 = vmatpush.bf16.msra.mxu0 %v3032_v13 }
 0x2d6   :  { %v1979_v32 = vpop.f32.mrf.mxu1 }
 0x2d7   :  { %v1990_v52 = vpop.f32.mrf.mxu2 }
 0x2d8   :  { %v2104_v34 = vpop.f32.mrf.mxu0  ;;  %v2003_v51 = vpop.f32.mrf.mxu3  ;;  %4869 = vrot.lane.b32.xlu2 %v6965_v35, %s5636_s19  ;;  %4879 = vrot.lane.b32.xlu1 %v6973_v20, %s5636_s19  ;;  %v3023_v20 = vsel %vm3019_vm6, %v3008_v11, %v3010_v46 }
 0x2d9   :  { %v7333_v42 = vadd.f32 %v2104_v34, %v7248_v38  ;;  %v7347_v38 = vadd.f32 %v1990_v52, %v7262_v7  ;;  %v7350_v45 = vadd.f32 %v2003_v51, %v7265_v48  ;;  %5491 = vmatmul.msk.bf16.vlgmr.msra.gmra.mxu1 %vm215_vm8, %v7328_v2  ;;  %v3016_v35 = vpop.permute.xlu2 %3015  ;;  %v3012_v12 = vpop.permute.xlu0 %3011  ;;  %v3041_v9 = vsel %vm118_vm0, %v3023_v20, 0 }
 0x2da   :  { %4875 = vrot.lane.b32.xlu0 %v6960_v57, %s5636_s19  ;;  %v3035_v57 = vsel %vm118_vm0, %v3021_v36, 0  ;;  %v3024_v60 = vsel %vm3019_vm6, %v3010_v46, %v3012_v12  ;;  %v3025_v47 = vsel %vm3019_vm6, %v3012_v12, %v3014_v8 }
 0x2db   :  { %3075 = vmatpush.bf16.msra.mxu1 %v3035_v57  ;;  %v3044_v22 = vsel %vm118_vm0, %v3024_v60, 0 }
 0x2de   :  { %v2117_v29 = vpop.f32.mrf.mxu1 }
 0x2df   :  { %v7354_v53 = vadd.f32 %v2117_v29, %v7269_v6  ;;  %v1992_v7 = vpop.f32.mrf.mxu2  ;;  %v8161_v6 = vld [vmem:[#allocation22_spill] sm:$0xff] }
 0x2e0   :  { %v2106_v18 = vpop.f32.mrf.mxu0  ;;  %v2005_v48 = vpop.f32.mrf.mxu3  ;;  %4881 = vrot.lane.b32.xlu2 %v8161_v6, %s5636_s19  ;;  %4883 = vrot.lane.b32.xlu1 %v6995_v3, %s5636_s19 }
 0x2e1   :  { %5492 = vmatmul.msk.bf16.vlgmr.msra.gmra.mxu2 %vm215_vm8, %v7328_v2  ;;  %5493 = vmatmul.msk.bf16.vlgmr.msra.gmra.mxu3 %vm215_vm8, %v7328_v2  ;;  %v3198_v40 = vpop.permute.xlu2 %3197  ;;  %v3200_v41 = vpop.permute.xlu0 %3199 }
 0x2e2   :  { %4877 = vrot.lane.b32.xlu0 %v8160_v15, %s5636_s19  ;;  %3088 = vmatpush.bf16.msra.mxu2 %v3038_v43  ;;  %v3214_v36 = vsel %vm3211_vm5, %v3198_v40, %v3200_v41 }
 0x2e3   :  { %3101 = vmatpush.bf16.msra.mxu3 %v3041_v9  ;;  %5494 = vmatmul.msk.bf16.vlgmr.msrb.gmra.mxu0 %vm215_vm8, %v7328_v2 }
 0x2e4   :  { %3114 = vmatpush.bf16.msrb.mxu0 %v3044_v22 }
 0x2e6   :  { %v2119_v0 = vpop.f32.mrf.mxu1 }
 0x2e7   :  { %v2130_v3 = vpop.f32.mrf.mxu2 }
 0x2e8   :  { %v2156_v58 = vpop.f32.mrf.mxu0  ;;  %v2143_v28 = vpop.f32.mrf.mxu3  ;;  %5062 = vrot.lane.b32.xlu2 %v7024_v14, %s5637_s20  ;;  %5058 = vrot.lane.b32.xlu1 %v7042_v62, %s5637_s20  ;;  %v3027_v62 = vsel %vm3019_vm6, %v3016_v35, %v3018_v56 }
 0x2e9   :  { %v7373_v33 = vadd.f32 %v2156_v58, %v7288_v50  ;;  %v7387_v50 = vadd.f32 %v2130_v3, %v7302_v1  ;;  %v7390_v4 = vadd.f32 %v2143_v28, %v7305_v27  ;;  %5495 = vmatmul.msk.bf16.vlgmr.msrb.gmra.mxu1 %vm215_vm8, %v7328_v2  ;;  %v3194_v27 = vpop.permute.xlu1 %3193  ;;  %v3196_v55 = vpop.permute.xlu2 %3195  ;;  %v3053_v44 = vsel %vm118_vm0, %v3027_v62, 0 }
 0x2ea   :  { %5064 = vrot.lane.b32.xlu0 %v7022_v63, %s5637_s20  ;;  %v3047_v63 = vsel %vm118_vm0, %v3025_v47, 0  ;;  %v3212_v11 = vsel %vm3211_vm5, %v3194_v27, %v3196_v55 }
 0x2eb   :  { %3127 = vmatpush.bf16.msrb.mxu1 %v3047_v63  ;;  %v3224_v39 = vsel %vm118_vm0, %v3212_v11, 0 }
 0x2ee   :  { %v2169_v30 = vpop.f32.mrf.mxu1 }
 0x2ef   :  { %v7394_v25 = vadd.f32 %v2169_v30, %v7309_v31  ;;  %v2132_v14 = vpop.f32.mrf.mxu2  ;;  %v3026_v31 = vsel %vm3019_vm6, %v3014_v8, %v3016_v35  ;;  %v3230_v8 = vsel %vm118_vm0, %v3214_v36, 0  ;;  %vm3403_vm6 = vcmask 375808  }
 0x2f0   :  { %v2158_v37 = vpop.f32.mrf.mxu0  ;;  %v2145_v1 = vpop.f32.mrf.mxu3  ;;  %5060 = vrot.lane.b32.xlu2 %v7040_v17, %s5637_s20  ;;  %5070 = vrot.lane.b32.xlu1 %v7049_v54, %s5637_s20  ;;  %v3050_v17 = vsel %vm118_vm0, %v3026_v31, 0 }
 0x2f1   :  { %5496 = vmatmul.msk.bf16.vlgmr.msrb.gmra.mxu2 %vm215_vm8, %v7328_v2  ;;  %5497 = vmatmul.msk.bf16.vlgmr.msrb.gmra.mxu3 %vm215_vm8, %v7328_v2  ;;  %v3202_v54 = vpop.permute.xlu0 %3201  ;;  %v3213_v2 = vsel %vm3211_vm5, %v3196_v55, %v3198_v40  ;;  %v3206_v13 = vpop.permute.xlu1 %3205  ;;  %v7479_v37 = vld [vmem:[%s8122_s3 + $0x10] sm:$0x1] }
 0x2f2   :  { %5066 = vrot.lane.b32.xlu0 %v7026_v21, %s5637_s20  ;;  %v7413_v21 = vld [vmem:[%s8122_s3 + $0xf] sm:$0x1]  ;;  %3140 = vmatpush.bf16.msrb.mxu2 %v3050_v17  ;;  %v3208_v52 = vpop.permute.xlu2 %3207  ;;  %v3215_v29 = vsel %vm3211_vm5, %v3200_v41, %v3202_v54 }
 0x2f3   :  { %3153 = vmatpush.bf16.msrb.mxu3 %v3053_v44  ;;  %5499 = vmatmul.msk.bf16.vlgmr.msra.gmra.mxu0 %vm215_vm8, %v7413_v21  ;;  %v3233_v35 = vsel %vm118_vm0, %v3215_v29, 0  ;;  %v3218_v40 = vsel %vm3211_vm5, %v3206_v13, %v3208_v52 }
 0x2f4   :  { %3254 = vmatpush.bf16.msra.mxu0 %v3224_v39  ;;  %v3242_v63 = vsel %vm118_vm0, %v3218_v40, 0  ;;  %v8164_v40 = vld [vmem:[#allocation4_spill] sm:$0xff] }
 0x2f6   :  { %v2171_v23 = vpop.f32.mrf.mxu1 }
 0x2f7   :  { %v2182_v16 = vpop.f32.mrf.mxu2 }
 0x2f8   :  { %v2296_v61 = vpop.f32.mrf.mxu0  ;;  %v2195_v32 = vpop.f32.mrf.mxu3  ;;  %5072 = vrot.lane.b32.xlu2 %v8162_v59, %s5637_s20  ;;  %v7432_v49 = vadd.f32 %v2182_v16, %v7347_v38 }
 0x2f9   :  { %v7418_v24 = vadd.f32 %v2296_v61, %v7333_v42  ;;  %v7435_v34 = vadd.f32 %v2195_v32, %v7350_v45  ;;  %v5056_v42 = vld [vmem:[#allocation1] sm:$0xff]  ;;  %5500 = vmatmul.msk.bf16.vlgmr.msra.gmra.mxu1 %vm215_vm8, %v7413_v21  ;;  %v3204_v45 = vpop.permute.xlu0 %3203  ;;  %v3210_v12 = vpop.permute.xlu1 %3209 }
 0x2fa   :  { %5068 = vrot.lane.b32.xlu0 %v7044_v26, %s5637_s20  ;;  %5074 = vrot.lane.b32.xlu1 %v5056_v42, %s5637_s20  ;;  %v3227_v26 = vsel %vm118_vm0, %v3213_v2, 0  ;;  %v3216_v18 = vsel %vm3211_vm5, %v3202_v54, %v3204_v45  ;;  %v3390_v5 = vpop.permute.xlu2 %3389  ;;  %v3217_v60 = vsel %vm3211_vm5, %v3204_v45, %v3206_v13 }
 0x2fb   :  { %3267 = vmatpush.bf16.msra.mxu1 %v3227_v26  ;;  %v3236_v48 = vsel %vm118_vm0, %v3216_v18, 0 }
 0x2fe   :  { %v2309_v19 = vpop.f32.mrf.mxu1 }
 0x2ff   :  { %v7439_v10 = vadd.f32 %v2309_v19, %v7354_v53  ;;  %v2184_v51 = vpop.f32.mrf.mxu2 }
 0x300   :  { %v2298_v46 = vpop.f32.mrf.mxu0  ;;  %v2197_v38 = vpop.f32.mrf.mxu3 }
 0x301   :  { %5501 = vmatmul.msk.bf16.vlgmr.msra.gmra.mxu2 %vm215_vm8, %v7413_v21  ;;  %5502 = vmatmul.msk.bf16.vlgmr.msra.gmra.mxu3 %vm215_vm8, %v7413_v21  ;;  %v3392_v22 = vpop.permute.xlu0 %3391  ;;  %v3386_v28 = vpop.permute.xlu1 %3385 }
 0x302   :  { %3280 = vmatpush.bf16.msra.mxu2 %v3230_v8  ;;  %3293 = vmatpush.bf16.msra.mxu3 %v3233_v35  ;;  %v3388_v47 = vpop.permute.xlu2 %3387  ;;  %v3406_v16 = vsel %vm3403_vm6, %v3390_v5, %v3392_v22 }
 0x303   :  { %5503 = vmatmul.msk.bf16.vlgmr.msrb.gmra.mxu0 %vm215_vm8, %v7413_v21  ;;  %v3404_v30 = vsel %vm3403_vm6, %v3386_v28, %v3388_v47  ;;  %v3405_v11 = vsel %vm3403_vm6, %v3388_v47, %v3390_v5  ;;  %v3422_v2 = vsel %vm118_vm0, %v3406_v16, 0 }
 0x304   :  { %3306 = vmatpush.bf16.msrb.mxu0 %v3236_v48  ;;  %v3416_v27 = vsel %vm118_vm0, %v3404_v30, 0  ;;  %v3419_v44 = vsel %vm118_vm0, %v3405_v11, 0 }
 0x306   :  { %v2311_v53 = vpop.f32.mrf.mxu1 }
 0x307   :  { %v2322_v15 = vpop.f32.mrf.mxu2 }
 0x308   :  { %v2348_v57 = vpop.f32.mrf.mxu0  ;;  %v2335_v6 = vpop.f32.mrf.mxu3  ;;  %v7461_v20 = vadd.f32 %v2322_v15, %v7387_v50  ;;  %v3219_v50 = vsel %vm3211_vm5, %v3208_v52, %v3210_v12 }
 0x309   :  { %v7451_v7 = vadd.f32 %v2348_v57, %v7373_v33  ;;  %v7464_v0 = vadd.f32 %v2335_v6, %v7390_v4  ;;  %v3239_v33 = vsel %vm118_vm0, %v3217_v60, 0  ;;  %5504 = vmatmul.msk.bf16.vlgmr.msrb.gmra.mxu1 %vm215_vm8, %v7413_v21  ;;  %v3245_v41 = vsel %vm118_vm0, %v3219_v50, 0  ;;  %v3394_v1 = vpop.permute.xlu0 %3393  ;;  %v5516_v6 = vld [vmem:[%s8122_s3 + $0x11] sm:$0x1]  ;;  %v8163_v60 = vld [vmem:[#allocation3_spill] sm:$0xff] }
 0x30a   :  { %3319 = vmatpush.bf16.msrb.mxu1 %v3239_v33  ;;  %v3407_v32 = vsel %vm3403_vm6, %v3392_v22, %v3394_v1  ;;  %v3400_v35 = vpop.permute.xlu2 %3399  ;;  %v3569_v50 = vsel %vm118_vm0, %v8164_v40, 0 }
 0x30b   :  { %v3425_v19 = vsel %vm118_vm0, %v3407_v32, 0 }
 0x30e   :  { %v2361_v58 = vpop.f32.mrf.mxu1 }
 0x30f   :  { %v7468_v43 = vadd.f32 %v2361_v58, %v7394_v25  ;;  %v2324_v56 = vpop.f32.mrf.mxu2  ;;  %v3567_v58 = vsel %vm118_vm0, %v8163_v60, 0 }
 0x310   :  { %v2350_v9 = vpop.f32.mrf.mxu0  ;;  %v2337_v3 = vpop.f32.mrf.mxu3 }
 0x311   :  { %5505 = vmatmul.msk.bf16.vlgmr.msrb.gmra.mxu2 %vm215_vm8, %v7413_v21  ;;  %5506 = vmatmul.msk.bf16.vlgmr.msrb.gmra.mxu3 %vm215_vm8, %v7413_v21  ;;  %v3396_v39 = vpop.permute.xlu0 %3395 }
 0x312   :  { %3332 = vmatpush.bf16.msrb.mxu2 %v3242_v63  ;;  %3345 = vmatpush.bf16.msrb.mxu3 %v3245_v41  ;;  %v8165_v63 = vld [vmem:[#allocation5_spill] sm:$0xff] }
 0x313   :  { %5508 = vmatmul.msk.bf16.vlgmr.msra.gmra.mxu0 %vm215_vm8, %v7479_v37  ;;  %v3571_v41 = vsel %vm118_vm0, %v8165_v63, 0 }
 0x314   :  { %3446 = vmatpush.bf16.msra.mxu0 %v3416_v27  ;;  %v8167_v27 = vld [vmem:[#allocation7_spill] sm:$0xff] }
 0x316   :  { %v2363_v4 = vpop.f32.mrf.mxu1 }
 0x317   :  { %v2374_v31 = vpop.f32.mrf.mxu2 }
 0x318   :  { %v2488_v25 = vpop.f32.mrf.mxu0  ;;  %v2387_v62 = vpop.f32.mrf.mxu3  ;;  %v2397_v23 = vadd.f32 %v2374_v31, %v7432_v49  ;;  %v3408_v49 = vsel %vm3403_vm6, %v3394_v1, %v3396_v39  ;;  %v3575_v31 = vsel %vm118_vm0, %v8167_v27, 0 }
 0x319   :  { %v2583_v14 = vadd.f32 %v2488_v25, %v7418_v24  ;;  %v2398_v55 = vadd.f32 %v2387_v62, %v7435_v34  ;;  %5509 = vmatmul.msk.bf16.vlgmr.msra.gmra.mxu1 %vm215_vm8, %v7479_v37  ;;  %v3428_v46 = vsel %vm118_vm0, %v3408_v49, 0 }
 0x31a   :  { %3459 = vmatpush.bf16.msra.mxu1 %v3419_v44 }
 0x31e   :  { %v2501_v61 = vpop.f32.mrf.mxu1 }
 0x31f   :  { %v2584_v21 = vadd.f32 %v2501_v61, %v7439_v10  ;;  %v2376_v24 = vpop.f32.mrf.mxu2  ;;  %v3398_v10 = vpop.permute.xlu1 %3397 }
 0x320   :  { %v2490_v17 = vpop.f32.mrf.mxu0  ;;  %v2389_v54 = vpop.f32.mrf.mxu3  ;;  %v3409_v38 = vsel %vm3403_vm6, %v3396_v39, %v3398_v10 }
 0x321   :  { %5510 = vmatmul.msk.bf16.vlgmr.msra.gmra.mxu2 %vm215_vm8, %v7479_v37  ;;  %5511 = vmatmul.msk.bf16.vlgmr.msra.gmra.mxu3 %vm215_vm8, %v7479_v37  ;;  %v3431_v53 = vsel %vm118_vm0, %v3409_v38, 0  ;;  %v3728_v24 = vpop.permute.xlu0 %3727  ;;  %v8168_v54 = vld [vmem:[#allocation8_spill] sm:$0xff] }
 0x322   :  { %3472 = vmatpush.bf16.msra.mxu2 %v3422_v2  ;;  %3485 = vmatpush.bf16.msra.mxu3 %v3425_v19  ;;  %v3577_v39 = vsel %vm118_vm0, %v8168_v54, 0 }
 0x323   :  { %5512 = vmatmul.msk.bf16.vlgmr.msrb.gmra.mxu0 %vm215_vm8, %v7479_v37 }
 0x324   :  { %3498 = vmatpush.bf16.msrb.mxu0 %v3428_v46  ;;  %v8169_v46 = vld [vmem:[#allocation9_spill] sm:$0xff] }
 0x326   :  { %v2503_v59 = vpop.f32.mrf.mxu1 }
 0x327   :  { %v2514_v26 = vpop.f32.mrf.mxu2  ;;  %v3402_v18 = vpop.permute.xlu1 %3401 }
 0x328   :  { %v2540_v34 = vpop.f32.mrf.mxu0  ;;  %v2527_v13 = vpop.f32.mrf.mxu3  ;;  %v2585_v52 = vadd.f32 %v2514_v26, %v7461_v20  ;;  %v3411_v48 = vsel %vm3403_vm6, %v3400_v35, %v3402_v18  ;;  %v3579_v26 = vsel %vm118_vm0, %v8169_v46, 0 }
 0x329   :  { %v2587_v42 = vadd.f32 %v2540_v34, %v7451_v7  ;;  %v2586_v51 = vadd.f32 %v2527_v13, %v7464_v0  ;;  %5513 = vmatmul.msk.bf16.vlgmr.msrb.gmra.mxu1 %vm215_vm8, %v7479_v37  ;;  %v3410_v7 = vsel %vm3403_vm6, %v3398_v10, %v3400_v35  ;;  %v3437_v20 = vsel %vm118_vm0, %v3411_v48, 0  ;;  %v7559_v10 = vld [vmem:[%s8122_s3 + $0x12] sm:$0x1]  ;;  %v8170_v13 = vld [vmem:[#allocation10_spill] sm:$0xff] }
 0x32a   :  { %3511 = vmatpush.bf16.msrb.mxu1 %v3431_v53  ;;  %v3434_v5 = vsel %vm118_vm0, %v3410_v7, 0 }
 0x32e   :  { %v2553_v45 = vpop.f32.mrf.mxu1 }
 0x32f   :  { %v2588_v36 = vadd.f32 %v2553_v45, %v7468_v43  ;;  %v2516_v57 = vpop.f32.mrf.mxu2  ;;  %v3722_v59 = vpop.permute.xlu1 %3721 }
 0x330   :  { %v2542_v29 = vpop.f32.mrf.mxu0  ;;  %v2529_v8 = vpop.f32.mrf.mxu3 }
 0x331   :  { %5514 = vmatmul.msk.bf16.vlgmr.msrb.gmra.mxu2 %vm215_vm8, %v7479_v37  ;;  %5515 = vmatmul.msk.bf16.vlgmr.msrb.gmra.mxu3 %vm215_vm8, %v7479_v37 }
 0x332   :  { %3524 = vmatpush.bf16.msrb.mxu2 %v3434_v5  ;;  %3537 = vmatpush.bf16.msrb.mxu3 %v3437_v20 }
 0x333   :  { %5517 = vmatmul.msk.bf16.vlgmr.msra.gmra.mxu0 %vm215_vm8, %v5516_v6 }
 0x334   :  { %3590 = vmatpush.bf16.msra.mxu0 %v3567_v58 }
 0x336   :  { %v2555_v12 = vpop.f32.mrf.mxu1 }
 0x337   :  { %v2566_v43 = vpop.f32.mrf.mxu2  ;;  %v3734_v48 = vpop.permute.xlu1 %3733 }
 0x338   :  { %v2680_v15 = vpop.f32.mrf.mxu0  ;;  %v2579_v9 = vpop.f32.mrf.mxu3  ;;  %v2589_v33 = vadd.f32 %v2566_v43, %v2397_v23 }
 0x339   :  { %v2775_v0 = vadd.f32 %v2680_v15, %v2583_v14  ;;  %v2590_v22 = vadd.f32 %v2579_v9, %v2398_v55  ;;  %5518 = vmatmul.msk.bf16.vlgmr.msra.gmra.mxu1 %vm215_vm8, %v5516_v6  ;;  %v8166_v14 = vld [vmem:[#allocation6_spill] sm:$0xff]  ;;  %v3726_v55 = vpop.permute.xlu2 %3725 }
 0x33a   :  { %3603 = vmatpush.bf16.msra.mxu1 %v3569_v50  ;;  %v3573_v1 = vsel %vm118_vm0, %v8166_v14, 0  ;;  %v3741_v20 = vsel %vm206_vm7, %v3726_v55, %v3728_v24 }
 0x33b   :  { %v3757_v9 = vsel %vm118_vm0, %v3741_v20, 0 }
 0x33e   :  { %v2693_v56 = vpop.f32.mrf.mxu1 }
 0x33f   :  { %v2776_v3 = vadd.f32 %v2693_v56, %v2584_v21  ;;  %v2568_v4 = vpop.f32.mrf.mxu2 }
 0x340   :  { %v2682_v28 = vpop.f32.mrf.mxu0  ;;  %v2581_v47 = vpop.f32.mrf.mxu3 }
 0x341   :  { %5519 = vmatmul.msk.bf16.vlgmr.msra.gmra.mxu2 %vm215_vm8, %v5516_v6  ;;  %5520 = vmatmul.msk.bf16.vlgmr.msra.gmra.mxu3 %vm215_vm8, %v5516_v6  ;;  %v3724_v34 = vpop.permute.xlu2 %3723 }
 0x342   :  { %3616 = vmatpush.bf16.msra.mxu2 %v3571_v41  ;;  %3629 = vmatpush.bf16.msra.mxu3 %v3573_v1  ;;  %v3739_v2 = vsel %vm206_vm7, %v3722_v59, %v3724_v34  ;;  %v3740_v18 = vsel %vm206_vm7, %v3724_v34, %v3726_v55 }
 0x343   :  { %5521 = vmatmul.msk.bf16.vlgmr.msrb.gmra.mxu0 %vm215_vm8, %v5516_v6  ;;  %v3751_v38 = vsel %vm118_vm0, %v3739_v2, 0  ;;  %v3754_v7 = vsel %vm118_vm0, %v3740_v18, 0 }
 0x344   :  { %3642 = vmatpush.bf16.msrb.mxu0 %v3575_v31 }
 0x346   :  { %v2695_v30 = vpop.f32.mrf.mxu1 }
 0x347   :  { %v2706_v62 = vpop.f32.mrf.mxu2 }
 0x348   :  { %v2732_v25 = vpop.f32.mrf.mxu0  ;;  %v2719_v23 = vpop.f32.mrf.mxu3  ;;  %v7546_v11 = vadd.f32 %v2706_v62, %v2585_v52  ;;  %v3581_v52 = vsel %vm118_vm0, %v8170_v13, 0 }
 0x349   :  { %v7535_v37 = vadd.f32 %v2732_v25, %v2587_v42  ;;  %v7548_v61 = vadd.f32 %v2719_v23, %v2586_v51  ;;  %5522 = vmatmul.msk.bf16.vlgmr.msrb.gmra.mxu1 %vm215_vm8, %v5516_v6  ;;  %v3730_v51 = vpop.permute.xlu0 %3729  ;;  %v3736_v12 = vpop.permute.xlu2 %3735 }
 0x34a   :  { %3655 = vmatpush.bf16.msrb.mxu1 %v3577_v39  ;;  %v3745_v62 = vsel %vm206_vm7, %v3734_v48, %v3736_v12 }
 0x34e   :  { %v2745_v21 = vpop.f32.mrf.mxu1 }
 0x34f   :  { %v7550_v17 = vadd.f32 %v2745_v21, %v2588_v36  ;;  %v2708_v16 = vpop.f32.mrf.mxu2 }
 0x350   :  { %v2734_v44 = vpop.f32.mrf.mxu0  ;;  %v2721_v32 = vpop.f32.mrf.mxu3 }
 0x351   :  { %5523 = vmatmul.msk.bf16.vlgmr.msrb.gmra.mxu2 %vm215_vm8, %v5516_v6  ;;  %5524 = vmatmul.msk.bf16.vlgmr.msrb.gmra.mxu3 %vm215_vm8, %v5516_v6  ;;  %v3732_v5 = vpop.permute.xlu0 %3731  ;;  %v3917_v50 = vpop.permute.xlu2 %3916  ;;  %v3769_v44 = vsel %vm118_vm0, %v3745_v62, 0 }
 0x352   :  { %3668 = vmatpush.bf16.msrb.mxu2 %v3579_v26  ;;  %3681 = vmatpush.bf16.msrb.mxu3 %v3581_v52  ;;  %v3743_v58 = vsel %vm206_vm7, %v3730_v51, %v3732_v5  ;;  %v3744_v30 = vsel %vm206_vm7, %v3732_v5, %v3734_v48 }
 0x353   :  { %5526 = vmatmul.msk.bf16.vlgmr.msra.gmra.mxu0 %vm215_vm8, %v7559_v10  ;;  %v3763_v56 = vsel %vm118_vm0, %v3743_v58, 0  ;;  %v3766_v41 = vsel %vm118_vm0, %v3744_v30, 0 }
 0x354   :  { %3781 = vmatpush.bf16.msra.mxu0 %v3751_v38 }
 0x356   :  { %v2747_v49 = vpop.f32.mrf.mxu1 }
 0x357   :  { %v2758_v45 = vpop.f32.mrf.mxu2 }
 0x358   :  { %v2872_v19 = vpop.f32.mrf.mxu0  ;;  %v2771_v36 = vpop.f32.mrf.mxu3  ;;  %v7572_v29 = vadd.f32 %v2758_v45, %v2589_v33 }
 0x359   :  { %v7561_v42 = vadd.f32 %v2872_v19, %v2775_v0  ;;  %v7574_v53 = vadd.f32 %v2771_v36, %v2590_v22  ;;  %5527 = vmatmul.msk.bf16.vlgmr.msra.gmra.mxu1 %vm215_vm8, %v7559_v10  ;;  %v3742_v0 = vsel %vm206_vm7, %v3728_v24, %v3730_v51  ;;  %v3919_v14 = vpop.permute.xlu0 %3918 }
 0x35a   :  { %3794 = vmatpush.bf16.msra.mxu1 %v3754_v7  ;;  %v3760_v33 = vsel %vm118_vm0, %v3742_v0, 0  ;;  %v3932_v45 = vsel %vm523_vm9, %v3917_v50, %v3919_v14 }
 0x35e   :  { %v2885_v57 = vpop.f32.mrf.mxu1 }
 0x35f   :  { %v7577_v8 = vadd.f32 %v2885_v57, %v2776_v3  ;;  %v2760_v15 = vpop.f32.mrf.mxu2  ;;  %v3738_v3 = vpop.permute.xlu1 %3737  ;;  %v3948_v57 = vsel %vm118_vm0, %v3932_v45, 0 }
 0x360   :  { %v2874_v35 = vpop.f32.mrf.mxu0  ;;  %v2773_v6 = vpop.f32.mrf.mxu3  ;;  %v3746_v23 = vsel %vm206_vm7, %v3736_v12, %v3738_v3  ;;  %vm5348_vm7 = vcmask 7168  }
 0x361   :  { %5528 = vmatmul.msk.bf16.vlgmr.msra.gmra.mxu2 %vm215_vm8, %v7559_v10  ;;  %5529 = vmatmul.msk.bf16.vlgmr.msra.gmra.mxu3 %vm215_vm8, %v7559_v10  ;;  %v3772_v24 = vsel %vm118_vm0, %v3746_v23, 0  ;;  %v3921_v39 = vpop.permute.xlu0 %3920 }
 0x362   :  { %3807 = vmatpush.bf16.msra.mxu2 %v3757_v9  ;;  %3820 = vmatpush.bf16.msra.mxu3 %v3760_v33  ;;  %v3933_v36 = vsel %vm523_vm9, %v3919_v14, %v3921_v39 }
 0x363   :  { %5530 = vmatmul.msk.bf16.vlgmr.msrb.gmra.mxu0 %vm215_vm8, %v7559_v10 }
 0x364   :  { %3833 = vmatpush.bf16.msrb.mxu0 %v3763_v56 }
 0x366   :  { %v2887_v60 = vpop.f32.mrf.mxu1 }
 0x367   :  { %v2898_v28 = vpop.f32.mrf.mxu2  ;;  %v3913_v31 = vpop.permute.xlu1 %3912 }
 0x368   :  { %v2924_v43 = vpop.f32.mrf.mxu0  ;;  %v2911_v40 = vpop.f32.mrf.mxu3  ;;  %v7598_v4 = vadd.f32 %v2898_v28, %v7546_v11 }
 0x369   :  { %v7588_v22 = vadd.f32 %v2924_v43, %v7535_v37  ;;  %v7601_v47 = vadd.f32 %v2911_v40, %v7548_v61  ;;  %5531 = vmatmul.msk.bf16.vlgmr.msrb.gmra.mxu1 %vm215_vm8, %v7559_v10  ;;  %v3915_v11 = vpop.permute.xlu2 %3914  ;;  %v3923_v38 = vpop.permute.xlu0 %3922 }
 0x36a   :  { %3846 = vmatpush.bf16.msrb.mxu1 %v3766_v41  ;;  %v3930_v61 = vsel %vm523_vm9, %v3913_v31, %v3915_v11  ;;  %v3931_v2 = vsel %vm523_vm9, %v3915_v11, %v3917_v50 }
 0x36b   :  { %v3942_v16 = vsel %vm118_vm0, %v3930_v61, 0  ;;  %v3945_v46 = vsel %vm118_vm0, %v3931_v2, 0 }
 0x36e   :  { %v2937_v25 = vpop.f32.mrf.mxu1 }
 0x36f   :  { %v7605_v37 = vadd.f32 %v2937_v25, %v7550_v17  ;;  %v2900_v1 = vpop.f32.mrf.mxu2  ;;  %v7616_v17 = vld [vmem:[%s8122_s3 + $0x13] sm:$0x1]  ;;  %v3925_v26 = vpop.permute.xlu1 %3924  ;;  %v7677_v25 = vld [vmem:[%s8122_s3 + $0x14] sm:$0x1] }
 0x370   :  { %v2926_v63 = vpop.f32.mrf.mxu0  ;;  %v2913_v27 = vpop.f32.mrf.mxu3  ;;  %v3935_v0 = vsel %vm523_vm9, %v3923_v38, %v3925_v26 }
 0x371   :  { %5532 = vmatmul.msk.bf16.vlgmr.msrb.gmra.mxu2 %vm215_vm8, %v7559_v10  ;;  %5533 = vmatmul.msk.bf16.vlgmr.msrb.gmra.mxu3 %vm215_vm8, %v7559_v10  ;;  %v3927_v13 = vpop.permute.xlu2 %3926  ;;  %v3957_v9 = vsel %vm118_vm0, %v3935_v0, 0  ;;  %v4110_v33 = vpop.permute.xlu0 %4109 }
 0x372   :  { %3859 = vmatpush.bf16.msrb.mxu2 %v3769_v44  ;;  %3872 = vmatpush.bf16.msrb.mxu3 %v3772_v24  ;;  %v3936_v28 = vsel %vm523_vm9, %v3925_v26, %v3927_v13 }
 0x373   :  { %5535 = vmatmul.msk.bf16.vlgmr.msra.gmra.mxu0 %vm215_vm8, %v7616_v17 }
 0x374   :  { %3972 = vmatpush.bf16.msra.mxu0 %v3942_v16 }
 0x376   :  { %v2939_v55 = vpop.f32.mrf.mxu1 }
 0x377   :  { %v2950_v32 = vpop.f32.mrf.mxu2  ;;  %v3929_v48 = vpop.permute.xlu1 %3928 }
 0x378   :  { %v3064_v21 = vpop.f32.mrf.mxu0  ;;  %v2963_v59 = vpop.f32.mrf.mxu3  ;;  %v7631_v49 = vadd.f32 %v2950_v32, %v7572_v29  ;;  %v3937_v40 = vsel %vm523_vm9, %v3927_v13, %v3929_v48 }
 0x379   :  { %v7621_v54 = vadd.f32 %v3064_v21, %v7561_v42  ;;  %v7634_v34 = vadd.f32 %v2963_v59, %v7574_v53  ;;  %5536 = vmatmul.msk.bf16.vlgmr.msra.gmra.mxu1 %vm215_vm8, %v7616_v17  ;;  %v3934_v53 = vsel %vm523_vm9, %v3921_v39, %v3923_v38  ;;  %v4108_v6 = vpop.permute.xlu2 %4107  ;;  %v3963_v63 = vsel %vm118_vm0, %v3937_v40, 0  ;;  %v4112_v14 = vpop.permute.xlu0 %4111 }
 0x37a   :  { %3985 = vmatpush.bf16.msra.mxu1 %v3945_v46  ;;  %v3954_v7 = vsel %vm118_vm0, %v3934_v53, 0  ;;  %v4123_v32 = vsel %vm715_vm10, %v4108_v6, %v4110_v33  ;;  %v4124_v59 = vsel %vm715_vm10, %v4110_v33, %v4112_v14 }
 0x37e   :  { %v3077_v19 = vpop.f32.mrf.mxu1 }
 0x37f   :  { %v7638_v10 = vadd.f32 %v3077_v19, %v7577_v8  ;;  %v2952_v52 = vpop.f32.mrf.mxu2  ;;  %v3951_v8 = vsel %vm118_vm0, %v3933_v36, 0  ;;  %v4104_v3 = vpop.permute.xlu1 %4103  ;;  %v4139_v19 = vsel %vm118_vm0, %v4123_v32, 0 }
 0x380   :  { %v3066_v42 = vpop.f32.mrf.mxu0  ;;  %v2965_v51 = vpop.f32.mrf.mxu3 }
 0x381   :  { %5537 = vmatmul.msk.bf16.vlgmr.msra.gmra.mxu2 %vm215_vm8, %v7616_v17  ;;  %5538 = vmatmul.msk.bf16.vlgmr.msra.gmra.mxu3 %vm215_vm8, %v7616_v17  ;;  %v4114_v16 = vpop.permute.xlu0 %4113 }
 0x382   :  { %3998 = vmatpush.bf16.msra.mxu2 %v3948_v57  ;;  %4011 = vmatpush.bf16.msra.mxu3 %v3951_v8 }
 0x383   :  { %5539 = vmatmul.msk.bf16.vlgmr.msrb.gmra.mxu0 %vm215_vm8, %v7616_v17 }
 0x384   :  { %4024 = vmatpush.bf16.msrb.mxu0 %v3954_v7 }
 0x386   :  { %v3079_v29 = vpop.f32.mrf.mxu1 }
 0x387   :  { %v3090_v12 = vpop.f32.mrf.mxu2  ;;  %v4116_v44 = vpop.permute.xlu1 %4115 }
 0x388   :  { %v3116_v18 = vpop.f32.mrf.mxu0  ;;  %v3103_v15 = vpop.f32.mrf.mxu3  ;;  %v7659_v5 = vadd.f32 %v3090_v12, %v7598_v4  ;;  %v4126_v36 = vsel %vm715_vm10, %v4114_v16, %v4116_v44 }
 0x389   :  { %v7649_v35 = vadd.f32 %v3116_v18, %v7588_v22  ;;  %v7662_v20 = vadd.f32 %v3103_v15, %v7601_v47  ;;  %5540 = vmatmul.msk.bf16.vlgmr.msrb.gmra.mxu1 %vm215_vm8, %v7616_v17  ;;  %v4106_v4 = vpop.permute.xlu2 %4105  ;;  %v4148_v57 = vsel %vm118_vm0, %v4126_v36, 0  ;;  %v4301_v8 = vpop.permute.xlu0 %4300 }
 0x38a   :  { %4037 = vmatpush.bf16.msrb.mxu1 %v3957_v9  ;;  %v4121_v47 = vsel %vm715_vm10, %v4104_v3, %v4106_v4  ;;  %v4122_v55 = vsel %vm715_vm10, %v4106_v4, %v4108_v6 }
 0x38b   :  { %v4133_v1 = vsel %vm118_vm0, %v4121_v47, 0 }
 0x38e   :  { %v3129_v60 = vpop.f32.mrf.mxu1 }
 0x38f   :  { %v7666_v58 = vadd.f32 %v3129_v60, %v7605_v37  ;;  %v3092_v22 = vpop.f32.mrf.mxu2  ;;  %v3960_v37 = vsel %vm118_vm0, %v3936_v28, 0  ;;  %v4120_v26 = vpop.permute.xlu1 %4119  ;;  %v7738_v60 = vld [vmem:[%s8122_s3 + $0x15] sm:$0x1] }
 0x390   :  { %v3118_v43 = vpop.f32.mrf.mxu0  ;;  %v3105_v56 = vpop.f32.mrf.mxu3 }
 0x391   :  { %5541 = vmatmul.msk.bf16.vlgmr.msrb.gmra.mxu2 %vm215_vm8, %v7616_v17  ;;  %5542 = vmatmul.msk.bf16.vlgmr.msrb.gmra.mxu3 %vm215_vm8, %v7616_v17  ;;  %v4136_v17 = vsel %vm118_vm0, %v4122_v55, 0  ;;  %v4118_v24 = vpop.permute.xlu2 %4117  ;;  %v4303_v33 = vpop.permute.xlu0 %4302 }
 0x392   :  { %4050 = vmatpush.bf16.msrb.mxu2 %v3960_v37  ;;  %4063 = vmatpush.bf16.msrb.mxu3 %v3963_v63  ;;  %v4127_v12 = vsel %vm715_vm10, %v4116_v44, %v4118_v24  ;;  %v4128_v15 = vsel %vm715_vm10, %v4118_v24, %v4120_v26 }
 0x393   :  { %5544 = vmatmul.msk.bf16.vlgmr.msra.gmra.mxu0 %vm215_vm8, %v7677_v25  ;;  %v4154_v43 = vsel %vm118_vm0, %v4128_v15, 0 }
 0x394   :  { %4163 = vmatpush.bf16.msra.mxu0 %v4133_v1 }
 0x396   :  { %v3131_v50 = vpop.f32.mrf.mxu1 }
 0x397   :  { %v3142_v27 = vpop.f32.mrf.mxu2  ;;  %v4295_v48 = vpop.permute.xlu1 %4294 }
 0x398   :  { %v3256_v30 = vpop.f32.mrf.mxu0  ;;  %v3155_v31 = vpop.f32.mrf.mxu3  ;;  %v7692_v62 = vadd.f32 %v3142_v27, %v7631_v49 }
 0x399   :  { %v7682_v41 = vadd.f32 %v3256_v30, %v7621_v54  ;;  %v7695_v23 = vadd.f32 %v3155_v31, %v7634_v34  ;;  %5545 = vmatmul.msk.bf16.vlgmr.msra.gmra.mxu1 %vm215_vm8, %v7677_v25  ;;  %v4125_v34 = vsel %vm715_vm10, %v4112_v14, %v4114_v16  ;;  %v4299_v51 = vpop.permute.xlu2 %4298  ;;  %v4305_v1 = vpop.permute.xlu0 %4304  ;;  %v4315_v31 = vsel %vm907_vm11, %v4301_v8, %v4303_v33 }
 0x39a   :  { %4176 = vmatpush.bf16.msra.mxu1 %v4136_v17  ;;  %v4145_v46 = vsel %vm118_vm0, %v4125_v34, 0  ;;  %v4314_v27 = vsel %vm907_vm11, %v4299_v51, %v4301_v8 }
 0x39e   :  { %v3269_v11 = vpop.f32.mrf.mxu1 }
 0x39f   :  { %v7699_v61 = vadd.f32 %v3269_v11, %v7638_v10  ;;  %v3144_v54 = vpop.f32.mrf.mxu2  ;;  %v4142_v10 = vsel %vm118_vm0, %v4124_v59, 0  ;;  %v4307_v37 = vpop.permute.xlu1 %4306  ;;  %v4330_v11 = vsel %vm118_vm0, %v4314_v27, 0 }
 0x3a0   :  { %v3258_v21 = vpop.f32.mrf.mxu0  ;;  %v3157_v39 = vpop.f32.mrf.mxu3  ;;  %v4317_v59 = vsel %vm907_vm11, %v4305_v1, %v4307_v37 }
 0x3a1   :  { %5546 = vmatmul.msk.bf16.vlgmr.msra.gmra.mxu2 %vm215_vm8, %v7677_v25  ;;  %5547 = vmatmul.msk.bf16.vlgmr.msra.gmra.mxu3 %vm215_vm8, %v7677_v25 }
 0x3a2   :  { %4189 = vmatpush.bf16.msra.mxu2 %v4139_v19  ;;  %4202 = vmatpush.bf16.msra.mxu3 %v4142_v10  ;;  %v4339_v19 = vsel %vm118_vm0, %v4317_v59, 0  ;;  %v4492_v10 = vpop.permute.xlu0 %4491 }
 0x3a3   :  { %5548 = vmatmul.msk.bf16.vlgmr.msrb.gmra.mxu0 %vm215_vm8, %v7677_v25 }
 0x3a4   :  { %4215 = vmatpush.bf16.msrb.mxu0 %v4145_v46 }
 0x3a6   :  { %v3271_v49 = vpop.f32.mrf.mxu1 }
 0x3a7   :  { %v3282_v13 = vpop.f32.mrf.mxu2  ;;  %v4311_v44 = vpop.permute.xlu1 %4310 }
 0x3a8   :  { %v3308_v2 = vpop.f32.mrf.mxu0  ;;  %v3295_v52 = vpop.f32.mrf.mxu3  ;;  %v7720_v38 = vadd.f32 %v3282_v13, %v7659_v5 }
 0x3a9   :  { %v7710_v42 = vadd.f32 %v3308_v2, %v7649_v35  ;;  %v7723_v45 = vadd.f32 %v3295_v52, %v7662_v20  ;;  %5549 = vmatmul.msk.bf16.vlgmr.msrb.gmra.mxu1 %vm215_vm8, %v7677_v25  ;;  %v4297_v5 = vpop.permute.xlu2 %4296 }
 0x3aa   :  { %4228 = vmatpush.bf16.msrb.mxu1 %v4148_v57  ;;  %v4312_v20 = vsel %vm907_vm11, %v4295_v48, %v4297_v5  ;;  %v4313_v50 = vsel %vm907_vm11, %v4297_v5, %v4299_v51  ;;  %v4494_v8 = vpop.permute.xlu0 %4493 }
 0x3ab   :  { %v4324_v22 = vsel %vm118_vm0, %v4312_v20, 0 }
 0x3ae   :  { %v3321_v29 = vpop.f32.mrf.mxu1 }
 0x3af   :  { %v7727_v53 = vadd.f32 %v3321_v29, %v7666_v58  ;;  %v3284_v35 = vpop.f32.mrf.mxu2  ;;  %v4151_v58 = vsel %vm118_vm0, %v4127_v12, 0  ;;  %v4486_v26 = vpop.permute.xlu1 %4485  ;;  %v7799_v29 = vld [vmem:[%s8122_s3 + $0x16] sm:$0x1] }
 0x3b0   :  { %v3310_v18 = vpop.f32.mrf.mxu0  ;;  %v3297_v7 = vpop.f32.mrf.mxu3 }
 0x3b1   :  { %5550 = vmatmul.msk.bf16.vlgmr.msrb.gmra.mxu2 %vm215_vm8, %v7677_v25  ;;  %5551 = vmatmul.msk.bf16.vlgmr.msrb.gmra.mxu3 %vm215_vm8, %v7677_v25  ;;  %v4327_v25 = vsel %vm118_vm0, %v4313_v50, 0  ;;  %v4309_v63 = vpop.permute.xlu2 %4308 }
 0x3b2   :  { %4241 = vmatpush.bf16.msrb.mxu2 %v4151_v58  ;;  %4254 = vmatpush.bf16.msrb.mxu3 %v4154_v43  ;;  %v4318_v13 = vsel %vm907_vm11, %v4307_v37, %v4309_v63  ;;  %v4319_v52 = vsel %vm907_vm11, %v4309_v63, %v4311_v44 }
 0x3b3   :  { %5553 = vmatmul.msk.bf16.vlgmr.msra.gmra.mxu0 %vm215_vm8, %v7738_v60  ;;  %v4345_v18 = vsel %vm118_vm0, %v4319_v52, 0 }
 0x3b4   :  { %4354 = vmatpush.bf16.msra.mxu0 %v4324_v22  ;;  %v4496_v22 = vpop.permute.xlu0 %4495 }
 0x3b6   :  { %v3323_v6 = vpop.f32.mrf.mxu1 }
 0x3b7   :  { %v3334_v56 = vpop.f32.mrf.mxu2  ;;  %v4498_v58 = vpop.permute.xlu1 %4497 }
 0x3b8   :  { %v3448_v0 = vpop.f32.mrf.mxu0  ;;  %v3347_v3 = vpop.f32.mrf.mxu3  ;;  %v7753_v28 = vadd.f32 %v3334_v56, %v7692_v62 }
 0x3b9   :  { %v7743_v9 = vadd.f32 %v3448_v0, %v7682_v41  ;;  %v7756_v40 = vadd.f32 %v3347_v3, %v7695_v23  ;;  %5554 = vmatmul.msk.bf16.vlgmr.msra.gmra.mxu1 %vm215_vm8, %v7738_v60  ;;  %v4316_v23 = vsel %vm907_vm11, %v4303_v33, %v4305_v1  ;;  %v4490_v39 = vpop.permute.xlu2 %4489  ;;  %v4506_v3 = vsel %vm1099_vm12, %v4492_v10, %v4494_v8 }
 0x3ba   :  { %4367 = vmatpush.bf16.msra.mxu1 %v4327_v25  ;;  %v4336_v17 = vsel %vm118_vm0, %v4316_v23, 0  ;;  %v4505_v56 = vsel %vm1099_vm12, %v4490_v39, %v4492_v10 }
 0x3be   :  { %v3461_v4 = vpop.f32.mrf.mxu1 }
 0x3bf   :  { %v7760_v47 = vadd.f32 %v3461_v4, %v7699_v61  ;;  %v3336_v41 = vpop.f32.mrf.mxu2  ;;  %v4333_v61 = vsel %vm118_vm0, %v4315_v31, 0  ;;  %v4521_v4 = vsel %vm118_vm0, %v4505_v56, 0  ;;  %v4502_v37 = vpop.permute.xlu1 %4501  ;;  %v4508_v31 = vsel %vm1099_vm12, %v4496_v22, %v4498_v58 }
 0x3c0   :  { %v3450_v30 = vpop.f32.mrf.mxu0  ;;  %v3349_v14 = vpop.f32.mrf.mxu3 }
 0x3c1   :  { %5555 = vmatmul.msk.bf16.vlgmr.msra.gmra.mxu2 %vm215_vm8, %v7738_v60  ;;  %5556 = vmatmul.msk.bf16.vlgmr.msra.gmra.mxu3 %vm215_vm8, %v7738_v60 }
 0x3c2   :  { %4380 = vmatpush.bf16.msra.mxu2 %v4330_v11  ;;  %4393 = vmatpush.bf16.msra.mxu3 %v4333_v61  ;;  %v4530_v11 = vsel %vm118_vm0, %v4508_v31, 0  ;;  %v4683_v61 = vpop.permute.xlu0 %4682 }
 0x3c3   :  { %5557 = vmatmul.msk.bf16.vlgmr.msrb.gmra.mxu0 %vm215_vm8, %v7738_v60 }
 0x3c4   :  { %4406 = vmatpush.bf16.msrb.mxu0 %v4336_v17 }
 0x3c6   :  { %v3463_v62 = vpop.f32.mrf.mxu1 }
 0x3c7   :  { %v3474_v24 = vpop.f32.mrf.mxu2  ;;  %v4677_v44 = vpop.permute.xlu1 %4676 }
 0x3c8   :  { %v3500_v55 = vpop.f32.mrf.mxu0  ;;  %v3487_v54 = vpop.f32.mrf.mxu3  ;;  %v7781_v16 = vadd.f32 %v3474_v24, %v7720_v38 }
 0x3c9   :  { %v7771_v21 = vadd.f32 %v3500_v55, %v7710_v42  ;;  %v7784_v32 = vadd.f32 %v3487_v54, %v7723_v45  ;;  %5558 = vmatmul.msk.bf16.vlgmr.msrb.gmra.mxu1 %vm215_vm8, %v7738_v60  ;;  %v4488_v38 = vpop.permute.xlu2 %4487 }
 0x3ca   :  { %4419 = vmatpush.bf16.msrb.mxu1 %v4339_v19  ;;  %v4503_v45 = vsel %vm1099_vm12, %v4486_v26, %v4488_v38  ;;  %v4504_v6 = vsel %vm1099_vm12, %v4488_v38, %v4490_v39  ;;  %v4685_v10 = vpop.permute.xlu0 %4684 }
 0x3cb   :  { %v4515_v35 = vsel %vm118_vm0, %v4503_v45, 0 }
 0x3ce   :  { %v3513_v49 = vpop.f32.mrf.mxu1 }
 0x3cf   :  { %v7788_v34 = vadd.f32 %v3513_v49, %v7727_v53  ;;  %v3476_v42 = vpop.f32.mrf.mxu2  ;;  %v4342_v53 = vsel %vm118_vm0, %v4318_v13, 0  ;;  %v7860_v49 = vld [vmem:[%s8122_s3 + $0x17] sm:$0x1] }
 0x3d0   :  { %v3502_v2 = vpop.f32.mrf.mxu0  ;;  %v3489_v46 = vpop.f32.mrf.mxu3 }
 0x3d1   :  { %5559 = vmatmul.msk.bf16.vlgmr.msrb.gmra.mxu2 %vm215_vm8, %v7738_v60  ;;  %5560 = vmatmul.msk.bf16.vlgmr.msrb.gmra.mxu3 %vm215_vm8, %v7738_v60  ;;  %v4518_v60 = vsel %vm118_vm0, %v4504_v6, 0  ;;  %v4500_v43 = vpop.permute.xlu2 %4499 }
 0x3d2   :  { %4432 = vmatpush.bf16.msrb.mxu2 %v4342_v53  ;;  %4445 = vmatpush.bf16.msrb.mxu3 %v4345_v18  ;;  %v4509_v24 = vsel %vm1099_vm12, %v4498_v58, %v4500_v43  ;;  %v4510_v54 = vsel %vm1099_vm12, %v4500_v43, %v4502_v37  ;;  %v4689_v53 = vpop.permute.xlu1 %4688 }
 0x3d3   :  { %5562 = vmatmul.msk.bf16.vlgmr.msra.gmra.mxu0 %vm215_vm8, %v7799_v29  ;;  %v4536_v2 = vsel %vm118_vm0, %v4510_v54, 0 }
 0x3d4   :  { %4545 = vmatpush.bf16.msra.mxu0 %v4515_v35  ;;  %v4687_v35 = vpop.permute.xlu0 %4686 }
 0x3d6   :  { %v3515_v51 = vpop.f32.mrf.mxu1 }
 0x3d7   :  { %v3526_v7 = vpop.f32.mrf.mxu2 }
 0x3d8   :  { %v3592_v36 = vpop.f32.mrf.mxu0  ;;  %v3539_v48 = vpop.f32.mrf.mxu3  ;;  %v7814_v12 = vadd.f32 %v3526_v7, %v7753_v28 }
 0x3d9   :  { %v7804_v57 = vadd.f32 %v3592_v36, %v7743_v9  ;;  %v7817_v15 = vadd.f32 %v3539_v48, %v7756_v40  ;;  %5563 = vmatmul.msk.bf16.vlgmr.msra.gmra.mxu1 %vm215_vm8, %v7799_v29  ;;  %v4507_v40 = vsel %vm1099_vm12, %v4494_v8, %v4496_v22  ;;  %v4681_v14 = vpop.permute.xlu2 %4680  ;;  %v4697_v48 = vsel %vm1291_vm13, %v4683_v61, %v4685_v10 }
 0x3da   :  { %4558 = vmatpush.bf16.msra.mxu1 %v4518_v60  ;;  %v4527_v25 = vsel %vm118_vm0, %v4507_v40, 0  ;;  %v4696_v7 = vsel %vm1291_vm13, %v4681_v14, %v4683_v61  ;;  %v4693_v58 = vpop.permute.xlu1 %4692 }
 0x3de   :  { %v3605_v5 = vpop.f32.mrf.mxu1 }
 0x3df   :  { %v7821_v20 = vadd.f32 %v3605_v5, %v7760_v47  ;;  %v3528_v9 = vpop.f32.mrf.mxu2  ;;  %v4524_v47 = vsel %vm118_vm0, %v4506_v3, 0  ;;  %v4712_v5 = vsel %vm118_vm0, %v4696_v7, 0  ;;  %v4699_v3 = vsel %vm1291_vm13, %v4687_v35, %v4689_v53 }
 0x3e0   :  { %v3594_v0 = vpop.f32.mrf.mxu0  ;;  %v3541_v33 = vpop.f32.mrf.mxu3 }
 0x3e1   :  { %5564 = vmatmul.msk.bf16.vlgmr.msra.gmra.mxu2 %vm215_vm8, %v7799_v29  ;;  %5565 = vmatmul.msk.bf16.vlgmr.msra.gmra.mxu3 %vm215_vm8, %v7799_v29 }
 0x3e2   :  { %4571 = vmatpush.bf16.msra.mxu2 %v4521_v4  ;;  %4584 = vmatpush.bf16.msra.mxu3 %v4524_v47  ;;  %v4721_v4 = vsel %vm118_vm0, %v4699_v3, 0  ;;  %v4874_v47 = vpop.permute.xlu0 %4873  ;;  %v4868_v37 = vpop.permute.xlu1 %4867 }
 0x3e3   :  { %5566 = vmatmul.msk.bf16.vlgmr.msrb.gmra.mxu0 %vm215_vm8, %v7799_v29 }
 0x3e4   :  { %4597 = vmatpush.bf16.msrb.mxu0 %v4527_v25 }
 0x3e6   :  { %v3607_v28 = vpop.f32.mrf.mxu1 }
 0x3e7   :  { %v3618_v63 = vpop.f32.mrf.mxu2 }
 0x3e8   :  { %v3644_v50 = vpop.f32.mrf.mxu0  ;;  %v3631_v41 = vpop.f32.mrf.mxu3  ;;  %v7842_v1 = vadd.f32 %v3618_v63, %v7781_v16 }
 0x3e9   :  { %v7832_v30 = vadd.f32 %v3644_v50, %v7771_v21  ;;  %v7845_v27 = vadd.f32 %v3631_v41, %v7784_v32  ;;  %5567 = vmatmul.msk.bf16.vlgmr.msrb.gmra.mxu1 %vm215_vm8, %v7799_v29  ;;  %v4679_v16 = vpop.permute.xlu2 %4678 }
 0x3ea   :  { %4610 = vmatpush.bf16.msrb.mxu1 %v4530_v11  ;;  %v4694_v32 = vsel %vm1291_vm13, %v4677_v44, %v4679_v16  ;;  %v4695_v51 = vsel %vm1291_vm13, %v4679_v16, %v4681_v14  ;;  %v4876_v61 = vpop.permute.xlu0 %4875 }
 0x3eb   :  { %v4706_v42 = vsel %vm118_vm0, %v4694_v32, 0 }
 0x3ee   :  { %v3657_v62 = vpop.f32.mrf.mxu1 }
 0x3ef   :  { %v7849_v23 = vadd.f32 %v3657_v62, %v7788_v34  ;;  %v3620_v21 = vpop.f32.mrf.mxu2  ;;  %v4533_v34 = vsel %vm118_vm0, %v4509_v24, 0  ;;  %v7921_v62 = vld [vmem:[%s8122_s3 + $0x18] sm:$0x1] }
 0x3f0   :  { %v3646_v55 = vpop.f32.mrf.mxu0  ;;  %v3633_v17 = vpop.f32.mrf.mxu3 }
 0x3f1   :  { %5568 = vmatmul.msk.bf16.vlgmr.msrb.gmra.mxu2 %vm215_vm8, %v7799_v29  ;;  %5569 = vmatmul.msk.bf16.vlgmr.msrb.gmra.mxu3 %vm215_vm8, %v7799_v29  ;;  %v4709_v29 = vsel %vm118_vm0, %v4695_v51, 0  ;;  %v4691_v18 = vpop.permute.xlu2 %4690 }
 0x3f2   :  { %4623 = vmatpush.bf16.msrb.mxu2 %v4533_v34  ;;  %4636 = vmatpush.bf16.msrb.mxu3 %v4536_v2  ;;  %v4700_v63 = vsel %vm1291_vm13, %v4689_v53, %v4691_v18  ;;  %v4701_v41 = vsel %vm1291_vm13, %v4691_v18, %v4693_v58  ;;  %v4880_v34 = vpop.permute.xlu1 %4879 }
 0x3f3   :  { %5571 = vmatmul.msk.bf16.vlgmr.msra.gmra.mxu0 %vm215_vm8, %v7860_v49  ;;  %v4727_v55 = vsel %vm118_vm0, %v4701_v41, 0 }
 0x3f4   :  { %4736 = vmatpush.bf16.msra.mxu0 %v4706_v42  ;;  %v4878_v42 = vpop.permute.xlu0 %4877 }
 0x3f6   :  { %v3659_v39 = vpop.f32.mrf.mxu1 }
 0x3f7   :  { %v3670_v46 = vpop.f32.mrf.mxu2 }
 0x3f8   :  { %v3783_v59 = vpop.f32.mrf.mxu0  ;;  %v3683_v26 = vpop.f32.mrf.mxu3  ;;  %v7875_v13 = vadd.f32 %v3670_v46, %v7814_v12 }
 0x3f9   :  { %v7865_v19 = vadd.f32 %v3783_v59, %v7804_v57  ;;  %v7878_v52 = vadd.f32 %v3683_v26, %v7817_v15  ;;  %5572 = vmatmul.msk.bf16.vlgmr.msra.gmra.mxu1 %vm215_vm8, %v7860_v49  ;;  %v4698_v15 = vsel %vm1291_vm13, %v4685_v10, %v4687_v35  ;;  %v4872_v33 = vpop.permute.xlu2 %4871  ;;  %v4888_v26 = vsel %vm1483_vm14, %v4874_v47, %v4876_v61 }
 0x3fa   :  { %4749 = vmatpush.bf16.msra.mxu1 %v4709_v29  ;;  %v4718_v60 = vsel %vm118_vm0, %v4698_v15, 0  ;;  %v4887_v46 = vsel %vm1483_vm14, %v4872_v33, %v4874_v47  ;;  %v4884_v53 = vpop.permute.xlu1 %4883 }
 0x3fe   :  { %v3796_v38 = vpop.f32.mrf.mxu1 }
 0x3ff   :  { %v7882_v45 = vadd.f32 %v3796_v38, %v7821_v20  ;;  %v3672_v57 = vpop.f32.mrf.mxu2  ;;  %v4715_v20 = vsel %vm118_vm0, %v4697_v48, 0  ;;  %v4903_v38 = vsel %vm118_vm0, %v4887_v46, 0  ;;  %v4890_v48 = vsel %vm1483_vm14, %v4878_v42, %v4880_v34 }
 0x400   :  { %v3785_v36 = vpop.f32.mrf.mxu0  ;;  %v3685_v8 = vpop.f32.mrf.mxu3 }
 0x401   :  { %5573 = vmatmul.msk.bf16.vlgmr.msra.gmra.mxu2 %vm215_vm8, %v7860_v49  ;;  %5574 = vmatmul.msk.bf16.vlgmr.msra.gmra.mxu3 %vm215_vm8, %v7860_v49 }
 0x402   :  { %4762 = vmatpush.bf16.msra.mxu2 %v4712_v5  ;;  %4775 = vmatpush.bf16.msra.mxu3 %v4715_v20  ;;  %v4912_v5 = vsel %vm118_vm0, %v4890_v48, 0  ;;  %v5065_v20 = vpop.permute.xlu0 %5064  ;;  %v5059_v58 = vpop.permute.xlu1 %5058 }
 0x403   :  { %5575 = vmatmul.msk.bf16.vlgmr.msrb.gmra.mxu0 %vm215_vm8, %v7860_v49 }
 0x404   :  { %4788 = vmatpush.bf16.msrb.mxu0 %v4718_v60 }
 0x406   :  { %v3798_v12 = vpop.f32.mrf.mxu1 }
 0x407   :  { %v3809_v43 = vpop.f32.mrf.mxu2 }
 0x408   :  { %v3835_v6 = vpop.f32.mrf.mxu0  ;;  %v3822_v9 = vpop.f32.mrf.mxu3  ;;  %v7903_v22 = vadd.f32 %v3809_v43, %v7842_v1 }
 0x409   :  { %v7893_v0 = vadd.f32 %v3835_v6, %v7832_v30  ;;  %v7906_v56 = vadd.f32 %v3822_v9, %v7845_v27  ;;  %5576 = vmatmul.msk.bf16.vlgmr.msrb.gmra.mxu1 %vm215_vm8, %v7860_v49  ;;  %v4870_v1 = vpop.permute.xlu2 %4869 }
 0x40a   :  { %4801 = vmatpush.bf16.msrb.mxu1 %v4721_v4  ;;  %v4885_v27 = vsel %vm1483_vm14, %v4868_v37, %v4870_v1  ;;  %v4886_v39 = vsel %vm1483_vm14, %v4870_v1, %v4872_v33  ;;  %v5067_v47 = vpop.permute.xlu0 %5066 }
 0x40b   :  { %v4897_v21 = vsel %vm118_vm0, %v4885_v27, 0 }
 0x40e   :  { %v3848_v28 = vpop.f32.mrf.mxu1 }
 0x40f   :  { %v7910_v40 = vadd.f32 %v3848_v28, %v7849_v23  ;;  %v3811_v30 = vpop.f32.mrf.mxu2  ;;  %v4724_v23 = vsel %vm118_vm0, %v4700_v63, 0  ;;  %v7982_v28 = vld [vmem:[%s8122_s3 + $0x19] sm:$0x1] }
 0x410   :  { %v3837_v50 = vpop.f32.mrf.mxu0  ;;  %v3824_v25 = vpop.f32.mrf.mxu3 }
 0x411   :  { %5577 = vmatmul.msk.bf16.vlgmr.msrb.gmra.mxu2 %vm215_vm8, %v7860_v49  ;;  %5578 = vmatmul.msk.bf16.vlgmr.msrb.gmra.mxu3 %vm215_vm8, %v7860_v49  ;;  %v4900_v49 = vsel %vm118_vm0, %v4886_v39, 0  ;;  %v4882_v2 = vpop.permute.xlu2 %4881 }
 0x412   :  { %4814 = vmatpush.bf16.msrb.mxu2 %v4724_v23  ;;  %4827 = vmatpush.bf16.msrb.mxu3 %v4727_v55  ;;  %v4891_v43 = vsel %vm1483_vm14, %v4880_v34, %v4882_v2  ;;  %v4892_v9 = vsel %vm1483_vm14, %v4882_v2, %v4884_v53 }
 0x413   :  { %5580 = vmatmul.msk.bf16.vlgmr.msra.gmra.mxu0 %vm215_vm8, %v7921_v62  ;;  %v4918_v50 = vsel %vm118_vm0, %v4892_v9, 0 }
 0x414   :  { %4927 = vmatpush.bf16.msra.mxu0 %v4897_v21  ;;  %v5079_v21 = vsel %vm1675_vm15, %v5065_v20, %v5067_v47 }
 0x415   :  { %v5097_v39 = vsel %vm118_vm0, %v5079_v21, 0 }
 0x416   :  { %v3850_v14 = vpop.f32.mrf.mxu1 }
 0x417   :  { %v3861_v17 = vpop.f32.mrf.mxu2 }
 0x418   :  { %v3974_v31 = vpop.f32.mrf.mxu0  ;;  %v3874_v44 = vpop.f32.mrf.mxu3  ;;  %v7936_v24 = vadd.f32 %v3861_v17, %v7875_v13 }
 0x419   :  { %v7926_v11 = vadd.f32 %v3974_v31, %v7865_v19  ;;  %v7939_v54 = vadd.f32 %v3874_v44, %v7878_v52  ;;  %5581 = vmatmul.msk.bf16.vlgmr.msra.gmra.mxu1 %vm215_vm8, %v7921_v62  ;;  %v4889_v52 = vsel %vm1483_vm14, %v4876_v61, %v4878_v42  ;;  %v5063_v8 = vpop.permute.xlu2 %5062 }
 0x41a   :  { %4940 = vmatpush.bf16.msra.mxu1 %v4900_v49  ;;  %v4909_v29 = vsel %vm118_vm0, %v4889_v52, 0  ;;  %v5078_v61 = vsel %vm1675_vm15, %v5063_v8, %v5065_v20 }
 0x41e   :  { %v3987_v16 = vpop.f32.mrf.mxu1 }
 0x41f   :  { %v7943_v32 = vadd.f32 %v3987_v16, %v7882_v45  ;;  %v3863_v19 = vpop.f32.mrf.mxu2  ;;  %v4906_v45 = vsel %vm118_vm0, %v4888_v26, 0  ;;  %v5071_v16 = vpop.permute.xlu1 %5070 }
 0x420   :  { %v3976_v59 = vpop.f32.mrf.mxu0  ;;  %v3876_v10 = vpop.f32.mrf.mxu3 }
 0x421   :  { %5582 = vmatmul.msk.bf16.vlgmr.msra.gmra.mxu2 %vm215_vm8, %v7921_v62  ;;  %5583 = vmatmul.msk.bf16.vlgmr.msra.gmra.mxu3 %vm215_vm8, %v7921_v62 }
 0x422   :  { %4953 = vmatpush.bf16.msra.mxu2 %v4903_v38  ;;  %4966 = vmatpush.bf16.msra.mxu3 %v4906_v45 }
 0x423   :  { %5584 = vmatmul.msk.bf16.vlgmr.msrb.gmra.mxu0 %vm215_vm8, %v7921_v62 }
 0x424   :  { %4979 = vmatpush.bf16.msrb.mxu0 %v4909_v29 }
 0x426   :  { %v3989_v13 = vpop.f32.mrf.mxu1 }
 0x427   :  { %v4000_v18 = vpop.f32.mrf.mxu2  ;;  %v5075_v52 = vpop.permute.xlu1 %5074 }
 0x428   :  { %v4026_v51 = vpop.f32.mrf.mxu0  ;;  %v4013_v57 = vpop.f32.mrf.mxu3  ;;  %v7964_v35 = vadd.f32 %v4000_v18, %v7903_v22 }
 0x429   :  { %v7954_v36 = vadd.f32 %v4026_v51, %v7893_v0  ;;  %v7967_v7 = vadd.f32 %v4013_v57, %v7906_v56  ;;  %5585 = vmatmul.msk.bf16.vlgmr.msrb.gmra.mxu1 %vm215_vm8, %v7921_v62  ;;  %v5061_v22 = vpop.permute.xlu2 %5060  ;;  %v5597_v57 = vld [vmem:[%s8122_s3 + $0x1a] sm:$0x1] }
 0x42a   :  { %4992 = vmatpush.bf16.msrb.mxu1 %v4912_v5  ;;  %v5076_v56 = vsel %vm1675_vm15, %v5059_v58, %v5061_v22  ;;  %v5077_v14 = vsel %vm1675_vm15, %v5061_v22, %v5063_v8 }
 0x42b   :  { %v5088_v30 = vsel %vm118_vm0, %v5076_v56, 0 }
 0x42e   :  { %v4039_v12 = vpop.f32.mrf.mxu1 }
 0x42f   :  { %v7971_v15 = vadd.f32 %v4039_v12, %v7910_v40  ;;  %v4002_v0 = vpop.f32.mrf.mxu2  ;;  %v4915_v40 = vsel %vm118_vm0, %v4891_v43, 0 }
 0x430   :  { %v4028_v6 = vpop.f32.mrf.mxu0  ;;  %v4015_v60 = vpop.f32.mrf.mxu3  ;;  %v5223_v0 = vld [vmem:[%s8123_s4] sm:$0x3] }
 0x431   :  { %5586 = vmatmul.msk.bf16.vlgmr.msrb.gmra.mxu2 %vm215_vm8, %v7921_v62  ;;  %5587 = vmatmul.msk.bf16.vlgmr.msrb.gmra.mxu3 %vm215_vm8, %v7921_v62  ;;  %v5091_v62 = vsel %vm118_vm0, %v5077_v14, 0  ;;  %v5073_v45 = vpop.permute.xlu2 %5072 }
 0x432   :  { %5005 = vmatpush.bf16.msrb.mxu2 %v4915_v40  ;;  %5018 = vmatpush.bf16.msrb.mxu3 %v4918_v50  ;;  %v5083_v29 = vsel %vm1675_vm15, %v5073_v45, %v5075_v52 }
 0x433   :  { %5589 = vmatmul.msk.bf16.vlgmr.msra.gmra.mxu0 %vm215_vm8, %v7982_v28  ;;  %5226 = vperm.xlu2 %5626, %v5223_v0  }
 0x434   :  { %5118 = vmatpush.bf16.msra.mxu0 %v5088_v30 }
 0x436   :  { %v4041_v33 = vpop.f32.mrf.mxu1 }
 0x437   :  { %v4052_v25 = vpop.f32.mrf.mxu2 }
 0x438   :  { %v4165_v3 = vpop.f32.mrf.mxu0  ;;  %v4065_v37 = vpop.f32.mrf.mxu3  ;;  %v4075_v63 = vadd.f32 %v4052_v25, %v7936_v24 }
 0x439   :  { %v4260_v4 = vadd.f32 %v4165_v3, %v7926_v11  ;;  %v4076_v41 = vadd.f32 %v4065_v37, %v7939_v54  ;;  %5590 = vmatmul.msk.bf16.vlgmr.msra.gmra.mxu1 %vm215_vm8, %v7982_v28  ;;  %v5069_v11 = vpop.permute.xlu0 %5068  ;;  %v5094_v54 = vsel %vm118_vm0, %v5078_v61, 0 }
 0x43a   :  { %5131 = vmatpush.bf16.msra.mxu1 %v5091_v62  ;;  %v5080_v44 = vsel %vm1675_vm15, %v5067_v47, %v5069_v11  ;;  %v5081_v10 = vsel %vm1675_vm15, %v5069_v11, %v5071_v16 }
 0x43b   :  { %v5100_v59 = vsel %vm118_vm0, %v5080_v44, 0  ;;  %v5103_v13 = vsel %vm118_vm0, %v5081_v10, 0 }
 0x43e   :  { %v4178_v1 = vpop.f32.mrf.mxu1 }
 0x43f   :  { %v4261_v27 = vadd.f32 %v4178_v1, %v7943_v32  ;;  %v4054_v23 = vpop.f32.mrf.mxu2 }
 0x440   :  { %v4167_v31 = vpop.f32.mrf.mxu0  ;;  %v4067_v55 = vpop.f32.mrf.mxu3 }
 0x441   :  { %5591 = vmatmul.msk.bf16.vlgmr.msra.gmra.mxu2 %vm215_vm8, %v7982_v28  ;;  %5592 = vmatmul.msk.bf16.vlgmr.msra.gmra.mxu3 %vm215_vm8, %v7982_v28 }
 0x442   :  { %5144 = vmatpush.bf16.msra.mxu2 %v5094_v54  ;;  %5157 = vmatpush.bf16.msra.mxu3 %v5097_v39 }
 0x443   :  { %5593 = vmatmul.msk.bf16.vlgmr.msrb.gmra.mxu0 %vm215_vm8, %v7982_v28 }
 0x444   :  { %5170 = vmatpush.bf16.msrb.mxu0 %v5100_v59 }
 0x446   :  { %v4180_v17 = vpop.f32.mrf.mxu1 }
 0x447   :  { %v4191_v49 = vpop.f32.mrf.mxu2 }
 0x448   :  { %v4217_v24 = vpop.f32.mrf.mxu0  ;;  %v4204_v34 = vpop.f32.mrf.mxu3  ;;  %v4262_v2 = vadd.f32 %v4191_v49, %v7964_v35  ;;  %v5109_v35 = vsel %vm118_vm0, %v5083_v29, 0 }
 0x449   :  { %v4264_v32 = vadd.f32 %v4217_v24, %v7954_v36  ;;  %v4263_v19 = vadd.f32 %v4204_v34, %v7967_v7  ;;  %5594 = vmatmul.msk.bf16.vlgmr.msrb.gmra.mxu1 %vm215_vm8, %v7982_v28  ;;  %v5082_v36 = vsel %vm1675_vm15, %v5071_v16, %v5073_v45 }
 0x44a   :  { %5183 = vmatpush.bf16.msrb.mxu1 %v5103_v13  ;;  %v5106_v8 = vsel %vm118_vm0, %v5082_v36, 0 }
 0x44e   :  { %v4230_v42 = vpop.f32.mrf.mxu1 }
 0x44f   :  { %v4265_v46 = vadd.f32 %v4230_v42, %v7971_v15  ;;  %v4193_v51 = vpop.f32.mrf.mxu2 }
 0x450   :  { %v4219_v26 = vpop.f32.mrf.mxu0  ;;  %v4206_v38 = vpop.f32.mrf.mxu3 }
 0x451   :  { %5595 = vmatmul.msk.bf16.vlgmr.msrb.gmra.mxu2 %vm215_vm8, %v7982_v28  ;;  %5596 = vmatmul.msk.bf16.vlgmr.msrb.gmra.mxu3 %vm215_vm8, %v7982_v28 }
 0x452   :  { %5196 = vmatpush.bf16.msrb.mxu2 %v5106_v8  ;;  %5209 = vmatpush.bf16.msrb.mxu3 %v5109_v35 }
 0x453   :  { %5598 = vmatmul.msk.bf16.vlgmr.msra.gmra.mxu0 %vm215_vm8, %v5597_v57 }
 0x456   :  { %v4232_v53 = vpop.f32.mrf.mxu1 }
 0x457   :  { %v4243_v48 = vpop.f32.mrf.mxu2 }
 0x458   :  { %v4356_v18 = vpop.f32.mrf.mxu0  ;;  %v4256_v12 = vpop.f32.mrf.mxu3  ;;  %v4266_v15 = vadd.f32 %v4243_v48, %v4075_v63 }
 0x459   :  { %v4451_v7 = vadd.f32 %v4356_v18, %v4260_v4  ;;  %v4267_v6 = vadd.f32 %v4256_v12, %v4076_v41  ;;  %5599 = vmatmul.msk.bf16.vlgmr.msra.gmra.mxu1 %vm215_vm8, %v5597_v57 }
 0x45e   :  { %v4369_v5 = vpop.f32.mrf.mxu1 }
 0x45f   :  { %v4452_v20 = vadd.f32 %v4369_v5, %v4261_v27  ;;  %v4245_v58 = vpop.f32.mrf.mxu2 }
 0x460   :  { %v4358_v60 = vpop.f32.mrf.mxu0  ;;  %v4258_v43 = vpop.f32.mrf.mxu3 }
 0x461   :  { %5600 = vmatmul.msk.bf16.vlgmr.msra.gmra.mxu2 %vm215_vm8, %v5597_v57  ;;  %5601 = vmatmul.msk.bf16.vlgmr.msra.gmra.mxu3 %vm215_vm8, %v5597_v57 }
 0x463   :  { %5602 = vmatmul.msk.bf16.vlgmr.msrb.gmra.mxu0 %vm215_vm8, %v5597_v57 }
 0x466   :  { %v4371_v9 = vpop.f32.mrf.mxu1 }
 0x467   :  { %v4382_v56 = vpop.f32.mrf.mxu2 }
 0x468   :  { %v4408_v33 = vpop.f32.mrf.mxu0  ;;  %v4395_v3 = vpop.f32.mrf.mxu3  ;;  %v4453_v28 = vadd.f32 %v4382_v56, %v4262_v2 }
 0x469   :  { %v4455_v22 = vadd.f32 %v4408_v33, %v4264_v32  ;;  %v4454_v40 = vadd.f32 %v4395_v3, %v4263_v19  ;;  %5603 = vmatmul.msk.bf16.vlgmr.msrb.gmra.mxu1 %vm215_vm8, %v5597_v57 }
 0x46e   :  { %v4421_v50 = vpop.f32.mrf.mxu1 }
 0x46f   :  { %v4456_v4 = vadd.f32 %v4421_v50, %v4265_v46  ;;  %v4384_v30 = vpop.f32.mrf.mxu2 }
 0x470   :  { %v4410_v47 = vpop.f32.mrf.mxu0  ;;  %v4397_v25 = vpop.f32.mrf.mxu3 }
 0x471   :  { %5604 = vmatmul.msk.bf16.vlgmr.msrb.gmra.mxu2 %vm215_vm8, %v5597_v57  ;;  %5605 = vmatmul.msk.bf16.vlgmr.msrb.gmra.mxu3 %vm215_vm8, %v5597_v57  ;;  %v5269_v47 = vld [vmem:[%s8124_s2] sm:$0xff]  ;;  %vm5350_vm8 = vcmask 9216  }
 0x472   :  { %v5270_v25 = vunpack.c.l.bf16 %v5269_v47 }
 0x476   :  { %v4423_v37 = vpop.f32.mrf.mxu1 }
 0x477   :  { %v4434_v14 = vpop.f32.mrf.mxu2 }
 0x478   :  { %v4547_v63 = vpop.f32.mrf.mxu0  ;;  %v4447_v1 = vpop.f32.mrf.mxu3  ;;  %v4457_v27 = vadd.f32 %v4434_v14, %v4266_v15 }
 0x479   :  { %v4642_v41 = vadd.f32 %v4547_v63, %v4451_v7  ;;  %v4458_v31 = vadd.f32 %v4447_v1, %v4267_v6 }
 0x47e   :  { %v4560_v62 = vpop.f32.mrf.mxu1 }
 0x47f   :  { %v4643_v23 = vadd.f32 %v4560_v62, %v4452_v20  ;;  %v4436_v11 = vpop.f32.mrf.mxu2 }
 0x480   :  { %v4549_v55 = vpop.f32.mrf.mxu0  ;;  %v4449_v61 = vpop.f32.mrf.mxu3 }
 0x486   :  { %v4562_v21 = vpop.f32.mrf.mxu1 }
 0x487   :  { %v4573_v24 = vpop.f32.mrf.mxu2 }
 0x488   :  { %v4599_v17 = vpop.f32.mrf.mxu0  ;;  %v4586_v54 = vpop.f32.mrf.mxu3  ;;  %v4644_v39 = vadd.f32 %v4573_v24, %v4453_v28 }
 0x489   :  { %v4646_v44 = vadd.f32 %v4599_v17, %v4455_v22  ;;  %v4645_v16 = vadd.f32 %v4586_v54, %v4454_v40 }
 0x48e   :  { %v4612_v32 = vpop.f32.mrf.mxu1 }
 0x48f   :  { %v4647_v59 = vadd.f32 %v4612_v32, %v4456_v4  ;;  %v4575_v34 = vpop.f32.mrf.mxu2 }
 0x490   :  { %v4601_v49 = vpop.f32.mrf.mxu0  ;;  %v4588_v2 = vpop.f32.mrf.mxu3 }
 0x496   :  { %v4614_v19 = vpop.f32.mrf.mxu1 }
 0x497   :  { %v4625_v46 = vpop.f32.mrf.mxu2 }
 0x498   :  { %v4738_v10 = vpop.f32.mrf.mxu0  ;;  %v4638_v26 = vpop.f32.mrf.mxu3  ;;  %v8043_v13 = vadd.f32 %v4625_v46, %v4457_v27 }
 0x499   :  { %v4833_v42 = vadd.f32 %v4738_v10, %v4642_v41  ;;  %v8045_v52 = vadd.f32 %v4638_v26, %v4458_v31  ;;  %v5274_v41 = vperm.slane %v5270_v25, 0 }
 0x49b   :  { %v5290_v62 = vperm.slane %v5274_v41, 0 }
 0x49e   :  { %v4751_v51 = vpop.f32.mrf.mxu1 }
 0x49f   :  { %v4834_v38 = vadd.f32 %v4751_v51, %v4643_v23  ;;  %v4627_v36 = vpop.f32.mrf.mxu2  ;;  %v5275_v23 = vperm.slane %v5270_v25, 2 }
 0x4a0   :  { %v4740_v45 = vpop.f32.mrf.mxu0  ;;  %v4640_v29 = vpop.f32.mrf.mxu3 }
 0x4a1   :  { %v5291_v17 = vperm.slane %v5275_v23, 0 }
 0x4a6   :  { %v4753_v53 = vpop.f32.mrf.mxu1 }
 0x4a7   :  { %v4764_v8 = vpop.f32.mrf.mxu2 }
 0x4a8   :  { %v4790_v18 = vpop.f32.mrf.mxu0  ;;  %v4777_v35 = vpop.f32.mrf.mxu3  ;;  %v8047_v7 = vadd.f32 %v4764_v8, %v4644_v39  ;;  %v5276_v8 = vperm.slane %v5270_v25, 4 }
 0x4a9   :  { %v4837_v57 = vadd.f32 %v4790_v18, %v4646_v44  ;;  %v8049_v48 = vadd.f32 %v4777_v35, %v4645_v16  ;;  %v8064_v44 = vpop.permute.xlu2 %5226  ;;  %v8066_v16 = vunpack.c.h.bf16 %v5269_v47 }
 0x4ab   :  { %v5278_v36 = vperm.slane %v8066_v16, 0 }
 0x4ae   :  { %v4803_v12 = vpop.f32.mrf.mxu1 }
 0x4af   :  { %v8051_v15 = vadd.f32 %v4803_v12, %v4647_v59  ;;  %v4766_v5 = vpop.f32.mrf.mxu2  ;;  %v5277_v12 = vperm.slane %v5270_v25, 6 }
 0x4b0   :  { %v4792_v6 = vpop.f32.mrf.mxu0  ;;  %v4779_v20 = vpop.f32.mrf.mxu3  ;;  %v5294_v5 = vperm.slane %v5278_v36, 0 }
 0x4b6   :  { %v4805_v0 = vpop.f32.mrf.mxu1 }
 0x4b7   :  { %v8053_v58 = vpop.f32.mrf.mxu2 }
 0x4b8   :  { %v4929_v60 = vpop.f32.mrf.mxu0  ;;  %v8055_v43 = vpop.f32.mrf.mxu3 }
 0x4b9   :  { %v5024_v1 = vadd.f32 %v4929_v60, %v4833_v42  ;;  %v5292_v60 = vperm.slane %v5276_v8, 0 }
 0x4be   :  { %v4942_v9 = vpop.f32.mrf.mxu1 }
 0x4bf   :  { %v4818_v22 = vpop.f32.mrf.mxu2  ;;  %v5025_v61 = vadd.f32 %v4942_v9, %v4834_v38  ;;  %v5279_v9 = vperm.slane %v8066_v16, 2 }
 0x4c0   :  { %v4931_v33 = vpop.f32.mrf.mxu0  ;;  %v4831_v56 = vpop.f32.mrf.mxu3 }
 0x4c1   :  { %v5293_v56 = vperm.slane %v5277_v12, 0  ;;  %v4840_v12 = vadd.f32 %v8055_v43, %v8045_v52 }
 0x4c6   :  { %v4944_v3 = vpop.f32.mrf.mxu1 }
 0x4c7   :  { %v4955_v40 = vpop.f32.mrf.mxu2 }
 0x4c8   :  { %v4981_v28 = vpop.f32.mrf.mxu0  ;;  %v4968_v50 = vpop.f32.mrf.mxu3  ;;  %v5026_v20 = vadd.f32 %v4955_v40, %v8047_v7  ;;  %v5295_v7 = vperm.slane %v5279_v9, 0 }
 0x4c9   :  { %v5028_v18 = vadd.f32 %v4981_v28, %v4837_v57  ;;  %v5027_v0 = vadd.f32 %v4968_v50, %v8049_v48 }
 0x4ce   :  { %v4994_v4 = vpop.f32.mrf.mxu1 }
 0x4cf   :  { %v4957_v37 = vpop.f32.mrf.mxu2  ;;  %v5029_v57 = vadd.f32 %v4994_v4, %v8051_v15 }
 0x4d0   :  { %v4983_v30 = vpop.f32.mrf.mxu0  ;;  %v4970_v63 = vpop.f32.mrf.mxu3 }
 0x4d6   :  { %v4996_v14 = vpop.f32.mrf.mxu1 }
 0x4d7   :  { %v8060_v55 = vpop.f32.mrf.mxu2 }
 0x4d8   :  { %v5120_v27 = vpop.f32.mrf.mxu0  ;;  %v8062_v11 = vpop.f32.mrf.mxu3 }
 0x4d9   :  { %v5215_v31 = vadd.f32 %v5120_v27, %v5024_v1 }
 0x4db   :  { %v5298_v21 = vmul.f32 %v5290_v62, %v5215_v31  ;;  %v5229_v59 = vadd.f32 %v8064_v44, %v5215_v31 }
 0x4dd   :  { %v5323_v32 = vmul.f32 %v5298_v21, %v5298_v21  ;;  %v5306_v2 = vsel %vm126_vm2, %v5298_v21, 0.0 }
 0x4de   :  { %v5133_v24 = vpop.f32.mrf.mxu1 }
 0x4df   :  { %v5216_v54 = vadd.f32 %v5133_v24, %v5025_v61  ;;  %v5009_v26 = vpop.f32.mrf.mxu2  ;;  %v5331_v38 = vsel %vm126_vm2, %v5323_v32, 0.0 }
 0x4e0   :  { %v5122_v39 = vpop.f32.mrf.mxu0  ;;  %v5022_v51 = vpop.f32.mrf.mxu3 }
 0x4e1   :  { %v5230_v49 = vadd.f32 %v8064_v44, %v5216_v54  ;;  %v5299_v34 = vmul.f32 %v5291_v17, %v5216_v54 }
 0x4e3   :  { %v5237_v19 = vpack.c.bf16 %v5230_v49, %v5229_v59  ;;  %v5307_v10 = vsel %vm126_vm2, %v5299_v34, 0.0  ;;  %v5324_v42 = vmul.f32 %v5299_v34, %v5299_v34 }
 0x4e4   :  { %v5308_v46 = vadd.f32 %v5307_v10, %v5306_v2 }
 0x4e5   :  { %v5332_v45 = vsel %vm126_vm2, %v5324_v42, 0.0  ;;  %v5245_v40 = vrot.slane %v5237_v19, 3 }
 0x4e6   :  { %v5333_v29 = vadd.f32 %v5332_v45, %v5331_v38  ;;  %v5135_v53 = vpop.f32.mrf.mxu1 }
 0x4e7   :  { %v5146_v33 = vpop.f32.mrf.mxu2  ;;  %v5254_v2 = vsel %vm118_vm0, %v5237_v19, %v5245_v40  ;;  %v5280_v53 = vperm.slane %v8066_v16, 4  ;;  %vm8171_vm0 = vcmask 1045508  }
 0x4e8   :  { %v5172_v35 = vpop.f32.mrf.mxu0  ;;  %v5159_v22 = vpop.f32.mrf.mxu3  ;;  %v5217_v47 = vadd.f32 %v5146_v33, %v5026_v20 }
 0x4e9   :  { %v5219_v6 = vadd.f32 %v5172_v35, %v5028_v18  ;;  %v5218_v30 = vadd.f32 %v5159_v22, %v5027_v0  ;;  %v5281_v18 = vperm.slane %v8066_v16, 6  ;;  %v4839_v35 = vadd.f32 %v8053_v58, %v8043_v13 }
 0x4ea   :  { %v5231_v25 = vadd.f32 %v8064_v44, %v5217_v47  ;;  %v5300_v37 = vmul.f32 %v5292_v60, %v5217_v47  ;;  %v5031_v60 = vadd.f32 %v8062_v11, %v4840_v12  ;;  %v5296_v9 = vperm.slane %v5280_v53, 0 }
 0x4eb   :  { %v5302_v3 = vmul.f32 %v5294_v5, %v5219_v6  ;;  %v5232_v63 = vadd.f32 %v8064_v44, %v5218_v30  ;;  %v5233_v48 = vadd.f32 %v8064_v44, %v5219_v6  ;;  %v5301_v50 = vmul.f32 %v5293_v56, %v5218_v30 }
 0x4ec   :  { %v5309_v27 = vsel %vm126_vm2, %v5300_v37, 0.0  ;;  %v5325_v31 = vmul.f32 %v5300_v37, %v5300_v37  ;;  %v5030_v0 = vadd.f32 %v8060_v55, %v4839_v35  ;;  %v5297_v33 = vperm.slane %v5281_v18, 0 }
 0x4ed   :  { %v5327_v1 = vmul.f32 %v5302_v3, %v5302_v3  ;;  %v5238_v62 = vpack.c.bf16 %v5232_v63, %v5231_v25  ;;  %v5310_v23 = vadd.f32 %v5309_v27, %v5308_v46  ;;  %v5311_v15 = vsel %vm126_vm2, %v5301_v50, 0.0 }
 0x4ee   :  { %v5185_v28 = vpop.f32.mrf.mxu1  ;;  %v5326_v4 = vmul.f32 %v5301_v50, %v5301_v50  ;;  %v5334_v21 = vsel %vm126_vm2, %v5325_v31, 0.0  ;;  %v5313_v26 = vsel %vm126_vm2, %v5302_v3, 0.0 }
 0x4ef   :  { %v5220_v41 = vadd.f32 %v5185_v28, %v5029_v57  ;;  %v5246_v17 = vrot.slane %v5238_v62, 6  ;;  %v5247_v24 = vrot.slane %v5238_v62, 1  ;;  %v5335_v39 = vadd.f32 %v5334_v21, %v5333_v29  ;;  %v5148_v49 = vpop.f32.mrf.mxu2 }
 0x4f0   :  { %v5174_v14 = vpop.f32.mrf.mxu0  ;;  %v5312_v32 = vadd.f32 %v5311_v15, %v5310_v23  ;;  %v5161_v34 = vpop.f32.mrf.mxu3  ;;  %v5336_v42 = vsel %vm126_vm2, %v5326_v4, 0.0  ;;  %v5338_v36 = vsel %vm126_vm2, %v5327_v1, 0.0 }
 0x4f1   :  { %v5234_v61 = vadd.f32 %v8064_v44, %v5220_v41  ;;  %v5303_v54 = vmul.f32 %v5295_v7, %v5220_v41  ;;  %v5257_v10 = vsel %vm122_vm1, %v5246_v17, %v5247_v24  ;;  %v5337_v38 = vadd.f32 %v5336_v42, %v5335_v39 }
 0x4f2   :  { %v5258_v51 = vsel %vm126_vm2, %v5254_v2, %v5257_v10  ;;  %v5314_v29 = vadd.f32 %v5313_v26, %v5312_v32  ;;  %vm8172_vm1 = vcmask 1043456  }
 0x4f3   :  { %v5239_v59 = vpack.c.bf16 %v5234_v61, %v5233_v48  ;;  %v5328_v46 = vmul.f32 %v5303_v54, %v5303_v54  ;;  %v5315_v19 = vsel %vm126_vm2, %v5303_v54, 0.0  ;;  %v5339_v8 = vadd.f32 %v5338_v36, %v5337_v38 }
 0x4f4   :  { %v5316_v6 = vadd.f32 %v5315_v19, %v5314_v29 }
 0x4f5   :  { %v5340_v5 = vsel %vm126_vm2, %v5328_v46, 0.0  ;;  %v5248_v43 = vrot.slane %v5239_v59, 4  ;;  %v5249_v30 = vrot.slane %v5239_v59, 7 }
 0x4f6   :  { %v5187_v45 = vpop.f32.mrf.mxu1  ;;  %v5341_v20 = vadd.f32 %v5340_v5, %v5339_v8 }
 0x4f7   :  { %v5198_v16 = vpop.f32.mrf.mxu2 }
 0x4f8   :  { %v5211_v22 = vpop.f32.mrf.mxu3  ;;  %v5221_v56 = vadd.f32 %v5198_v16, %v5030_v0 }
 0x4f9   :  { %v5222_v3 = vadd.f32 %v5211_v22, %v5031_v60 }
 0x4fa   :  { %v5235_v47 = vadd.f32 %v8064_v44, %v5221_v56  ;;  %v5304_v13 = vmul.f32 %v5296_v9, %v5221_v56 }
 0x4fb   :  { %v5236_v58 = vadd.f32 %v8064_v44, %v5222_v3  ;;  %v5305_v52 = vmul.f32 %v5297_v33, %v5222_v3  ;;  %v5261_v44 = vsel %vm128_vm3, %v5248_v43, %v5249_v30 }
 0x4fc   :  { %v5317_v57 = vsel %vm126_vm2, %v5304_v13, 0.0  ;;  %v5329_v28 = vmul.f32 %v5304_v13, %v5304_v13 }
 0x4fd   :  { %v5240_v55 = vpack.c.bf16 %v5236_v58, %v5235_v47  ;;  %v5318_v25 = vadd.f32 %v5317_v57, %v5316_v6  ;;  %v5330_v11 = vmul.f32 %v5305_v52, %v5305_v52  ;;  %v5319_v40 = vsel %vm126_vm2, %v5305_v52, 0.0 }
 0x4fe   :  { %v5342_v37 = vsel %vm126_vm2, %v5329_v28, 0.0 }
 0x4ff   :  { %v5250_v63 = vrot.slane %v5240_v55, 2  ;;  %v5251_v7 = vrot.slane %v5240_v55, 5  ;;  %v5320_v48 = vadd.f32 %v5319_v40, %v5318_v25  ;;  %v5200_v50 = vpop.f32.mrf.mxu2  ;;  %v5343_v41 = vadd.f32 %v5342_v37, %v5341_v20 }
 0x500   :  { %v5213_v14 = vpop.f32.mrf.mxu3  ;;  %v5344_v27 = vsel %vm126_vm2, %v5330_v11, 0.0 }
 0x501   :  { %v5264_v1 = vsel %vm132_vm4, %v5250_v63, %v5251_v7  ;;  %5321 = vadd.xlane.f32.xlu0 %v5320_v48  ;;  %v5345_v62 = vadd.f32 %v5344_v27, %v5343_v41 }
 0x502   :  { %v5265_v31 = vsel %vm8171_vm0, %v5261_v44, %v5264_v1 }
 0x503   :  { %v5266_v23 = vsel %vm8172_vm1, %v5258_v51, %v5265_v31  ;;  %5346 = vadd.xlane.f32.xlu1 %v5345_v62 }
 0x504   :  { %5268 = vst [vmem:[%s8125_s7] sm:$0xff] %v5266_v23 }
 0x574   :  { %v5322_v15 = vpop.xlane.xlu0 %5321 }
 0x576   :  { %v5347_v4 = vpop.xlane.xlu1 %5346 }
 0x577   :  { %v5349_v61 = vsel %vm5348_vm7, %v5322_v15, %v5347_v4 }
 0x578   :  { %5351 = vst.msk [vmem:[%s8126_s8] sm:$0x3] %vm5350_vm8, %v5349_v61 }

</bundles_post_ra>
